<compile_context>
chip_gen: v7x
topology: tpu7x:2x2x1
jax: 0.10.0
libtpu: 0.0.40
codegen_flags: <defaults>
</compile_context>

<pallas_src>
import functools

import jax
import jax.numpy as jnp
from jax import lax
from jax.experimental import pallas as pl
from jax.experimental.pallas import tpu as pltpu
import numpy as np


# ----------------------------------------------------------------------------
# Fused kernel
# ----------------------------------------------------------------------------
def fused_qnet_kernel(T, B, *refs):
    """Fused 4x GRU -> ReLU -> Linear.

    refs layout:
      refs[0]                      x2d        (T*B, I)
      refs[1 + 4*l .. 4 + 4*l]     layer l:   w_ih_t (in_p, 3*Hp)
                                              w_hh_t (Hp,   3*Hp)
                                              b_ih   (1,    3*Hp)
                                              b_hh   (1,    3*Hp)
      refs[-3], refs[-2]           lin_w_t (Hp, Op), lin_b (1, Op)
      refs[-1]                     out (T*B, Op)
    All gate blocks are 128-lane padded: gate g lives in cols [g*Hp, g*Hp+H),
    padded lanes are zero-filled and provably stay zero through the recurrence.
    """
    num_layers = (len(refs) - 4) // 4
    x_ref = refs[0]
    lw_ref, lb_ref, o_ref = refs[-3], refs[-2], refs[-1]
    Hp = refs[2].shape[0]                      # w_hh_t of layer 0: (Hp, 3*Hp)

    layer_in = x_ref[...]                      # (T*B, in)

    for l in range(num_layers):
        wih_ref, whh_ref, bih_ref, bhh_ref = refs[1 + 4 * l: 5 + 4 * l]
        wih = wih_ref[...]                     # (in_p, 3*Hp)
        whh = whh_ref[...]                     # (Hp,   3*Hp)

        # Hoisted input projection: one big matmul over all T*B rows,
        # input bias folded in (outside the serial recurrence).
        gi = jnp.dot(layer_in, wih,
                     preferred_element_type=jnp.float32) + bih_ref[...]
        # Hoist the recurrent-bias broadcast out of the time loop
        # (JAX does not CSE broadcast_in_dim).
        bhh = jnp.broadcast_to(bhh_ref[...], (B, 3 * Hp))

        h = jnp.zeros((B, Hp), jnp.float32)
        outs = []
        # T is static -> fully unrolled recurrence; the scheduler can overlap
        # step t's h @ W_hh with step t-1's gate VPU/EUP math, and h lives in
        # registers (no per-step VMEM stores).
        for t in range(T):
            gi_t = gi[t * B:(t + 1) * B, :]                    # static slice
            gh = jnp.dot(h, whh, preferred_element_type=jnp.float32) + bhh
            r = jax.nn.sigmoid(gi_t[:, 0:Hp] + gh[:, 0:Hp])
            z = jax.nn.sigmoid(gi_t[:, Hp:2 * Hp] + gh[:, Hp:2 * Hp])
            n = jnp.tanh(gi_t[:, 2 * Hp:3 * Hp] + r * gh[:, 2 * Hp:3 * Hp])
            h = (1.0 - z) * n + z * h
            outs.append(h)
        layer_in = jnp.concatenate(outs, axis=0)               # (T*B, Hp)

    # ReLU + final Linear into a lane-dense (128-multiple) output slab.
    y = jnp.maximum(layer_in, 0.0)
    o_ref[...] = (jnp.dot(y, lw_ref[...], preferred_element_type=jnp.float32)
                  + lb_ref[...]).astype(o_ref.dtype)


# ----------------------------------------------------------------------------
# Wrapper
# ----------------------------------------------------------------------------
def _vmem_spec():
    return pl.BlockSpec(memory_space=pltpu.MemorySpace.VMEM)


@functools.partial(jax.jit, static_argnums=(0, 1))
def _fused_call(T, B, x2d, *flat_params):
    Op = flat_params[-1].shape[1]
    n_in = 1 + len(flat_params)
    kernel = functools.partial(fused_qnet_kernel, T, B)
    return pl.pallas_call(
        kernel,
        out_shape=jax.ShapeDtypeStruct((T * B, Op), jnp.float32),
        in_specs=[_vmem_spec()] * n_in,
        out_specs=_vmem_spec(),
    )(x2d, *flat_params)


def linear_qnet_forward(x, params):
    """Forward pass of Linear_QNet: stacked GRU (4 layers) -> ReLU -> Linear.

    x: (T, B, I) float32. Returns (T, B, O) float32.
    """
    T, B, I = x.shape
    O = int(params["output_size"])
    flat = []
    for layer in params["gru"]:
        flat += [layer["w_ih_t"], layer["w_hh_t"], layer["b_ih"], layer["b_hh"]]
    flat += [params["lin_w_t"], params["lin_b"]]
    out_p = _fused_call(T, B, x.reshape(T * B, I), *flat)      # (T*B, Op)
    return out_p.reshape(T, B, -1)[..., :O]


# ----------------------------------------------------------------------------
# Parameter init (PyTorch-style uniform(-1/sqrt(H), 1/sqrt(H))) + lane padding
# ----------------------------------------------------------------------------
def _round_up(n, m):
    return ((n + m - 1) // m) * m


def _pad_gate_cols(mat, H, Hp):
    """(rows, 3H) -> (rows, 3*Hp); gate g occupies cols [g*Hp, g*Hp + H)."""
    rows = mat.shape[0]
    out = jnp.zeros((rows, 3 * Hp), mat.dtype)
    for g in range(3):
        out = out.at[:, g * Hp:g * Hp + H].set(mat[:, g * H:(g + 1) * H])
    return out


def _pad_cols(mat, cols_p):
    rows, cols = mat.shape
    return jnp.zeros((rows, cols_p), mat.dtype).at[:, :cols].set(mat)


def _pad_rows(mat, rows_p):
    rows, cols = mat.shape
    return jnp.zeros((rows_p, cols), mat.dtype).at[:rows, :].set(mat)


def init_params(key, input_size, hidden_size, output_size, num_layers=4):
    H, O = hidden_size, output_size
    Hp = _round_up(H, 128)
    Op = _round_up(O, 128)
    bound = 1.0 / np.sqrt(H)

    gru_pad, gru_raw = [], []
    for l in range(num_layers):
        in_f = input_size if l == 0 else H
        in_fp = input_size if l == 0 else Hp
        key, k1, k2, k3, k4 = jax.random.split(key, 5)
        w_ih = jax.random.uniform(k1, (3 * H, in_f), jnp.float32, -bound, bound)
        w_hh = jax.random.uniform(k2, (3 * H, H), jnp.float32, -bound, bound)
        b_ih = jax.random.uniform(k3, (3 * H,), jnp.float32, -bound, bound)
        b_hh = jax.random.uniform(k4, (3 * H,), jnp.float32, -bound, bound)

        gru_raw.append({
            "w_ih_t": w_ih.T, "w_hh_t": w_hh.T,
            "b_ih": b_ih.reshape(1, -1), "b_hh": b_hh.reshape(1, -1),
        })
        gru_pad.append({
            "w_ih_t": _pad_rows(_pad_gate_cols(w_ih.T, H, Hp), in_fp),
            "w_hh_t": _pad_rows(_pad_gate_cols(w_hh.T, H, Hp), Hp),
            "b_ih": _pad_gate_cols(b_ih.reshape(1, -1), H, Hp),
            "b_hh": _pad_gate_cols(b_hh.reshape(1, -1), H, Hp),
        })

    key, k5, k6 = jax.random.split(key, 3)
    lin_w = jax.random.uniform(k5, (O, H), jnp.float32, -bound, bound)
    lin_b = jax.random.uniform(k6, (O,), jnp.float32, -bound, bound)

    return {
        "gru": gru_pad,
        "lin_w_t": _pad_rows(_pad_cols(lin_w.T, Op), Hp),     # (Hp, Op)
        "lin_b": _pad_cols(lin_b.reshape(1, -1), Op),         # (1, Op)
        "output_size": O,
        "raw": {"gru": gru_raw, "lin_w_t": lin_w.T, "lin_b": lin_b.reshape(1, -1)},
    }


# ----------------------------------------------------------------------------
# Pure-JAX reference (same math, unpadded weights) for correctness check
# ----------------------------------------------------------------------------
def reference_forward(x, raw):
    h_seq = x
    for layer in raw["gru"]:
        H = layer["w_hh_t"].shape[0]
        B = x.shape[1]

        def step(h, x_t):
            gi = x_t @ layer["w_ih_t"] + layer["b_ih"]
            gh = h @ layer["w_hh_t"] + layer["b_hh"]
            r = jax.nn.sigmoid(gi[:, :H] + gh[:, :H])
            z = jax.nn.sigmoid(gi[:, H:2 * H] + gh[:, H:2 * H])
            n = jnp.tanh(gi[:, 2 * H:] + r * gh[:, 2 * H:])
            h_new = (1.0 - z) * n + z * h
            return h_new, h_new

        _, h_seq = lax.scan(step, jnp.zeros((B, H), jnp.float32), h_seq)
    y = jnp.maximum(h_seq, 0.0)
    return y @ raw["lin_w_t"] + raw["lin_b"]


# ----------------------------------------------------------------------------
if __name__ == "__main__":
    SEQ, BATCH = 8, 2
    INPUT_SIZE, HIDDEN_SIZE, OUTPUT_SIZE = 16, 32, 3

    key = jax.random.PRNGKey(0)
    key, xkey = jax.random.split(key)
    x = jax.random.normal(xkey, (SEQ, BATCH, INPUT_SIZE), jnp.float32)

    params = init_params(key, INPUT_SIZE, HIDDEN_SIZE, OUTPUT_SIZE, num_layers=4)

    out = linear_qnet_forward(x, params)
    out = jax.block_until_ready(out)

    ref = jax.block_until_ready(reference_forward(x, params["raw"]))
    np.testing.assert_allclose(np.asarray(out), np.asarray(ref),
                               rtol=1e-5, atol=1e-5)

    assert out.shape == (SEQ, BATCH, OUTPUT_SIZE)
    print("KERNEL_OK")
</pallas_src>

<mosaic_0001>
module attributes {stable_mosaic.version = 11 : i64} {
  func.func @fused_qnet_kernel(%arg0: memref<16x16xf32, #tpu.memory_space<vmem>>, %arg1: memref<16x384xf32, #tpu.memory_space<vmem>>, %arg2: memref<128x384xf32, #tpu.memory_space<vmem>>, %arg3: memref<1x384xf32, #tpu.memory_space<vmem>>, %arg4: memref<1x384xf32, #tpu.memory_space<vmem>>, %arg5: memref<128x384xf32, #tpu.memory_space<vmem>>, %arg6: memref<128x384xf32, #tpu.memory_space<vmem>>, %arg7: memref<1x384xf32, #tpu.memory_space<vmem>>, %arg8: memref<1x384xf32, #tpu.memory_space<vmem>>, %arg9: memref<128x384xf32, #tpu.memory_space<vmem>>, %arg10: memref<128x384xf32, #tpu.memory_space<vmem>>, %arg11: memref<1x384xf32, #tpu.memory_space<vmem>>, %arg12: memref<1x384xf32, #tpu.memory_space<vmem>>, %arg13: memref<128x384xf32, #tpu.memory_space<vmem>>, %arg14: memref<128x384xf32, #tpu.memory_space<vmem>>, %arg15: memref<1x384xf32, #tpu.memory_space<vmem>>, %arg16: memref<1x384xf32, #tpu.memory_space<vmem>>, %arg17: memref<128x128xf32, #tpu.memory_space<vmem>>, %arg18: memref<1x128xf32, #tpu.memory_space<vmem>>, %arg19: memref<16x128xf32, #tpu.memory_space<vmem>>) attributes {dimension_semantics = [], scalar_prefetch = 0 : i64, scratch_operands = 0 : i64, tpu.core_type = #tpu.core_type<tc>} {
    %c0 = arith.constant 0 : index
    %c0_0 = arith.constant 0 : index
    %0 = vector.load %arg0[%c0, %c0_0] : memref<16x16xf32, #tpu.memory_space<vmem>>, vector<16x16xf32>
    %c0_1 = arith.constant 0 : index
    %c0_2 = arith.constant 0 : index
    %1 = vector.load %arg1[%c0_1, %c0_2] : memref<16x384xf32, #tpu.memory_space<vmem>>, vector<16x384xf32>
    %c0_3 = arith.constant 0 : index
    %c0_4 = arith.constant 0 : index
    %2 = vector.load %arg2[%c0_3, %c0_4] : memref<128x384xf32, #tpu.memory_space<vmem>>, vector<128x384xf32>
    %cst = arith.constant dense<0.000000e+00> : vector<16x384xf32>
    %3 = tpu.matmul %0, %1, %cst {dimension_numbers = #tpu.dot_dimension_numbers<[1], [0], [0], [1], [0, 0, 1, 1], [], []>} : vector<16x16xf32>, vector<16x384xf32>, vector<16x384xf32> -> vector<16x384xf32>
    %c0_5 = arith.constant 0 : index
    %c0_6 = arith.constant 0 : index
    %4 = vector.load %arg3[%c0_5, %c0_6] : memref<1x384xf32, #tpu.memory_space<vmem>>, vector<1x384xf32>
    %5 = vector.broadcast %4 : vector<1x384xf32> to vector<16x384xf32>
    %6 = arith.addf %3, %5 : vector<16x384xf32>
    %c0_7 = arith.constant 0 : index
    %c0_8 = arith.constant 0 : index
    %7 = vector.load %arg4[%c0_7, %c0_8] : memref<1x384xf32, #tpu.memory_space<vmem>>, vector<1x384xf32>
    %8 = vector.shape_cast %7 : vector<1x384xf32> to vector<1x384xf32>
    %9 = vector.broadcast %8 : vector<1x384xf32> to vector<2x384xf32>
    %cst_9 = arith.constant 0.000000e+00 : f32
    %10 = vector.broadcast %cst_9 : f32 to vector<2x128xf32>
    %11 = vector.extract_strided_slice %6 {offsets = [0, 0], sizes = [2, 384], strides = [1, 1]} : vector<16x384xf32> to vector<2x384xf32>
    %cst_10 = arith.constant dense<0.000000e+00> : vector<2x384xf32>
    %12 = tpu.matmul %10, %2, %cst_10 {dimension_numbers = #tpu.dot_dimension_numbers<[1], [0], [0], [1], [0, 0, 1, 1], [], []>} : vector<2x128xf32>, vector<128x384xf32>, vector<2x384xf32> -> vector<2x384xf32>
    %13 = arith.addf %12, %9 : vector<2x384xf32>
    %14 = vector.extract_strided_slice %11 {offsets = [0, 0], sizes = [2, 128], strides = [1, 1]} : vector<2x384xf32> to vector<2x128xf32>
    %15 = vector.extract_strided_slice %13 {offsets = [0, 0], sizes = [2, 128], strides = [1, 1]} : vector<2x384xf32> to vector<2x128xf32>
    %16 = arith.addf %14, %15 : vector<2x128xf32>
    %17 = arith.negf %16 : vector<2x128xf32>
    %18 = math.exp %17 : vector<2x128xf32>
    %cst_11 = arith.constant 1.000000e+00 : f32
    %19 = vector.broadcast %cst_11 : f32 to vector<2x128xf32>
    %20 = arith.addf %19, %18 : vector<2x128xf32>
    %21 = arith.divf %19, %20 : vector<2x128xf32>
    %22 = vector.extract_strided_slice %11 {offsets = [0, 128], sizes = [2, 128], strides = [1, 1]} : vector<2x384xf32> to vector<2x128xf32>
    %23 = vector.extract_strided_slice %13 {offsets = [0, 128], sizes = [2, 128], strides = [1, 1]} : vector<2x384xf32> to vector<2x128xf32>
    %24 = arith.addf %22, %23 : vector<2x128xf32>
    %25 = arith.negf %24 : vector<2x128xf32>
    %26 = math.exp %25 : vector<2x128xf32>
    %cst_12 = arith.constant 1.000000e+00 : f32
    %27 = vector.broadcast %cst_12 : f32 to vector<2x128xf32>
    %28 = arith.addf %27, %26 : vector<2x128xf32>
    %29 = arith.divf %27, %28 : vector<2x128xf32>
    %30 = vector.extract_strided_slice %11 {offsets = [0, 256], sizes = [2, 128], strides = [1, 1]} : vector<2x384xf32> to vector<2x128xf32>
    %31 = vector.extract_strided_slice %13 {offsets = [0, 256], sizes = [2, 128], strides = [1, 1]} : vector<2x384xf32> to vector<2x128xf32>
    %32 = arith.mulf %21, %31 : vector<2x128xf32>
    %33 = arith.addf %30, %32 : vector<2x128xf32>
    %34 = math.tanh %33 : vector<2x128xf32>
    %cst_13 = arith.constant 1.000000e+00 : f32
    %35 = vector.broadcast %cst_13 : f32 to vector<2x128xf32>
    %36 = arith.subf %35, %29 : vector<2x128xf32>
    %37 = arith.mulf %36, %34 : vector<2x128xf32>
    %38 = arith.mulf %29, %10 : vector<2x128xf32>
    %39 = arith.addf %37, %38 : vector<2x128xf32>
    %40 = vector.extract_strided_slice %6 {offsets = [2, 0], sizes = [2, 384], strides = [1, 1]} : vector<16x384xf32> to vector<2x384xf32>
    %cst_14 = arith.constant dense<0.000000e+00> : vector<2x384xf32>
    %41 = tpu.matmul %39, %2, %cst_14 {dimension_numbers = #tpu.dot_dimension_numbers<[1], [0], [0], [1], [0, 0, 1, 1], [], []>} : vector<2x128xf32>, vector<128x384xf32>, vector<2x384xf32> -> vector<2x384xf32>
    %42 = arith.addf %41, %9 : vector<2x384xf32>
    %43 = vector.extract_strided_slice %40 {offsets = [0, 0], sizes = [2, 128], strides = [1, 1]} : vector<2x384xf32> to vector<2x128xf32>
    %44 = vector.extract_strided_slice %42 {offsets = [0, 0], sizes = [2, 128], strides = [1, 1]} : vector<2x384xf32> to vector<2x128xf32>
    %45 = arith.addf %43, %44 : vector<2x128xf32>
    %46 = arith.negf %45 : vector<2x128xf32>
    %47 = math.exp %46 : vector<2x128xf32>
    %cst_15 = arith.constant 1.000000e+00 : f32
    %48 = vector.broadcast %cst_15 : f32 to vector<2x128xf32>
    %49 = arith.addf %48, %47 : vector<2x128xf32>
    %50 = arith.divf %48, %49 : vector<2x128xf32>
    %51 = vector.extract_strided_slice %40 {offsets = [0, 128], sizes = [2, 128], strides = [1, 1]} : vector<2x384xf32> to vector<2x128xf32>
    %52 = vector.extract_strided_slice %42 {offsets = [0, 128], sizes = [2, 128], strides = [1, 1]} : vector<2x384xf32> to vector<2x128xf32>
    %53 = arith.addf %51, %52 : vector<2x128xf32>
    %54 = arith.negf %53 : vector<2x128xf32>
    %55 = math.exp %54 : vector<2x128xf32>
    %cst_16 = arith.constant 1.000000e+00 : f32
    %56 = vector.broadcast %cst_16 : f32 to vector<2x128xf32>
    %57 = arith.addf %56, %55 : vector<2x128xf32>
    %58 = arith.divf %56, %57 : vector<2x128xf32>
    %59 = vector.extract_strided_slice %40 {offsets = [0, 256], sizes = [2, 128], strides = [1, 1]} : vector<2x384xf32> to vector<2x128xf32>
    %60 = vector.extract_strided_slice %42 {offsets = [0, 256], sizes = [2, 128], strides = [1, 1]} : vector<2x384xf32> to vector<2x128xf32>
    %61 = arith.mulf %50, %60 : vector<2x128xf32>
    %62 = arith.addf %59, %61 : vector<2x128xf32>
    %63 = math.tanh %62 : vector<2x128xf32>
    %cst_17 = arith.constant 1.000000e+00 : f32
    %64 = vector.broadcast %cst_17 : f32 to vector<2x128xf32>
    %65 = arith.subf %64, %58 : vector<2x128xf32>
    %66 = arith.mulf %65, %63 : vector<2x128xf32>
    %67 = arith.mulf %58, %39 : vector<2x128xf32>
    %68 = arith.addf %66, %67 : vector<2x128xf32>
    %69 = vector.extract_strided_slice %6 {offsets = [4, 0], sizes = [2, 384], strides = [1, 1]} : vector<16x384xf32> to vector<2x384xf32>
    %cst_18 = arith.constant dense<0.000000e+00> : vector<2x384xf32>
    %70 = tpu.matmul %68, %2, %cst_18 {dimension_numbers = #tpu.dot_dimension_numbers<[1], [0], [0], [1], [0, 0, 1, 1], [], []>} : vector<2x128xf32>, vector<128x384xf32>, vector<2x384xf32> -> vector<2x384xf32>
    %71 = arith.addf %70, %9 : vector<2x384xf32>
    %72 = vector.extract_strided_slice %69 {offsets = [0, 0], sizes = [2, 128], strides = [1, 1]} : vector<2x384xf32> to vector<2x128xf32>
    %73 = vector.extract_strided_slice %71 {offsets = [0, 0], sizes = [2, 128], strides = [1, 1]} : vector<2x384xf32> to vector<2x128xf32>
    %74 = arith.addf %72, %73 : vector<2x128xf32>
    %75 = arith.negf %74 : vector<2x128xf32>
    %76 = math.exp %75 : vector<2x128xf32>
    %cst_19 = arith.constant 1.000000e+00 : f32
    %77 = vector.broadcast %cst_19 : f32 to vector<2x128xf32>
    %78 = arith.addf %77, %76 : vector<2x128xf32>
    %79 = arith.divf %77, %78 : vector<2x128xf32>
    %80 = vector.extract_strided_slice %69 {offsets = [0, 128], sizes = [2, 128], strides = [1, 1]} : vector<2x384xf32> to vector<2x128xf32>
    %81 = vector.extract_strided_slice %71 {offsets = [0, 128], sizes = [2, 128], strides = [1, 1]} : vector<2x384xf32> to vector<2x128xf32>
    %82 = arith.addf %80, %81 : vector<2x128xf32>
    %83 = arith.negf %82 : vector<2x128xf32>
    %84 = math.exp %83 : vector<2x128xf32>
    %cst_20 = arith.constant 1.000000e+00 : f32
    %85 = vector.broadcast %cst_20 : f32 to vector<2x128xf32>
    %86 = arith.addf %85, %84 : vector<2x128xf32>
    %87 = arith.divf %85, %86 : vector<2x128xf32>
    %88 = vector.extract_strided_slice %69 {offsets = [0, 256], sizes = [2, 128], strides = [1, 1]} : vector<2x384xf32> to vector<2x128xf32>
    %89 = vector.extract_strided_slice %71 {offsets = [0, 256], sizes = [2, 128], strides = [1, 1]} : vector<2x384xf32> to vector<2x128xf32>
    %90 = arith.mulf %79, %89 : vector<2x128xf32>
    %91 = arith.addf %88, %90 : vector<2x128xf32>
    %92 = math.tanh %91 : vector<2x128xf32>
    %cst_21 = arith.constant 1.000000e+00 : f32
    %93 = vector.broadcast %cst_21 : f32 to vector<2x128xf32>
    %94 = arith.subf %93, %87 : vector<2x128xf32>
    %95 = arith.mulf %94, %92 : vector<2x128xf32>
    %96 = arith.mulf %87, %68 : vector<2x128xf32>
    %97 = arith.addf %95, %96 : vector<2x128xf32>
    %98 = vector.extract_strided_slice %6 {offsets = [6, 0], sizes = [2, 384], strides = [1, 1]} : vector<16x384xf32> to vector<2x384xf32>
    %cst_22 = arith.constant dense<0.000000e+00> : vector<2x384xf32>
    %99 = tpu.matmul %97, %2, %cst_22 {dimension_numbers = #tpu.dot_dimension_numbers<[1], [0], [0], [1], [0, 0, 1, 1], [], []>} : vector<2x128xf32>, vector<128x384xf32>, vector<2x384xf32> -> vector<2x384xf32>
    %100 = arith.addf %99, %9 : vector<2x384xf32>
    %101 = vector.extract_strided_slice %98 {offsets = [0, 0], sizes = [2, 128], strides = [1, 1]} : vector<2x384xf32> to vector<2x128xf32>
    %102 = vector.extract_strided_slice %100 {offsets = [0, 0], sizes = [2, 128], strides = [1, 1]} : vector<2x384xf32> to vector<2x128xf32>
    %103 = arith.addf %101, %102 : vector<2x128xf32>
    %104 = arith.negf %103 : vector<2x128xf32>
    %105 = math.exp %104 : vector<2x128xf32>
    %cst_23 = arith.constant 1.000000e+00 : f32
    %106 = vector.broadcast %cst_23 : f32 to vector<2x128xf32>
    %107 = arith.addf %106, %105 : vector<2x128xf32>
    %108 = arith.divf %106, %107 : vector<2x128xf32>
    %109 = vector.extract_strided_slice %98 {offsets = [0, 128], sizes = [2, 128], strides = [1, 1]} : vector<2x384xf32> to vector<2x128xf32>
    %110 = vector.extract_strided_slice %100 {offsets = [0, 128], sizes = [2, 128], strides = [1, 1]} : vector<2x384xf32> to vector<2x128xf32>
    %111 = arith.addf %109, %110 : vector<2x128xf32>
    %112 = arith.negf %111 : vector<2x128xf32>
    %113 = math.exp %112 : vector<2x128xf32>
    %cst_24 = arith.constant 1.000000e+00 : f32
    %114 = vector.broadcast %cst_24 : f32 to vector<2x128xf32>
    %115 = arith.addf %114, %113 : vector<2x128xf32>
    %116 = arith.divf %114, %115 : vector<2x128xf32>
    %117 = vector.extract_strided_slice %98 {offsets = [0, 256], sizes = [2, 128], strides = [1, 1]} : vector<2x384xf32> to vector<2x128xf32>
    %118 = vector.extract_strided_slice %100 {offsets = [0, 256], sizes = [2, 128], strides = [1, 1]} : vector<2x384xf32> to vector<2x128xf32>
    %119 = arith.mulf %108, %118 : vector<2x128xf32>
    %120 = arith.addf %117, %119 : vector<2x128xf32>
    %121 = math.tanh %120 : vector<2x128xf32>
    %cst_25 = arith.constant 1.000000e+00 : f32
    %122 = vector.broadcast %cst_25 : f32 to vector<2x128xf32>
    %123 = arith.subf %122, %116 : vector<2x128xf32>
    %124 = arith.mulf %123, %121 : vector<2x128xf32>
    %125 = arith.mulf %116, %97 : vector<2x128xf32>
    %126 = arith.addf %124, %125 : vector<2x128xf32>
    %127 = vector.extract_strided_slice %6 {offsets = [8, 0], sizes = [2, 384], strides = [1, 1]} : vector<16x384xf32> to vector<2x384xf32>
    %cst_26 = arith.constant dense<0.000000e+00> : vector<2x384xf32>
    %128 = tpu.matmul %126, %2, %cst_26 {dimension_numbers = #tpu.dot_dimension_numbers<[1], [0], [0], [1], [0, 0, 1, 1], [], []>} : vector<2x128xf32>, vector<128x384xf32>, vector<2x384xf32> -> vector<2x384xf32>
    %129 = arith.addf %128, %9 : vector<2x384xf32>
    %130 = vector.extract_strided_slice %127 {offsets = [0, 0], sizes = [2, 128], strides = [1, 1]} : vector<2x384xf32> to vector<2x128xf32>
    %131 = vector.extract_strided_slice %129 {offsets = [0, 0], sizes = [2, 128], strides = [1, 1]} : vector<2x384xf32> to vector<2x128xf32>
    %132 = arith.addf %130, %131 : vector<2x128xf32>
    %133 = arith.negf %132 : vector<2x128xf32>
    %134 = math.exp %133 : vector<2x128xf32>
    %cst_27 = arith.constant 1.000000e+00 : f32
    %135 = vector.broadcast %cst_27 : f32 to vector<2x128xf32>
    %136 = arith.addf %135, %134 : vector<2x128xf32>
    %137 = arith.divf %135, %136 : vector<2x128xf32>
    %138 = vector.extract_strided_slice %127 {offsets = [0, 128], sizes = [2, 128], strides = [1, 1]} : vector<2x384xf32> to vector<2x128xf32>
    %139 = vector.extract_strided_slice %129 {offsets = [0, 128], sizes = [2, 128], strides = [1, 1]} : vector<2x384xf32> to vector<2x128xf32>
    %140 = arith.addf %138, %139 : vector<2x128xf32>
    %141 = arith.negf %140 : vector<2x128xf32>
    %142 = math.exp %141 : vector<2x128xf32>
    %cst_28 = arith.constant 1.000000e+00 : f32
    %143 = vector.broadcast %cst_28 : f32 to vector<2x128xf32>
    %144 = arith.addf %143, %142 : vector<2x128xf32>
    %145 = arith.divf %143, %144 : vector<2x128xf32>
    %146 = vector.extract_strided_slice %127 {offsets = [0, 256], sizes = [2, 128], strides = [1, 1]} : vector<2x384xf32> to vector<2x128xf32>
    %147 = vector.extract_strided_slice %129 {offsets = [0, 256], sizes = [2, 128], strides = [1, 1]} : vector<2x384xf32> to vector<2x128xf32>
    %148 = arith.mulf %137, %147 : vector<2x128xf32>
    %149 = arith.addf %146, %148 : vector<2x128xf32>
    %150 = math.tanh %149 : vector<2x128xf32>
    %cst_29 = arith.constant 1.000000e+00 : f32
    %151 = vector.broadcast %cst_29 : f32 to vector<2x128xf32>
    %152 = arith.subf %151, %145 : vector<2x128xf32>
    %153 = arith.mulf %152, %150 : vector<2x128xf32>
    %154 = arith.mulf %145, %126 : vector<2x128xf32>
    %155 = arith.addf %153, %154 : vector<2x128xf32>
    %156 = vector.extract_strided_slice %6 {offsets = [10, 0], sizes = [2, 384], strides = [1, 1]} : vector<16x384xf32> to vector<2x384xf32>
    %cst_30 = arith.constant dense<0.000000e+00> : vector<2x384xf32>
    %157 = tpu.matmul %155, %2, %cst_30 {dimension_numbers = #tpu.dot_dimension_numbers<[1], [0], [0], [1], [0, 0, 1, 1], [], []>} : vector<2x128xf32>, vector<128x384xf32>, vector<2x384xf32> -> vector<2x384xf32>
    %158 = arith.addf %157, %9 : vector<2x384xf32>
    %159 = vector.extract_strided_slice %156 {offsets = [0, 0], sizes = [2, 128], strides = [1, 1]} : vector<2x384xf32> to vector<2x128xf32>
    %160 = vector.extract_strided_slice %158 {offsets = [0, 0], sizes = [2, 128], strides = [1, 1]} : vector<2x384xf32> to vector<2x128xf32>
    %161 = arith.addf %159, %160 : vector<2x128xf32>
    %162 = arith.negf %161 : vector<2x128xf32>
    %163 = math.exp %162 : vector<2x128xf32>
    %cst_31 = arith.constant 1.000000e+00 : f32
    %164 = vector.broadcast %cst_31 : f32 to vector<2x128xf32>
    %165 = arith.addf %164, %163 : vector<2x128xf32>
    %166 = arith.divf %164, %165 : vector<2x128xf32>
    %167 = vector.extract_strided_slice %156 {offsets = [0, 128], sizes = [2, 128], strides = [1, 1]} : vector<2x384xf32> to vector<2x128xf32>
    %168 = vector.extract_strided_slice %158 {offsets = [0, 128], sizes = [2, 128], strides = [1, 1]} : vector<2x384xf32> to vector<2x128xf32>
    %169 = arith.addf %167, %168 : vector<2x128xf32>
    %170 = arith.negf %169 : vector<2x128xf32>
    %171 = math.exp %170 : vector<2x128xf32>
    %cst_32 = arith.constant 1.000000e+00 : f32
    %172 = vector.broadcast %cst_32 : f32 to vector<2x128xf32>
    %173 = arith.addf %172, %171 : vector<2x128xf32>
    %174 = arith.divf %172, %173 : vector<2x128xf32>
    %175 = vector.extract_strided_slice %156 {offsets = [0, 256], sizes = [2, 128], strides = [1, 1]} : vector<2x384xf32> to vector<2x128xf32>
    %176 = vector.extract_strided_slice %158 {offsets = [0, 256], sizes = [2, 128], strides = [1, 1]} : vector<2x384xf32> to vector<2x128xf32>
    %177 = arith.mulf %166, %176 : vector<2x128xf32>
    %178 = arith.addf %175, %177 : vector<2x128xf32>
    %179 = math.tanh %178 : vector<2x128xf32>
    %cst_33 = arith.constant 1.000000e+00 : f32
    %180 = vector.broadcast %cst_33 : f32 to vector<2x128xf32>
    %181 = arith.subf %180, %174 : vector<2x128xf32>
    %182 = arith.mulf %181, %179 : vector<2x128xf32>
    %183 = arith.mulf %174, %155 : vector<2x128xf32>
    %184 = arith.addf %182, %183 : vector<2x128xf32>
    %185 = vector.extract_strided_slice %6 {offsets = [12, 0], sizes = [2, 384], strides = [1, 1]} : vector<16x384xf32> to vector<2x384xf32>
    %cst_34 = arith.constant dense<0.000000e+00> : vector<2x384xf32>
    %186 = tpu.matmul %184, %2, %cst_34 {dimension_numbers = #tpu.dot_dimension_numbers<[1], [0], [0], [1], [0, 0, 1, 1], [], []>} : vector<2x128xf32>, vector<128x384xf32>, vector<2x384xf32> -> vector<2x384xf32>
    %187 = arith.addf %186, %9 : vector<2x384xf32>
    %188 = vector.extract_strided_slice %185 {offsets = [0, 0], sizes = [2, 128], strides = [1, 1]} : vector<2x384xf32> to vector<2x128xf32>
    %189 = vector.extract_strided_slice %187 {offsets = [0, 0], sizes = [2, 128], strides = [1, 1]} : vector<2x384xf32> to vector<2x128xf32>
    %190 = arith.addf %188, %189 : vector<2x128xf32>
    %191 = arith.negf %190 : vector<2x128xf32>
    %192 = math.exp %191 : vector<2x128xf32>
    %cst_35 = arith.constant 1.000000e+00 : f32
    %193 = vector.broadcast %cst_35 : f32 to vector<2x128xf32>
    %194 = arith.addf %193, %192 : vector<2x128xf32>
    %195 = arith.divf %193, %194 : vector<2x128xf32>
    %196 = vector.extract_strided_slice %185 {offsets = [0, 128], sizes = [2, 128], strides = [1, 1]} : vector<2x384xf32> to vector<2x128xf32>
    %197 = vector.extract_strided_slice %187 {offsets = [0, 128], sizes = [2, 128], strides = [1, 1]} : vector<2x384xf32> to vector<2x128xf32>
    %198 = arith.addf %196, %197 : vector<2x128xf32>
    %199 = arith.negf %198 : vector<2x128xf32>
    %200 = math.exp %199 : vector<2x128xf32>
    %cst_36 = arith.constant 1.000000e+00 : f32
    %201 = vector.broadcast %cst_36 : f32 to vector<2x128xf32>
    %202 = arith.addf %201, %200 : vector<2x128xf32>
    %203 = arith.divf %201, %202 : vector<2x128xf32>
    %204 = vector.extract_strided_slice %185 {offsets = [0, 256], sizes = [2, 128], strides = [1, 1]} : vector<2x384xf32> to vector<2x128xf32>
    %205 = vector.extract_strided_slice %187 {offsets = [0, 256], sizes = [2, 128], strides = [1, 1]} : vector<2x384xf32> to vector<2x128xf32>
    %206 = arith.mulf %195, %205 : vector<2x128xf32>
    %207 = arith.addf %204, %206 : vector<2x128xf32>
    %208 = math.tanh %207 : vector<2x128xf32>
    %cst_37 = arith.constant 1.000000e+00 : f32
    %209 = vector.broadcast %cst_37 : f32 to vector<2x128xf32>
    %210 = arith.subf %209, %203 : vector<2x128xf32>
    %211 = arith.mulf %210, %208 : vector<2x128xf32>
    %212 = arith.mulf %203, %184 : vector<2x128xf32>
    %213 = arith.addf %211, %212 : vector<2x128xf32>
    %214 = vector.extract_strided_slice %6 {offsets = [14, 0], sizes = [2, 384], strides = [1, 1]} : vector<16x384xf32> to vector<2x384xf32>
    %cst_38 = arith.constant dense<0.000000e+00> : vector<2x384xf32>
    %215 = tpu.matmul %213, %2, %cst_38 {dimension_numbers = #tpu.dot_dimension_numbers<[1], [0], [0], [1], [0, 0, 1, 1], [], []>} : vector<2x128xf32>, vector<128x384xf32>, vector<2x384xf32> -> vector<2x384xf32>
    %216 = arith.addf %215, %9 : vector<2x384xf32>
    %217 = vector.extract_strided_slice %214 {offsets = [0, 0], sizes = [2, 128], strides = [1, 1]} : vector<2x384xf32> to vector<2x128xf32>
    %218 = vector.extract_strided_slice %216 {offsets = [0, 0], sizes = [2, 128], strides = [1, 1]} : vector<2x384xf32> to vector<2x128xf32>
    %219 = arith.addf %217, %218 : vector<2x128xf32>
    %220 = arith.negf %219 : vector<2x128xf32>
    %221 = math.exp %220 : vector<2x128xf32>
    %cst_39 = arith.constant 1.000000e+00 : f32
    %222 = vector.broadcast %cst_39 : f32 to vector<2x128xf32>
    %223 = arith.addf %222, %221 : vector<2x128xf32>
    %224 = arith.divf %222, %223 : vector<2x128xf32>
    %225 = vector.extract_strided_slice %214 {offsets = [0, 128], sizes = [2, 128], strides = [1, 1]} : vector<2x384xf32> to vector<2x128xf32>
    %226 = vector.extract_strided_slice %216 {offsets = [0, 128], sizes = [2, 128], strides = [1, 1]} : vector<2x384xf32> to vector<2x128xf32>
    %227 = arith.addf %225, %226 : vector<2x128xf32>
    %228 = arith.negf %227 : vector<2x128xf32>
    %229 = math.exp %228 : vector<2x128xf32>
    %cst_40 = arith.constant 1.000000e+00 : f32
    %230 = vector.broadcast %cst_40 : f32 to vector<2x128xf32>
    %231 = arith.addf %230, %229 : vector<2x128xf32>
    %232 = arith.divf %230, %231 : vector<2x128xf32>
    %233 = vector.extract_strided_slice %214 {offsets = [0, 256], sizes = [2, 128], strides = [1, 1]} : vector<2x384xf32> to vector<2x128xf32>
    %234 = vector.extract_strided_slice %216 {offsets = [0, 256], sizes = [2, 128], strides = [1, 1]} : vector<2x384xf32> to vector<2x128xf32>
    %235 = arith.mulf %224, %234 : vector<2x128xf32>
    %236 = arith.addf %233, %235 : vector<2x128xf32>
    %237 = math.tanh %236 : vector<2x128xf32>
    %cst_41 = arith.constant 1.000000e+00 : f32
    %238 = vector.broadcast %cst_41 : f32 to vector<2x128xf32>
    %239 = arith.subf %238, %232 : vector<2x128xf32>
    %240 = arith.mulf %239, %237 : vector<2x128xf32>
    %241 = arith.mulf %232, %213 : vector<2x128xf32>
    %242 = arith.addf %240, %241 : vector<2x128xf32>
    %243 = tpu.concatenate %39, %68, %97, %126, %155, %184, %213, %242 in 0 : vector<2x128xf32>, vector<2x128xf32>, vector<2x128xf32>, vector<2x128xf32>, vector<2x128xf32>, vector<2x128xf32>, vector<2x128xf32>, vector<2x128xf32> -> vector<16x128xf32>
    %c0_42 = arith.constant 0 : index
    %c0_43 = arith.constant 0 : index
    %244 = vector.load %arg5[%c0_42, %c0_43] : memref<128x384xf32, #tpu.memory_space<vmem>>, vector<128x384xf32>
    %c0_44 = arith.constant 0 : index
    %c0_45 = arith.constant 0 : index
    %245 = vector.load %arg6[%c0_44, %c0_45] : memref<128x384xf32, #tpu.memory_space<vmem>>, vector<128x384xf32>
    %cst_46 = arith.constant dense<0.000000e+00> : vector<16x384xf32>
    %246 = tpu.matmul %243, %244, %cst_46 {dimension_numbers = #tpu.dot_dimension_numbers<[1], [0], [0], [1], [0, 0, 1, 1], [], []>} : vector<16x128xf32>, vector<128x384xf32>, vector<16x384xf32> -> vector<16x384xf32>
    %c0_47 = arith.constant 0 : index
    %c0_48 = arith.constant 0 : index
    %247 = vector.load %arg7[%c0_47, %c0_48] : memref<1x384xf32, #tpu.memory_space<vmem>>, vector<1x384xf32>
    %248 = vector.broadcast %247 : vector<1x384xf32> to vector<16x384xf32>
    %249 = arith.addf %246, %248 : vector<16x384xf32>
    %c0_49 = arith.constant 0 : index
    %c0_50 = arith.constant 0 : index
    %250 = vector.load %arg8[%c0_49, %c0_50] : memref<1x384xf32, #tpu.memory_space<vmem>>, vector<1x384xf32>
    %251 = vector.shape_cast %250 : vector<1x384xf32> to vector<1x384xf32>
    %252 = vector.broadcast %251 : vector<1x384xf32> to vector<2x384xf32>
    %cst_51 = arith.constant 0.000000e+00 : f32
    %253 = vector.broadcast %cst_51 : f32 to vector<2x128xf32>
    %254 = vector.extract_strided_slice %249 {offsets = [0, 0], sizes = [2, 384], strides = [1, 1]} : vector<16x384xf32> to vector<2x384xf32>
    %cst_52 = arith.constant dense<0.000000e+00> : vector<2x384xf32>
    %255 = tpu.matmul %253, %245, %cst_52 {dimension_numbers = #tpu.dot_dimension_numbers<[1], [0], [0], [1], [0, 0, 1, 1], [], []>} : vector<2x128xf32>, vector<128x384xf32>, vector<2x384xf32> -> vector<2x384xf32>
    %256 = arith.addf %255, %252 : vector<2x384xf32>
    %257 = vector.extract_strided_slice %254 {offsets = [0, 0], sizes = [2, 128], strides = [1, 1]} : vector<2x384xf32> to vector<2x128xf32>
    %258 = vector.extract_strided_slice %256 {offsets = [0, 0], sizes = [2, 128], strides = [1, 1]} : vector<2x384xf32> to vector<2x128xf32>
    %259 = arith.addf %257, %258 : vector<2x128xf32>
    %260 = arith.negf %259 : vector<2x128xf32>
    %261 = math.exp %260 : vector<2x128xf32>
    %cst_53 = arith.constant 1.000000e+00 : f32
    %262 = vector.broadcast %cst_53 : f32 to vector<2x128xf32>
    %263 = arith.addf %262, %261 : vector<2x128xf32>
    %264 = arith.divf %262, %263 : vector<2x128xf32>
    %265 = vector.extract_strided_slice %254 {offsets = [0, 128], sizes = [2, 128], strides = [1, 1]} : vector<2x384xf32> to vector<2x128xf32>
    %266 = vector.extract_strided_slice %256 {offsets = [0, 128], sizes = [2, 128], strides = [1, 1]} : vector<2x384xf32> to vector<2x128xf32>
    %267 = arith.addf %265, %266 : vector<2x128xf32>
    %268 = arith.negf %267 : vector<2x128xf32>
    %269 = math.exp %268 : vector<2x128xf32>
    %cst_54 = arith.constant 1.000000e+00 : f32
    %270 = vector.broadcast %cst_54 : f32 to vector<2x128xf32>
    %271 = arith.addf %270, %269 : vector<2x128xf32>
    %272 = arith.divf %270, %271 : vector<2x128xf32>
    %273 = vector.extract_strided_slice %254 {offsets = [0, 256], sizes = [2, 128], strides = [1, 1]} : vector<2x384xf32> to vector<2x128xf32>
    %274 = vector.extract_strided_slice %256 {offsets = [0, 256], sizes = [2, 128], strides = [1, 1]} : vector<2x384xf32> to vector<2x128xf32>
    %275 = arith.mulf %264, %274 : vector<2x128xf32>
    %276 = arith.addf %273, %275 : vector<2x128xf32>
    %277 = math.tanh %276 : vector<2x128xf32>
    %cst_55 = arith.constant 1.000000e+00 : f32
    %278 = vector.broadcast %cst_55 : f32 to vector<2x128xf32>
    %279 = arith.subf %278, %272 : vector<2x128xf32>
    %280 = arith.mulf %279, %277 : vector<2x128xf32>
    %281 = arith.mulf %272, %253 : vector<2x128xf32>
    %282 = arith.addf %280, %281 : vector<2x128xf32>
    %283 = vector.extract_strided_slice %249 {offsets = [2, 0], sizes = [2, 384], strides = [1, 1]} : vector<16x384xf32> to vector<2x384xf32>
    %cst_56 = arith.constant dense<0.000000e+00> : vector<2x384xf32>
    %284 = tpu.matmul %282, %245, %cst_56 {dimension_numbers = #tpu.dot_dimension_numbers<[1], [0], [0], [1], [0, 0, 1, 1], [], []>} : vector<2x128xf32>, vector<128x384xf32>, vector<2x384xf32> -> vector<2x384xf32>
    %285 = arith.addf %284, %252 : vector<2x384xf32>
    %286 = vector.extract_strided_slice %283 {offsets = [0, 0], sizes = [2, 128], strides = [1, 1]} : vector<2x384xf32> to vector<2x128xf32>
    %287 = vector.extract_strided_slice %285 {offsets = [0, 0], sizes = [2, 128], strides = [1, 1]} : vector<2x384xf32> to vector<2x128xf32>
    %288 = arith.addf %286, %287 : vector<2x128xf32>
    %289 = arith.negf %288 : vector<2x128xf32>
    %290 = math.exp %289 : vector<2x128xf32>
    %cst_57 = arith.constant 1.000000e+00 : f32
    %291 = vector.broadcast %cst_57 : f32 to vector<2x128xf32>
    %292 = arith.addf %291, %290 : vector<2x128xf32>
    %293 = arith.divf %291, %292 : vector<2x128xf32>
    %294 = vector.extract_strided_slice %283 {offsets = [0, 128], sizes = [2, 128], strides = [1, 1]} : vector<2x384xf32> to vector<2x128xf32>
    %295 = vector.extract_strided_slice %285 {offsets = [0, 128], sizes = [2, 128], strides = [1, 1]} : vector<2x384xf32> to vector<2x128xf32>
    %296 = arith.addf %294, %295 : vector<2x128xf32>
    %297 = arith.negf %296 : vector<2x128xf32>
    %298 = math.exp %297 : vector<2x128xf32>
    %cst_58 = arith.constant 1.000000e+00 : f32
    %299 = vector.broadcast %cst_58 : f32 to vector<2x128xf32>
    %300 = arith.addf %299, %298 : vector<2x128xf32>
    %301 = arith.divf %299, %300 : vector<2x128xf32>
    %302 = vector.extract_strided_slice %283 {offsets = [0, 256], sizes = [2, 128], strides = [1, 1]} : vector<2x384xf32> to vector<2x128xf32>
    %303 = vector.extract_strided_slice %285 {offsets = [0, 256], sizes = [2, 128], strides = [1, 1]} : vector<2x384xf32> to vector<2x128xf32>
    %304 = arith.mulf %293, %303 : vector<2x128xf32>
    %305 = arith.addf %302, %304 : vector<2x128xf32>
    %306 = math.tanh %305 : vector<2x128xf32>
    %cst_59 = arith.constant 1.000000e+00 : f32
    %307 = vector.broadcast %cst_59 : f32 to vector<2x128xf32>
    %308 = arith.subf %307, %301 : vector<2x128xf32>
    %309 = arith.mulf %308, %306 : vector<2x128xf32>
    %310 = arith.mulf %301, %282 : vector<2x128xf32>
    %311 = arith.addf %309, %310 : vector<2x128xf32>
    %312 = vector.extract_strided_slice %249 {offsets = [4, 0], sizes = [2, 384], strides = [1, 1]} : vector<16x384xf32> to vector<2x384xf32>
    %cst_60 = arith.constant dense<0.000000e+00> : vector<2x384xf32>
    %313 = tpu.matmul %311, %245, %cst_60 {dimension_numbers = #tpu.dot_dimension_numbers<[1], [0], [0], [1], [0, 0, 1, 1], [], []>} : vector<2x128xf32>, vector<128x384xf32>, vector<2x384xf32> -> vector<2x384xf32>
    %314 = arith.addf %313, %252 : vector<2x384xf32>
    %315 = vector.extract_strided_slice %312 {offsets = [0, 0], sizes = [2, 128], strides = [1, 1]} : vector<2x384xf32> to vector<2x128xf32>
    %316 = vector.extract_strided_slice %314 {offsets = [0, 0], sizes = [2, 128], strides = [1, 1]} : vector<2x384xf32> to vector<2x128xf32>
    %317 = arith.addf %315, %316 : vector<2x128xf32>
    %318 = arith.negf %317 : vector<2x128xf32>
    %319 = math.exp %318 : vector<2x128xf32>
    %cst_61 = arith.constant 1.000000e+00 : f32
    %320 = vector.broadcast %cst_61 : f32 to vector<2x128xf32>
    %321 = arith.addf %320, %319 : vector<2x128xf32>
    %322 = arith.divf %320, %321 : vector<2x128xf32>
    %323 = vector.extract_strided_slice %312 {offsets = [0, 128], sizes = [2, 128], strides = [1, 1]} : vector<2x384xf32> to vector<2x128xf32>
    %324 = vector.extract_strided_slice %314 {offsets = [0, 128], sizes = [2, 128], strides = [1, 1]} : vector<2x384xf32> to vector<2x128xf32>
    %325 = arith.addf %323, %324 : vector<2x128xf32>
    %326 = arith.negf %325 : vector<2x128xf32>
    %327 = math.exp %326 : vector<2x128xf32>
    %cst_62 = arith.constant 1.000000e+00 : f32
    %328 = vector.broadcast %cst_62 : f32 to vector<2x128xf32>
    %329 = arith.addf %328, %327 : vector<2x128xf32>
    %330 = arith.divf %328, %329 : vector<2x128xf32>
    %331 = vector.extract_strided_slice %312 {offsets = [0, 256], sizes = [2, 128], strides = [1, 1]} : vector<2x384xf32> to vector<2x128xf32>
    %332 = vector.extract_strided_slice %314 {offsets = [0, 256], sizes = [2, 128], strides = [1, 1]} : vector<2x384xf32> to vector<2x128xf32>
    %333 = arith.mulf %322, %332 : vector<2x128xf32>
    %334 = arith.addf %331, %333 : vector<2x128xf32>
    %335 = math.tanh %334 : vector<2x128xf32>
    %cst_63 = arith.constant 1.000000e+00 : f32
    %336 = vector.broadcast %cst_63 : f32 to vector<2x128xf32>
    %337 = arith.subf %336, %330 : vector<2x128xf32>
    %338 = arith.mulf %337, %335 : vector<2x128xf32>
    %339 = arith.mulf %330, %311 : vector<2x128xf32>
    %340 = arith.addf %338, %339 : vector<2x128xf32>
    %341 = vector.extract_strided_slice %249 {offsets = [6, 0], sizes = [2, 384], strides = [1, 1]} : vector<16x384xf32> to vector<2x384xf32>
    %cst_64 = arith.constant dense<0.000000e+00> : vector<2x384xf32>
    %342 = tpu.matmul %340, %245, %cst_64 {dimension_numbers = #tpu.dot_dimension_numbers<[1], [0], [0], [1], [0, 0, 1, 1], [], []>} : vector<2x128xf32>, vector<128x384xf32>, vector<2x384xf32> -> vector<2x384xf32>
    %343 = arith.addf %342, %252 : vector<2x384xf32>
    %344 = vector.extract_strided_slice %341 {offsets = [0, 0], sizes = [2, 128], strides = [1, 1]} : vector<2x384xf32> to vector<2x128xf32>
    %345 = vector.extract_strided_slice %343 {offsets = [0, 0], sizes = [2, 128], strides = [1, 1]} : vector<2x384xf32> to vector<2x128xf32>
    %346 = arith.addf %344, %345 : vector<2x128xf32>
    %347 = arith.negf %346 : vector<2x128xf32>
    %348 = math.exp %347 : vector<2x128xf32>
    %cst_65 = arith.constant 1.000000e+00 : f32
    %349 = vector.broadcast %cst_65 : f32 to vector<2x128xf32>
    %350 = arith.addf %349, %348 : vector<2x128xf32>
    %351 = arith.divf %349, %350 : vector<2x128xf32>
    %352 = vector.extract_strided_slice %341 {offsets = [0, 128], sizes = [2, 128], strides = [1, 1]} : vector<2x384xf32> to vector<2x128xf32>
    %353 = vector.extract_strided_slice %343 {offsets = [0, 128], sizes = [2, 128], strides = [1, 1]} : vector<2x384xf32> to vector<2x128xf32>
    %354 = arith.addf %352, %353 : vector<2x128xf32>
    %355 = arith.negf %354 : vector<2x128xf32>
    %356 = math.exp %355 : vector<2x128xf32>
    %cst_66 = arith.constant 1.000000e+00 : f32
    %357 = vector.broadcast %cst_66 : f32 to vector<2x128xf32>
    %358 = arith.addf %357, %356 : vector<2x128xf32>
    %359 = arith.divf %357, %358 : vector<2x128xf32>
    %360 = vector.extract_strided_slice %341 {offsets = [0, 256], sizes = [2, 128], strides = [1, 1]} : vector<2x384xf32> to vector<2x128xf32>
    %361 = vector.extract_strided_slice %343 {offsets = [0, 256], sizes = [2, 128], strides = [1, 1]} : vector<2x384xf32> to vector<2x128xf32>
    %362 = arith.mulf %351, %361 : vector<2x128xf32>
    %363 = arith.addf %360, %362 : vector<2x128xf32>
    %364 = math.tanh %363 : vector<2x128xf32>
    %cst_67 = arith.constant 1.000000e+00 : f32
    %365 = vector.broadcast %cst_67 : f32 to vector<2x128xf32>
    %366 = arith.subf %365, %359 : vector<2x128xf32>
    %367 = arith.mulf %366, %364 : vector<2x128xf32>
    %368 = arith.mulf %359, %340 : vector<2x128xf32>
    %369 = arith.addf %367, %368 : vector<2x128xf32>
    %370 = vector.extract_strided_slice %249 {offsets = [8, 0], sizes = [2, 384], strides = [1, 1]} : vector<16x384xf32> to vector<2x384xf32>
    %cst_68 = arith.constant dense<0.000000e+00> : vector<2x384xf32>
    %371 = tpu.matmul %369, %245, %cst_68 {dimension_numbers = #tpu.dot_dimension_numbers<[1], [0], [0], [1], [0, 0, 1, 1], [], []>} : vector<2x128xf32>, vector<128x384xf32>, vector<2x384xf32> -> vector<2x384xf32>
    %372 = arith.addf %371, %252 : vector<2x384xf32>
    %373 = vector.extract_strided_slice %370 {offsets = [0, 0], sizes = [2, 128], strides = [1, 1]} : vector<2x384xf32> to vector<2x128xf32>
    %374 = vector.extract_strided_slice %372 {offsets = [0, 0], sizes = [2, 128], strides = [1, 1]} : vector<2x384xf32> to vector<2x128xf32>
    %375 = arith.addf %373, %374 : vector<2x128xf32>
    %376 = arith.negf %375 : vector<2x128xf32>
    %377 = math.exp %376 : vector<2x128xf32>
    %cst_69 = arith.constant 1.000000e+00 : f32
    %378 = vector.broadcast %cst_69 : f32 to vector<2x128xf32>
    %379 = arith.addf %378, %377 : vector<2x128xf32>
    %380 = arith.divf %378, %379 : vector<2x128xf32>
    %381 = vector.extract_strided_slice %370 {offsets = [0, 128], sizes = [2, 128], strides = [1, 1]} : vector<2x384xf32> to vector<2x128xf32>
    %382 = vector.extract_strided_slice %372 {offsets = [0, 128], sizes = [2, 128], strides = [1, 1]} : vector<2x384xf32> to vector<2x128xf32>
    %383 = arith.addf %381, %382 : vector<2x128xf32>
    %384 = arith.negf %383 : vector<2x128xf32>
    %385 = math.exp %384 : vector<2x128xf32>
    %cst_70 = arith.constant 1.000000e+00 : f32
    %386 = vector.broadcast %cst_70 : f32 to vector<2x128xf32>
    %387 = arith.addf %386, %385 : vector<2x128xf32>
    %388 = arith.divf %386, %387 : vector<2x128xf32>
    %389 = vector.extract_strided_slice %370 {offsets = [0, 256], sizes = [2, 128], strides = [1, 1]} : vector<2x384xf32> to vector<2x128xf32>
    %390 = vector.extract_strided_slice %372 {offsets = [0, 256], sizes = [2, 128], strides = [1, 1]} : vector<2x384xf32> to vector<2x128xf32>
    %391 = arith.mulf %380, %390 : vector<2x128xf32>
    %392 = arith.addf %389, %391 : vector<2x128xf32>
    %393 = math.tanh %392 : vector<2x128xf32>
    %cst_71 = arith.constant 1.000000e+00 : f32
    %394 = vector.broadcast %cst_71 : f32 to vector<2x128xf32>
    %395 = arith.subf %394, %388 : vector<2x128xf32>
    %396 = arith.mulf %395, %393 : vector<2x128xf32>
    %397 = arith.mulf %388, %369 : vector<2x128xf32>
    %398 = arith.addf %396, %397 : vector<2x128xf32>
    %399 = vector.extract_strided_slice %249 {offsets = [10, 0], sizes = [2, 384], strides = [1, 1]} : vector<16x384xf32> to vector<2x384xf32>
    %cst_72 = arith.constant dense<0.000000e+00> : vector<2x384xf32>
    %400 = tpu.matmul %398, %245, %cst_72 {dimension_numbers = #tpu.dot_dimension_numbers<[1], [0], [0], [1], [0, 0, 1, 1], [], []>} : vector<2x128xf32>, vector<128x384xf32>, vector<2x384xf32> -> vector<2x384xf32>
    %401 = arith.addf %400, %252 : vector<2x384xf32>
    %402 = vector.extract_strided_slice %399 {offsets = [0, 0], sizes = [2, 128], strides = [1, 1]} : vector<2x384xf32> to vector<2x128xf32>
    %403 = vector.extract_strided_slice %401 {offsets = [0, 0], sizes = [2, 128], strides = [1, 1]} : vector<2x384xf32> to vector<2x128xf32>
    %404 = arith.addf %402, %403 : vector<2x128xf32>
    %405 = arith.negf %404 : vector<2x128xf32>
    %406 = math.exp %405 : vector<2x128xf32>
    %cst_73 = arith.constant 1.000000e+00 : f32
    %407 = vector.broadcast %cst_73 : f32 to vector<2x128xf32>
    %408 = arith.addf %407, %406 : vector<2x128xf32>
    %409 = arith.divf %407, %408 : vector<2x128xf32>
    %410 = vector.extract_strided_slice %399 {offsets = [0, 128], sizes = [2, 128], strides = [1, 1]} : vector<2x384xf32> to vector<2x128xf32>
    %411 = vector.extract_strided_slice %401 {offsets = [0, 128], sizes = [2, 128], strides = [1, 1]} : vector<2x384xf32> to vector<2x128xf32>
    %412 = arith.addf %410, %411 : vector<2x128xf32>
    %413 = arith.negf %412 : vector<2x128xf32>
    %414 = math.exp %413 : vector<2x128xf32>
    %cst_74 = arith.constant 1.000000e+00 : f32
    %415 = vector.broadcast %cst_74 : f32 to vector<2x128xf32>
    %416 = arith.addf %415, %414 : vector<2x128xf32>
    %417 = arith.divf %415, %416 : vector<2x128xf32>
    %418 = vector.extract_strided_slice %399 {offsets = [0, 256], sizes = [2, 128], strides = [1, 1]} : vector<2x384xf32> to vector<2x128xf32>
    %419 = vector.extract_strided_slice %401 {offsets = [0, 256], sizes = [2, 128], strides = [1, 1]} : vector<2x384xf32> to vector<2x128xf32>
    %420 = arith.mulf %409, %419 : vector<2x128xf32>
    %421 = arith.addf %418, %420 : vector<2x128xf32>
    %422 = math.tanh %421 : vector<2x128xf32>
    %cst_75 = arith.constant 1.000000e+00 : f32
    %423 = vector.broadcast %cst_75 : f32 to vector<2x128xf32>
    %424 = arith.subf %423, %417 : vector<2x128xf32>
    %425 = arith.mulf %424, %422 : vector<2x128xf32>
    %426 = arith.mulf %417, %398 : vector<2x128xf32>
    %427 = arith.addf %425, %426 : vector<2x128xf32>
    %428 = vector.extract_strided_slice %249 {offsets = [12, 0], sizes = [2, 384], strides = [1, 1]} : vector<16x384xf32> to vector<2x384xf32>
    %cst_76 = arith.constant dense<0.000000e+00> : vector<2x384xf32>
    %429 = tpu.matmul %427, %245, %cst_76 {dimension_numbers = #tpu.dot_dimension_numbers<[1], [0], [0], [1], [0, 0, 1, 1], [], []>} : vector<2x128xf32>, vector<128x384xf32>, vector<2x384xf32> -> vector<2x384xf32>
    %430 = arith.addf %429, %252 : vector<2x384xf32>
    %431 = vector.extract_strided_slice %428 {offsets = [0, 0], sizes = [2, 128], strides = [1, 1]} : vector<2x384xf32> to vector<2x128xf32>
    %432 = vector.extract_strided_slice %430 {offsets = [0, 0], sizes = [2, 128], strides = [1, 1]} : vector<2x384xf32> to vector<2x128xf32>
    %433 = arith.addf %431, %432 : vector<2x128xf32>
    %434 = arith.negf %433 : vector<2x128xf32>
    %435 = math.exp %434 : vector<2x128xf32>
    %cst_77 = arith.constant 1.000000e+00 : f32
    %436 = vector.broadcast %cst_77 : f32 to vector<2x128xf32>
    %437 = arith.addf %436, %435 : vector<2x128xf32>
    %438 = arith.divf %436, %437 : vector<2x128xf32>
    %439 = vector.extract_strided_slice %428 {offsets = [0, 128], sizes = [2, 128], strides = [1, 1]} : vector<2x384xf32> to vector<2x128xf32>
    %440 = vector.extract_strided_slice %430 {offsets = [0, 128], sizes = [2, 128], strides = [1, 1]} : vector<2x384xf32> to vector<2x128xf32>
    %441 = arith.addf %439, %440 : vector<2x128xf32>
    %442 = arith.negf %441 : vector<2x128xf32>
    %443 = math.exp %442 : vector<2x128xf32>
    %cst_78 = arith.constant 1.000000e+00 : f32
    %444 = vector.broadcast %cst_78 : f32 to vector<2x128xf32>
    %445 = arith.addf %444, %443 : vector<2x128xf32>
    %446 = arith.divf %444, %445 : vector<2x128xf32>
    %447 = vector.extract_strided_slice %428 {offsets = [0, 256], sizes = [2, 128], strides = [1, 1]} : vector<2x384xf32> to vector<2x128xf32>
    %448 = vector.extract_strided_slice %430 {offsets = [0, 256], sizes = [2, 128], strides = [1, 1]} : vector<2x384xf32> to vector<2x128xf32>
    %449 = arith.mulf %438, %448 : vector<2x128xf32>
    %450 = arith.addf %447, %449 : vector<2x128xf32>
    %451 = math.tanh %450 : vector<2x128xf32>
    %cst_79 = arith.constant 1.000000e+00 : f32
    %452 = vector.broadcast %cst_79 : f32 to vector<2x128xf32>
    %453 = arith.subf %452, %446 : vector<2x128xf32>
    %454 = arith.mulf %453, %451 : vector<2x128xf32>
    %455 = arith.mulf %446, %427 : vector<2x128xf32>
    %456 = arith.addf %454, %455 : vector<2x128xf32>
    %457 = vector.extract_strided_slice %249 {offsets = [14, 0], sizes = [2, 384], strides = [1, 1]} : vector<16x384xf32> to vector<2x384xf32>
    %cst_80 = arith.constant dense<0.000000e+00> : vector<2x384xf32>
    %458 = tpu.matmul %456, %245, %cst_80 {dimension_numbers = #tpu.dot_dimension_numbers<[1], [0], [0], [1], [0, 0, 1, 1], [], []>} : vector<2x128xf32>, vector<128x384xf32>, vector<2x384xf32> -> vector<2x384xf32>
    %459 = arith.addf %458, %252 : vector<2x384xf32>
    %460 = vector.extract_strided_slice %457 {offsets = [0, 0], sizes = [2, 128], strides = [1, 1]} : vector<2x384xf32> to vector<2x128xf32>
    %461 = vector.extract_strided_slice %459 {offsets = [0, 0], sizes = [2, 128], strides = [1, 1]} : vector<2x384xf32> to vector<2x128xf32>
    %462 = arith.addf %460, %461 : vector<2x128xf32>
    %463 = arith.negf %462 : vector<2x128xf32>
    %464 = math.exp %463 : vector<2x128xf32>
    %cst_81 = arith.constant 1.000000e+00 : f32
    %465 = vector.broadcast %cst_81 : f32 to vector<2x128xf32>
    %466 = arith.addf %465, %464 : vector<2x128xf32>
    %467 = arith.divf %465, %466 : vector<2x128xf32>
    %468 = vector.extract_strided_slice %457 {offsets = [0, 128], sizes = [2, 128], strides = [1, 1]} : vector<2x384xf32> to vector<2x128xf32>
    %469 = vector.extract_strided_slice %459 {offsets = [0, 128], sizes = [2, 128], strides = [1, 1]} : vector<2x384xf32> to vector<2x128xf32>
    %470 = arith.addf %468, %469 : vector<2x128xf32>
    %471 = arith.negf %470 : vector<2x128xf32>
    %472 = math.exp %471 : vector<2x128xf32>
    %cst_82 = arith.constant 1.000000e+00 : f32
    %473 = vector.broadcast %cst_82 : f32 to vector<2x128xf32>
    %474 = arith.addf %473, %472 : vector<2x128xf32>
    %475 = arith.divf %473, %474 : vector<2x128xf32>
    %476 = vector.extract_strided_slice %457 {offsets = [0, 256], sizes = [2, 128], strides = [1, 1]} : vector<2x384xf32> to vector<2x128xf32>
    %477 = vector.extract_strided_slice %459 {offsets = [0, 256], sizes = [2, 128], strides = [1, 1]} : vector<2x384xf32> to vector<2x128xf32>
    %478 = arith.mulf %467, %477 : vector<2x128xf32>
    %479 = arith.addf %476, %478 : vector<2x128xf32>
    %480 = math.tanh %479 : vector<2x128xf32>
    %cst_83 = arith.constant 1.000000e+00 : f32
    %481 = vector.broadcast %cst_83 : f32 to vector<2x128xf32>
    %482 = arith.subf %481, %475 : vector<2x128xf32>
    %483 = arith.mulf %482, %480 : vector<2x128xf32>
    %484 = arith.mulf %475, %456 : vector<2x128xf32>
    %485 = arith.addf %483, %484 : vector<2x128xf32>
    %486 = tpu.concatenate %282, %311, %340, %369, %398, %427, %456, %485 in 0 : vector<2x128xf32>, vector<2x128xf32>, vector<2x128xf32>, vector<2x128xf32>, vector<2x128xf32>, vector<2x128xf32>, vector<2x128xf32>, vector<2x128xf32> -> vector<16x128xf32>
    %c0_84 = arith.constant 0 : index
    %c0_85 = arith.constant 0 : index
    %487 = vector.load %arg9[%c0_84, %c0_85] : memref<128x384xf32, #tpu.memory_space<vmem>>, vector<128x384xf32>
    %c0_86 = arith.constant 0 : index
    %c0_87 = arith.constant 0 : index
    %488 = vector.load %arg10[%c0_86, %c0_87] : memref<128x384xf32, #tpu.memory_space<vmem>>, vector<128x384xf32>
    %cst_88 = arith.constant dense<0.000000e+00> : vector<16x384xf32>
    %489 = tpu.matmul %486, %487, %cst_88 {dimension_numbers = #tpu.dot_dimension_numbers<[1], [0], [0], [1], [0, 0, 1, 1], [], []>} : vector<16x128xf32>, vector<128x384xf32>, vector<16x384xf32> -> vector<16x384xf32>
    %c0_89 = arith.constant 0 : index
    %c0_90 = arith.constant 0 : index
    %490 = vector.load %arg11[%c0_89, %c0_90] : memref<1x384xf32, #tpu.memory_space<vmem>>, vector<1x384xf32>
    %491 = vector.broadcast %490 : vector<1x384xf32> to vector<16x384xf32>
    %492 = arith.addf %489, %491 : vector<16x384xf32>
    %c0_91 = arith.constant 0 : index
    %c0_92 = arith.constant 0 : index
    %493 = vector.load %arg12[%c0_91, %c0_92] : memref<1x384xf32, #tpu.memory_space<vmem>>, vector<1x384xf32>
    %494 = vector.shape_cast %493 : vector<1x384xf32> to vector<1x384xf32>
    %495 = vector.broadcast %494 : vector<1x384xf32> to vector<2x384xf32>
    %cst_93 = arith.constant 0.000000e+00 : f32
    %496 = vector.broadcast %cst_93 : f32 to vector<2x128xf32>
    %497 = vector.extract_strided_slice %492 {offsets = [0, 0], sizes = [2, 384], strides = [1, 1]} : vector<16x384xf32> to vector<2x384xf32>
    %cst_94 = arith.constant dense<0.000000e+00> : vector<2x384xf32>
    %498 = tpu.matmul %496, %488, %cst_94 {dimension_numbers = #tpu.dot_dimension_numbers<[1], [0], [0], [1], [0, 0, 1, 1], [], []>} : vector<2x128xf32>, vector<128x384xf32>, vector<2x384xf32> -> vector<2x384xf32>
    %499 = arith.addf %498, %495 : vector<2x384xf32>
    %500 = vector.extract_strided_slice %497 {offsets = [0, 0], sizes = [2, 128], strides = [1, 1]} : vector<2x384xf32> to vector<2x128xf32>
    %501 = vector.extract_strided_slice %499 {offsets = [0, 0], sizes = [2, 128], strides = [1, 1]} : vector<2x384xf32> to vector<2x128xf32>
    %502 = arith.addf %500, %501 : vector<2x128xf32>
    %503 = arith.negf %502 : vector<2x128xf32>
    %504 = math.exp %503 : vector<2x128xf32>
    %cst_95 = arith.constant 1.000000e+00 : f32
    %505 = vector.broadcast %cst_95 : f32 to vector<2x128xf32>
    %506 = arith.addf %505, %504 : vector<2x128xf32>
    %507 = arith.divf %505, %506 : vector<2x128xf32>
    %508 = vector.extract_strided_slice %497 {offsets = [0, 128], sizes = [2, 128], strides = [1, 1]} : vector<2x384xf32> to vector<2x128xf32>
    %509 = vector.extract_strided_slice %499 {offsets = [0, 128], sizes = [2, 128], strides = [1, 1]} : vector<2x384xf32> to vector<2x128xf32>
    %510 = arith.addf %508, %509 : vector<2x128xf32>
    %511 = arith.negf %510 : vector<2x128xf32>
    %512 = math.exp %511 : vector<2x128xf32>
    %cst_96 = arith.constant 1.000000e+00 : f32
    %513 = vector.broadcast %cst_96 : f32 to vector<2x128xf32>
    %514 = arith.addf %513, %512 : vector<2x128xf32>
    %515 = arith.divf %513, %514 : vector<2x128xf32>
    %516 = vector.extract_strided_slice %497 {offsets = [0, 256], sizes = [2, 128], strides = [1, 1]} : vector<2x384xf32> to vector<2x128xf32>
    %517 = vector.extract_strided_slice %499 {offsets = [0, 256], sizes = [2, 128], strides = [1, 1]} : vector<2x384xf32> to vector<2x128xf32>
    %518 = arith.mulf %507, %517 : vector<2x128xf32>
    %519 = arith.addf %516, %518 : vector<2x128xf32>
    %520 = math.tanh %519 : vector<2x128xf32>
    %cst_97 = arith.constant 1.000000e+00 : f32
    %521 = vector.broadcast %cst_97 : f32 to vector<2x128xf32>
    %522 = arith.subf %521, %515 : vector<2x128xf32>
    %523 = arith.mulf %522, %520 : vector<2x128xf32>
    %524 = arith.mulf %515, %496 : vector<2x128xf32>
    %525 = arith.addf %523, %524 : vector<2x128xf32>
    %526 = vector.extract_strided_slice %492 {offsets = [2, 0], sizes = [2, 384], strides = [1, 1]} : vector<16x384xf32> to vector<2x384xf32>
    %cst_98 = arith.constant dense<0.000000e+00> : vector<2x384xf32>
    %527 = tpu.matmul %525, %488, %cst_98 {dimension_numbers = #tpu.dot_dimension_numbers<[1], [0], [0], [1], [0, 0, 1, 1], [], []>} : vector<2x128xf32>, vector<128x384xf32>, vector<2x384xf32> -> vector<2x384xf32>
    %528 = arith.addf %527, %495 : vector<2x384xf32>
    %529 = vector.extract_strided_slice %526 {offsets = [0, 0], sizes = [2, 128], strides = [1, 1]} : vector<2x384xf32> to vector<2x128xf32>
    %530 = vector.extract_strided_slice %528 {offsets = [0, 0], sizes = [2, 128], strides = [1, 1]} : vector<2x384xf32> to vector<2x128xf32>
    %531 = arith.addf %529, %530 : vector<2x128xf32>
    %532 = arith.negf %531 : vector<2x128xf32>
    %533 = math.exp %532 : vector<2x128xf32>
    %cst_99 = arith.constant 1.000000e+00 : f32
    %534 = vector.broadcast %cst_99 : f32 to vector<2x128xf32>
    %535 = arith.addf %534, %533 : vector<2x128xf32>
    %536 = arith.divf %534, %535 : vector<2x128xf32>
    %537 = vector.extract_strided_slice %526 {offsets = [0, 128], sizes = [2, 128], strides = [1, 1]} : vector<2x384xf32> to vector<2x128xf32>
    %538 = vector.extract_strided_slice %528 {offsets = [0, 128], sizes = [2, 128], strides = [1, 1]} : vector<2x384xf32> to vector<2x128xf32>
    %539 = arith.addf %537, %538 : vector<2x128xf32>
    %540 = arith.negf %539 : vector<2x128xf32>
    %541 = math.exp %540 : vector<2x128xf32>
    %cst_100 = arith.constant 1.000000e+00 : f32
    %542 = vector.broadcast %cst_100 : f32 to vector<2x128xf32>
    %543 = arith.addf %542, %541 : vector<2x128xf32>
    %544 = arith.divf %542, %543 : vector<2x128xf32>
    %545 = vector.extract_strided_slice %526 {offsets = [0, 256], sizes = [2, 128], strides = [1, 1]} : vector<2x384xf32> to vector<2x128xf32>
    %546 = vector.extract_strided_slice %528 {offsets = [0, 256], sizes = [2, 128], strides = [1, 1]} : vector<2x384xf32> to vector<2x128xf32>
    %547 = arith.mulf %536, %546 : vector<2x128xf32>
    %548 = arith.addf %545, %547 : vector<2x128xf32>
    %549 = math.tanh %548 : vector<2x128xf32>
    %cst_101 = arith.constant 1.000000e+00 : f32
    %550 = vector.broadcast %cst_101 : f32 to vector<2x128xf32>
    %551 = arith.subf %550, %544 : vector<2x128xf32>
    %552 = arith.mulf %551, %549 : vector<2x128xf32>
    %553 = arith.mulf %544, %525 : vector<2x128xf32>
    %554 = arith.addf %552, %553 : vector<2x128xf32>
    %555 = vector.extract_strided_slice %492 {offsets = [4, 0], sizes = [2, 384], strides = [1, 1]} : vector<16x384xf32> to vector<2x384xf32>
    %cst_102 = arith.constant dense<0.000000e+00> : vector<2x384xf32>
    %556 = tpu.matmul %554, %488, %cst_102 {dimension_numbers = #tpu.dot_dimension_numbers<[1], [0], [0], [1], [0, 0, 1, 1], [], []>} : vector<2x128xf32>, vector<128x384xf32>, vector<2x384xf32> -> vector<2x384xf32>
    %557 = arith.addf %556, %495 : vector<2x384xf32>
    %558 = vector.extract_strided_slice %555 {offsets = [0, 0], sizes = [2, 128], strides = [1, 1]} : vector<2x384xf32> to vector<2x128xf32>
    %559 = vector.extract_strided_slice %557 {offsets = [0, 0], sizes = [2, 128], strides = [1, 1]} : vector<2x384xf32> to vector<2x128xf32>
    %560 = arith.addf %558, %559 : vector<2x128xf32>
    %561 = arith.negf %560 : vector<2x128xf32>
    %562 = math.exp %561 : vector<2x128xf32>
    %cst_103 = arith.constant 1.000000e+00 : f32
    %563 = vector.broadcast %cst_103 : f32 to vector<2x128xf32>
    %564 = arith.addf %563, %562 : vector<2x128xf32>
    %565 = arith.divf %563, %564 : vector<2x128xf32>
    %566 = vector.extract_strided_slice %555 {offsets = [0, 128], sizes = [2, 128], strides = [1, 1]} : vector<2x384xf32> to vector<2x128xf32>
    %567 = vector.extract_strided_slice %557 {offsets = [0, 128], sizes = [2, 128], strides = [1, 1]} : vector<2x384xf32> to vector<2x128xf32>
    %568 = arith.addf %566, %567 : vector<2x128xf32>
    %569 = arith.negf %568 : vector<2x128xf32>
    %570 = math.exp %569 : vector<2x128xf32>
    %cst_104 = arith.constant 1.000000e+00 : f32
    %571 = vector.broadcast %cst_104 : f32 to vector<2x128xf32>
    %572 = arith.addf %571, %570 : vector<2x128xf32>
    %573 = arith.divf %571, %572 : vector<2x128xf32>
    %574 = vector.extract_strided_slice %555 {offsets = [0, 256], sizes = [2, 128], strides = [1, 1]} : vector<2x384xf32> to vector<2x128xf32>
    %575 = vector.extract_strided_slice %557 {offsets = [0, 256], sizes = [2, 128], strides = [1, 1]} : vector<2x384xf32> to vector<2x128xf32>
    %576 = arith.mulf %565, %575 : vector<2x128xf32>
    %577 = arith.addf %574, %576 : vector<2x128xf32>
    %578 = math.tanh %577 : vector<2x128xf32>
    %cst_105 = arith.constant 1.000000e+00 : f32
    %579 = vector.broadcast %cst_105 : f32 to vector<2x128xf32>
    %580 = arith.subf %579, %573 : vector<2x128xf32>
    %581 = arith.mulf %580, %578 : vector<2x128xf32>
    %582 = arith.mulf %573, %554 : vector<2x128xf32>
    %583 = arith.addf %581, %582 : vector<2x128xf32>
    %584 = vector.extract_strided_slice %492 {offsets = [6, 0], sizes = [2, 384], strides = [1, 1]} : vector<16x384xf32> to vector<2x384xf32>
    %cst_106 = arith.constant dense<0.000000e+00> : vector<2x384xf32>
    %585 = tpu.matmul %583, %488, %cst_106 {dimension_numbers = #tpu.dot_dimension_numbers<[1], [0], [0], [1], [0, 0, 1, 1], [], []>} : vector<2x128xf32>, vector<128x384xf32>, vector<2x384xf32> -> vector<2x384xf32>
    %586 = arith.addf %585, %495 : vector<2x384xf32>
    %587 = vector.extract_strided_slice %584 {offsets = [0, 0], sizes = [2, 128], strides = [1, 1]} : vector<2x384xf32> to vector<2x128xf32>
    %588 = vector.extract_strided_slice %586 {offsets = [0, 0], sizes = [2, 128], strides = [1, 1]} : vector<2x384xf32> to vector<2x128xf32>
    %589 = arith.addf %587, %588 : vector<2x128xf32>
    %590 = arith.negf %589 : vector<2x128xf32>
    %591 = math.exp %590 : vector<2x128xf32>
    %cst_107 = arith.constant 1.000000e+00 : f32
    %592 = vector.broadcast %cst_107 : f32 to vector<2x128xf32>
    %593 = arith.addf %592, %591 : vector<2x128xf32>
    %594 = arith.divf %592, %593 : vector<2x128xf32>
    %595 = vector.extract_strided_slice %584 {offsets = [0, 128], sizes = [2, 128], strides = [1, 1]} : vector<2x384xf32> to vector<2x128xf32>
    %596 = vector.extract_strided_slice %586 {offsets = [0, 128], sizes = [2, 128], strides = [1, 1]} : vector<2x384xf32> to vector<2x128xf32>
    %597 = arith.addf %595, %596 : vector<2x128xf32>
    %598 = arith.negf %597 : vector<2x128xf32>
    %599 = math.exp %598 : vector<2x128xf32>
    %cst_108 = arith.constant 1.000000e+00 : f32
    %600 = vector.broadcast %cst_108 : f32 to vector<2x128xf32>
    %601 = arith.addf %600, %599 : vector<2x128xf32>
    %602 = arith.divf %600, %601 : vector<2x128xf32>
    %603 = vector.extract_strided_slice %584 {offsets = [0, 256], sizes = [2, 128], strides = [1, 1]} : vector<2x384xf32> to vector<2x128xf32>
    %604 = vector.extract_strided_slice %586 {offsets = [0, 256], sizes = [2, 128], strides = [1, 1]} : vector<2x384xf32> to vector<2x128xf32>
    %605 = arith.mulf %594, %604 : vector<2x128xf32>
    %606 = arith.addf %603, %605 : vector<2x128xf32>
    %607 = math.tanh %606 : vector<2x128xf32>
    %cst_109 = arith.constant 1.000000e+00 : f32
    %608 = vector.broadcast %cst_109 : f32 to vector<2x128xf32>
    %609 = arith.subf %608, %602 : vector<2x128xf32>
    %610 = arith.mulf %609, %607 : vector<2x128xf32>
    %611 = arith.mulf %602, %583 : vector<2x128xf32>
    %612 = arith.addf %610, %611 : vector<2x128xf32>
    %613 = vector.extract_strided_slice %492 {offsets = [8, 0], sizes = [2, 384], strides = [1, 1]} : vector<16x384xf32> to vector<2x384xf32>
    %cst_110 = arith.constant dense<0.000000e+00> : vector<2x384xf32>
    %614 = tpu.matmul %612, %488, %cst_110 {dimension_numbers = #tpu.dot_dimension_numbers<[1], [0], [0], [1], [0, 0, 1, 1], [], []>} : vector<2x128xf32>, vector<128x384xf32>, vector<2x384xf32> -> vector<2x384xf32>
    %615 = arith.addf %614, %495 : vector<2x384xf32>
    %616 = vector.extract_strided_slice %613 {offsets = [0, 0], sizes = [2, 128], strides = [1, 1]} : vector<2x384xf32> to vector<2x128xf32>
    %617 = vector.extract_strided_slice %615 {offsets = [0, 0], sizes = [2, 128], strides = [1, 1]} : vector<2x384xf32> to vector<2x128xf32>
    %618 = arith.addf %616, %617 : vector<2x128xf32>
    %619 = arith.negf %618 : vector<2x128xf32>
    %620 = math.exp %619 : vector<2x128xf32>
    %cst_111 = arith.constant 1.000000e+00 : f32
    %621 = vector.broadcast %cst_111 : f32 to vector<2x128xf32>
    %622 = arith.addf %621, %620 : vector<2x128xf32>
    %623 = arith.divf %621, %622 : vector<2x128xf32>
    %624 = vector.extract_strided_slice %613 {offsets = [0, 128], sizes = [2, 128], strides = [1, 1]} : vector<2x384xf32> to vector<2x128xf32>
    %625 = vector.extract_strided_slice %615 {offsets = [0, 128], sizes = [2, 128], strides = [1, 1]} : vector<2x384xf32> to vector<2x128xf32>
    %626 = arith.addf %624, %625 : vector<2x128xf32>
    %627 = arith.negf %626 : vector<2x128xf32>
    %628 = math.exp %627 : vector<2x128xf32>
    %cst_112 = arith.constant 1.000000e+00 : f32
    %629 = vector.broadcast %cst_112 : f32 to vector<2x128xf32>
    %630 = arith.addf %629, %628 : vector<2x128xf32>
    %631 = arith.divf %629, %630 : vector<2x128xf32>
    %632 = vector.extract_strided_slice %613 {offsets = [0, 256], sizes = [2, 128], strides = [1, 1]} : vector<2x384xf32> to vector<2x128xf32>
    %633 = vector.extract_strided_slice %615 {offsets = [0, 256], sizes = [2, 128], strides = [1, 1]} : vector<2x384xf32> to vector<2x128xf32>
    %634 = arith.mulf %623, %633 : vector<2x128xf32>
    %635 = arith.addf %632, %634 : vector<2x128xf32>
    %636 = math.tanh %635 : vector<2x128xf32>
    %cst_113 = arith.constant 1.000000e+00 : f32
    %637 = vector.broadcast %cst_113 : f32 to vector<2x128xf32>
    %638 = arith.subf %637, %631 : vector<2x128xf32>
    %639 = arith.mulf %638, %636 : vector<2x128xf32>
    %640 = arith.mulf %631, %612 : vector<2x128xf32>
    %641 = arith.addf %639, %640 : vector<2x128xf32>
    %642 = vector.extract_strided_slice %492 {offsets = [10, 0], sizes = [2, 384], strides = [1, 1]} : vector<16x384xf32> to vector<2x384xf32>
    %cst_114 = arith.constant dense<0.000000e+00> : vector<2x384xf32>
    %643 = tpu.matmul %641, %488, %cst_114 {dimension_numbers = #tpu.dot_dimension_numbers<[1], [0], [0], [1], [0, 0, 1, 1], [], []>} : vector<2x128xf32>, vector<128x384xf32>, vector<2x384xf32> -> vector<2x384xf32>
    %644 = arith.addf %643, %495 : vector<2x384xf32>
    %645 = vector.extract_strided_slice %642 {offsets = [0, 0], sizes = [2, 128], strides = [1, 1]} : vector<2x384xf32> to vector<2x128xf32>
    %646 = vector.extract_strided_slice %644 {offsets = [0, 0], sizes = [2, 128], strides = [1, 1]} : vector<2x384xf32> to vector<2x128xf32>
    %647 = arith.addf %645, %646 : vector<2x128xf32>
    %648 = arith.negf %647 : vector<2x128xf32>
    %649 = math.exp %648 : vector<2x128xf32>
    %cst_115 = arith.constant 1.000000e+00 : f32
    %650 = vector.broadcast %cst_115 : f32 to vector<2x128xf32>
    %651 = arith.addf %650, %649 : vector<2x128xf32>
    %652 = arith.divf %650, %651 : vector<2x128xf32>
    %653 = vector.extract_strided_slice %642 {offsets = [0, 128], sizes = [2, 128], strides = [1, 1]} : vector<2x384xf32> to vector<2x128xf32>
    %654 = vector.extract_strided_slice %644 {offsets = [0, 128], sizes = [2, 128], strides = [1, 1]} : vector<2x384xf32> to vector<2x128xf32>
    %655 = arith.addf %653, %654 : vector<2x128xf32>
    %656 = arith.negf %655 : vector<2x128xf32>
    %657 = math.exp %656 : vector<2x128xf32>
    %cst_116 = arith.constant 1.000000e+00 : f32
    %658 = vector.broadcast %cst_116 : f32 to vector<2x128xf32>
    %659 = arith.addf %658, %657 : vector<2x128xf32>
    %660 = arith.divf %658, %659 : vector<2x128xf32>
    %661 = vector.extract_strided_slice %642 {offsets = [0, 256], sizes = [2, 128], strides = [1, 1]} : vector<2x384xf32> to vector<2x128xf32>
    %662 = vector.extract_strided_slice %644 {offsets = [0, 256], sizes = [2, 128], strides = [1, 1]} : vector<2x384xf32> to vector<2x128xf32>
    %663 = arith.mulf %652, %662 : vector<2x128xf32>
    %664 = arith.addf %661, %663 : vector<2x128xf32>
    %665 = math.tanh %664 : vector<2x128xf32>
    %cst_117 = arith.constant 1.000000e+00 : f32
    %666 = vector.broadcast %cst_117 : f32 to vector<2x128xf32>
    %667 = arith.subf %666, %660 : vector<2x128xf32>
    %668 = arith.mulf %667, %665 : vector<2x128xf32>
    %669 = arith.mulf %660, %641 : vector<2x128xf32>
    %670 = arith.addf %668, %669 : vector<2x128xf32>
    %671 = vector.extract_strided_slice %492 {offsets = [12, 0], sizes = [2, 384], strides = [1, 1]} : vector<16x384xf32> to vector<2x384xf32>
    %cst_118 = arith.constant dense<0.000000e+00> : vector<2x384xf32>
    %672 = tpu.matmul %670, %488, %cst_118 {dimension_numbers = #tpu.dot_dimension_numbers<[1], [0], [0], [1], [0, 0, 1, 1], [], []>} : vector<2x128xf32>, vector<128x384xf32>, vector<2x384xf32> -> vector<2x384xf32>
    %673 = arith.addf %672, %495 : vector<2x384xf32>
    %674 = vector.extract_strided_slice %671 {offsets = [0, 0], sizes = [2, 128], strides = [1, 1]} : vector<2x384xf32> to vector<2x128xf32>
    %675 = vector.extract_strided_slice %673 {offsets = [0, 0], sizes = [2, 128], strides = [1, 1]} : vector<2x384xf32> to vector<2x128xf32>
    %676 = arith.addf %674, %675 : vector<2x128xf32>
    %677 = arith.negf %676 : vector<2x128xf32>
    %678 = math.exp %677 : vector<2x128xf32>
    %cst_119 = arith.constant 1.000000e+00 : f32
    %679 = vector.broadcast %cst_119 : f32 to vector<2x128xf32>
    %680 = arith.addf %679, %678 : vector<2x128xf32>
    %681 = arith.divf %679, %680 : vector<2x128xf32>
    %682 = vector.extract_strided_slice %671 {offsets = [0, 128], sizes = [2, 128], strides = [1, 1]} : vector<2x384xf32> to vector<2x128xf32>
    %683 = vector.extract_strided_slice %673 {offsets = [0, 128], sizes = [2, 128], strides = [1, 1]} : vector<2x384xf32> to vector<2x128xf32>
    %684 = arith.addf %682, %683 : vector<2x128xf32>
    %685 = arith.negf %684 : vector<2x128xf32>
    %686 = math.exp %685 : vector<2x128xf32>
    %cst_120 = arith.constant 1.000000e+00 : f32
    %687 = vector.broadcast %cst_120 : f32 to vector<2x128xf32>
    %688 = arith.addf %687, %686 : vector<2x128xf32>
    %689 = arith.divf %687, %688 : vector<2x128xf32>
    %690 = vector.extract_strided_slice %671 {offsets = [0, 256], sizes = [2, 128], strides = [1, 1]} : vector<2x384xf32> to vector<2x128xf32>
    %691 = vector.extract_strided_slice %673 {offsets = [0, 256], sizes = [2, 128], strides = [1, 1]} : vector<2x384xf32> to vector<2x128xf32>
    %692 = arith.mulf %681, %691 : vector<2x128xf32>
    %693 = arith.addf %690, %692 : vector<2x128xf32>
    %694 = math.tanh %693 : vector<2x128xf32>
    %cst_121 = arith.constant 1.000000e+00 : f32
    %695 = vector.broadcast %cst_121 : f32 to vector<2x128xf32>
    %696 = arith.subf %695, %689 : vector<2x128xf32>
    %697 = arith.mulf %696, %694 : vector<2x128xf32>
    %698 = arith.mulf %689, %670 : vector<2x128xf32>
    %699 = arith.addf %697, %698 : vector<2x128xf32>
    %700 = vector.extract_strided_slice %492 {offsets = [14, 0], sizes = [2, 384], strides = [1, 1]} : vector<16x384xf32> to vector<2x384xf32>
    %cst_122 = arith.constant dense<0.000000e+00> : vector<2x384xf32>
    %701 = tpu.matmul %699, %488, %cst_122 {dimension_numbers = #tpu.dot_dimension_numbers<[1], [0], [0], [1], [0, 0, 1, 1], [], []>} : vector<2x128xf32>, vector<128x384xf32>, vector<2x384xf32> -> vector<2x384xf32>
    %702 = arith.addf %701, %495 : vector<2x384xf32>
    %703 = vector.extract_strided_slice %700 {offsets = [0, 0], sizes = [2, 128], strides = [1, 1]} : vector<2x384xf32> to vector<2x128xf32>
    %704 = vector.extract_strided_slice %702 {offsets = [0, 0], sizes = [2, 128], strides = [1, 1]} : vector<2x384xf32> to vector<2x128xf32>
    %705 = arith.addf %703, %704 : vector<2x128xf32>
    %706 = arith.negf %705 : vector<2x128xf32>
    %707 = math.exp %706 : vector<2x128xf32>
    %cst_123 = arith.constant 1.000000e+00 : f32
    %708 = vector.broadcast %cst_123 : f32 to vector<2x128xf32>
    %709 = arith.addf %708, %707 : vector<2x128xf32>
    %710 = arith.divf %708, %709 : vector<2x128xf32>
    %711 = vector.extract_strided_slice %700 {offsets = [0, 128], sizes = [2, 128], strides = [1, 1]} : vector<2x384xf32> to vector<2x128xf32>
    %712 = vector.extract_strided_slice %702 {offsets = [0, 128], sizes = [2, 128], strides = [1, 1]} : vector<2x384xf32> to vector<2x128xf32>
    %713 = arith.addf %711, %712 : vector<2x128xf32>
    %714 = arith.negf %713 : vector<2x128xf32>
    %715 = math.exp %714 : vector<2x128xf32>
    %cst_124 = arith.constant 1.000000e+00 : f32
    %716 = vector.broadcast %cst_124 : f32 to vector<2x128xf32>
    %717 = arith.addf %716, %715 : vector<2x128xf32>
    %718 = arith.divf %716, %717 : vector<2x128xf32>
    %719 = vector.extract_strided_slice %700 {offsets = [0, 256], sizes = [2, 128], strides = [1, 1]} : vector<2x384xf32> to vector<2x128xf32>
    %720 = vector.extract_strided_slice %702 {offsets = [0, 256], sizes = [2, 128], strides = [1, 1]} : vector<2x384xf32> to vector<2x128xf32>
    %721 = arith.mulf %710, %720 : vector<2x128xf32>
    %722 = arith.addf %719, %721 : vector<2x128xf32>
    %723 = math.tanh %722 : vector<2x128xf32>
    %cst_125 = arith.constant 1.000000e+00 : f32
    %724 = vector.broadcast %cst_125 : f32 to vector<2x128xf32>
    %725 = arith.subf %724, %718 : vector<2x128xf32>
    %726 = arith.mulf %725, %723 : vector<2x128xf32>
    %727 = arith.mulf %718, %699 : vector<2x128xf32>
    %728 = arith.addf %726, %727 : vector<2x128xf32>
    %729 = tpu.concatenate %525, %554, %583, %612, %641, %670, %699, %728 in 0 : vector<2x128xf32>, vector<2x128xf32>, vector<2x128xf32>, vector<2x128xf32>, vector<2x128xf32>, vector<2x128xf32>, vector<2x128xf32>, vector<2x128xf32> -> vector<16x128xf32>
    %c0_126 = arith.constant 0 : index
    %c0_127 = arith.constant 0 : index
    %730 = vector.load %arg13[%c0_126, %c0_127] : memref<128x384xf32, #tpu.memory_space<vmem>>, vector<128x384xf32>
    %c0_128 = arith.constant 0 : index
    %c0_129 = arith.constant 0 : index
    %731 = vector.load %arg14[%c0_128, %c0_129] : memref<128x384xf32, #tpu.memory_space<vmem>>, vector<128x384xf32>
    %cst_130 = arith.constant dense<0.000000e+00> : vector<16x384xf32>
    %732 = tpu.matmul %729, %730, %cst_130 {dimension_numbers = #tpu.dot_dimension_numbers<[1], [0], [0], [1], [0, 0, 1, 1], [], []>} : vector<16x128xf32>, vector<128x384xf32>, vector<16x384xf32> -> vector<16x384xf32>
    %c0_131 = arith.constant 0 : index
    %c0_132 = arith.constant 0 : index
    %733 = vector.load %arg15[%c0_131, %c0_132] : memref<1x384xf32, #tpu.memory_space<vmem>>, vector<1x384xf32>
    %734 = vector.broadcast %733 : vector<1x384xf32> to vector<16x384xf32>
    %735 = arith.addf %732, %734 : vector<16x384xf32>
    %c0_133 = arith.constant 0 : index
    %c0_134 = arith.constant 0 : index
    %736 = vector.load %arg16[%c0_133, %c0_134] : memref<1x384xf32, #tpu.memory_space<vmem>>, vector<1x384xf32>
    %737 = vector.shape_cast %736 : vector<1x384xf32> to vector<1x384xf32>
    %738 = vector.broadcast %737 : vector<1x384xf32> to vector<2x384xf32>
    %cst_135 = arith.constant 0.000000e+00 : f32
    %739 = vector.broadcast %cst_135 : f32 to vector<2x128xf32>
    %740 = vector.extract_strided_slice %735 {offsets = [0, 0], sizes = [2, 384], strides = [1, 1]} : vector<16x384xf32> to vector<2x384xf32>
    %cst_136 = arith.constant dense<0.000000e+00> : vector<2x384xf32>
    %741 = tpu.matmul %739, %731, %cst_136 {dimension_numbers = #tpu.dot_dimension_numbers<[1], [0], [0], [1], [0, 0, 1, 1], [], []>} : vector<2x128xf32>, vector<128x384xf32>, vector<2x384xf32> -> vector<2x384xf32>
    %742 = arith.addf %741, %738 : vector<2x384xf32>
    %743 = vector.extract_strided_slice %740 {offsets = [0, 0], sizes = [2, 128], strides = [1, 1]} : vector<2x384xf32> to vector<2x128xf32>
    %744 = vector.extract_strided_slice %742 {offsets = [0, 0], sizes = [2, 128], strides = [1, 1]} : vector<2x384xf32> to vector<2x128xf32>
    %745 = arith.addf %743, %744 : vector<2x128xf32>
    %746 = arith.negf %745 : vector<2x128xf32>
    %747 = math.exp %746 : vector<2x128xf32>
    %cst_137 = arith.constant 1.000000e+00 : f32
    %748 = vector.broadcast %cst_137 : f32 to vector<2x128xf32>
    %749 = arith.addf %748, %747 : vector<2x128xf32>
    %750 = arith.divf %748, %749 : vector<2x128xf32>
    %751 = vector.extract_strided_slice %740 {offsets = [0, 128], sizes = [2, 128], strides = [1, 1]} : vector<2x384xf32> to vector<2x128xf32>
    %752 = vector.extract_strided_slice %742 {offsets = [0, 128], sizes = [2, 128], strides = [1, 1]} : vector<2x384xf32> to vector<2x128xf32>
    %753 = arith.addf %751, %752 : vector<2x128xf32>
    %754 = arith.negf %753 : vector<2x128xf32>
    %755 = math.exp %754 : vector<2x128xf32>
    %cst_138 = arith.constant 1.000000e+00 : f32
    %756 = vector.broadcast %cst_138 : f32 to vector<2x128xf32>
    %757 = arith.addf %756, %755 : vector<2x128xf32>
    %758 = arith.divf %756, %757 : vector<2x128xf32>
    %759 = vector.extract_strided_slice %740 {offsets = [0, 256], sizes = [2, 128], strides = [1, 1]} : vector<2x384xf32> to vector<2x128xf32>
    %760 = vector.extract_strided_slice %742 {offsets = [0, 256], sizes = [2, 128], strides = [1, 1]} : vector<2x384xf32> to vector<2x128xf32>
    %761 = arith.mulf %750, %760 : vector<2x128xf32>
    %762 = arith.addf %759, %761 : vector<2x128xf32>
    %763 = math.tanh %762 : vector<2x128xf32>
    %cst_139 = arith.constant 1.000000e+00 : f32
    %764 = vector.broadcast %cst_139 : f32 to vector<2x128xf32>
    %765 = arith.subf %764, %758 : vector<2x128xf32>
    %766 = arith.mulf %765, %763 : vector<2x128xf32>
    %767 = arith.mulf %758, %739 : vector<2x128xf32>
    %768 = arith.addf %766, %767 : vector<2x128xf32>
    %769 = vector.extract_strided_slice %735 {offsets = [2, 0], sizes = [2, 384], strides = [1, 1]} : vector<16x384xf32> to vector<2x384xf32>
    %cst_140 = arith.constant dense<0.000000e+00> : vector<2x384xf32>
    %770 = tpu.matmul %768, %731, %cst_140 {dimension_numbers = #tpu.dot_dimension_numbers<[1], [0], [0], [1], [0, 0, 1, 1], [], []>} : vector<2x128xf32>, vector<128x384xf32>, vector<2x384xf32> -> vector<2x384xf32>
    %771 = arith.addf %770, %738 : vector<2x384xf32>
    %772 = vector.extract_strided_slice %769 {offsets = [0, 0], sizes = [2, 128], strides = [1, 1]} : vector<2x384xf32> to vector<2x128xf32>
    %773 = vector.extract_strided_slice %771 {offsets = [0, 0], sizes = [2, 128], strides = [1, 1]} : vector<2x384xf32> to vector<2x128xf32>
    %774 = arith.addf %772, %773 : vector<2x128xf32>
    %775 = arith.negf %774 : vector<2x128xf32>
    %776 = math.exp %775 : vector<2x128xf32>
    %cst_141 = arith.constant 1.000000e+00 : f32
    %777 = vector.broadcast %cst_141 : f32 to vector<2x128xf32>
    %778 = arith.addf %777, %776 : vector<2x128xf32>
    %779 = arith.divf %777, %778 : vector<2x128xf32>
    %780 = vector.extract_strided_slice %769 {offsets = [0, 128], sizes = [2, 128], strides = [1, 1]} : vector<2x384xf32> to vector<2x128xf32>
    %781 = vector.extract_strided_slice %771 {offsets = [0, 128], sizes = [2, 128], strides = [1, 1]} : vector<2x384xf32> to vector<2x128xf32>
    %782 = arith.addf %780, %781 : vector<2x128xf32>
    %783 = arith.negf %782 : vector<2x128xf32>
    %784 = math.exp %783 : vector<2x128xf32>
    %cst_142 = arith.constant 1.000000e+00 : f32
    %785 = vector.broadcast %cst_142 : f32 to vector<2x128xf32>
    %786 = arith.addf %785, %784 : vector<2x128xf32>
    %787 = arith.divf %785, %786 : vector<2x128xf32>
    %788 = vector.extract_strided_slice %769 {offsets = [0, 256], sizes = [2, 128], strides = [1, 1]} : vector<2x384xf32> to vector<2x128xf32>
    %789 = vector.extract_strided_slice %771 {offsets = [0, 256], sizes = [2, 128], strides = [1, 1]} : vector<2x384xf32> to vector<2x128xf32>
    %790 = arith.mulf %779, %789 : vector<2x128xf32>
    %791 = arith.addf %788, %790 : vector<2x128xf32>
    %792 = math.tanh %791 : vector<2x128xf32>
    %cst_143 = arith.constant 1.000000e+00 : f32
    %793 = vector.broadcast %cst_143 : f32 to vector<2x128xf32>
    %794 = arith.subf %793, %787 : vector<2x128xf32>
    %795 = arith.mulf %794, %792 : vector<2x128xf32>
    %796 = arith.mulf %787, %768 : vector<2x128xf32>
    %797 = arith.addf %795, %796 : vector<2x128xf32>
    %798 = vector.extract_strided_slice %735 {offsets = [4, 0], sizes = [2, 384], strides = [1, 1]} : vector<16x384xf32> to vector<2x384xf32>
    %cst_144 = arith.constant dense<0.000000e+00> : vector<2x384xf32>
    %799 = tpu.matmul %797, %731, %cst_144 {dimension_numbers = #tpu.dot_dimension_numbers<[1], [0], [0], [1], [0, 0, 1, 1], [], []>} : vector<2x128xf32>, vector<128x384xf32>, vector<2x384xf32> -> vector<2x384xf32>
    %800 = arith.addf %799, %738 : vector<2x384xf32>
    %801 = vector.extract_strided_slice %798 {offsets = [0, 0], sizes = [2, 128], strides = [1, 1]} : vector<2x384xf32> to vector<2x128xf32>
    %802 = vector.extract_strided_slice %800 {offsets = [0, 0], sizes = [2, 128], strides = [1, 1]} : vector<2x384xf32> to vector<2x128xf32>
    %803 = arith.addf %801, %802 : vector<2x128xf32>
    %804 = arith.negf %803 : vector<2x128xf32>
    %805 = math.exp %804 : vector<2x128xf32>
    %cst_145 = arith.constant 1.000000e+00 : f32
    %806 = vector.broadcast %cst_145 : f32 to vector<2x128xf32>
    %807 = arith.addf %806, %805 : vector<2x128xf32>
    %808 = arith.divf %806, %807 : vector<2x128xf32>
    %809 = vector.extract_strided_slice %798 {offsets = [0, 128], sizes = [2, 128], strides = [1, 1]} : vector<2x384xf32> to vector<2x128xf32>
    %810 = vector.extract_strided_slice %800 {offsets = [0, 128], sizes = [2, 128], strides = [1, 1]} : vector<2x384xf32> to vector<2x128xf32>
    %811 = arith.addf %809, %810 : vector<2x128xf32>
    %812 = arith.negf %811 : vector<2x128xf32>
    %813 = math.exp %812 : vector<2x128xf32>
    %cst_146 = arith.constant 1.000000e+00 : f32
    %814 = vector.broadcast %cst_146 : f32 to vector<2x128xf32>
    %815 = arith.addf %814, %813 : vector<2x128xf32>
    %816 = arith.divf %814, %815 : vector<2x128xf32>
    %817 = vector.extract_strided_slice %798 {offsets = [0, 256], sizes = [2, 128], strides = [1, 1]} : vector<2x384xf32> to vector<2x128xf32>
    %818 = vector.extract_strided_slice %800 {offsets = [0, 256], sizes = [2, 128], strides = [1, 1]} : vector<2x384xf32> to vector<2x128xf32>
    %819 = arith.mulf %808, %818 : vector<2x128xf32>
    %820 = arith.addf %817, %819 : vector<2x128xf32>
    %821 = math.tanh %820 : vector<2x128xf32>
    %cst_147 = arith.constant 1.000000e+00 : f32
    %822 = vector.broadcast %cst_147 : f32 to vector<2x128xf32>
    %823 = arith.subf %822, %816 : vector<2x128xf32>
    %824 = arith.mulf %823, %821 : vector<2x128xf32>
    %825 = arith.mulf %816, %797 : vector<2x128xf32>
    %826 = arith.addf %824, %825 : vector<2x128xf32>
    %827 = vector.extract_strided_slice %735 {offsets = [6, 0], sizes = [2, 384], strides = [1, 1]} : vector<16x384xf32> to vector<2x384xf32>
    %cst_148 = arith.constant dense<0.000000e+00> : vector<2x384xf32>
    %828 = tpu.matmul %826, %731, %cst_148 {dimension_numbers = #tpu.dot_dimension_numbers<[1], [0], [0], [1], [0, 0, 1, 1], [], []>} : vector<2x128xf32>, vector<128x384xf32>, vector<2x384xf32> -> vector<2x384xf32>
    %829 = arith.addf %828, %738 : vector<2x384xf32>
    %830 = vector.extract_strided_slice %827 {offsets = [0, 0], sizes = [2, 128], strides = [1, 1]} : vector<2x384xf32> to vector<2x128xf32>
    %831 = vector.extract_strided_slice %829 {offsets = [0, 0], sizes = [2, 128], strides = [1, 1]} : vector<2x384xf32> to vector<2x128xf32>
    %832 = arith.addf %830, %831 : vector<2x128xf32>
    %833 = arith.negf %832 : vector<2x128xf32>
    %834 = math.exp %833 : vector<2x128xf32>
    %cst_149 = arith.constant 1.000000e+00 : f32
    %835 = vector.broadcast %cst_149 : f32 to vector<2x128xf32>
    %836 = arith.addf %835, %834 : vector<2x128xf32>
    %837 = arith.divf %835, %836 : vector<2x128xf32>
    %838 = vector.extract_strided_slice %827 {offsets = [0, 128], sizes = [2, 128], strides = [1, 1]} : vector<2x384xf32> to vector<2x128xf32>
    %839 = vector.extract_strided_slice %829 {offsets = [0, 128], sizes = [2, 128], strides = [1, 1]} : vector<2x384xf32> to vector<2x128xf32>
    %840 = arith.addf %838, %839 : vector<2x128xf32>
    %841 = arith.negf %840 : vector<2x128xf32>
    %842 = math.exp %841 : vector<2x128xf32>
    %cst_150 = arith.constant 1.000000e+00 : f32
    %843 = vector.broadcast %cst_150 : f32 to vector<2x128xf32>
    %844 = arith.addf %843, %842 : vector<2x128xf32>
    %845 = arith.divf %843, %844 : vector<2x128xf32>
    %846 = vector.extract_strided_slice %827 {offsets = [0, 256], sizes = [2, 128], strides = [1, 1]} : vector<2x384xf32> to vector<2x128xf32>
    %847 = vector.extract_strided_slice %829 {offsets = [0, 256], sizes = [2, 128], strides = [1, 1]} : vector<2x384xf32> to vector<2x128xf32>
    %848 = arith.mulf %837, %847 : vector<2x128xf32>
    %849 = arith.addf %846, %848 : vector<2x128xf32>
    %850 = math.tanh %849 : vector<2x128xf32>
    %cst_151 = arith.constant 1.000000e+00 : f32
    %851 = vector.broadcast %cst_151 : f32 to vector<2x128xf32>
    %852 = arith.subf %851, %845 : vector<2x128xf32>
    %853 = arith.mulf %852, %850 : vector<2x128xf32>
    %854 = arith.mulf %845, %826 : vector<2x128xf32>
    %855 = arith.addf %853, %854 : vector<2x128xf32>
    %856 = vector.extract_strided_slice %735 {offsets = [8, 0], sizes = [2, 384], strides = [1, 1]} : vector<16x384xf32> to vector<2x384xf32>
    %cst_152 = arith.constant dense<0.000000e+00> : vector<2x384xf32>
    %857 = tpu.matmul %855, %731, %cst_152 {dimension_numbers = #tpu.dot_dimension_numbers<[1], [0], [0], [1], [0, 0, 1, 1], [], []>} : vector<2x128xf32>, vector<128x384xf32>, vector<2x384xf32> -> vector<2x384xf32>
    %858 = arith.addf %857, %738 : vector<2x384xf32>
    %859 = vector.extract_strided_slice %856 {offsets = [0, 0], sizes = [2, 128], strides = [1, 1]} : vector<2x384xf32> to vector<2x128xf32>
    %860 = vector.extract_strided_slice %858 {offsets = [0, 0], sizes = [2, 128], strides = [1, 1]} : vector<2x384xf32> to vector<2x128xf32>
    %861 = arith.addf %859, %860 : vector<2x128xf32>
    %862 = arith.negf %861 : vector<2x128xf32>
    %863 = math.exp %862 : vector<2x128xf32>
    %cst_153 = arith.constant 1.000000e+00 : f32
    %864 = vector.broadcast %cst_153 : f32 to vector<2x128xf32>
    %865 = arith.addf %864, %863 : vector<2x128xf32>
    %866 = arith.divf %864, %865 : vector<2x128xf32>
    %867 = vector.extract_strided_slice %856 {offsets = [0, 128], sizes = [2, 128], strides = [1, 1]} : vector<2x384xf32> to vector<2x128xf32>
    %868 = vector.extract_strided_slice %858 {offsets = [0, 128], sizes = [2, 128], strides = [1, 1]} : vector<2x384xf32> to vector<2x128xf32>
    %869 = arith.addf %867, %868 : vector<2x128xf32>
    %870 = arith.negf %869 : vector<2x128xf32>
    %871 = math.exp %870 : vector<2x128xf32>
    %cst_154 = arith.constant 1.000000e+00 : f32
    %872 = vector.broadcast %cst_154 : f32 to vector<2x128xf32>
    %873 = arith.addf %872, %871 : vector<2x128xf32>
    %874 = arith.divf %872, %873 : vector<2x128xf32>
    %875 = vector.extract_strided_slice %856 {offsets = [0, 256], sizes = [2, 128], strides = [1, 1]} : vector<2x384xf32> to vector<2x128xf32>
    %876 = vector.extract_strided_slice %858 {offsets = [0, 256], sizes = [2, 128], strides = [1, 1]} : vector<2x384xf32> to vector<2x128xf32>
    %877 = arith.mulf %866, %876 : vector<2x128xf32>
    %878 = arith.addf %875, %877 : vector<2x128xf32>
    %879 = math.tanh %878 : vector<2x128xf32>
    %cst_155 = arith.constant 1.000000e+00 : f32
    %880 = vector.broadcast %cst_155 : f32 to vector<2x128xf32>
    %881 = arith.subf %880, %874 : vector<2x128xf32>
    %882 = arith.mulf %881, %879 : vector<2x128xf32>
    %883 = arith.mulf %874, %855 : vector<2x128xf32>
    %884 = arith.addf %882, %883 : vector<2x128xf32>
    %885 = vector.extract_strided_slice %735 {offsets = [10, 0], sizes = [2, 384], strides = [1, 1]} : vector<16x384xf32> to vector<2x384xf32>
    %cst_156 = arith.constant dense<0.000000e+00> : vector<2x384xf32>
    %886 = tpu.matmul %884, %731, %cst_156 {dimension_numbers = #tpu.dot_dimension_numbers<[1], [0], [0], [1], [0, 0, 1, 1], [], []>} : vector<2x128xf32>, vector<128x384xf32>, vector<2x384xf32> -> vector<2x384xf32>
    %887 = arith.addf %886, %738 : vector<2x384xf32>
    %888 = vector.extract_strided_slice %885 {offsets = [0, 0], sizes = [2, 128], strides = [1, 1]} : vector<2x384xf32> to vector<2x128xf32>
    %889 = vector.extract_strided_slice %887 {offsets = [0, 0], sizes = [2, 128], strides = [1, 1]} : vector<2x384xf32> to vector<2x128xf32>
    %890 = arith.addf %888, %889 : vector<2x128xf32>
    %891 = arith.negf %890 : vector<2x128xf32>
    %892 = math.exp %891 : vector<2x128xf32>
    %cst_157 = arith.constant 1.000000e+00 : f32
    %893 = vector.broadcast %cst_157 : f32 to vector<2x128xf32>
    %894 = arith.addf %893, %892 : vector<2x128xf32>
    %895 = arith.divf %893, %894 : vector<2x128xf32>
    %896 = vector.extract_strided_slice %885 {offsets = [0, 128], sizes = [2, 128], strides = [1, 1]} : vector<2x384xf32> to vector<2x128xf32>
    %897 = vector.extract_strided_slice %887 {offsets = [0, 128], sizes = [2, 128], strides = [1, 1]} : vector<2x384xf32> to vector<2x128xf32>
    %898 = arith.addf %896, %897 : vector<2x128xf32>
    %899 = arith.negf %898 : vector<2x128xf32>
    %900 = math.exp %899 : vector<2x128xf32>
    %cst_158 = arith.constant 1.000000e+00 : f32
    %901 = vector.broadcast %cst_158 : f32 to vector<2x128xf32>
    %902 = arith.addf %901, %900 : vector<2x128xf32>
    %903 = arith.divf %901, %902 : vector<2x128xf32>
    %904 = vector.extract_strided_slice %885 {offsets = [0, 256], sizes = [2, 128], strides = [1, 1]} : vector<2x384xf32> to vector<2x128xf32>
    %905 = vector.extract_strided_slice %887 {offsets = [0, 256], sizes = [2, 128], strides = [1, 1]} : vector<2x384xf32> to vector<2x128xf32>
    %906 = arith.mulf %895, %905 : vector<2x128xf32>
    %907 = arith.addf %904, %906 : vector<2x128xf32>
    %908 = math.tanh %907 : vector<2x128xf32>
    %cst_159 = arith.constant 1.000000e+00 : f32
    %909 = vector.broadcast %cst_159 : f32 to vector<2x128xf32>
    %910 = arith.subf %909, %903 : vector<2x128xf32>
    %911 = arith.mulf %910, %908 : vector<2x128xf32>
    %912 = arith.mulf %903, %884 : vector<2x128xf32>
    %913 = arith.addf %911, %912 : vector<2x128xf32>
    %914 = vector.extract_strided_slice %735 {offsets = [12, 0], sizes = [2, 384], strides = [1, 1]} : vector<16x384xf32> to vector<2x384xf32>
    %cst_160 = arith.constant dense<0.000000e+00> : vector<2x384xf32>
    %915 = tpu.matmul %913, %731, %cst_160 {dimension_numbers = #tpu.dot_dimension_numbers<[1], [0], [0], [1], [0, 0, 1, 1], [], []>} : vector<2x128xf32>, vector<128x384xf32>, vector<2x384xf32> -> vector<2x384xf32>
    %916 = arith.addf %915, %738 : vector<2x384xf32>
    %917 = vector.extract_strided_slice %914 {offsets = [0, 0], sizes = [2, 128], strides = [1, 1]} : vector<2x384xf32> to vector<2x128xf32>
    %918 = vector.extract_strided_slice %916 {offsets = [0, 0], sizes = [2, 128], strides = [1, 1]} : vector<2x384xf32> to vector<2x128xf32>
    %919 = arith.addf %917, %918 : vector<2x128xf32>
    %920 = arith.negf %919 : vector<2x128xf32>
    %921 = math.exp %920 : vector<2x128xf32>
    %cst_161 = arith.constant 1.000000e+00 : f32
    %922 = vector.broadcast %cst_161 : f32 to vector<2x128xf32>
    %923 = arith.addf %922, %921 : vector<2x128xf32>
    %924 = arith.divf %922, %923 : vector<2x128xf32>
    %925 = vector.extract_strided_slice %914 {offsets = [0, 128], sizes = [2, 128], strides = [1, 1]} : vector<2x384xf32> to vector<2x128xf32>
    %926 = vector.extract_strided_slice %916 {offsets = [0, 128], sizes = [2, 128], strides = [1, 1]} : vector<2x384xf32> to vector<2x128xf32>
    %927 = arith.addf %925, %926 : vector<2x128xf32>
    %928 = arith.negf %927 : vector<2x128xf32>
    %929 = math.exp %928 : vector<2x128xf32>
    %cst_162 = arith.constant 1.000000e+00 : f32
    %930 = vector.broadcast %cst_162 : f32 to vector<2x128xf32>
    %931 = arith.addf %930, %929 : vector<2x128xf32>
    %932 = arith.divf %930, %931 : vector<2x128xf32>
    %933 = vector.extract_strided_slice %914 {offsets = [0, 256], sizes = [2, 128], strides = [1, 1]} : vector<2x384xf32> to vector<2x128xf32>
    %934 = vector.extract_strided_slice %916 {offsets = [0, 256], sizes = [2, 128], strides = [1, 1]} : vector<2x384xf32> to vector<2x128xf32>
    %935 = arith.mulf %924, %934 : vector<2x128xf32>
    %936 = arith.addf %933, %935 : vector<2x128xf32>
    %937 = math.tanh %936 : vector<2x128xf32>
    %cst_163 = arith.constant 1.000000e+00 : f32
    %938 = vector.broadcast %cst_163 : f32 to vector<2x128xf32>
    %939 = arith.subf %938, %932 : vector<2x128xf32>
    %940 = arith.mulf %939, %937 : vector<2x128xf32>
    %941 = arith.mulf %932, %913 : vector<2x128xf32>
    %942 = arith.addf %940, %941 : vector<2x128xf32>
    %943 = vector.extract_strided_slice %735 {offsets = [14, 0], sizes = [2, 384], strides = [1, 1]} : vector<16x384xf32> to vector<2x384xf32>
    %cst_164 = arith.constant dense<0.000000e+00> : vector<2x384xf32>
    %944 = tpu.matmul %942, %731, %cst_164 {dimension_numbers = #tpu.dot_dimension_numbers<[1], [0], [0], [1], [0, 0, 1, 1], [], []>} : vector<2x128xf32>, vector<128x384xf32>, vector<2x384xf32> -> vector<2x384xf32>
    %945 = arith.addf %944, %738 : vector<2x384xf32>
    %946 = vector.extract_strided_slice %943 {offsets = [0, 0], sizes = [2, 128], strides = [1, 1]} : vector<2x384xf32> to vector<2x128xf32>
    %947 = vector.extract_strided_slice %945 {offsets = [0, 0], sizes = [2, 128], strides = [1, 1]} : vector<2x384xf32> to vector<2x128xf32>
    %948 = arith.addf %946, %947 : vector<2x128xf32>
    %949 = arith.negf %948 : vector<2x128xf32>
    %950 = math.exp %949 : vector<2x128xf32>
    %cst_165 = arith.constant 1.000000e+00 : f32
    %951 = vector.broadcast %cst_165 : f32 to vector<2x128xf32>
    %952 = arith.addf %951, %950 : vector<2x128xf32>
    %953 = arith.divf %951, %952 : vector<2x128xf32>
    %954 = vector.extract_strided_slice %943 {offsets = [0, 128], sizes = [2, 128], strides = [1, 1]} : vector<2x384xf32> to vector<2x128xf32>
    %955 = vector.extract_strided_slice %945 {offsets = [0, 128], sizes = [2, 128], strides = [1, 1]} : vector<2x384xf32> to vector<2x128xf32>
    %956 = arith.addf %954, %955 : vector<2x128xf32>
    %957 = arith.negf %956 : vector<2x128xf32>
    %958 = math.exp %957 : vector<2x128xf32>
    %cst_166 = arith.constant 1.000000e+00 : f32
    %959 = vector.broadcast %cst_166 : f32 to vector<2x128xf32>
    %960 = arith.addf %959, %958 : vector<2x128xf32>
    %961 = arith.divf %959, %960 : vector<2x128xf32>
    %962 = vector.extract_strided_slice %943 {offsets = [0, 256], sizes = [2, 128], strides = [1, 1]} : vector<2x384xf32> to vector<2x128xf32>
    %963 = vector.extract_strided_slice %945 {offsets = [0, 256], sizes = [2, 128], strides = [1, 1]} : vector<2x384xf32> to vector<2x128xf32>
    %964 = arith.mulf %953, %963 : vector<2x128xf32>
    %965 = arith.addf %962, %964 : vector<2x128xf32>
    %966 = math.tanh %965 : vector<2x128xf32>
    %cst_167 = arith.constant 1.000000e+00 : f32
    %967 = vector.broadcast %cst_167 : f32 to vector<2x128xf32>
    %968 = arith.subf %967, %961 : vector<2x128xf32>
    %969 = arith.mulf %968, %966 : vector<2x128xf32>
    %970 = arith.mulf %961, %942 : vector<2x128xf32>
    %971 = arith.addf %969, %970 : vector<2x128xf32>
    %972 = tpu.concatenate %768, %797, %826, %855, %884, %913, %942, %971 in 0 : vector<2x128xf32>, vector<2x128xf32>, vector<2x128xf32>, vector<2x128xf32>, vector<2x128xf32>, vector<2x128xf32>, vector<2x128xf32>, vector<2x128xf32> -> vector<16x128xf32>
    %cst_168 = arith.constant 0.000000e+00 : f32
    %973 = vector.broadcast %cst_168 : f32 to vector<16x128xf32>
    %974 = arith.maximumf %972, %973 : vector<16x128xf32>
    %c0_169 = arith.constant 0 : index
    %c0_170 = arith.constant 0 : index
    %975 = vector.load %arg17[%c0_169, %c0_170] : memref<128x128xf32, #tpu.memory_space<vmem>>, vector<128x128xf32>
    %cst_171 = arith.constant dense<0.000000e+00> : vector<16x128xf32>
    %976 = tpu.matmul %974, %975, %cst_171 {dimension_numbers = #tpu.dot_dimension_numbers<[1], [0], [0], [1], [0, 0, 1, 1], [], []>} : vector<16x128xf32>, vector<128x128xf32>, vector<16x128xf32> -> vector<16x128xf32>
    %c0_172 = arith.constant 0 : index
    %c0_173 = arith.constant 0 : index
    %977 = vector.load %arg18[%c0_172, %c0_173] : memref<1x128xf32, #tpu.memory_space<vmem>>, vector<1x128xf32>
    %978 = vector.broadcast %977 : vector<1x128xf32> to vector<16x128xf32>
    %979 = arith.addf %976, %978 : vector<16x128xf32>
    %c0_174 = arith.constant 0 : index
    %c0_175 = arith.constant 0 : index
    %980 = vector.load %arg19[%c0_174, %c0_175] : memref<16x128xf32, #tpu.memory_space<vmem>>, vector<16x128xf32>
    tpu.vector_store %arg19[%c0_174, %c0_175], %979 {strides = array<i32>} : memref<16x128xf32, #tpu.memory_space<vmem>>, vector<16x128xf32>,
    return
  }
}

</mosaic_0001>

<bundles_post_ra>
// kernel: _fused_call.1
= control target key start
LH: loop header
LB: loop body
LE: loop exit
PB: predicated region body
PF: predicated region fallthrough
CT: control target
= control target key end

     0   :  { %s13742_s0 = inlined_call_operand.hbm [shape: f32[16,16], index: 0, kind: input, shape index: {}]   ;;  %s13743_s1 = inlined_call_operand.hbm [shape: f32[16,384], index: 1, kind: input, shape index: {}]   ;;  %s13744_s2 = inlined_call_operand.hbm [shape: f32[128,384], index: 2, kind: input, shape index: {}]   ;;  %s13745_s3 = inlined_call_operand.vmem [shape: f32[1,384], index: 3, kind: input, shape index: {}]   ;;  %s13746_s4 = inlined_call_operand.vmem [shape: f32[1,384], index: 4, kind: input, shape index: {}]   ;;  %s13747_s5 = inlined_call_operand.hbm [shape: f32[128,384], index: 5, kind: input, shape index: {}]   ;;  %s13748_s6 = inlined_call_operand.hbm [shape: f32[128,384], index: 6, kind: input, shape index: {}]   ;;  %s13749_s7 = inlined_call_operand.vmem [shape: f32[1,384], index: 7, kind: input, shape index: {}]   ;;  %s13750_s8 = inlined_call_operand.vmem [shape: f32[1,384], index: 8, kind: input, shape index: {}]   ;;  %s13751_s9 = inlined_call_operand.hbm [shape: f32[128,384], index: 9, kind: input, shape index: {}]   ;;  %s13752_s10 = inlined_call_operand.hbm [shape: f32[128,384], index: 10, kind: input, shape index: {}]   ;;  %s13753_s11 = inlined_call_operand.vmem [shape: f32[1,384], index: 11, kind: input, shape index: {}]   ;;  %s13754_s12 = inlined_call_operand.vmem [shape: f32[1,384], index: 12, kind: input, shape index: {}]   ;;  %s13755_s13 = inlined_call_operand.hbm [shape: f32[128,384], index: 13, kind: input, shape index: {}]   ;;  %s13756_s14 = inlined_call_operand.hbm [shape: f32[128,384], index: 14, kind: input, shape index: {}]   ;;  %s13757_s15 = inlined_call_operand.vmem [shape: f32[1,384], index: 15, kind: input, shape index: {}]   ;;  %s13758_s16 = inlined_call_operand.vmem [shape: f32[1,384], index: 16, kind: input, shape index: {}]   ;;  %s13759_s17 = inlined_call_operand.hbm [shape: f32[128,128], index: 17, kind: input, shape index: {}]   ;;  %s13760_s18 = inlined_call_operand.vmem [shape: f32[1,128], index: 18, kind: input, shape index: {}]   ;;  %s13761_s19 = inlined_call_operand.hbm [shape: f32[16,128], index: 19, kind: output, shape index: {}]  }
   0x1   :  { %13766 = sst [smem:[#allocation27_spill]] %s13742_s0 }
   0x2   :  { %13767 = sst [smem:[#allocation28_spill]] %s13743_s1 }
   0x3   :  { %13768 = sst [smem:[#allocation29_spill]] %s13744_s2 }
   0x4   :  { %13769 = sst [smem:[#allocation30_spill]] %s13745_s3 }
   0x5   :  { %13770 = sst [smem:[#allocation31_spill]] %s13760_s18 }
   0x6   :  { %13771 = sst [smem:[#allocation32_spill]] %s13761_s19 }
   0x7   :  { %24 = vsyncpa [#allocation3], 0 }
   0x8   :  { %25 = vsyncpa [#allocation6], 0 }
   0x9   :  { %26 = vsyncpa [#allocation9], 0 }
   0xa   :  { %27 = vsyncpa [#allocation12], 0 }
   0xb   :  { %28 = vsyncpa [#allocation15], 0 }
   0xc   :  { %29 = vsyncpa [#allocation18], 0 }
   0xd   :  { %30 = vsyncpa [#allocation4], 0  ;;  %s11535_s0 = smov [#allocation5]   ;;  %s13772_s1 = sld [smem:[#allocation28_spill]] }
   0xe   :  { %s48_s30 = sshll.u32 %s11535_s0, 4  ;;  %s49_s30 = int_to_ptr.vmem [resolvable:$true] %s48_s30 }
  0x13   :  { %s11279_s22 = scalar_lea.hbm %s13772_s1, 768 }
  0x14   :  { %p11280_p0 = scmp.ne.s32.totalorder %s13772_s1, %s11279_s22  ;;  %p11283_p1 = scmp.lt.u32.totalorder %s11279_s22, %s13772_s1 }
  0x16   :  { %p11285_p2 = pnand %p11283_p1, %p11280_p0 }
  0x18   :  { %11288 = shalt.err (!%p11285_p2)
}
  0x19   :  { %s11289_s3 = scalar_lea.vmem %s49_s30, 768  ;;  %p11294_p4 = scmp.lt.s32.totalorder %s49_s30, %s49_s30 }
  0x1a   :  { %p11290_p3 = scmp.ne.s32.totalorder %s49_s30, %s11289_s3  ;;  %p11295_p5 = scmp.lt.s32.totalorder %s11289_s3, %s11289_s3 }
  0x1c   :  { %p11296_p6 = por %p11295_p5, %p11294_p4 }
  0x1e   :  { %p11297_p7 = pnand %p11296_p6, %p11290_p3 }
  0x20   :  { %11300 = shalt.err (!%p11297_p7)
}
  0x21   :  { %s11536_s26 = smov 384   ;;  %s11537_s27 = smov 24  }
  0x22   :  { %54 = dma.hbm_to_vmem [thread:$0]  %s13772_s1, 768, %s49_s30, [#allocation6], %s11536_s26, %s11536_s26, %s11537_s27  }
  0x23   :  { %s11538_s0 = smov [#allocation8]   ;;  %s11539_s21 = smov [#allocation11]  }
  0x24   :  { %s76_s20 = sshll.u32 %s11538_s0, 4  ;;  %s104_s22 = sshll.u32 %s11539_s21, 4  ;;  %s77_s20 = int_to_ptr.vmem [resolvable:$true] %s76_s20  ;;  %s105_s22 = int_to_ptr.vmem [resolvable:$true] %s104_s22 }
  0x25   :  { %s11301_s24 = scalar_lea.hbm %s13747_s5, 6144 }
  0x26   :  { %p11302_p8 = scmp.ne.s32.totalorder %s13747_s5, %s11301_s24  ;;  %p11305_p9 = scmp.lt.u32.totalorder %s11301_s24, %s13747_s5 }
  0x28   :  { %p11307_p10 = pnand %p11305_p9, %p11302_p8 }
  0x2a   :  { %11310 = shalt.err (!%p11307_p10)
}
  0x2b   :  { %s11311_s30 = scalar_lea.vmem %s77_s20, 6144  ;;  %p11316_p12 = scmp.lt.s32.totalorder %s77_s20, %s77_s20 }
  0x2c   :  { %p11312_p11 = scmp.ne.s32.totalorder %s77_s20, %s11311_s30  ;;  %p11317_p13 = scmp.lt.s32.totalorder %s11311_s30, %s11311_s30 }
  0x2e   :  { %p11318_p0 = por %p11317_p13, %p11316_p12 }
  0x30   :  { %p11319_p1 = pnand %p11318_p0, %p11312_p11 }
  0x32   :  { %11322 = shalt.err (!%p11319_p1)
}
  0x33   :  { %82 = dma.hbm_to_vmem [thread:$0]  %s13747_s5, 6144, %s77_s20, [#allocation9], %s11536_s26, %s11536_s26, %s11537_s27  }
  0x34   :  { %s11323_s19 = scalar_lea.hbm %s13751_s9, 6144 }
  0x35   :  { %p11324_p2 = scmp.ne.s32.totalorder %s13751_s9, %s11323_s19  ;;  %p11327_p3 = scmp.lt.u32.totalorder %s11323_s19, %s13751_s9 }
  0x37   :  { %p11329_p4 = pnand %p11327_p3, %p11324_p2 }
  0x39   :  { %11332 = shalt.err (!%p11329_p4)
}
  0x3a   :  { %s11333_s24 = scalar_lea.vmem %s105_s22, 6144  ;;  %p11338_p6 = scmp.lt.s32.totalorder %s105_s22, %s105_s22 }
  0x3b   :  { %p11334_p5 = scmp.ne.s32.totalorder %s105_s22, %s11333_s24  ;;  %p11339_p7 = scmp.lt.s32.totalorder %s11333_s24, %s11333_s24 }
  0x3d   :  { %p11340_p8 = por %p11339_p7, %p11338_p6 }
  0x3f   :  { %p11341_p9 = pnand %p11340_p8, %p11334_p5 }
  0x41   :  { %11344 = shalt.err (!%p11341_p9)
}
  0x42   :  { %110 = dma.hbm_to_vmem [thread:$0]  %s13751_s9, 6144, %s105_s22, [#allocation12], %s11536_s26, %s11536_s26, %s11537_s27  }
  0x43   :  { %s11540_s25 = smov [#allocation14]   ;;  %s11541_s30 = smov [#allocation2]  }
  0x44   :  { %s132_s3 = sshll.u32 %s11540_s25, 4  ;;  %s36_s1 = sshll.u32 %s11541_s30, 4  ;;  %s133_s3 = int_to_ptr.vmem [resolvable:$true] %s132_s3  ;;  %s37_s1 = int_to_ptr.vmem [resolvable:$true] %s36_s1 }
  0x45   :  { %s11345_s18 = scalar_lea.hbm %s13755_s13, 6144 }
  0x46   :  { %p11346_p10 = scmp.ne.s32.totalorder %s13755_s13, %s11345_s18  ;;  %p11349_p11 = scmp.lt.u32.totalorder %s11345_s18, %s13755_s13 }
  0x48   :  { %p11351_p12 = pnand %p11349_p11, %p11346_p10 }
  0x4a   :  { %11354 = shalt.err (!%p11351_p12)
}
  0x4b   :  { %s11355_s9 = scalar_lea.vmem %s133_s3, 6144  ;;  %p11360_p0 = scmp.lt.s32.totalorder %s133_s3, %s133_s3 }
  0x4c   :  { %p11356_p13 = scmp.ne.s32.totalorder %s133_s3, %s11355_s9  ;;  %p11361_p1 = scmp.lt.s32.totalorder %s11355_s9, %s11355_s9 }
  0x4e   :  { %p11362_p2 = por %p11361_p1, %p11360_p0 }
  0x50   :  { %p11363_p3 = pnand %p11362_p2, %p11356_p13 }
  0x52   :  { %11366 = shalt.err (!%p11363_p3)
}
  0x53   :  { %138 = dma.hbm_to_vmem [thread:$0]  %s13755_s13, 6144, %s133_s3, [#allocation15], %s11536_s26, %s11536_s26, %s11537_s27  }
  0x54   :  { %s13773_s20 = sld [smem:[#allocation27_spill]] }
  0x5a   :  { %s11367_s25 = scalar_lea.hbm %s13773_s20, 256 }
  0x5b   :  { %p11368_p4 = scmp.ne.s32.totalorder %s13773_s20, %s11367_s25  ;;  %p11371_p5 = scmp.lt.u32.totalorder %s11367_s25, %s13773_s20 }
  0x5d   :  { %p11373_p6 = pnand %p11371_p5, %p11368_p4 }
  0x5f   :  { %11376 = shalt.err (!%p11373_p6)
}
  0x60   :  { %s11377_s19 = scalar_lea.vmem %s37_s1, 256  ;;  %p11382_p8 = scmp.lt.s32.totalorder %s37_s1, %s37_s1 }
  0x61   :  { %p11378_p7 = scmp.ne.s32.totalorder %s37_s1, %s11377_s19  ;;  %p11383_p9 = scmp.lt.s32.totalorder %s11377_s19, %s11377_s19 }
  0x63   :  { %p11384_p10 = por %p11383_p9, %p11382_p8 }
  0x65   :  { %p11385_p11 = pnand %p11384_p10, %p11378_p7 }
  0x67   :  { %11388 = shalt.err (!%p11385_p11)
}
  0x68   :  { %s11542_s13 = smov 128   ;;  %s11543_s3 = smov 8  }
  0x69   :  { %42 = dma.hbm_to_vmem [thread:$0]  %s13773_s20, 256, %s37_s1, [#allocation3], %s11542_s13, %s11542_s13, %s11543_s3  }
  0x6a   :  { %s11544_s2 = smov [#allocation7]   ;;  %s11545_s22 = smov [#allocation10]  }
  0x6b   :  { %s60_s9 = sshll.u32 %s11544_s2, 4  ;;  %s88_s23 = sshll.u32 %s11545_s22, 4  ;;  %s61_s9 = int_to_ptr.vmem [resolvable:$true] %s60_s9  ;;  %s89_s23 = int_to_ptr.vmem [resolvable:$true] %s88_s23 }
  0x6c   :  { %s13774_s25 = sld [smem:[#allocation29_spill]] }
  0x72   :  { %s11389_s30 = scalar_lea.hbm %s13774_s25, 6144 }
  0x73   :  { %p11390_p12 = scmp.ne.s32.totalorder %s13774_s25, %s11389_s30  ;;  %p11393_p13 = scmp.lt.u32.totalorder %s11389_s30, %s13774_s25 }
  0x75   :  { %p11395_p0 = pnand %p11393_p13, %p11390_p12 }
  0x77   :  { %11398 = shalt.err (!%p11395_p0)
}
  0x78   :  { %s11399_s1 = scalar_lea.vmem %s61_s9, 6144  ;;  %p11404_p2 = scmp.lt.s32.totalorder %s61_s9, %s61_s9 }
  0x79   :  { %p11400_p1 = scmp.ne.s32.totalorder %s61_s9, %s11399_s1  ;;  %p11405_p3 = scmp.lt.s32.totalorder %s11399_s1, %s11399_s1 }
  0x7b   :  { %p11406_p4 = por %p11405_p3, %p11404_p2 }
  0x7d   :  { %p11407_p5 = pnand %p11406_p4, %p11400_p1 }
  0x7f   :  { %11410 = shalt.err (!%p11407_p5)
}
  0x80   :  { %66 = dma.hbm_to_vmem [thread:$0]  %s13774_s25, 6144, %s61_s9, [#allocation6], %s11536_s26, %s11536_s26, %s11537_s27  }
  0x81   :  { %s11411_s22 = scalar_lea.hbm %s13748_s6, 6144 }
  0x82   :  { %p11412_p6 = scmp.ne.s32.totalorder %s13748_s6, %s11411_s22  ;;  %p11415_p7 = scmp.lt.u32.totalorder %s11411_s22, %s13748_s6 }
  0x84   :  { %p11417_p8 = pnand %p11415_p7, %p11412_p6 }
  0x86   :  { %11420 = shalt.err (!%p11417_p8)
}
  0x87   :  { %s11421_s29 = scalar_lea.vmem %s89_s23, 6144  ;;  %p11426_p10 = scmp.lt.s32.totalorder %s89_s23, %s89_s23 }
  0x88   :  { %p11422_p9 = scmp.ne.s32.totalorder %s89_s23, %s11421_s29  ;;  %p11427_p11 = scmp.lt.s32.totalorder %s11421_s29, %s11421_s29 }
  0x8a   :  { %p11428_p12 = por %p11427_p11, %p11426_p10 }
  0x8c   :  { %p11429_p13 = pnand %p11428_p12, %p11422_p9 }
  0x8e   :  { %11432 = shalt.err (!%p11429_p13)
}
  0x8f   :  { %94 = dma.hbm_to_vmem [thread:$0]  %s13748_s6, 6144, %s89_s23, [#allocation9], %s11536_s26, %s11536_s26, %s11537_s27  }
  0x90   :  { %s11546_s18 = smov [#allocation13]   ;;  %s11547_s1 = smov [#allocation16]  }
  0x91   :  { %s116_s19 = sshll.u32 %s11546_s18, 4  ;;  %s144_s20 = sshll.u32 %s11547_s1, 4  ;;  %s117_s19 = int_to_ptr.vmem [resolvable:$true] %s116_s19  ;;  %s145_s20 = int_to_ptr.vmem [resolvable:$true] %s144_s20 }
  0x92   :  { %s11433_s2 = scalar_lea.hbm %s13752_s10, 6144 }
  0x93   :  { %p11434_p0 = scmp.ne.s32.totalorder %s13752_s10, %s11433_s2  ;;  %p11437_p1 = scmp.lt.u32.totalorder %s11433_s2, %s13752_s10 }
  0x95   :  { %p11439_p2 = pnand %p11437_p1, %p11434_p0 }
  0x97   :  { %11442 = shalt.err (!%p11439_p2)
}
  0x98   :  { %s11443_s6 = scalar_lea.vmem %s117_s19, 6144  ;;  %p11448_p4 = scmp.lt.s32.totalorder %s117_s19, %s117_s19 }
  0x99   :  { %p11444_p3 = scmp.ne.s32.totalorder %s117_s19, %s11443_s6  ;;  %p11449_p5 = scmp.lt.s32.totalorder %s11443_s6, %s11443_s6 }
  0x9b   :  { %p11450_p6 = por %p11449_p5, %p11448_p4 }
  0x9d   :  { %p11451_p7 = pnand %p11450_p6, %p11444_p3 }
  0x9f   :  { %11454 = shalt.err (!%p11451_p7)
}
  0xa0   :  { %122 = dma.hbm_to_vmem [thread:$0]  %s13752_s10, 6144, %s117_s19, [#allocation12], %s11536_s26, %s11536_s26, %s11537_s27  }
  0xa1   :  { %s11455_s25 = scalar_lea.hbm %s13756_s14, 6144 }
  0xa2   :  { %p11456_p8 = scmp.ne.s32.totalorder %s13756_s14, %s11455_s25  ;;  %p11459_p9 = scmp.lt.u32.totalorder %s11455_s25, %s13756_s14 }
  0xa4   :  { %p11461_p10 = pnand %p11459_p9, %p11456_p8 }
  0xa6   :  { %11464 = shalt.err (!%p11461_p10)
}
  0xa7   :  { %s11465_s2 = scalar_lea.vmem %s145_s20, 6144  ;;  %p11470_p12 = scmp.lt.s32.totalorder %s145_s20, %s145_s20 }
  0xa8   :  { %p11466_p11 = scmp.ne.s32.totalorder %s145_s20, %s11465_s2  ;;  %p11471_p13 = scmp.lt.s32.totalorder %s11465_s2, %s11465_s2 }
  0xaa   :  { %p11472_p0 = por %p11471_p13, %p11470_p12 }
  0xac   :  { %p11473_p1 = pnand %p11472_p0, %p11466_p11 }
  0xae   :  { %11476 = shalt.err (!%p11473_p1)
}
  0xaf   :  { %150 = dma.hbm_to_vmem [thread:$0]  %s13756_s14, 6144, %s145_s20, [#allocation15], %s11536_s26, %s11536_s26, %s11537_s27  }
  0xb0   :  { %s11548_s22 = smov [#allocation17]   ;;  %s11477_s6 = scalar_lea.hbm %s13759_s17, 2048 }
  0xb1   :  { %s160_s24 = sshll.u32 %s11548_s22, 4  ;;  %p11478_p2 = scmp.ne.s32.totalorder %s13759_s17, %s11477_s6  ;;  %s161_s24 = int_to_ptr.vmem [resolvable:$true] %s160_s24 }
  0xb2   :  { %p11481_p3 = scmp.lt.u32.totalorder %s11477_s6, %s13759_s17 }
  0xb4   :  { %p11483_p4 = pnand %p11481_p3, %p11478_p2 }
  0xb6   :  { %11486 = shalt.err (!%p11483_p4)
}
  0xb7   :  { %s11487_s25 = scalar_lea.vmem %s161_s24, 2048  ;;  %p11492_p6 = scmp.lt.s32.totalorder %s161_s24, %s161_s24 }
  0xb8   :  { %p11488_p5 = scmp.ne.s32.totalorder %s161_s24, %s11487_s25  ;;  %p11493_p7 = scmp.lt.s32.totalorder %s11487_s25, %s11487_s25 }
  0xba   :  { %p11494_p8 = por %p11493_p7, %p11492_p6 }
  0xbc   :  { %p11495_p9 = pnand %p11494_p8, %p11488_p5 }
  0xbe   :  { %11498 = shalt.err (!%p11495_p9)
}
  0xbf   :  { %166 = dma.hbm_to_vmem [thread:$0]  %s13759_s17, 2048, %s161_s24, [#allocation18], %s11542_s13, %s11542_s13, %s11543_s3  }
  0xc0   :  { %11521 = dma.done.wait [#allocation3], 256  }
  0xc1   :  { %11522 = vsyncadd [#allocation3], 4294967040 }
  0xc2   :  { %11523 = dma.done.wait [#allocation6], 6912  }
  0xc3   :  { %11524 = vsyncadd [#allocation6], 4294960384 }
  0xc4   :  { %11525 = dma.done.wait [#allocation9], 12288  }
  0xc5   :  { %11526 = vsyncadd [#allocation9], 4294955008 }
  0xc6   :  { %11527 = dma.done.wait [#allocation12], 12288  }
  0xc7   :  { %11528 = vsyncadd [#allocation12], 4294955008 }
  0xc8   :  { %11529 = dma.done.wait [#allocation15], 12288  }
  0xc9   :  { %11530 = vsyncadd [#allocation15], 4294955008 }
  0xca   :  { %11531 = dma.done.wait [#allocation18], 2048  }
  0xcb   :  { %11532 = vsyncadd [#allocation18], 4294965248  ;;  %v11549_v0 = vmov 0.0   ;;  %v208_v1 = vld [vmem:[#allocation7 + $0x8] sm:$0xff]  ;;  %v211_v2 = vld [vmem:[#allocation7 + $0x20] sm:$0xff]  ;;  %vm272_vm0 = vcmask 130048  }
  0xcc   :  { %343 = vmatprep.mubr.f32.mxu1 %v11549_v0  ;;  %512 = vmatprep.mubr.f32.mxu0 %v11549_v0  ;;  %v207_v3 = vld [vmem:[#allocation7] sm:$0xff]  ;;  %v11805_v4 = vpack.c.bf16 %v211_v2, %v208_v1  ;;  %v210_v5 = vld [vmem:[#allocation7 + $0x18] sm:$0xff]  ;;  %v217_v7 = vld [vmem:[#allocation7 + $0x50] sm:$0xff]  ;;  %v11550_v43 = vmov 0.0|0.0   ;;  %vm11551_vm1 = vmmov 0   ;;  %s13775_s20 = sld [smem:[#allocation30_spill]] }
  0xcd   :  { %v214_v6 = vld [vmem:[#allocation7 + $0x38] sm:$0xff]  ;;  %v11807_v8 = vpack.c.bf16 %v210_v5, %v207_v3  ;;  %v213_v10 = vld [vmem:[#allocation7 + $0x30] sm:$0xff]  ;;  %v216_v11 = vld [vmem:[#allocation7 + $0x48] sm:$0xff]  ;;  %vm1827_vm2 = vcmask 1041408   ;;  %vm1829_vm3 = vcmask 1043456   ;;  %vm1831_vm4 = vcmask 1045504  }
  0xce   :  { %v11809_v9 = vpack.c.bf16 %v217_v7, %v214_v6  ;;  %v220_v12 = vld [vmem:[#allocation7 + $0x68] sm:$0xff]  ;;  %8926 = vmatprep.subr.bf16.mxu0 %v11805_v4  ;;  %v223_v13 = vld [vmem:[#allocation7 + $0x80] sm:$0xff]  ;;  %v11813_v14 = vpack.c.bf16 %v216_v11, %v213_v10  ;;  %v222_v17 = vld [vmem:[#allocation7 + $0x78] sm:$0xff]  ;;  %s13776_s5 = sld [smem:[#allocation31_spill]]  ;;  %s11552_s30 = smov [#allocation19]  }
  0xcf   :  { %8928 = vmatpush1.bf16.msra.mxu0 %v11807_v8  ;;  %v219_v15 = vld [vmem:[#allocation7 + $0x60] sm:$0xff]  ;;  %v11816_v16 = vpack.c.bf16 %v223_v13, %v220_v12  ;;  %v202_v18 = vld [vmem:[#allocation5 + $0x8] sm:$0xff]  ;;  %v205_v19 = vld [vmem:[#allocation5 + $0x20] sm:$0xff]  ;;  %s6944_s6 = sshll.u32 %s11552_s30, 4  ;;  %s6945_s6 = int_to_ptr.vmem [resolvable:$true] %s6944_s6 }
  0xd0   :  { %8930 = vmatprep.subr.bf16.mxu0 %v11809_v9  ;;  %v226_v20 = vld [vmem:[#allocation7 + $0x98] sm:$0xff]  ;;  %v229_v21 = vld [vmem:[#allocation7 + $0xb0] sm:$0xff]  ;;  %v8917_v22 = vpack.c.bf16 %v205_v19, %v202_v18  ;;  %v204_v24 = vld [vmem:[#allocation5 + $0x18] sm:$0xff]  ;;  %v11819_v25 = vpack.c.bf16 %v222_v17, %v219_v15  ;;  %s11499_s23 = scalar_lea.vmem %s6945_s6, 256  ;;  %p11504_p11 = scmp.lt.s32.totalorder %s6945_s6, %s6945_s6 }
  0xd1   :  { %v201_v23 = vld [vmem:[#allocation5] sm:$0xff]  ;;  %v203_v27 = vld [vmem:[#allocation5 + $0x10] sm:$0xff]  ;;  %v206_v28 = vld [vmem:[#allocation5 + $0x28] sm:$0xff]  ;;  %v11822_v29 = vpack.c.bf16 %v229_v21, %v226_v20  ;;  %p11500_p10 = scmp.ne.s32.totalorder %s6945_s6, %s11499_s23  ;;  %p11505_p12 = scmp.lt.s32.totalorder %s11499_s23, %s11499_s23 }
  0xd2   :  { %8918 = vmatprep.subr.bf16.mxu1 %v8917_v22  ;;  %v8919_v26 = vpack.c.bf16 %v204_v24, %v201_v23  ;;  %v225_v30 = vld [vmem:[#allocation7 + $0x90] sm:$0xff]  ;;  %v228_v31 = vld [vmem:[#allocation7 + $0xa8] sm:$0xff]  ;;  %v8921_v32 = vpack.c.bf16 %v206_v28, %v203_v27  ;;  %v235_v34 = vld [vmem:[#allocation7 + $0xe0] sm:$0xff]  ;;  %v257_v28 = vlaneseq }
  0xd3   :  { %8932 = vmatpush1.bf16.msra.mxu0 %v11813_v14  ;;  %v232_v33 = vld [vmem:[#allocation7 + $0xc8] sm:$0xff]  ;;  %v199_v35 = vld [vmem:[#allocation2] sm:$0xff]  ;;  %v11825_v36 = vpack.c.bf16 %v228_v31, %v225_v30  ;;  %v234_v39 = vld [vmem:[#allocation7 + $0xd8] sm:$0xff]  ;;  %p11506_p13 = por %p11505_p12, %p11504_p11 }
  0xd4   :  { %8934 = vmatprep.subr.bf16.mxu0 %v11816_v16  ;;  %8920 = vmatpush1.bf16.msra.mxu1 %v8919_v26  ;;  %v11828_v37 = vpack.c.bf16 %v235_v34, %v232_v33  ;;  %v231_v38 = vld [vmem:[#allocation7 + $0xc0] sm:$0xff]  ;;  %v238_v40 = vld [vmem:[#allocation7 + $0xf8] sm:$0xff]  ;;  %v241_v41 = vld [vmem:[#allocation7 + $0x110] sm:$0xff]  ;;  %v258_v30 = vshrl.u32 %v257_v28, 7 }
  0xd5   :  { %8922 = vmatprep.subr.bf16.mxu1 %v8921_v32  ;;  %v200_v42 = vld [vmem:[#allocation2 + $0x8] sm:$0xff]  ;;  %v209_v44 = vld [vmem:[#allocation7 + $0x10] sm:$0xff]  ;;  %v11834_v46 = vpack.c.bf16 %v234_v39, %v231_v38  ;;  %v11837_v47 = vpack.c.bf16 %v241_v41, %v238_v40  ;;  %v247_v51 = vld [vmem:[#allocation7 + $0x140] sm:$0xff]  ;;  %p11507_p0 = pnand %p11506_p13, %p11500_p10 }
  0xd6   :  { %v212_v45 = vld [vmem:[#allocation7 + $0x28] sm:$0xff]  ;;  %v237_v48 = vld [vmem:[#allocation7 + $0xf0] sm:$0xff]  ;;  %v215_v53 = vld [vmem:[#allocation7 + $0x40] sm:$0xff]  ;;  %v11931_v31 = vsub.s32 0, %v258_v30  ;;  %v11936_v34 = vsub.s32 1, %v258_v30  ;;  %v11938_v38 = vsub.s32 2, %v258_v30 }
  0xd7   :  { %8936 = vmatpush1.bf16.msra.mxu0 %v11819_v25  ;;  %6961 = vmatmul.mubr.msk.f32.vlgmr.msra.gmra.mrb[0].mxu1 %vm272_vm0, %v199_v35  ;;  %v240_v49 = vld [vmem:[#allocation7 + $0x108] sm:$0xff]  ;;  %v11841_v52 = vpack.c.bf16 %v212_v45, %v209_v44  ;;  %v218_v54 = vld [vmem:[#allocation7 + $0x58] sm:$0xff]  ;;  %v243_v57 = vld [vmem:[#allocation7 + $0x120] sm:$0xff] }
  0xd8   :  { %8938 = vmatprep.subr.bf16.mxu0 %v11822_v29  ;;  %8924 = vmatpush3.bf16.msra.mxu1 %v8921_v32  ;;  %v244_v50 = vld [vmem:[#allocation7 + $0x128] sm:$0xff]  ;;  %v11844_v55 = vpack.c.bf16 %v240_v49, %v237_v48  ;;  %v246_v58 = vld [vmem:[#allocation7 + $0x138] sm:$0xff]  ;;  %v253_v60 = vld [vmem:[#allocation7 + $0x170] sm:$0xff]  ;;  %v11851_v61 = vpack.c.bf16 %v218_v54, %v215_v53 }
  0xd9   :  { %349 = vmatprep.mubr.f32.mxu1 %v11549_v0  ;;  %8957 = vmatprep.subr.bf16.mxu1 %v11550_v43  ;;  %v11847_v56 = vpack.c.bf16 %v247_v51, %v244_v50  ;;  %v250_v59 = vld [vmem:[#allocation7 + $0x158] sm:$0xff]  ;;  %v221_v62 = vld [vmem:[#allocation7 + $0x70] sm:$0xff]  ;;  %v224_v63 = vld [vmem:[#allocation7 + $0x88] sm:$0xff]  ;;  %v11857_v1 = vpack.c.bf16 %v246_v58, %v243_v57 }
  0xda   :  { %v11860_v2 = vpack.c.bf16 %v253_v60, %v250_v59  ;;  %v249_v3 = vld [vmem:[#allocation7 + $0x150] sm:$0xff]  ;;  %v252_v5 = vld [vmem:[#allocation7 + $0x168] sm:$0xff]  ;;  %v11863_v6 = vpack.c.bf16 %v224_v63, %v221_v62  ;;  %v227_v7 = vld [vmem:[#allocation7 + $0xa0] sm:$0xff] }
  0xdb   :  { %8940 = vmatpush1.bf16.msra.mxu0 %v11825_v36  ;;  %6962 = vmatmul.mubr.msk.f32.gmra.mrb[2].mxu1 %vm272_vm0, %v200_v42  ;;  %v230_v10 = vld [vmem:[#allocation7 + $0xb8] sm:$0xff]  ;;  %v11867_v11 = vpack.c.bf16 %v252_v5, %v249_v3  ;;  %v233_v13 = vld [vmem:[#allocation7 + $0xd0] sm:$0xff]  ;;  %v236_v15 = vld [vmem:[#allocation7 + $0xe8] sm:$0xff] }
  0xdc   :  { %8942 = vmatprep.subr.bf16.mxu0 %v11828_v37  ;;  %7654 = vmatprep.mubr.msk.f32.mxu1 %vm272_vm0, %v199_v35  ;;  %v11871_v12 = vpack.c.bf16 %v230_v10, %v227_v7  ;;  %v11877_v17 = vpack.c.bf16 %v236_v15, %v233_v13  ;;  %v239_v18 = vld [vmem:[#allocation7 + $0x100] sm:$0xff]  ;;  %v242_v19 = vld [vmem:[#allocation7 + $0x118] sm:$0xff]  ;;  %v245_v21 = vld [vmem:[#allocation7 + $0x130] sm:$0xff] }
  0xdd   :  { %v11885_v20 = vpack.c.bf16 %v242_v19, %v239_v18  ;;  %v248_v22 = vld [vmem:[#allocation7 + $0x148] sm:$0xff]  ;;  %v251_v24 = vld [vmem:[#allocation7 + $0x160] sm:$0xff]  ;;  %v254_v26 = vld [vmem:[#allocation7 + $0x178] sm:$0xff] }
  0xde   :  { %v11891_v23 = vpack.c.bf16 %v248_v22, %v245_v21  ;;  %v11897_v27 = vpack.c.bf16 %v254_v26, %v251_v24  ;;  %v255_v32 = vld [vmem:[%s13775_s20] sm:$0x7] }
  0xdf   :  { %8944 = vmatpush1.bf16.msra.mxu0 %v11834_v46  ;;  %7655 = vmatmul.mubr.msk.f32.vlgmr.msra.gmra.mrb[4].mxu1 %vm272_vm0, %v200_v42  ;;  %v260_v39 = vrot.slane %v255_v32, %v11931_v31  ;;  %v264_v40 = vrot.slane %v255_v32, %v11936_v34  ;;  %v268_v45 = vrot.slane %v255_v32, %v11938_v38  ;;  %v431_v53 = vld [vmem:[%s13746_s4] sm:$0x7] }
  0xe0   :  { %8946 = vmatprep.subr.bf16.mxu0 %v11837_v47  ;;  %8959 = vmatpush3.bf16.msra.mxu1 %v11841_v52  ;;  %v11953_v54 = vrot.slane %v431_v53, %v11931_v31  ;;  %v11956_v57 = vrot.slane %v431_v53, %v11936_v34  ;;  %v11967_v22 = vrot.slane %v431_v53, %v11938_v38 }
  0xe1   :  { %7689 = vmatprep.mubr.msk.f32.mxu1 %vm11551_vm1, %v11549_v0  ;;  %8960 = vmatprep.subr.bf16.mxu1 %v11550_v43 }
  0xe3   :  { %8948 = vmatpush1.bf16.msra.mxu0 %v11844_v55 }
  0xe4   :  { %8950 = vmatprep.subr.bf16.mxu0 %v11847_v56  ;;  %8962 = vmatpush3.bf16.msra.mxu1 %v11851_v61 }
  0xe5   :  { %8963 = vmatprep.subr.bf16.mxu1 %v11550_v43 }
  0xe7   :  { %8952 = vmatpush1.bf16.msra.mxu0 %v11857_v1 }
  0xe8   :  { %8954 = vmatprep.subr.bf16.mxu0 %v11860_v2  ;;  %8965 = vmatpush3.bf16.msra.mxu1 %v11863_v6 }
  0xe9   :  { %8966 = vmatprep.subr.bf16.mxu1 %v11550_v43 }
  0xeb   :  { %8956 = vmatpush1.bf16.msra.mxu0 %v11867_v11 }
  0xec   :  { %8982 = vmatprep.subr.bf16.mxu0 %v11805_v4  ;;  %8968 = vmatpush3.bf16.msra.mxu1 %v11871_v12 }
  0xed   :  { %8969 = vmatprep.subr.bf16.mxu1 %v11550_v43 }
  0xee   :  { %513 = vmatmul.mubr.f32.vlgmr.msra.gmra.mrb[0].mxu0 %v11549_v0 }
  0xef   :  { %8984 = vmatpush1.bf16.msra.mxu0 %v11807_v8  ;;  %674 = vmatprep.mubr.f32.mxu0 %v11549_v0 }
  0xf0   :  { %8986 = vmatprep.subr.bf16.mxu0 %v11809_v9  ;;  %8971 = vmatpush3.bf16.msra.mxu1 %v11877_v17 }
  0xf1   :  { %8972 = vmatprep.subr.bf16.mxu1 %v11550_v43 }
  0xf3   :  { %8988 = vmatpush1.bf16.msra.mxu0 %v11813_v14 }
  0xf4   :  { %8990 = vmatprep.subr.bf16.mxu0 %v11816_v16  ;;  %8974 = vmatpush3.bf16.msra.mxu1 %v11885_v20 }
  0xf5   :  { %8975 = vmatprep.subr.bf16.mxu1 %v11550_v43 }
  0xf7   :  { %8992 = vmatpush1.bf16.msra.mxu0 %v11819_v25 }
  0xf8   :  { %8994 = vmatprep.subr.bf16.mxu0 %v11822_v29  ;;  %8977 = vmatpush3.bf16.msra.mxu1 %v11891_v23 }
  0xf9   :  { %8978 = vmatprep.subr.bf16.mxu1 %v11550_v43 }
  0xfb   :  { %8996 = vmatpush1.bf16.msra.mxu0 %v11825_v36 }
  0xfc   :  { %8998 = vmatprep.subr.bf16.mxu0 %v11828_v37  ;;  %8980 = vmatpush3.bf16.msra.mxu1 %v11897_v27 }
  0xfd   :  { %9013 = vmatprep.subr.bf16.mxu1 %v11550_v43 }
  0xff   :  { %9000 = vmatpush1.bf16.msra.mxu0 %v11834_v46  ;;  %7690 = vmatmul.mubr.f32.vlgmr.msra.gmra.mrb[6].mxu1 %v11549_v0 }
 0x100   :  { %9002 = vmatprep.subr.bf16.mxu0 %v11837_v47  ;;  %9015 = vmatpush3.bf16.msra.mxu1 %v11841_v52 }
 0x101   :  { %7724 = vmatprep.mubr.msk.f32.mxu1 %vm11551_vm1, %v11549_v0  ;;  %9016 = vmatprep.subr.bf16.mxu1 %v11550_v43 }
 0x103   :  { %9004 = vmatpush1.bf16.msra.mxu0 %v11844_v55 }
 0x104   :  { %9006 = vmatprep.subr.bf16.mxu0 %v11847_v56  ;;  %9018 = vmatpush3.bf16.msra.mxu1 %v11851_v61 }
 0x105   :  { %9019 = vmatprep.subr.bf16.mxu1 %v11550_v43 }
 0x107   :  { %9008 = vmatpush1.bf16.msra.mxu0 %v11857_v1 }
 0x108   :  { %9010 = vmatprep.subr.bf16.mxu0 %v11860_v2  ;;  %9021 = vmatpush3.bf16.msra.mxu1 %v11863_v6 }
 0x109   :  { %9022 = vmatprep.subr.bf16.mxu1 %v11550_v43 }
 0x10b   :  { %9012 = vmatpush1.bf16.msra.mxu0 %v11867_v11 }
 0x10c   :  { %9038 = vmatprep.subr.bf16.mxu0 %v11805_v4  ;;  %9024 = vmatpush3.bf16.msra.mxu1 %v11871_v12 }
 0x10d   :  { %9025 = vmatprep.subr.bf16.mxu1 %v11550_v43 }
 0x110   :  { %9027 = vmatpush3.bf16.msra.mxu1 %v11877_v17 }
 0x111   :  { %9028 = vmatprep.subr.bf16.mxu1 %v11550_v43 }
 0x114   :  { %9030 = vmatpush3.bf16.msra.mxu1 %v11885_v20 }
 0x115   :  { %9031 = vmatprep.subr.bf16.mxu1 %v11550_v43 }
 0x118   :  { %9033 = vmatpush3.bf16.msra.mxu1 %v11891_v23 }
 0x119   :  { %9034 = vmatprep.subr.bf16.mxu1 %v11550_v43 }
 0x11c   :  { %9036 = vmatpush3.bf16.msra.mxu1 %v11897_v27 }
 0x11d   :  { %9069 = vmatprep.subr.bf16.mxu1 %v11550_v43 }
 0x1aa   :  { %v345_v33 = vpop.f32.mrb[0].mxu1 }
 0x1ab   :  { %v347_v35 = vpop.f32.mrb[1].mxu1  ;;  %v11958_v59 = vadd.f32 %v345_v33, %v260_v39 }
 0x1ac   :  { %v11963_v5 = vadd.f32 %v347_v35, %v264_v40 }
 0x1ae   :  { %v351_v41 = vpop.f32.mrb[2].mxu1 }
 0x1af   :  { %v11942_v42 = vadd.f32 %v351_v41, %v260_v39  ;;  %v353_v44 = vpop.f32.mrb[3].mxu1 }
 0x1b0   :  { %v11945_v48 = vadd.f32 %v353_v44, %v264_v40 }
 0x1b2   :  { %v7656_v49 = vpop.f32.mrb[4].mxu1 }
 0x1b3   :  { %v11947_v50 = vadd.f32 %v7656_v49, %v268_v45  ;;  %v422_v51 = vpop.f32.mrb[5].mxu1 }
 0x1b4   :  { %v11970_v32 = vadd.f32 %v422_v51, %v268_v45 }
 0x1c1   :  { %v514_v58 = vpop.f32.mrb[0].mxu0 }
 0x1c2   :  { %v515_v60 = vadd.f32 %v514_v58, %v11953_v54  ;;  %v516_v62 = vpop.f32.mrb[1].mxu0 }
 0x1c3   :  { %v517_v63 = vadd.f32 %v516_v62, %v11956_v57 }
 0x1c4   :  { %v589_v3 = vadd.f32 %v515_v60, %v11958_v59 }
 0x1c5   :  { %v596_v10 = vadd.f32 %v517_v63, %v11963_v5 }
 0x1c6   :  { %v6965_v7 = vmul.f32 -1.442695, %v589_v3 }
 0x1c7   :  { %v6966_v13 = vmul.f32 -1.442695, %v596_v10 }
 0x1c8   :  { %10959 = vpow2.f32 %v6965_v7 }
 0x1c9   :  { %10961 = vpow2.f32 %v6966_v13 }
 0x1d2   :  { %v10960_v15 = vpop.eup %10959  ;;  %v585_v19 = vpop.f32.mrb[6].mxu1 }
 0x1d3   :  { %v593_v18 = vadd.f32 1.0, %v10960_v15  ;;  %v7691_v21 = vpop.f32.mrb[7].mxu1  ;;  %v10962_v24 = vpop.eup %10961  ;;  %v586_v28 = vadd.f32 %v585_v19, %v11967_v22 }
 0x1d4   :  { %v600_v26 = vadd.f32 1.0, %v10962_v24 }
 0x1d5   :  { %10963 = vrcp.f32 %v593_v18 }
 0x1d6   :  { %10965 = vrcp.f32 %v600_v26 }
 0x1df   :  { %v10964_v30 = vpop.eup %10963 }
 0x1e0   :  { %v603_v33 = vmul.f32 %v10964_v30, %v586_v28  ;;  %v10966_v39 = vpop.eup %10965 }
 0x1e1   :  { %v606_v40 = vsub.f32 1.0, %v10966_v39  ;;  %v608_v49 = vmul.f32 0.0, %v10966_v39 }
 0x1e2   :  { %v604_v35 = vadd.f32 %v603_v33, %v11970_v32 }
 0x1e4   :  { %10967 = vtanh.f32 %v604_v35 }
 0x1ee   :  { %v10968_v41 = vpop.eup %10967 }
 0x1ef   :  { %v607_v44 = vmul.f32 %v10968_v41, %v606_v40 }
 0x1f1   :  { %v11973_v58 = vadd.f32 %v608_v49, %v607_v44 }
 0x1f3   :  { %675 = vmatmul.mubr.f32.vlgmr.msra.gmra.mrb[2].mxu0 %v11973_v58  ;;  %7725 = vmatmul.mubr.f32.vlgmr.msra.gmra.mrb[8].mxu1 %v11973_v58  ;;  %v780_v41 = vrot.slane %v11973_v58, 6 }
 0x1f4   :  { %9040 = vmatpush1.bf16.msra.mxu0 %v11807_v8  ;;  %9071 = vmatpush3.bf16.msra.mxu1 %v11841_v52 }
 0x1f5   :  { %9042 = vmatprep.subr.bf16.mxu0 %v11809_v9  ;;  %9072 = vmatprep.subr.bf16.mxu1 %v11550_v43 }
 0x1f6   :  { %851 = vmatprep.mubr.f32.mxu0 %v11549_v0  ;;  %7759 = vmatprep.mubr.msk.f32.mxu1 %vm11551_vm1, %v11549_v0 }
 0x1f8   :  { %9044 = vmatpush1.bf16.msra.mxu0 %v11813_v14  ;;  %9074 = vmatpush3.bf16.msra.mxu1 %v11851_v61 }
 0x1f9   :  { %9046 = vmatprep.subr.bf16.mxu0 %v11816_v16  ;;  %9075 = vmatprep.subr.bf16.mxu1 %v11550_v43 }
 0x1fc   :  { %9048 = vmatpush1.bf16.msra.mxu0 %v11819_v25  ;;  %9077 = vmatpush3.bf16.msra.mxu1 %v11863_v6 }
 0x1fd   :  { %9050 = vmatprep.subr.bf16.mxu0 %v11822_v29  ;;  %9078 = vmatprep.subr.bf16.mxu1 %v11550_v43 }
 0x200   :  { %9052 = vmatpush1.bf16.msra.mxu0 %v11825_v36  ;;  %9080 = vmatpush3.bf16.msra.mxu1 %v11871_v12 }
 0x201   :  { %9054 = vmatprep.subr.bf16.mxu0 %v11828_v37  ;;  %9081 = vmatprep.subr.bf16.mxu1 %v11550_v43 }
 0x204   :  { %9056 = vmatpush1.bf16.msra.mxu0 %v11834_v46  ;;  %9083 = vmatpush3.bf16.msra.mxu1 %v11877_v17 }
 0x205   :  { %9058 = vmatprep.subr.bf16.mxu0 %v11837_v47  ;;  %9084 = vmatprep.subr.bf16.mxu1 %v11550_v43 }
 0x208   :  { %9060 = vmatpush1.bf16.msra.mxu0 %v11844_v55  ;;  %9086 = vmatpush3.bf16.msra.mxu1 %v11885_v20 }
 0x209   :  { %9062 = vmatprep.subr.bf16.mxu0 %v11847_v56  ;;  %9087 = vmatprep.subr.bf16.mxu1 %v11550_v43 }
 0x20c   :  { %9064 = vmatpush1.bf16.msra.mxu0 %v11857_v1  ;;  %9089 = vmatpush3.bf16.msra.mxu1 %v11891_v23 }
 0x20d   :  { %9066 = vmatprep.subr.bf16.mxu0 %v11860_v2  ;;  %9090 = vmatprep.subr.bf16.mxu1 %v11550_v43 }
 0x210   :  { %9068 = vmatpush1.bf16.msra.mxu0 %v11867_v11  ;;  %9092 = vmatpush3.bf16.msra.mxu1 %v11897_v27 }
 0x211   :  { %9094 = vmatprep.subr.bf16.mxu0 %v11805_v4  ;;  %9125 = vmatprep.subr.bf16.mxu1 %v11550_v43 }
 0x2c6   :  { %v676_v45 = vpop.f32.mrb[2].mxu0  ;;  %v747_v51 = vpop.f32.mrb[8].mxu1 }
 0x2c7   :  { %v677_v53 = vadd.f32 %v676_v45, %v11953_v54  ;;  %v678_v60 = vpop.f32.mrb[3].mxu0  ;;  %v7726_v62 = vpop.f32.mrb[9].mxu1  ;;  %v748_v26 = vadd.f32 %v747_v51, %v11967_v22 }
 0x2c8   :  { %v679_v63 = vadd.f32 %v678_v60, %v11956_v57 }
 0x2c9   :  { %v752_v3 = vrot.slane %v677_v53, 6  ;;  %v772_v30 = vrot.slane %v748_v26, 6 }
 0x2ca   :  { %v762_v7 = vrot.slane %v679_v63, 6 }
 0x2cb   :  { %v754_v10 = vadd.f32 %v752_v3, %v11958_v59 }
 0x2cc   :  { %v764_v15 = vadd.f32 %v762_v7, %v11963_v5 }
 0x2cd   :  { %v6967_v13 = vmul.f32 -1.442695, %v754_v10 }
 0x2ce   :  { %v6968_v18 = vmul.f32 -1.442695, %v764_v15 }
 0x2cf   :  { %10969 = vpow2.f32 %v6967_v13 }
 0x2d0   :  { %10971 = vpow2.f32 %v6968_v18 }
 0x2d9   :  { %v10970_v19 = vpop.eup %10969 }
 0x2da   :  { %v758_v21 = vadd.f32 1.0, %v10970_v19  ;;  %v10972_v24 = vpop.eup %10971 }
 0x2db   :  { %v768_v28 = vadd.f32 1.0, %v10972_v24 }
 0x2dc   :  { %10973 = vrcp.f32 %v758_v21 }
 0x2dd   :  { %10975 = vrcp.f32 %v768_v28 }
 0x2e6   :  { %v10974_v33 = vpop.eup %10973 }
 0x2e7   :  { %v774_v35 = vmul.f32 %v10974_v33, %v772_v30  ;;  %v10976_v40 = vpop.eup %10975 }
 0x2e8   :  { %v777_v44 = vsub.f32 1.0, %v10976_v40  ;;  %v782_v53 = vmul.f32 %v10976_v40, %v780_v41 }
 0x2e9   :  { %v775_v39 = vadd.f32 %v774_v35, %v11970_v32 }
 0x2eb   :  { %10977 = vtanh.f32 %v775_v39 }
 0x2f5   :  { %v10978_v49 = vpop.eup %10977 }
 0x2f6   :  { %v778_v45 = vmul.f32 %v10978_v49, %v777_v44 }
 0x2f8   :  { %v12019_v60 = vadd.f32 %v782_v53, %v778_v45 }
 0x2fa   :  { %v785_v62 = vrot.slane %v12019_v60, 2  ;;  %v956_v44 = vrot.slane %v12019_v60, 6 }
 0x2fc   :  { %852 = vmatmul.mubr.f32.vlgmr.msra.gmra.mrb[4].mxu0 %v785_v62  ;;  %7760 = vmatmul.mubr.f32.vlgmr.msra.gmra.mrb[10].mxu1 %v785_v62 }
 0x2fd   :  { %9096 = vmatpush1.bf16.msra.mxu0 %v11807_v8  ;;  %9127 = vmatpush3.bf16.msra.mxu1 %v11841_v52 }
 0x2fe   :  { %9098 = vmatprep.subr.bf16.mxu0 %v11809_v9  ;;  %9128 = vmatprep.subr.bf16.mxu1 %v11550_v43 }
 0x2ff   :  { %1027 = vmatprep.mubr.f32.mxu0 %v11549_v0  ;;  %7794 = vmatprep.mubr.msk.f32.mxu1 %vm11551_vm1, %v11549_v0 }
 0x301   :  { %9100 = vmatpush1.bf16.msra.mxu0 %v11813_v14  ;;  %9130 = vmatpush3.bf16.msra.mxu1 %v11851_v61 }
 0x302   :  { %9102 = vmatprep.subr.bf16.mxu0 %v11816_v16  ;;  %9131 = vmatprep.subr.bf16.mxu1 %v11550_v43 }
 0x305   :  { %9104 = vmatpush1.bf16.msra.mxu0 %v11819_v25  ;;  %9133 = vmatpush3.bf16.msra.mxu1 %v11863_v6 }
 0x306   :  { %9106 = vmatprep.subr.bf16.mxu0 %v11822_v29  ;;  %9134 = vmatprep.subr.bf16.mxu1 %v11550_v43 }
 0x309   :  { %9108 = vmatpush1.bf16.msra.mxu0 %v11825_v36  ;;  %9136 = vmatpush3.bf16.msra.mxu1 %v11871_v12 }
 0x30a   :  { %9110 = vmatprep.subr.bf16.mxu0 %v11828_v37  ;;  %9137 = vmatprep.subr.bf16.mxu1 %v11550_v43 }
 0x30d   :  { %9112 = vmatpush1.bf16.msra.mxu0 %v11834_v46  ;;  %9139 = vmatpush3.bf16.msra.mxu1 %v11877_v17 }
 0x30e   :  { %9114 = vmatprep.subr.bf16.mxu0 %v11837_v47  ;;  %9140 = vmatprep.subr.bf16.mxu1 %v11550_v43 }
 0x311   :  { %9116 = vmatpush1.bf16.msra.mxu0 %v11844_v55  ;;  %9142 = vmatpush3.bf16.msra.mxu1 %v11885_v20 }
 0x312   :  { %9118 = vmatprep.subr.bf16.mxu0 %v11847_v56  ;;  %9143 = vmatprep.subr.bf16.mxu1 %v11550_v43 }
 0x315   :  { %9120 = vmatpush1.bf16.msra.mxu0 %v11857_v1  ;;  %9145 = vmatpush3.bf16.msra.mxu1 %v11891_v23 }
 0x316   :  { %9122 = vmatprep.subr.bf16.mxu0 %v11860_v2  ;;  %9146 = vmatprep.subr.bf16.mxu1 %v11550_v43 }
 0x319   :  { %9124 = vmatpush1.bf16.msra.mxu0 %v11867_v11  ;;  %9148 = vmatpush3.bf16.msra.mxu1 %v11897_v27 }
 0x31a   :  { %9150 = vmatprep.subr.bf16.mxu0 %v11805_v4  ;;  %9181 = vmatprep.subr.bf16.mxu1 %v11550_v43 }
 0x3cf   :  { %v853_v51 = vpop.f32.mrb[4].mxu0  ;;  %v924_v63 = vpop.f32.mrb[10].mxu1 }
 0x3d0   :  { %v854_v3 = vadd.f32 %v853_v51, %v11953_v54  ;;  %v855_v7 = vpop.f32.mrb[5].mxu0  ;;  %v7761_v10 = vpop.f32.mrb[11].mxu1  ;;  %v925_v39 = vadd.f32 %v924_v63, %v11967_v22  ;;  %v1828_v63 = vsel %vm1827_vm2, %v11973_v58, %v12019_v60 }
 0x3d1   :  { %v856_v13 = vadd.f32 %v855_v7, %v11956_v57 }
 0x3d2   :  { %v929_v15 = vrot.slane %v854_v3, 4  ;;  %v949_v40 = vrot.slane %v925_v39, 4 }
 0x3d3   :  { %v939_v18 = vrot.slane %v856_v13, 4 }
 0x3d4   :  { %v931_v19 = vadd.f32 %v929_v15, %v11958_v59 }
 0x3d5   :  { %v941_v21 = vadd.f32 %v939_v18, %v11963_v5 }
 0x3d6   :  { %v6969_v24 = vmul.f32 -1.442695, %v931_v19 }
 0x3d7   :  { %v6970_v26 = vmul.f32 -1.442695, %v941_v21 }
 0x3d8   :  { %10979 = vpow2.f32 %v6969_v24 }
 0x3d9   :  { %10981 = vpow2.f32 %v6970_v26 }
 0x3e2   :  { %v10980_v28 = vpop.eup %10979 }
 0x3e3   :  { %v10982_v30 = vpop.eup %10981  ;;  %v935_v33 = vadd.f32 1.0, %v10980_v28 }
 0x3e4   :  { %v945_v35 = vadd.f32 1.0, %v10982_v30 }
 0x3e5   :  { %10983 = vrcp.f32 %v935_v33 }
 0x3e6   :  { %10985 = vrcp.f32 %v945_v35 }
 0x3ef   :  { %v10984_v41 = vpop.eup %10983 }
 0x3f0   :  { %v10986_v49 = vpop.eup %10985  ;;  %v951_v45 = vmul.f32 %v10984_v41, %v949_v40 }
 0x3f1   :  { %v958_v53 = vmul.f32 %v10986_v49, %v956_v44  ;;  %v954_v51 = vsub.f32 1.0, %v10986_v49 }
 0x3f2   :  { %v952_v62 = vadd.f32 %v951_v45, %v11970_v32 }
 0x3f4   :  { %10987 = vtanh.f32 %v952_v62 }
 0x3fe   :  { %v10988_v3 = vpop.eup %10987 }
 0x3ff   :  { %v955_v7 = vmul.f32 %v10988_v3, %v954_v51 }
 0x401   :  { %v12064_v10 = vadd.f32 %v958_v53, %v955_v7 }
 0x403   :  { %v961_v13 = vrot.slane %v12064_v10, 4  ;;  %v12072_v15 = vsel %vm1829_vm3, %v1828_v63, %v12064_v10  ;;  %v1132_v51 = vrot.slane %v12064_v10, 6 }
 0x405   :  { %1028 = vmatmul.mubr.f32.vlgmr.msra.gmra.mrb[6].mxu0 %v961_v13  ;;  %7795 = vmatmul.mubr.f32.vlgmr.msra.gmra.mrb[12].mxu1 %v961_v13 }
 0x406   :  { %9152 = vmatpush1.bf16.msra.mxu0 %v11807_v8  ;;  %9183 = vmatpush3.bf16.msra.mxu1 %v11841_v52 }
 0x407   :  { %9154 = vmatprep.subr.bf16.mxu0 %v11809_v9  ;;  %9184 = vmatprep.subr.bf16.mxu1 %v11550_v43 }
 0x408   :  { %1203 = vmatprep.mubr.f32.mxu0 %v11549_v0  ;;  %7829 = vmatprep.mubr.msk.f32.mxu1 %vm11551_vm1, %v11549_v0 }
 0x40a   :  { %9156 = vmatpush1.bf16.msra.mxu0 %v11813_v14  ;;  %9186 = vmatpush3.bf16.msra.mxu1 %v11851_v61 }
 0x40b   :  { %9158 = vmatprep.subr.bf16.mxu0 %v11816_v16  ;;  %9187 = vmatprep.subr.bf16.mxu1 %v11550_v43 }
 0x40e   :  { %9160 = vmatpush1.bf16.msra.mxu0 %v11819_v25  ;;  %9189 = vmatpush3.bf16.msra.mxu1 %v11863_v6 }
 0x40f   :  { %9162 = vmatprep.subr.bf16.mxu0 %v11822_v29  ;;  %9190 = vmatprep.subr.bf16.mxu1 %v11550_v43 }
 0x412   :  { %9164 = vmatpush1.bf16.msra.mxu0 %v11825_v36  ;;  %9192 = vmatpush3.bf16.msra.mxu1 %v11871_v12 }
 0x413   :  { %9166 = vmatprep.subr.bf16.mxu0 %v11828_v37  ;;  %9193 = vmatprep.subr.bf16.mxu1 %v11550_v43 }
 0x416   :  { %9168 = vmatpush1.bf16.msra.mxu0 %v11834_v46  ;;  %9195 = vmatpush3.bf16.msra.mxu1 %v11877_v17 }
 0x417   :  { %9170 = vmatprep.subr.bf16.mxu0 %v11837_v47  ;;  %9196 = vmatprep.subr.bf16.mxu1 %v11550_v43 }
 0x41a   :  { %9172 = vmatpush1.bf16.msra.mxu0 %v11844_v55  ;;  %9198 = vmatpush3.bf16.msra.mxu1 %v11885_v20 }
 0x41b   :  { %9174 = vmatprep.subr.bf16.mxu0 %v11847_v56  ;;  %9199 = vmatprep.subr.bf16.mxu1 %v11550_v43 }
 0x41e   :  { %9176 = vmatpush1.bf16.msra.mxu0 %v11857_v1  ;;  %9201 = vmatpush3.bf16.msra.mxu1 %v11891_v23 }
 0x41f   :  { %9178 = vmatprep.subr.bf16.mxu0 %v11860_v2  ;;  %9202 = vmatprep.subr.bf16.mxu1 %v11550_v43 }
 0x422   :  { %9180 = vmatpush1.bf16.msra.mxu0 %v11867_v11  ;;  %9204 = vmatpush3.bf16.msra.mxu1 %v11897_v27 }
 0x423   :  { %9206 = vmatprep.subr.bf16.mxu0 %v11805_v4  ;;  %9237 = vmatprep.subr.bf16.mxu1 %v11550_v43 }
 0x4d8   :  { %v1029_v58 = vpop.f32.mrb[6].mxu0  ;;  %v1100_v60 = vpop.f32.mrb[12].mxu1 }
 0x4d9   :  { %v1030_v18 = vadd.f32 %v1029_v58, %v11953_v54  ;;  %v1031_v19 = vpop.f32.mrb[7].mxu0  ;;  %v7796_v21 = vpop.f32.mrb[13].mxu1  ;;  %v1101_v45 = vadd.f32 %v1100_v60, %v11967_v22 }
 0x4da   :  { %v1032_v24 = vadd.f32 %v1031_v19, %v11956_v57 }
 0x4db   :  { %v1105_v26 = vrot.slane %v1030_v18, 2  ;;  %v1125_v53 = vrot.slane %v1101_v45, 2 }
 0x4dc   :  { %v1115_v28 = vrot.slane %v1032_v24, 2 }
 0x4dd   :  { %v1107_v30 = vadd.f32 %v1105_v26, %v11958_v59 }
 0x4de   :  { %v1117_v33 = vadd.f32 %v1115_v28, %v11963_v5 }
 0x4df   :  { %v6971_v35 = vmul.f32 -1.442695, %v1107_v30 }
 0x4e0   :  { %v6972_v39 = vmul.f32 -1.442695, %v1117_v33 }
 0x4e1   :  { %10989 = vpow2.f32 %v6971_v35 }
 0x4e2   :  { %10991 = vpow2.f32 %v6972_v39 }
 0x4eb   :  { %v10990_v40 = vpop.eup %10989 }
 0x4ec   :  { %v10992_v41 = vpop.eup %10991  ;;  %v1111_v44 = vadd.f32 1.0, %v10990_v40 }
 0x4ed   :  { %v1121_v49 = vadd.f32 1.0, %v10992_v41 }
 0x4ee   :  { %10993 = vrcp.f32 %v1111_v44 }
 0x4ef   :  { %10995 = vrcp.f32 %v1121_v49 }
 0x4f8   :  { %v10994_v62 = vpop.eup %10993 }
 0x4f9   :  { %v10996_v3 = vpop.eup %10995  ;;  %v1127_v59 = vmul.f32 %v10994_v62, %v1125_v53 }
 0x4fa   :  { %v1134_v7 = vmul.f32 %v10996_v3, %v1132_v51  ;;  %v1130_v63 = vsub.f32 1.0, %v10996_v3 }
 0x4fb   :  { %v1128_v5 = vadd.f32 %v1127_v59, %v11970_v32 }
 0x4fd   :  { %10997 = vtanh.f32 %v1128_v5 }
 0x507   :  { %v10998_v13 = vpop.eup %10997 }
 0x508   :  { %v1131_v58 = vmul.f32 %v10998_v13, %v1130_v63 }
 0x50a   :  { %v1135_v18 = vadd.f32 %v1134_v7, %v1131_v58 }
 0x50c   :  { %v12116_v19 = vrot.slane %v1135_v18, 6  ;;  %v12120_v60 = vsel %vm1831_vm4, %v12072_v15, %v1135_v18 }
 0x50e   :  { %1204 = vmatmul.mubr.f32.vlgmr.msra.gmra.mrb[8].mxu0 %v12116_v19  ;;  %7830 = vmatmul.mubr.f32.vlgmr.msra.gmra.mrb[14].mxu1 %v12116_v19 }
 0x50f   :  { %9208 = vmatpush1.bf16.msra.mxu0 %v11807_v8  ;;  %9239 = vmatpush3.bf16.msra.mxu1 %v11841_v52 }
 0x510   :  { %9210 = vmatprep.subr.bf16.mxu0 %v11809_v9  ;;  %9240 = vmatprep.subr.bf16.mxu1 %v11550_v43 }
 0x511   :  { %1365 = vmatprep.mubr.f32.mxu0 %v11549_v0  ;;  %7864 = vmatprep.mubr.msk.f32.mxu1 %vm11551_vm1, %v11549_v0 }
 0x513   :  { %9212 = vmatpush1.bf16.msra.mxu0 %v11813_v14  ;;  %9242 = vmatpush3.bf16.msra.mxu1 %v11851_v61 }
 0x514   :  { %9214 = vmatprep.subr.bf16.mxu0 %v11816_v16  ;;  %9243 = vmatprep.subr.bf16.mxu1 %v11550_v43 }
 0x517   :  { %9216 = vmatpush1.bf16.msra.mxu0 %v11819_v25  ;;  %9245 = vmatpush3.bf16.msra.mxu1 %v11863_v6 }
 0x518   :  { %9218 = vmatprep.subr.bf16.mxu0 %v11822_v29  ;;  %9246 = vmatprep.subr.bf16.mxu1 %v11550_v43 }
 0x51b   :  { %9220 = vmatpush1.bf16.msra.mxu0 %v11825_v36  ;;  %9248 = vmatpush3.bf16.msra.mxu1 %v11871_v12 }
 0x51c   :  { %9222 = vmatprep.subr.bf16.mxu0 %v11828_v37  ;;  %9249 = vmatprep.subr.bf16.mxu1 %v11550_v43 }
 0x51f   :  { %9224 = vmatpush1.bf16.msra.mxu0 %v11834_v46  ;;  %9251 = vmatpush3.bf16.msra.mxu1 %v11877_v17 }
 0x520   :  { %9226 = vmatprep.subr.bf16.mxu0 %v11837_v47  ;;  %9252 = vmatprep.subr.bf16.mxu1 %v11550_v43 }
 0x523   :  { %9228 = vmatpush1.bf16.msra.mxu0 %v11844_v55  ;;  %9254 = vmatpush3.bf16.msra.mxu1 %v11885_v20 }
 0x524   :  { %9230 = vmatprep.subr.bf16.mxu0 %v11847_v56  ;;  %9255 = vmatprep.subr.bf16.mxu1 %v11550_v43 }
 0x527   :  { %9232 = vmatpush1.bf16.msra.mxu0 %v11857_v1  ;;  %9257 = vmatpush3.bf16.msra.mxu1 %v11891_v23 }
 0x528   :  { %9234 = vmatprep.subr.bf16.mxu0 %v11860_v2  ;;  %9258 = vmatprep.subr.bf16.mxu1 %v11550_v43 }
 0x52b   :  { %9236 = vmatpush1.bf16.msra.mxu0 %v11867_v11  ;;  %9260 = vmatpush3.bf16.msra.mxu1 %v11897_v27 }
 0x52c   :  { %9262 = vmatprep.subr.bf16.mxu0 %v11805_v4  ;;  %9293 = vmatprep.subr.bf16.mxu1 %v11550_v43 }
 0x5e1   :  { %v1205_v32 = vpop.f32.mrb[8].mxu0  ;;  %v1276_v10 = vpop.f32.mrb[14].mxu1 }
 0x5e2   :  { %v1206_v15 = vadd.f32 %v1205_v32, %v11953_v54  ;;  %v1207_v21 = vpop.f32.mrb[9].mxu0  ;;  %v7831_v24 = vpop.f32.mrb[15].mxu1  ;;  %v1277_v49 = vadd.f32 %v1276_v10, %v11967_v22 }
 0x5e3   :  { %v1208_v26 = vadd.f32 %v1207_v21, %v11956_v57 }
 0x5e4   :  { %v1280_v28 = vadd.f32 %v1206_v15, %v11942_v42 }
 0x5e5   :  { %v1287_v33 = vadd.f32 %v1208_v26, %v11945_v48 }
 0x5e6   :  { %v6973_v30 = vmul.f32 -1.442695, %v1280_v28 }
 0x5e7   :  { %v6974_v35 = vmul.f32 -1.442695, %v1287_v33 }
 0x5e8   :  { %10999 = vpow2.f32 %v6973_v30 }
 0x5e9   :  { %11001 = vpow2.f32 %v6974_v35 }
 0x5f2   :  { %v11000_v39 = vpop.eup %10999 }
 0x5f3   :  { %v1284_v40 = vadd.f32 1.0, %v11000_v39  ;;  %v11002_v41 = vpop.eup %11001 }
 0x5f4   :  { %v1291_v44 = vadd.f32 1.0, %v11002_v41 }
 0x5f5   :  { %11003 = vrcp.f32 %v1284_v40 }
 0x5f6   :  { %11005 = vrcp.f32 %v1291_v44 }
 0x5ff   :  { %v11004_v45 = vpop.eup %11003 }
 0x600   :  { %v1294_v53 = vmul.f32 %v11004_v45, %v1277_v49  ;;  %v11006_v51 = vpop.eup %11005 }
 0x601   :  { %v1297_v3 = vsub.f32 1.0, %v11006_v51  ;;  %v1299_v5 = vmul.f32 %v11006_v51, %v12116_v19 }
 0x602   :  { %v1295_v62 = vadd.f32 %v1294_v53, %v11947_v50 }
 0x604   :  { %11007 = vtanh.f32 %v1295_v62 }
 0x60e   :  { %v11008_v59 = vpop.eup %11007 }
 0x60f   :  { %v1298_v7 = vmul.f32 %v11008_v59, %v1297_v3 }
 0x611   :  { %v12166_v63 = vadd.f32 %v1299_v5, %v1298_v7 }
 0x613   :  { %1366 = vmatmul.mubr.f32.vlgmr.msra.gmra.mrb[10].mxu0 %v12166_v63  ;;  %7865 = vmatmul.mubr.f32.vlgmr.msra.gmra.mrb[16].mxu1 %v12166_v63  ;;  %v1471_v62 = vrot.slane %v12166_v63, 6 }
 0x614   :  { %9264 = vmatpush1.bf16.msra.mxu0 %v11807_v8  ;;  %9295 = vmatpush3.bf16.msra.mxu1 %v11841_v52 }
 0x615   :  { %9266 = vmatprep.subr.bf16.mxu0 %v11809_v9  ;;  %9296 = vmatprep.subr.bf16.mxu1 %v11550_v43 }
 0x616   :  { %1542 = vmatprep.mubr.f32.mxu0 %v11549_v0  ;;  %7899 = vmatprep.mubr.msk.f32.mxu1 %vm11551_vm1, %v11549_v0 }
 0x618   :  { %9268 = vmatpush1.bf16.msra.mxu0 %v11813_v14  ;;  %9298 = vmatpush3.bf16.msra.mxu1 %v11851_v61 }
 0x619   :  { %9270 = vmatprep.subr.bf16.mxu0 %v11816_v16  ;;  %9299 = vmatprep.subr.bf16.mxu1 %v11550_v43 }
 0x61c   :  { %9272 = vmatpush1.bf16.msra.mxu0 %v11819_v25  ;;  %9301 = vmatpush3.bf16.msra.mxu1 %v11863_v6 }
 0x61d   :  { %9274 = vmatprep.subr.bf16.mxu0 %v11822_v29  ;;  %9302 = vmatprep.subr.bf16.mxu1 %v11550_v43 }
 0x620   :  { %9276 = vmatpush1.bf16.msra.mxu0 %v11825_v36  ;;  %9304 = vmatpush3.bf16.msra.mxu1 %v11871_v12 }
 0x621   :  { %9278 = vmatprep.subr.bf16.mxu0 %v11828_v37  ;;  %9305 = vmatprep.subr.bf16.mxu1 %v11550_v43 }
 0x624   :  { %9280 = vmatpush1.bf16.msra.mxu0 %v11834_v46  ;;  %9307 = vmatpush3.bf16.msra.mxu1 %v11877_v17 }
 0x625   :  { %9282 = vmatprep.subr.bf16.mxu0 %v11837_v47  ;;  %9308 = vmatprep.subr.bf16.mxu1 %v11550_v43 }
 0x628   :  { %9284 = vmatpush1.bf16.msra.mxu0 %v11844_v55  ;;  %9310 = vmatpush3.bf16.msra.mxu1 %v11885_v20 }
 0x629   :  { %9286 = vmatprep.subr.bf16.mxu0 %v11847_v56  ;;  %9311 = vmatprep.subr.bf16.mxu1 %v11550_v43 }
 0x62c   :  { %9288 = vmatpush1.bf16.msra.mxu0 %v11857_v1  ;;  %9313 = vmatpush3.bf16.msra.mxu1 %v11891_v23 }
 0x62d   :  { %9290 = vmatprep.subr.bf16.mxu0 %v11860_v2  ;;  %9314 = vmatprep.subr.bf16.mxu1 %v11550_v43 }
 0x630   :  { %9292 = vmatpush1.bf16.msra.mxu0 %v11867_v11  ;;  %9316 = vmatpush3.bf16.msra.mxu1 %v11897_v27 }
 0x631   :  { %9318 = vmatprep.subr.bf16.mxu0 %v11805_v4  ;;  %9349 = vmatprep.subr.bf16.mxu1 %v11550_v43 }
 0x6e6   :  { %v1367_v13 = vpop.f32.mrb[10].mxu0  ;;  %v1438_v58 = vpop.f32.mrb[16].mxu1 }
 0x6e7   :  { %v1368_v18 = vadd.f32 %v1367_v13, %v11953_v54  ;;  %v1369_v19 = vpop.f32.mrb[11].mxu0  ;;  %v7866_v32 = vpop.f32.mrb[17].mxu1  ;;  %v1439_v39 = vadd.f32 %v1438_v58, %v11967_v22 }
 0x6e8   :  { %v1370_v10 = vadd.f32 %v1369_v19, %v11956_v57 }
 0x6e9   :  { %v1443_v15 = vrot.slane %v1368_v18, 6  ;;  %v1463_v41 = vrot.slane %v1439_v39, 6 }
 0x6ea   :  { %v1453_v21 = vrot.slane %v1370_v10, 6 }
 0x6eb   :  { %v1445_v24 = vadd.f32 %v1443_v15, %v11942_v42 }
 0x6ec   :  { %v1455_v28 = vadd.f32 %v1453_v21, %v11945_v48 }
 0x6ed   :  { %v6975_v26 = vmul.f32 -1.442695, %v1445_v24  ;;  %v1836_v24 = vld [vmem:[#allocation8] sm:$0xff] }
 0x6ee   :  { %v6976_v30 = vmul.f32 -1.442695, %v1455_v28  ;;  %v1843_v28 = vld [vmem:[#allocation8 + $0x38] sm:$0xff] }
 0x6ef   :  { %11009 = vpow2.f32 %v6975_v26  ;;  %v1839_v26 = vld [vmem:[#allocation8 + $0x18] sm:$0xff] }
 0x6f0   :  { %11011 = vpow2.f32 %v6976_v30  ;;  %v1846_v30 = vld [vmem:[#allocation8 + $0x50] sm:$0xff] }
 0x6f9   :  { %v11010_v4 = vpop.eup %11009 }
 0x6fa   :  { %v1449_v33 = vadd.f32 1.0, %v11010_v4  ;;  %v11012_v35 = vpop.eup %11011 }
 0x6fb   :  { %v1459_v40 = vadd.f32 1.0, %v11012_v35 }
 0x6fc   :  { %11013 = vrcp.f32 %v1449_v33  ;;  %v9375_v33 = vpack.c.bf16 %v1839_v26, %v1836_v24  ;;  %v1844_v24 = vld [vmem:[#allocation8 + $0x40] sm:$0xff]  ;;  %v1847_v26 = vld [vmem:[#allocation8 + $0x58] sm:$0xff] }
 0x6fd   :  { %11015 = vrcp.f32 %v1459_v40  ;;  %v9377_v40 = vpack.c.bf16 %v1846_v30, %v1843_v28  ;;  %v9409_v28 = vpack.c.bf16 %v1847_v26, %v1844_v24  ;;  %v1885_v30 = vld [vmem:[#allocation10 + $0x8] sm:$0xff] }
 0x6fe   :  { %v1917_v24 = vld [vmem:[#allocation10 + $0x108] sm:$0xff] }
 0x706   :  { %v11014_v44 = vpop.eup %11013 }
 0x707   :  { %v1465_v49 = vmul.f32 %v11014_v44, %v1463_v41  ;;  %v11016_v53 = vpop.eup %11015  ;;  %v1842_v41 = vld [vmem:[#allocation8 + $0x30] sm:$0xff]  ;;  %v1845_v44 = vld [vmem:[#allocation8 + $0x48] sm:$0xff] }
 0x708   :  { %v1468_v51 = vsub.f32 1.0, %v11016_v53  ;;  %v1473_v7 = vmul.f32 %v11016_v53, %v1471_v62  ;;  %v1852_v53 = vld [vmem:[#allocation8 + $0x80] sm:$0xff]  ;;  %v9379_v62 = vpack.c.bf16 %v1845_v44, %v1842_v41  ;;  %v1853_v44 = vld [vmem:[#allocation8 + $0x88] sm:$0xff] }
 0x709   :  { %v1466_v45 = vadd.f32 %v1465_v49, %v11947_v50 }
 0x70b   :  { %11017 = vtanh.f32 %v1466_v45  ;;  %v1849_v45 = vld [vmem:[#allocation8 + $0x68] sm:$0xff] }
 0x715   :  { %v11018_v3 = vpop.eup %11017 }
 0x716   :  { %v1469_v59 = vmul.f32 %v11018_v3, %v1468_v51  ;;  %v9381_v51 = vpack.c.bf16 %v1852_v53, %v1849_v45  ;;  %v1851_v3 = vld [vmem:[#allocation8 + $0x78] sm:$0xff] }
 0x717   :  { %v1891_v53 = vld [vmem:[#allocation10 + $0x38] sm:$0xff] }
 0x718   :  { %v12212_v5 = vadd.f32 %v1473_v7, %v1469_v59  ;;  %v1855_v59 = vld [vmem:[#allocation8 + $0x98] sm:$0xff]  ;;  %v1858_v7 = vld [vmem:[#allocation8 + $0xb0] sm:$0xff] }
 0x71a   :  { %v1476_v13 = vrot.slane %v12212_v5, 2  ;;  %v1833_v35 = vsel %vm1827_vm2, %v12166_v63, %v12212_v5  ;;  %v1848_v63 = vld [vmem:[#allocation8 + $0x60] sm:$0xff] }
 0x71c   :  { %1543 = vmatmul.mubr.f32.vlgmr.msra.gmra.mrb[12].mxu0 %v1476_v13  ;;  %7900 = vmatmul.mubr.f32.vlgmr.msra.gmra.mrb[18].mxu1 %v1476_v13  ;;  %v9385_v13 = vpack.c.bf16 %v1858_v7, %v1855_v59  ;;  %v1856_v7 = vld [vmem:[#allocation8 + $0xa0] sm:$0xff] }
 0x71d   :  { %9320 = vmatpush1.bf16.msra.mxu0 %v11807_v8  ;;  %9351 = vmatpush3.bf16.msra.mxu1 %v11841_v52  ;;  %v1837_v8 = vld [vmem:[#allocation8 + $0x8] sm:$0xff] }
 0x71e   :  { %9322 = vmatprep.subr.bf16.mxu0 %v11809_v9  ;;  %9352 = vmatprep.subr.bf16.mxu1 %v11550_v43  ;;  %v1840_v9 = vld [vmem:[#allocation8 + $0x20] sm:$0xff] }
 0x71f   :  { %1718 = vmatprep.mubr.f32.mxu0 %v11549_v0  ;;  %7934 = vmatprep.mubr.msk.f32.mxu1 %vm11551_vm1, %v11549_v0 }
 0x721   :  { %9324 = vmatpush1.bf16.msra.mxu0 %v11813_v14  ;;  %9354 = vmatpush3.bf16.msra.mxu1 %v11851_v61  ;;  %v9373_v14 = vpack.c.bf16 %v1840_v9, %v1837_v8  ;;  %v1854_v8 = vld [vmem:[#allocation8 + $0x90] sm:$0xff]  ;;  %v1857_v9 = vld [vmem:[#allocation8 + $0xa8] sm:$0xff] }
 0x722   :  { %9326 = vmatprep.subr.bf16.mxu0 %v11816_v16  ;;  %9355 = vmatprep.subr.bf16.mxu1 %v11550_v43 }
 0x725   :  { %9328 = vmatpush1.bf16.msra.mxu0 %v11819_v25  ;;  %9357 = vmatpush3.bf16.msra.mxu1 %v11863_v6 }
 0x726   :  { %9330 = vmatprep.subr.bf16.mxu0 %v11822_v29  ;;  %9358 = vmatprep.subr.bf16.mxu1 %v11550_v43 }
 0x729   :  { %9332 = vmatpush1.bf16.msra.mxu0 %v11825_v36  ;;  %9360 = vmatpush3.bf16.msra.mxu1 %v11871_v12 }
 0x72a   :  { %9334 = vmatprep.subr.bf16.mxu0 %v11828_v37  ;;  %9361 = vmatprep.subr.bf16.mxu1 %v11550_v43 }
 0x72d   :  { %9336 = vmatpush1.bf16.msra.mxu0 %v11834_v46  ;;  %9363 = vmatpush3.bf16.msra.mxu1 %v11877_v17 }
 0x72e   :  { %9338 = vmatprep.subr.bf16.mxu0 %v11837_v47  ;;  %9364 = vmatprep.subr.bf16.mxu1 %v11550_v43 }
 0x731   :  { %9340 = vmatpush1.bf16.msra.mxu0 %v11844_v55  ;;  %9366 = vmatpush3.bf16.msra.mxu1 %v11885_v20 }
 0x732   :  { %9342 = vmatprep.subr.bf16.mxu0 %v11847_v56  ;;  %9367 = vmatprep.subr.bf16.mxu1 %v11550_v43 }
 0x735   :  { %9344 = vmatpush1.bf16.msra.mxu0 %v11857_v1  ;;  %9369 = vmatpush3.bf16.msra.mxu1 %v11891_v23 }
 0x736   :  { %9346 = vmatprep.subr.bf16.mxu0 %v11860_v2  ;;  %9370 = vmatprep.subr.bf16.mxu1 %v11550_v43 }
 0x739   :  { %9348 = vmatpush1.bf16.msra.mxu0 %v11867_v11  ;;  %9372 = vmatpush3.bf16.msra.mxu1 %v11897_v27  ;;  %v1647_v27 = vrot.slane %v12212_v5, 6  ;;  %v9383_v5 = vpack.c.bf16 %v1851_v3, %v1848_v63  ;;  %v1890_v63 = vld [vmem:[#allocation10 + $0x30] sm:$0xff]  ;;  %v1893_v3 = vld [vmem:[#allocation10 + $0x48] sm:$0xff] }
 0x73a   :  { %9374 = vmatprep.subr.bf16.mxu0 %v9373_v14  ;;  %v1861_v14 = vld [vmem:[#allocation8 + $0xc8] sm:$0xff]  ;;  %v12277_v59 = vpack.c.bf16 %v1893_v3, %v1890_v63  ;;  %v1927_v63 = vld [vmem:[#allocation10 + $0x158] sm:$0xff]  ;;  %v1930_v3 = vld [vmem:[#allocation10 + $0x170] sm:$0xff] }
 0x7ef   :  { %v1544_v16 = vpop.f32.mrb[12].mxu0  ;;  %v1615_v25 = vpop.f32.mrb[18].mxu1 }
 0x7f0   :  { %v1545_v29 = vadd.f32 %v1544_v16, %v11953_v54  ;;  %v1546_v36 = vpop.f32.mrb[13].mxu0  ;;  %v7901_v37 = vpop.f32.mrb[19].mxu1  ;;  %v1616_v17 = vadd.f32 %v1615_v25, %v11967_v22  ;;  %v1864_v16 = vld [vmem:[#allocation8 + $0xe0] sm:$0xff]  ;;  %v9387_v25 = vpack.c.bf16 %v1857_v9, %v1854_v8  ;;  %v1897_v8 = vld [vmem:[#allocation10 + $0x68] sm:$0xff] }
 0x7f1   :  { %v1547_v46 = vadd.f32 %v1546_v36, %v11956_v57  ;;  %v1860_v36 = vld [vmem:[#allocation8 + $0xc0] sm:$0xff]  ;;  %v1863_v37 = vld [vmem:[#allocation8 + $0xd8] sm:$0xff] }
 0x7f2   :  { %v1620_v47 = vrot.slane %v1545_v29, 4  ;;  %v1640_v20 = vrot.slane %v1616_v17, 4  ;;  %v9389_v29 = vpack.c.bf16 %v1864_v16, %v1861_v14  ;;  %v1875_v17 = vld [vmem:[#allocation8 + $0x138] sm:$0xff]  ;;  %v1900_v9 = vld [vmem:[#allocation10 + $0x80] sm:$0xff] }
 0x7f3   :  { %v1630_v52 = vrot.slane %v1547_v46, 4  ;;  %v1867_v46 = vld [vmem:[#allocation8 + $0xf8] sm:$0xff]  ;;  %v12281_v14 = vpack.c.bf16 %v1900_v9, %v1897_v8  ;;  %v1896_v16 = vld [vmem:[#allocation10 + $0x60] sm:$0xff] }
 0x7f4   :  { %v1622_v55 = vadd.f32 %v1620_v47, %v11942_v42  ;;  %v1870_v47 = vld [vmem:[#allocation8 + $0x110] sm:$0xff] }
 0x7f5   :  { %v1632_v56 = vadd.f32 %v1630_v52, %v11945_v48  ;;  %v9391_v52 = vpack.c.bf16 %v1863_v37, %v1860_v36  ;;  %v1862_v36 = vld [vmem:[#allocation8 + $0xd0] sm:$0xff]  ;;  %v1865_v37 = vld [vmem:[#allocation8 + $0xe8] sm:$0xff] }
 0x7f6   :  { %v6977_v61 = vmul.f32 -1.442695, %v1622_v55  ;;  %v9393_v55 = vpack.c.bf16 %v1870_v47, %v1867_v46  ;;  %v9421_v46 = vpack.c.bf16 %v1865_v37, %v1862_v36  ;;  %v1903_v47 = vld [vmem:[#allocation10 + $0x98] sm:$0xff] }
 0x7f7   :  { %v6978_v1 = vmul.f32 -1.442695, %v1632_v56  ;;  %v1866_v56 = vld [vmem:[#allocation8 + $0xf0] sm:$0xff] }
 0x7f8   :  { %11019 = vpow2.f32 %v6977_v61  ;;  %v1869_v61 = vld [vmem:[#allocation8 + $0x108] sm:$0xff] }
 0x7f9   :  { %11021 = vpow2.f32 %v6978_v1  ;;  %v1873_v1 = vld [vmem:[#allocation8 + $0x128] sm:$0xff] }
 0x802   :  { %v11020_v2 = vpop.eup %11019 }
 0x803   :  { %v11022_v6 = vpop.eup %11021  ;;  %v1626_v11 = vadd.f32 1.0, %v11020_v2  ;;  %v1876_v2 = vld [vmem:[#allocation8 + $0x140] sm:$0xff] }
 0x804   :  { %v1636_v12 = vadd.f32 1.0, %v11022_v6  ;;  %v9395_v6 = vpack.c.bf16 %v1869_v61, %v1866_v56  ;;  %v1902_v56 = vld [vmem:[#allocation10 + $0x90] sm:$0xff]  ;;  %v1905_v61 = vld [vmem:[#allocation10 + $0xa8] sm:$0xff] }
 0x805   :  { %11023 = vrcp.f32 %v1626_v11  ;;  %v9397_v11 = vpack.c.bf16 %v1876_v2, %v1873_v1  ;;  %v12289_v1 = vpack.c.bf16 %v1905_v61, %v1902_v56  ;;  %v1868_v2 = vld [vmem:[#allocation8 + $0x100] sm:$0xff] }
 0x806   :  { %11025 = vrcp.f32 %v1636_v12  ;;  %v1872_v12 = vld [vmem:[#allocation8 + $0x120] sm:$0xff] }
 0x80f   :  { %v11024_v23 = vpop.eup %11023 }
 0x810   :  { %v11026_v58 = vpop.eup %11025  ;;  %v1642_v18 = vmul.f32 %v11024_v23, %v1640_v20  ;;  %v1879_v20 = vld [vmem:[#allocation8 + $0x158] sm:$0xff]  ;;  %v1882_v23 = vld [vmem:[#allocation8 + $0x170] sm:$0xff] }
 0x811   :  { %v1649_v19 = vmul.f32 %v11026_v58, %v1647_v27  ;;  %v1645_v10 = vsub.f32 1.0, %v11026_v58  ;;  %v9399_v27 = vpack.c.bf16 %v1875_v17, %v1872_v12  ;;  %v9401_v58 = vpack.c.bf16 %v1882_v23, %v1879_v20  ;;  %v1912_v17 = vld [vmem:[#allocation10 + $0xe0] sm:$0xff]  ;;  %v1911_v23 = vld [vmem:[#allocation10 + $0xd8] sm:$0xff] }
 0x812   :  { %v1643_v32 = vadd.f32 %v1642_v18, %v11947_v50  ;;  %v1878_v18 = vld [vmem:[#allocation8 + $0x150] sm:$0xff]  ;;  %v1908_v20 = vld [vmem:[#allocation10 + $0xc0] sm:$0xff] }
 0x814   :  { %11027 = vtanh.f32 %v1643_v32 }
 0x81e   :  { %v11028_v15 = vpop.eup %11027 }
 0x81f   :  { %v1646_v21 = vmul.f32 %v11028_v15, %v1645_v10  ;;  %v1838_v10 = vld [vmem:[#allocation8 + $0x10] sm:$0xff]  ;;  %v1841_v15 = vld [vmem:[#allocation8 + $0x28] sm:$0xff] }
 0x821   :  { %v12255_v4 = vadd.f32 %v1649_v19, %v1646_v21  ;;  %v1881_v19 = vld [vmem:[#allocation8 + $0x168] sm:$0xff]  ;;  %v9405_v21 = vpack.c.bf16 %v1841_v15, %v1838_v10  ;;  %v1918_v15 = vld [vmem:[#allocation10 + $0x110] sm:$0xff] }
 0x822   :  { %v9403_v32 = vpack.c.bf16 %v1881_v19, %v1878_v18  ;;  %v1874_v18 = vld [vmem:[#allocation8 + $0x130] sm:$0xff]  ;;  %v1877_v19 = vld [vmem:[#allocation8 + $0x148] sm:$0xff] }
 0x823   :  { %v1652_v39 = vrot.slane %v12255_v4, 4  ;;  %v12263_v49 = vsel %vm1829_vm3, %v1833_v35, %v12255_v4  ;;  %9406 = vmatprep.subr.bf16.mxu1 %v9405_v21  ;;  %v9429_v10 = vpack.c.bf16 %v1877_v19, %v1874_v18 }
 0x825   :  { %1719 = vmatmul.mubr.f32.vlgmr.msra.gmra.mrb[14].mxu0 %v1652_v39  ;;  %7935 = vmatmul.mubr.f32.vlgmr.msra.gmra.mrb[20].mxu1 %v1652_v39  ;;  %v1884_v39 = vld [vmem:[#allocation10] sm:$0xff] }
 0x826   :  { %9376 = vmatpush1.bf16.msra.mxu0 %v9375_v33  ;;  %7969 = vmatprep.mubr.f32.mxu1 %v12120_v60  ;;  %v1888_v33 = vld [vmem:[#allocation10 + $0x20] sm:$0xff] }
 0x827   :  { %9378 = vmatprep.subr.bf16.mxu0 %v9377_v40  ;;  %2013 = vmatprep.mubr.f32.mxu0 %v11549_v0  ;;  %v12269_v35 = vpack.c.bf16 %v1888_v33, %v1885_v30  ;;  %v1887_v40 = vld [vmem:[#allocation10 + $0x18] sm:$0xff]  ;;  %v1921_v33 = vld [vmem:[#allocation10 + $0x128] sm:$0xff] }
 0x828   :  { %9408 = vmatpush3.bf16.msra.mxu1 %v9405_v21  ;;  %v12271_v41 = vpack.c.bf16 %v1887_v40, %v1884_v39  ;;  %v1914_v21 = vld [vmem:[#allocation10 + $0xf0] sm:$0xff]  ;;  %v1883_v30 = vld [vmem:[#allocation8 + $0x178] sm:$0xff]  ;;  %v1924_v39 = vld [vmem:[#allocation10 + $0x140] sm:$0xff] }
 0x829   :  { %9410 = vmatprep.subr.bf16.mxu1 %v9409_v28  ;;  %v12301_v40 = vpack.c.bf16 %v1917_v24, %v1914_v21 }
 0x82a   :  { %9380 = vmatpush1.bf16.msra.mxu0 %v9379_v62  ;;  %v1894_v62 = vld [vmem:[#allocation10 + $0x50] sm:$0xff] }
 0x82b   :  { %9382 = vmatprep.subr.bf16.mxu0 %v9381_v51  ;;  %v12275_v51 = vpack.c.bf16 %v1894_v62, %v1891_v53  ;;  %v1923_v53 = vld [vmem:[#allocation10 + $0x138] sm:$0xff] }
 0x82c   :  { %9412 = vmatpush3.bf16.msra.mxu1 %v9409_v28  ;;  %v1880_v28 = vld [vmem:[#allocation8 + $0x160] sm:$0xff] }
 0x82e   :  { %9384 = vmatpush1.bf16.msra.mxu0 %v9383_v5  ;;  %v1859_v5 = vld [vmem:[#allocation8 + $0xb8] sm:$0xff] }
 0x82f   :  { %9386 = vmatprep.subr.bf16.mxu0 %v9385_v13  ;;  %v9417_v13 = vpack.c.bf16 %v1859_v5, %v1856_v7  ;;  %v12312_v7 = vpack.c.bf16 %v1930_v3, %v1927_v63  ;;  %v1926_v5 = vld [vmem:[#allocation10 + $0x150] sm:$0xff]  ;;  %v1901_v63 = vld [vmem:[#allocation10 + $0x88] sm:$0xff]  ;;  %v1904_v3 = vld [vmem:[#allocation10 + $0xa0] sm:$0xff] }
 0x832   :  { %9388 = vmatpush1.bf16.msra.mxu0 %v9387_v25  ;;  %v1899_v25 = vld [vmem:[#allocation10 + $0x78] sm:$0xff] }
 0x833   :  { %9390 = vmatprep.subr.bf16.mxu0 %v9389_v29  ;;  %v12283_v29 = vpack.c.bf16 %v1899_v25, %v1896_v16 }
 0x836   :  { %9392 = vmatpush1.bf16.msra.mxu0 %v9391_v52  ;;  %v1906_v52 = vld [vmem:[#allocation10 + $0xb0] sm:$0xff] }
 0x837   :  { %9394 = vmatprep.subr.bf16.mxu0 %v9393_v55  ;;  %v12287_v55 = vpack.c.bf16 %v1906_v52, %v1903_v47 }
 0x83a   :  { %9396 = vmatpush1.bf16.msra.mxu0 %v9395_v6  ;;  %v1871_v6 = vld [vmem:[#allocation8 + $0x118] sm:$0xff] }
 0x83b   :  { %9398 = vmatprep.subr.bf16.mxu0 %v9397_v11  ;;  %v1909_v11 = vld [vmem:[#allocation10 + $0xc8] sm:$0xff]  ;;  %v9425_v12 = vpack.c.bf16 %v1871_v6, %v1868_v2 }
 0x83e   :  { %9400 = vmatpush1.bf16.msra.mxu0 %v9399_v27  ;;  %v12293_v27 = vpack.c.bf16 %v1912_v17, %v1909_v11 }
 0x83f   :  { %9402 = vmatprep.subr.bf16.mxu0 %v9401_v58  ;;  %v12295_v58 = vpack.c.bf16 %v1911_v23, %v1908_v20 }
 0x842   :  { %9404 = vmatpush1.bf16.msra.mxu0 %v9403_v32  ;;  %v1915_v32 = vld [vmem:[#allocation10 + $0xf8] sm:$0xff] }
 0x843   :  { %9438 = vmatprep.subr.bf16.mxu0 %v12269_v35  ;;  %v12298_v26 = vpack.c.bf16 %v1918_v15, %v1915_v32 }
 0x845   :  { %2014 = vmatmul.mubr.f32.vlgmr.msra.gmra.mrb[16].mxu0 %v12120_v60  ;;  %v1850_v60 = vld [vmem:[#allocation8 + $0x70] sm:$0xff] }
 0x846   :  { %2019 = vmatprep.mubr.f32.mxu0 %v11549_v0  ;;  %9440 = vmatpush1.bf16.msra.mxu0 %v12271_v41  ;;  %v9413_v45 = vpack.c.bf16 %v1853_v44, %v1850_v60  ;;  %v9433_v60 = vpack.c.bf16 %v1883_v30, %v1880_v28  ;;  %v12304_v44 = vpack.c.bf16 %v1924_v39, %v1921_v33  ;;  %v1886_v28 = vld [vmem:[#allocation10 + $0x10] sm:$0xff]  ;;  %v1889_v30 = vld [vmem:[#allocation10 + $0x28] sm:$0xff] }
 0x847   :  { %9442 = vmatprep.subr.bf16.mxu0 %v12275_v51  ;;  %v12330_v39 = vpack.c.bf16 %v1889_v30, %v1886_v28 }
 0x848   :  { %9414 = vmatprep.subr.bf16.mxu1 %v9413_v45 }
 0x849   :  { %9416 = vmatpush3.bf16.msra.mxu1 %v9413_v45  ;;  %v1920_v45 = vld [vmem:[#allocation10 + $0x120] sm:$0xff] }
 0x84a   :  { %9444 = vmatpush1.bf16.msra.mxu0 %v12277_v59  ;;  %9418 = vmatprep.subr.bf16.mxu1 %v9417_v13  ;;  %v12307_v62 = vpack.c.bf16 %v1923_v53, %v1920_v45  ;;  %v1895_v45 = vld [vmem:[#allocation10 + $0x58] sm:$0xff]  ;;  %v1898_v53 = vld [vmem:[#allocation10 + $0x70] sm:$0xff] }
 0x84b   :  { %9446 = vmatprep.subr.bf16.mxu0 %v12281_v14 }
 0x84d   :  { %9420 = vmatpush3.bf16.msra.mxu1 %v9417_v13  ;;  %v1929_v13 = vld [vmem:[#allocation10 + $0x168] sm:$0xff] }
 0x84e   :  { %9448 = vmatpush1.bf16.msra.mxu0 %v12283_v29  ;;  %9422 = vmatprep.subr.bf16.mxu1 %v9421_v46  ;;  %v12314_v8 = vpack.c.bf16 %v1929_v13, %v1926_v5  ;;  %v1907_v5 = vld [vmem:[#allocation10 + $0xb8] sm:$0xff] }
 0x84f   :  { %9450 = vmatprep.subr.bf16.mxu0 %v12287_v55  ;;  %v12350_v13 = vpack.c.bf16 %v1907_v5, %v1904_v3 }
 0x851   :  { %9424 = vmatpush3.bf16.msra.mxu1 %v9421_v46 }
 0x852   :  { %9452 = vmatpush1.bf16.msra.mxu0 %v12289_v1  ;;  %9426 = vmatprep.subr.bf16.mxu1 %v9425_v12 }
 0x853   :  { %9454 = vmatprep.subr.bf16.mxu0 %v12293_v27 }
 0x855   :  { %9428 = vmatpush3.bf16.msra.mxu1 %v9425_v12 }
 0x856   :  { %9456 = vmatpush1.bf16.msra.mxu0 %v12295_v58  ;;  %9430 = vmatprep.subr.bf16.mxu1 %v9429_v10 }
 0x857   :  { %9458 = vmatprep.subr.bf16.mxu0 %v12298_v26 }
 0x859   :  { %9432 = vmatpush3.bf16.msra.mxu1 %v9429_v10 }
 0x85a   :  { %9460 = vmatpush1.bf16.msra.mxu0 %v12301_v40  ;;  %9434 = vmatprep.subr.bf16.mxu1 %v9433_v60 }
 0x85b   :  { %9462 = vmatprep.subr.bf16.mxu0 %v12304_v44 }
 0x85d   :  { %9436 = vmatpush3.bf16.msra.mxu1 %v9433_v60  ;;  %v1892_v60 = vld [vmem:[#allocation10 + $0x40] sm:$0xff] }
 0x85e   :  { %9464 = vmatpush1.bf16.msra.mxu0 %v12307_v62  ;;  %9469 = vmatprep.subr.bf16.mxu1 %v11550_v43 }
 0x85f   :  { %9466 = vmatprep.subr.bf16.mxu0 %v12312_v7 }
 0x862   :  { %9468 = vmatpush1.bf16.msra.mxu0 %v12314_v8 }
 0x863   :  { %9494 = vmatprep.subr.bf16.mxu0 %v12269_v35 }
 0x8f8   :  { %v1720_v9 = vpop.f32.mrb[14].mxu0  ;;  %v1791_v16 = vpop.f32.mrb[20].mxu1 }
 0x8f9   :  { %v1721_v25 = vadd.f32 %v1720_v9, %v11953_v54  ;;  %v1722_v36 = vpop.f32.mrb[15].mxu0  ;;  %v7936_v37 = vpop.f32.mrb[21].mxu1  ;;  %v1792_v54 = vadd.f32 %v1791_v16, %v11967_v22  ;;  %v1910_v9 = vld [vmem:[#allocation10 + $0xd0] sm:$0xff]  ;;  %v1913_v16 = vld [vmem:[#allocation10 + $0xe8] sm:$0xff] }
 0x8fa   :  { %v1723_v46 = vadd.f32 %v1722_v36, %v11956_v57  ;;  %v1916_v36 = vld [vmem:[#allocation10 + $0x100] sm:$0xff]  ;;  %v1919_v37 = vld [vmem:[#allocation10 + $0x118] sm:$0xff] }
 0x8fb   :  { %v1796_v47 = vrot.slane %v1721_v25, 2  ;;  %v1816_v23 = vrot.slane %v1792_v54, 2  ;;  %v12356_v25 = vpack.c.bf16 %v1913_v16, %v1910_v9 }
 0x8fc   :  { %v1806_v52 = vrot.slane %v1723_v46, 2  ;;  %v12362_v46 = vpack.c.bf16 %v1919_v37, %v1916_v36 }
 0x8fd   :  { %v1798_v56 = vadd.f32 %v1796_v47, %v11942_v42  ;;  %v1823_v42 = vrot.slane %v12255_v4, 6  ;;  %v1922_v47 = vld [vmem:[#allocation10 + $0x130] sm:$0xff] }
 0x8fe   :  { %v1808_v61 = vadd.f32 %v1806_v52, %v11945_v48  ;;  %v1925_v52 = vld [vmem:[#allocation10 + $0x148] sm:$0xff] }
 0x8ff   :  { %v6979_v2 = vmul.f32 -1.442695, %v1798_v56  ;;  %v12368_v56 = vpack.c.bf16 %v1925_v52, %v1922_v47 }
 0x900   :  { %v6980_v6 = vmul.f32 -1.442695, %v1808_v61  ;;  %v1928_v61 = vld [vmem:[#allocation10 + $0x160] sm:$0xff] }
 0x901   :  { %11029 = vpow2.f32 %v6979_v2  ;;  %v1931_v2 = vld [vmem:[#allocation10 + $0x178] sm:$0xff] }
 0x902   :  { %11031 = vpow2.f32 %v6980_v6  ;;  %v12374_v6 = vpack.c.bf16 %v1931_v2, %v1928_v61 }
 0x90b   :  { %v11030_v11 = vpop.eup %11029 }
 0x90c   :  { %v11032_v12 = vpop.eup %11031  ;;  %v1802_v17 = vadd.f32 1.0, %v11030_v11  ;;  %v1932_v11 = vld [vmem:[%s13749_s7] sm:$0x7] }
 0x90d   :  { %v1812_v20 = vadd.f32 1.0, %v11032_v12  ;;  %v1945_v12 = vrot.slane %v1932_v11, %v11938_v38 }
 0x90e   :  { %11033 = vrcp.f32 %v1802_v17  ;;  %v2101_v17 = vld [vmem:[%s13750_s8] sm:$0x7] }
 0x90f   :  { %11035 = vrcp.f32 %v1812_v20  ;;  %v12442_v5 = vrot.slane %v2101_v17, %v11938_v38 }
 0x918   :  { %v11034_v57 = vpop.eup %11033  ;;  %v12324_v18 = vpop.f32.mrb[16].mxu0 }
 0x919   :  { %v11036_v19 = vpop.eup %11035  ;;  %v1818_v48 = vmul.f32 %v11034_v57, %v1816_v23  ;;  %v12327_v32 = vpop.f32.mrb[17].mxu0  ;;  %v12414_v23 = vrot.slane %v1932_v11, %v11931_v31 }
 0x91a   :  { %v1825_v10 = vmul.f32 %v11036_v19, %v1823_v42  ;;  %v1821_v21 = vsub.f32 1.0, %v11036_v19 }
 0x91b   :  { %v1819_v15 = vadd.f32 %v1818_v48, %v11947_v50  ;;  %v12336_v50 = vpack.c.bf16 %v1895_v45, %v1892_v60  ;;  %v12421_v48 = vrot.slane %v2101_v17, %v11931_v31 }
 0x91d   :  { %11037 = vtanh.f32 %v1819_v15  ;;  %v12427_v15 = vrot.slane %v1932_v11, %v11936_v34 }
 0x91f   :  { %v12438_v60 = vadd.f32 %v12327_v32, %v12427_v15 }
 0x927   :  { %v11038_v24 = vpop.eup %11037 }
 0x928   :  { %v1822_v33 = vmul.f32 %v11038_v24, %v1821_v21  ;;  %v12431_v24 = vadd.f32 %v12324_v18, %v12414_v23 }
 0x92a   :  { %v1826_v22 = vadd.f32 %v1825_v10, %v1822_v33  ;;  %v12424_v10 = vrot.slane %v2101_v17, %v11936_v34 }
 0x92c   :  { %v1835_v4 = vsel %vm1831_vm4, %v12263_v49, %v1826_v22  ;;  %v12343_v49 = vpack.c.bf16 %v1901_v63, %v1898_v53 }
 0x92d   :  { %2020 = vmatmul.mubr.f32.gmra.mrb[18].mxu0 %v1835_v4  ;;  %7970 = vmatmul.mubr.f32.vlgmr.msra.gmra.mrb[22].mxu1 %v1835_v4 }
 0x92e   :  { %9471 = vmatpush3.bf16.msra.mxu1 %v12330_v39  ;;  %2182 = vmatprep.mubr.f32.mxu0 %v11549_v0 }
 0x92f   :  { %9472 = vmatprep.subr.bf16.mxu1 %v11550_v43  ;;  %8004 = vmatprep.mubr.msk.f32.mxu1 %vm11551_vm1, %v11549_v0 }
 0x931   :  { %2183 = vmatmul.mubr.f32.vlgmr.msra.gmra.mrb[20].mxu0 %v11549_v0 }
 0x932   :  { %9474 = vmatpush3.bf16.msra.mxu1 %v12336_v50  ;;  %9496 = vmatpush1.bf16.msra.mxu0 %v12271_v41 }
 0x933   :  { %9475 = vmatprep.subr.bf16.mxu1 %v11550_v43  ;;  %9498 = vmatprep.subr.bf16.mxu0 %v12275_v51 }
 0x934   :  { %2344 = vmatprep.mubr.f32.mxu0 %v11549_v0 }
 0x936   :  { %9477 = vmatpush3.bf16.msra.mxu1 %v12343_v49  ;;  %9500 = vmatpush1.bf16.msra.mxu0 %v12277_v59 }
 0x937   :  { %9478 = vmatprep.subr.bf16.mxu1 %v11550_v43  ;;  %9502 = vmatprep.subr.bf16.mxu0 %v12281_v14 }
 0x93a   :  { %9480 = vmatpush3.bf16.msra.mxu1 %v12350_v13  ;;  %9504 = vmatpush1.bf16.msra.mxu0 %v12283_v29 }
 0x93b   :  { %9481 = vmatprep.subr.bf16.mxu1 %v11550_v43  ;;  %9506 = vmatprep.subr.bf16.mxu0 %v12287_v55 }
 0x93e   :  { %9483 = vmatpush3.bf16.msra.mxu1 %v12356_v25  ;;  %9508 = vmatpush1.bf16.msra.mxu0 %v12289_v1 }
 0x93f   :  { %9484 = vmatprep.subr.bf16.mxu1 %v11550_v43  ;;  %9510 = vmatprep.subr.bf16.mxu0 %v12293_v27 }
 0x942   :  { %9486 = vmatpush3.bf16.msra.mxu1 %v12362_v46  ;;  %9512 = vmatpush1.bf16.msra.mxu0 %v12295_v58 }
 0x943   :  { %9487 = vmatprep.subr.bf16.mxu1 %v11550_v43  ;;  %9514 = vmatprep.subr.bf16.mxu0 %v12298_v26 }
 0x946   :  { %9489 = vmatpush3.bf16.msra.mxu1 %v12368_v56  ;;  %9516 = vmatpush1.bf16.msra.mxu0 %v12301_v40 }
 0x947   :  { %9490 = vmatprep.subr.bf16.mxu1 %v11550_v43  ;;  %9518 = vmatprep.subr.bf16.mxu0 %v12304_v44 }
 0x94a   :  { %9492 = vmatpush3.bf16.msra.mxu1 %v12374_v6  ;;  %9520 = vmatpush1.bf16.msra.mxu0 %v12307_v62 }
 0x94b   :  { %9525 = vmatprep.subr.bf16.mxu1 %v11550_v43  ;;  %9522 = vmatprep.subr.bf16.mxu0 %v12312_v7 }
 0x94d   :  { %8005 = vmatmul.mubr.f32.vlgmr.msra.gmra.mrb[24].mxu1 %v11549_v0 }
 0x94e   :  { %9527 = vmatpush3.bf16.msra.mxu1 %v12330_v39  ;;  %9524 = vmatpush1.bf16.msra.mxu0 %v12314_v8 }
 0x94f   :  { %9528 = vmatprep.subr.bf16.mxu1 %v11550_v43  ;;  %8039 = vmatprep.mubr.msk.f32.mxu1 %vm11551_vm1, %v11549_v0 }
 0x950   :  { %9550 = vmatprep.subr.bf16.mxu0 %v12269_v35 }
 0x952   :  { %9530 = vmatpush3.bf16.msra.mxu1 %v12336_v50 }
 0x953   :  { %9531 = vmatprep.subr.bf16.mxu1 %v11550_v43 }
 0x956   :  { %9533 = vmatpush3.bf16.msra.mxu1 %v12343_v49 }
 0x957   :  { %9534 = vmatprep.subr.bf16.mxu1 %v11550_v43 }
 0x95a   :  { %9536 = vmatpush3.bf16.msra.mxu1 %v12350_v13 }
 0x95b   :  { %9537 = vmatprep.subr.bf16.mxu1 %v11550_v43 }
 0x95e   :  { %9539 = vmatpush3.bf16.msra.mxu1 %v12356_v25 }
 0x95f   :  { %9540 = vmatprep.subr.bf16.mxu1 %v11550_v43 }
 0x962   :  { %9542 = vmatpush3.bf16.msra.mxu1 %v12362_v46 }
 0x963   :  { %9543 = vmatprep.subr.bf16.mxu1 %v11550_v43 }
 0x966   :  { %9545 = vmatpush3.bf16.msra.mxu1 %v12368_v56 }
 0x967   :  { %9546 = vmatprep.subr.bf16.mxu1 %v11550_v43 }
 0x96a   :  { %9548 = vmatpush3.bf16.msra.mxu1 %v12374_v6 }
 0x96b   :  { %9581 = vmatprep.subr.bf16.mxu1 %v11550_v43 }
 0xa00   :  { %v12411_v20 = vpop.f32.mrb[18].mxu0  ;;  %v7971_v54 = vpop.f32.mrb[22].mxu1 }
 0xa01   :  { %v12416_v57 = vadd.f32 %v7971_v54, %v1945_v12  ;;  %v12418_v42 = vpop.f32.mrb[19].mxu0  ;;  %v2092_v19 = vpop.f32.mrb[23].mxu1 }
 0xa02   :  { %v12445_v47 = vadd.f32 %v2092_v19, %v1945_v12 }
 0xa04   :  { %v2184_v21 = vpop.f32.mrb[20].mxu0 }
 0xa05   :  { %v2185_v28 = vadd.f32 %v2184_v21, %v12421_v48  ;;  %v2186_v30 = vpop.f32.mrb[21].mxu0 }
 0xa06   :  { %v2187_v33 = vadd.f32 %v2186_v30, %v12424_v10 }
 0xa07   :  { %v2259_v22 = vadd.f32 %v2185_v28, %v12431_v24 }
 0xa08   :  { %v2266_v4 = vadd.f32 %v2187_v33, %v12438_v60 }
 0xa09   :  { %v6981_v45 = vmul.f32 -1.442695, %v2259_v22 }
 0xa0a   :  { %v6982_v53 = vmul.f32 -1.442695, %v2266_v4 }
 0xa0b   :  { %11039 = vpow2.f32 %v6981_v45 }
 0xa0c   :  { %11041 = vpow2.f32 %v6982_v53 }
 0xa15   :  { %v11040_v63 = vpop.eup %11039 }
 0xa16   :  { %v2263_v18 = vadd.f32 1.0, %v11040_v63  ;;  %v11042_v3 = vpop.eup %11041 }
 0xa17   :  { %v2270_v9 = vadd.f32 1.0, %v11042_v3 }
 0xa18   :  { %11043 = vrcp.f32 %v2263_v18 }
 0xa19   :  { %11045 = vrcp.f32 %v2270_v9 }
 0xa20   :  { %v2255_v16 = vpop.f32.mrb[24].mxu1 }
 0xa21   :  { %v2256_v36 = vadd.f32 %v2255_v16, %v12442_v5  ;;  %v8006_v37 = vpop.f32.mrb[25].mxu1 }
 0xa22   :  { %v11044_v32 = vpop.eup %11043 }
 0xa23   :  { %v2273_v52 = vmul.f32 %v11044_v32, %v2256_v36  ;;  %v11046_v2 = vpop.eup %11045 }
 0xa24   :  { %v2276_v11 = vsub.f32 1.0, %v11046_v2  ;;  %v2278_v28 = vmul.f32 0.0, %v11046_v2 }
 0xa25   :  { %v2274_v61 = vadd.f32 %v2273_v52, %v12445_v47 }
 0xa27   :  { %11047 = vtanh.f32 %v2274_v61 }
 0xa31   :  { %v11048_v54 = vpop.eup %11047 }
 0xa32   :  { %v2277_v21 = vmul.f32 %v11048_v54, %v2276_v11 }
 0xa34   :  { %v12448_v17 = vadd.f32 %v2278_v28, %v2277_v21 }
 0xa36   :  { %2345 = vmatmul.mubr.f32.vlgmr.msra.gmra.mrb[22].mxu0 %v12448_v17  ;;  %8040 = vmatmul.mubr.f32.vlgmr.msra.gmra.mrb[26].mxu1 %v12448_v17  ;;  %v2450_v28 = vrot.slane %v12448_v17, 6 }
 0xa37   :  { %9552 = vmatpush1.bf16.msra.mxu0 %v12271_v41  ;;  %9583 = vmatpush3.bf16.msra.mxu1 %v12330_v39 }
 0xa38   :  { %9554 = vmatprep.subr.bf16.mxu0 %v12275_v51  ;;  %9584 = vmatprep.subr.bf16.mxu1 %v11550_v43 }
 0xa39   :  { %2521 = vmatprep.mubr.f32.mxu0 %v11549_v0  ;;  %8074 = vmatprep.mubr.msk.f32.mxu1 %vm11551_vm1, %v11549_v0 }
 0xa3b   :  { %9556 = vmatpush1.bf16.msra.mxu0 %v12277_v59  ;;  %9586 = vmatpush3.bf16.msra.mxu1 %v12336_v50 }
 0xa3c   :  { %9558 = vmatprep.subr.bf16.mxu0 %v12281_v14  ;;  %9587 = vmatprep.subr.bf16.mxu1 %v11550_v43 }
 0xa3f   :  { %9560 = vmatpush1.bf16.msra.mxu0 %v12283_v29  ;;  %9589 = vmatpush3.bf16.msra.mxu1 %v12343_v49 }
 0xa40   :  { %9562 = vmatprep.subr.bf16.mxu0 %v12287_v55  ;;  %9590 = vmatprep.subr.bf16.mxu1 %v11550_v43 }
 0xa43   :  { %9564 = vmatpush1.bf16.msra.mxu0 %v12289_v1  ;;  %9592 = vmatpush3.bf16.msra.mxu1 %v12350_v13 }
 0xa44   :  { %9566 = vmatprep.subr.bf16.mxu0 %v12293_v27  ;;  %9593 = vmatprep.subr.bf16.mxu1 %v11550_v43 }
 0xa47   :  { %9568 = vmatpush1.bf16.msra.mxu0 %v12295_v58  ;;  %9595 = vmatpush3.bf16.msra.mxu1 %v12356_v25 }
 0xa48   :  { %9570 = vmatprep.subr.bf16.mxu0 %v12298_v26  ;;  %9596 = vmatprep.subr.bf16.mxu1 %v11550_v43 }
 0xa4b   :  { %9572 = vmatpush1.bf16.msra.mxu0 %v12301_v40  ;;  %9598 = vmatpush3.bf16.msra.mxu1 %v12362_v46 }
 0xa4c   :  { %9574 = vmatprep.subr.bf16.mxu0 %v12304_v44  ;;  %9599 = vmatprep.subr.bf16.mxu1 %v11550_v43 }
 0xa4f   :  { %9576 = vmatpush1.bf16.msra.mxu0 %v12307_v62  ;;  %9601 = vmatpush3.bf16.msra.mxu1 %v12368_v56 }
 0xa50   :  { %9578 = vmatprep.subr.bf16.mxu0 %v12312_v7  ;;  %9602 = vmatprep.subr.bf16.mxu1 %v11550_v43 }
 0xa53   :  { %9580 = vmatpush1.bf16.msra.mxu0 %v12314_v8  ;;  %9604 = vmatpush3.bf16.msra.mxu1 %v12374_v6 }
 0xa54   :  { %9606 = vmatprep.subr.bf16.mxu0 %v12269_v35  ;;  %9637 = vmatprep.subr.bf16.mxu1 %v11550_v43 }
 0xb09   :  { %v2346_v12 = vpop.f32.mrb[22].mxu0  ;;  %v2417_v19 = vpop.f32.mrb[26].mxu1 }
 0xb0a   :  { %v2347_v30 = vadd.f32 %v2346_v12, %v12421_v48  ;;  %v2348_v33 = vpop.f32.mrb[23].mxu0  ;;  %v8041_v22 = vpop.f32.mrb[27].mxu1  ;;  %v2418_v32 = vadd.f32 %v2417_v19, %v12442_v5 }
 0xb0b   :  { %v2349_v45 = vadd.f32 %v2348_v33, %v12424_v10 }
 0xb0c   :  { %v2422_v4 = vrot.slane %v2347_v30, 6  ;;  %v2442_v61 = vrot.slane %v2418_v32, 6 }
 0xb0d   :  { %v2432_v53 = vrot.slane %v2349_v45, 6 }
 0xb0e   :  { %v2424_v63 = vadd.f32 %v2422_v4, %v12431_v24 }
 0xb0f   :  { %v2434_v3 = vadd.f32 %v2432_v53, %v12438_v60 }
 0xb10   :  { %v6983_v18 = vmul.f32 -1.442695, %v2424_v63 }
 0xb11   :  { %v6984_v9 = vmul.f32 -1.442695, %v2434_v3 }
 0xb12   :  { %11049 = vpow2.f32 %v6983_v18 }
 0xb13   :  { %11051 = vpow2.f32 %v6984_v9 }
 0xb1c   :  { %v11050_v16 = vpop.eup %11049 }
 0xb1d   :  { %v2428_v36 = vadd.f32 1.0, %v11050_v16  ;;  %v11052_v37 = vpop.eup %11051 }
 0xb1e   :  { %v2438_v52 = vadd.f32 1.0, %v11052_v37 }
 0xb1f   :  { %11053 = vrcp.f32 %v2428_v36 }
 0xb20   :  { %11055 = vrcp.f32 %v2438_v52 }
 0xb29   :  { %v11054_v2 = vpop.eup %11053 }
 0xb2a   :  { %v2444_v11 = vmul.f32 %v11054_v2, %v2442_v61  ;;  %v11056_v21 = vpop.eup %11055 }
 0xb2b   :  { %v2447_v12 = vsub.f32 1.0, %v11056_v21  ;;  %v2452_v22 = vmul.f32 %v11056_v21, %v2450_v28 }
 0xb2c   :  { %v2445_v54 = vadd.f32 %v2444_v11, %v12445_v47 }
 0xb2e   :  { %11057 = vtanh.f32 %v2445_v54 }
 0xb38   :  { %v11058_v30 = vpop.eup %11057 }
 0xb39   :  { %v2448_v33 = vmul.f32 %v11058_v30, %v2447_v12 }
 0xb3b   :  { %v12494_v45 = vadd.f32 %v2452_v22, %v2448_v33 }
 0xb3d   :  { %v2455_v4 = vrot.slane %v12494_v45, 2  ;;  %v2626_v33 = vrot.slane %v12494_v45, 6 }
 0xb3f   :  { %2522 = vmatmul.mubr.f32.vlgmr.msra.gmra.mrb[24].mxu0 %v2455_v4  ;;  %8075 = vmatmul.mubr.f32.vlgmr.msra.gmra.mrb[28].mxu1 %v2455_v4 }
 0xb40   :  { %9608 = vmatpush1.bf16.msra.mxu0 %v12271_v41  ;;  %9639 = vmatpush3.bf16.msra.mxu1 %v12330_v39 }
 0xb41   :  { %9610 = vmatprep.subr.bf16.mxu0 %v12275_v51  ;;  %9640 = vmatprep.subr.bf16.mxu1 %v11550_v43 }
 0xb42   :  { %2697 = vmatprep.mubr.f32.mxu0 %v11549_v0  ;;  %8109 = vmatprep.mubr.msk.f32.mxu1 %vm11551_vm1, %v11549_v0 }
 0xb44   :  { %9612 = vmatpush1.bf16.msra.mxu0 %v12277_v59  ;;  %9642 = vmatpush3.bf16.msra.mxu1 %v12336_v50 }
 0xb45   :  { %9614 = vmatprep.subr.bf16.mxu0 %v12281_v14  ;;  %9643 = vmatprep.subr.bf16.mxu1 %v11550_v43 }
 0xb48   :  { %9616 = vmatpush1.bf16.msra.mxu0 %v12283_v29  ;;  %9645 = vmatpush3.bf16.msra.mxu1 %v12343_v49 }
 0xb49   :  { %9618 = vmatprep.subr.bf16.mxu0 %v12287_v55  ;;  %9646 = vmatprep.subr.bf16.mxu1 %v11550_v43 }
 0xb4c   :  { %9620 = vmatpush1.bf16.msra.mxu0 %v12289_v1  ;;  %9648 = vmatpush3.bf16.msra.mxu1 %v12350_v13 }
 0xb4d   :  { %9622 = vmatprep.subr.bf16.mxu0 %v12293_v27  ;;  %9649 = vmatprep.subr.bf16.mxu1 %v11550_v43 }
 0xb50   :  { %9624 = vmatpush1.bf16.msra.mxu0 %v12295_v58  ;;  %9651 = vmatpush3.bf16.msra.mxu1 %v12356_v25 }
 0xb51   :  { %9626 = vmatprep.subr.bf16.mxu0 %v12298_v26  ;;  %9652 = vmatprep.subr.bf16.mxu1 %v11550_v43 }
 0xb54   :  { %9628 = vmatpush1.bf16.msra.mxu0 %v12301_v40  ;;  %9654 = vmatpush3.bf16.msra.mxu1 %v12362_v46 }
 0xb55   :  { %9630 = vmatprep.subr.bf16.mxu0 %v12304_v44  ;;  %9655 = vmatprep.subr.bf16.mxu1 %v11550_v43 }
 0xb58   :  { %9632 = vmatpush1.bf16.msra.mxu0 %v12307_v62  ;;  %9657 = vmatpush3.bf16.msra.mxu1 %v12368_v56 }
 0xb59   :  { %9634 = vmatprep.subr.bf16.mxu0 %v12312_v7  ;;  %9658 = vmatprep.subr.bf16.mxu1 %v11550_v43 }
 0xb5c   :  { %9636 = vmatpush1.bf16.msra.mxu0 %v12314_v8  ;;  %9660 = vmatpush3.bf16.msra.mxu1 %v12374_v6 }
 0xb5d   :  { %9662 = vmatprep.subr.bf16.mxu0 %v12269_v35  ;;  %9693 = vmatprep.subr.bf16.mxu1 %v11550_v43 }
 0xc12   :  { %v2523_v19 = vpop.f32.mrb[24].mxu0  ;;  %v2594_v53 = vpop.f32.mrb[28].mxu1 }
 0xc13   :  { %v2524_v63 = vadd.f32 %v2523_v19, %v12421_v48  ;;  %v2525_v18 = vpop.f32.mrb[25].mxu0  ;;  %v8076_v3 = vpop.f32.mrb[29].mxu1  ;;  %v2595_v28 = vadd.f32 %v2594_v53, %v12442_v5 }
 0xc14   :  { %v2526_v9 = vadd.f32 %v2525_v18, %v12424_v10 }
 0xc15   :  { %v2599_v16 = vrot.slane %v2524_v63, 4  ;;  %v2619_v12 = vrot.slane %v2595_v28, 4 }
 0xc16   :  { %v2609_v36 = vrot.slane %v2526_v9, 4 }
 0xc17   :  { %v2601_v37 = vadd.f32 %v2599_v16, %v12431_v24 }
 0xc18   :  { %v2611_v32 = vadd.f32 %v2609_v36, %v12438_v60  ;;  %v3497_v36 = vsel %vm1827_vm2, %v12448_v17, %v12494_v45 }
 0xc19   :  { %v6985_v52 = vmul.f32 -1.442695, %v2601_v37 }
 0xc1a   :  { %v6986_v61 = vmul.f32 -1.442695, %v2611_v32 }
 0xc1b   :  { %11059 = vpow2.f32 %v6985_v52 }
 0xc1c   :  { %11061 = vpow2.f32 %v6986_v61 }
 0xc25   :  { %v11060_v2 = vpop.eup %11059 }
 0xc26   :  { %v11062_v11 = vpop.eup %11061  ;;  %v2605_v54 = vadd.f32 1.0, %v11060_v2 }
 0xc27   :  { %v2615_v21 = vadd.f32 1.0, %v11062_v11 }
 0xc28   :  { %11063 = vrcp.f32 %v2605_v54 }
 0xc29   :  { %11065 = vrcp.f32 %v2615_v21 }
 0xc32   :  { %v11064_v30 = vpop.eup %11063 }
 0xc33   :  { %v11066_v22 = vpop.eup %11065  ;;  %v2621_v4 = vmul.f32 %v11064_v30, %v2619_v12 }
 0xc34   :  { %v2628_v19 = vmul.f32 %v11066_v22, %v2626_v33  ;;  %v2624_v18 = vsub.f32 1.0, %v11066_v22 }
 0xc35   :  { %v2622_v63 = vadd.f32 %v2621_v4, %v12445_v47 }
 0xc37   :  { %11067 = vtanh.f32 %v2622_v63 }
 0xc41   :  { %v11068_v3 = vpop.eup %11067 }
 0xc42   :  { %v2625_v9 = vmul.f32 %v11068_v3, %v2624_v18 }
 0xc44   :  { %v12539_v16 = vadd.f32 %v2628_v19, %v2625_v9 }
 0xc46   :  { %v2631_v53 = vrot.slane %v12539_v16, 4  ;;  %v12547_v37 = vsel %vm1829_vm3, %v3497_v36, %v12539_v16  ;;  %v2802_v9 = vrot.slane %v12539_v16, 6 }
 0xc48   :  { %2698 = vmatmul.mubr.f32.vlgmr.msra.gmra.mrb[26].mxu0 %v2631_v53  ;;  %8110 = vmatmul.mubr.f32.vlgmr.msra.gmra.mrb[30].mxu1 %v2631_v53 }
 0xc49   :  { %9664 = vmatpush1.bf16.msra.mxu0 %v12271_v41  ;;  %9695 = vmatpush3.bf16.msra.mxu1 %v12330_v39 }
 0xc4a   :  { %9666 = vmatprep.subr.bf16.mxu0 %v12275_v51  ;;  %9696 = vmatprep.subr.bf16.mxu1 %v11550_v43 }
 0xc4b   :  { %2873 = vmatprep.mubr.f32.mxu0 %v11549_v0  ;;  %8144 = vmatprep.mubr.msk.f32.mxu1 %vm11551_vm1, %v11549_v0 }
 0xc4d   :  { %9668 = vmatpush1.bf16.msra.mxu0 %v12277_v59  ;;  %9698 = vmatpush3.bf16.msra.mxu1 %v12336_v50 }
 0xc4e   :  { %9670 = vmatprep.subr.bf16.mxu0 %v12281_v14  ;;  %9699 = vmatprep.subr.bf16.mxu1 %v11550_v43 }
 0xc51   :  { %9672 = vmatpush1.bf16.msra.mxu0 %v12283_v29  ;;  %9701 = vmatpush3.bf16.msra.mxu1 %v12343_v49 }
 0xc52   :  { %9674 = vmatprep.subr.bf16.mxu0 %v12287_v55  ;;  %9702 = vmatprep.subr.bf16.mxu1 %v11550_v43 }
 0xc55   :  { %9676 = vmatpush1.bf16.msra.mxu0 %v12289_v1  ;;  %9704 = vmatpush3.bf16.msra.mxu1 %v12350_v13 }
 0xc56   :  { %9678 = vmatprep.subr.bf16.mxu0 %v12293_v27  ;;  %9705 = vmatprep.subr.bf16.mxu1 %v11550_v43 }
 0xc59   :  { %9680 = vmatpush1.bf16.msra.mxu0 %v12295_v58  ;;  %9707 = vmatpush3.bf16.msra.mxu1 %v12356_v25 }
 0xc5a   :  { %9682 = vmatprep.subr.bf16.mxu0 %v12298_v26  ;;  %9708 = vmatprep.subr.bf16.mxu1 %v11550_v43 }
 0xc5d   :  { %9684 = vmatpush1.bf16.msra.mxu0 %v12301_v40  ;;  %9710 = vmatpush3.bf16.msra.mxu1 %v12362_v46 }
 0xc5e   :  { %9686 = vmatprep.subr.bf16.mxu0 %v12304_v44  ;;  %9711 = vmatprep.subr.bf16.mxu1 %v11550_v43 }
 0xc61   :  { %9688 = vmatpush1.bf16.msra.mxu0 %v12307_v62  ;;  %9713 = vmatpush3.bf16.msra.mxu1 %v12368_v56 }
 0xc62   :  { %9690 = vmatprep.subr.bf16.mxu0 %v12312_v7  ;;  %9714 = vmatprep.subr.bf16.mxu1 %v11550_v43 }
 0xc65   :  { %9692 = vmatpush1.bf16.msra.mxu0 %v12314_v8  ;;  %9716 = vmatpush3.bf16.msra.mxu1 %v12374_v6 }
 0xc66   :  { %9718 = vmatprep.subr.bf16.mxu0 %v12269_v35  ;;  %9749 = vmatprep.subr.bf16.mxu1 %v11550_v43 }
 0xd1b   :  { %v2699_v17 = vpop.f32.mrb[26].mxu0  ;;  %v2770_v45 = vpop.f32.mrb[30].mxu1 }
 0xd1c   :  { %v2700_v32 = vadd.f32 %v2699_v17, %v12421_v48  ;;  %v2701_v52 = vpop.f32.mrb[27].mxu0  ;;  %v8111_v61 = vpop.f32.mrb[31].mxu1  ;;  %v2771_v63 = vadd.f32 %v2770_v45, %v12442_v5 }
 0xd1d   :  { %v2702_v2 = vadd.f32 %v2701_v52, %v12424_v10 }
 0xd1e   :  { %v2775_v11 = vrot.slane %v2700_v32, 2  ;;  %v2795_v18 = vrot.slane %v2771_v63, 2 }
 0xd1f   :  { %v2785_v54 = vrot.slane %v2702_v2, 2 }
 0xd20   :  { %v2777_v21 = vadd.f32 %v2775_v11, %v12431_v24 }
 0xd21   :  { %v2787_v28 = vadd.f32 %v2785_v54, %v12438_v60 }
 0xd22   :  { %v6987_v12 = vmul.f32 -1.442695, %v2777_v21 }
 0xd23   :  { %v6988_v30 = vmul.f32 -1.442695, %v2787_v28 }
 0xd24   :  { %11069 = vpow2.f32 %v6987_v12 }
 0xd25   :  { %11071 = vpow2.f32 %v6988_v30  ;;  %v12643_v30 = vadd.f32 %v12418_v42, %v12427_v15 }
 0xd2e   :  { %v11070_v33 = vpop.eup %11069 }
 0xd2f   :  { %v11072_v22 = vpop.eup %11071  ;;  %v2781_v4 = vadd.f32 1.0, %v11070_v33 }
 0xd30   :  { %v2791_v19 = vadd.f32 1.0, %v11072_v22 }
 0xd31   :  { %11073 = vrcp.f32 %v2781_v4 }
 0xd32   :  { %11075 = vrcp.f32 %v2791_v19 }
 0xd3b   :  { %v11074_v3 = vpop.eup %11073 }
 0xd3c   :  { %v11076_v36 = vpop.eup %11075  ;;  %v2797_v24 = vmul.f32 %v11074_v3, %v2795_v18 }
 0xd3d   :  { %v2804_v53 = vmul.f32 %v11076_v36, %v2802_v9  ;;  %v2800_v17 = vsub.f32 1.0, %v11076_v36 }
 0xd3e   :  { %v2798_v60 = vadd.f32 %v2797_v24, %v12445_v47 }
 0xd40   :  { %11077 = vtanh.f32 %v2798_v60 }
 0xd4a   :  { %v11078_v32 = vpop.eup %11077 }
 0xd4b   :  { %v2801_v52 = vmul.f32 %v11078_v32, %v2800_v17 }
 0xd4d   :  { %v2805_v61 = vadd.f32 %v2804_v53, %v2801_v52 }
 0xd4f   :  { %v12591_v2 = vrot.slane %v2805_v61, 6  ;;  %v12595_v11 = vsel %vm1831_vm4, %v12547_v37, %v2805_v61  ;;  %v12636_v37 = vadd.f32 %v12411_v20, %v12414_v23 }
 0xd51   :  { %2874 = vmatmul.mubr.f32.vlgmr.msra.gmra.mrb[28].mxu0 %v12591_v2  ;;  %8145 = vmatmul.mubr.f32.vlgmr.msra.gmra.mrb[32].mxu1 %v12591_v2 }
 0xd52   :  { %9720 = vmatpush1.bf16.msra.mxu0 %v12271_v41  ;;  %9751 = vmatpush3.bf16.msra.mxu1 %v12330_v39 }
 0xd53   :  { %9722 = vmatprep.subr.bf16.mxu0 %v12275_v51  ;;  %9752 = vmatprep.subr.bf16.mxu1 %v11550_v43 }
 0xd54   :  { %3035 = vmatprep.mubr.f32.mxu0 %v11549_v0  ;;  %8179 = vmatprep.mubr.msk.f32.mxu1 %vm11551_vm1, %v11549_v0 }
 0xd56   :  { %9724 = vmatpush1.bf16.msra.mxu0 %v12277_v59  ;;  %9754 = vmatpush3.bf16.msra.mxu1 %v12336_v50 }
 0xd57   :  { %9726 = vmatprep.subr.bf16.mxu0 %v12281_v14  ;;  %9755 = vmatprep.subr.bf16.mxu1 %v11550_v43 }
 0xd5a   :  { %9728 = vmatpush1.bf16.msra.mxu0 %v12283_v29  ;;  %9757 = vmatpush3.bf16.msra.mxu1 %v12343_v49 }
 0xd5b   :  { %9730 = vmatprep.subr.bf16.mxu0 %v12287_v55  ;;  %9758 = vmatprep.subr.bf16.mxu1 %v11550_v43 }
 0xd5e   :  { %9732 = vmatpush1.bf16.msra.mxu0 %v12289_v1  ;;  %9760 = vmatpush3.bf16.msra.mxu1 %v12350_v13 }
 0xd5f   :  { %9734 = vmatprep.subr.bf16.mxu0 %v12293_v27  ;;  %9761 = vmatprep.subr.bf16.mxu1 %v11550_v43 }
 0xd62   :  { %9736 = vmatpush1.bf16.msra.mxu0 %v12295_v58  ;;  %9763 = vmatpush3.bf16.msra.mxu1 %v12356_v25 }
 0xd63   :  { %9738 = vmatprep.subr.bf16.mxu0 %v12298_v26  ;;  %9764 = vmatprep.subr.bf16.mxu1 %v11550_v43 }
 0xd66   :  { %9740 = vmatpush1.bf16.msra.mxu0 %v12301_v40  ;;  %9766 = vmatpush3.bf16.msra.mxu1 %v12362_v46 }
 0xd67   :  { %9742 = vmatprep.subr.bf16.mxu0 %v12304_v44  ;;  %9767 = vmatprep.subr.bf16.mxu1 %v11550_v43 }
 0xd6a   :  { %9744 = vmatpush1.bf16.msra.mxu0 %v12307_v62  ;;  %9769 = vmatpush3.bf16.msra.mxu1 %v12368_v56 }
 0xd6b   :  { %9746 = vmatprep.subr.bf16.mxu0 %v12312_v7  ;;  %9770 = vmatprep.subr.bf16.mxu1 %v11550_v43 }
 0xd6e   :  { %9748 = vmatpush1.bf16.msra.mxu0 %v12314_v8  ;;  %9772 = vmatpush3.bf16.msra.mxu1 %v12374_v6 }
 0xd6f   :  { %9774 = vmatprep.subr.bf16.mxu0 %v12269_v35  ;;  %9805 = vmatprep.subr.bf16.mxu1 %v11550_v43 }
 0xe24   :  { %v2875_v47 = vpop.f32.mrb[28].mxu0  ;;  %v2946_v16 = vpop.f32.mrb[32].mxu1 }
 0xe25   :  { %v2876_v45 = vadd.f32 %v2875_v47, %v12421_v48  ;;  %v2877_v54 = vpop.f32.mrb[29].mxu0  ;;  %v8146_v21 = vpop.f32.mrb[33].mxu1  ;;  %v2947_v18 = vadd.f32 %v2946_v16, %v12442_v5 }
 0xe26   :  { %v2878_v28 = vadd.f32 %v2877_v54, %v12424_v10 }
 0xe27   :  { %v2950_v12 = vadd.f32 %v2876_v45, %v12636_v37 }
 0xe28   :  { %v2957_v22 = vadd.f32 %v2878_v28, %v12643_v30 }
 0xe29   :  { %v6989_v33 = vmul.f32 -1.442695, %v2950_v12 }
 0xe2a   :  { %v6990_v4 = vmul.f32 -1.442695, %v2957_v22 }
 0xe2b   :  { %11079 = vpow2.f32 %v6989_v33 }
 0xe2c   :  { %11081 = vpow2.f32 %v6990_v4 }
 0xe35   :  { %v11080_v20 = vpop.eup %11079 }
 0xe36   :  { %v2954_v23 = vadd.f32 1.0, %v11080_v20  ;;  %v11082_v19 = vpop.eup %11081 }
 0xe37   :  { %v2961_v63 = vadd.f32 1.0, %v11082_v19 }
 0xe38   :  { %11083 = vrcp.f32 %v2954_v23 }
 0xe39   :  { %11085 = vrcp.f32 %v2961_v63 }
 0xe42   :  { %v11084_v3 = vpop.eup %11083 }
 0xe43   :  { %v2964_v9 = vmul.f32 %v11084_v3, %v2947_v18  ;;  %v11086_v42 = vpop.eup %11085 }
 0xe44   :  { %v2967_v15 = vsub.f32 1.0, %v11086_v42  ;;  %v2969_v60 = vmul.f32 %v11086_v42, %v12591_v2 }
 0xe45   :  { %v2965_v36 = vadd.f32 %v2964_v9, %v12416_v57 }
 0xe47   :  { %11087 = vtanh.f32 %v2965_v36 }
 0xe51   :  { %v11088_v24 = vpop.eup %11087 }
 0xe52   :  { %v2968_v53 = vmul.f32 %v11088_v24, %v2967_v15 }
 0xe54   :  { %v12649_v17 = vadd.f32 %v2969_v60, %v2968_v53 }
 0xe56   :  { %3036 = vmatmul.mubr.f32.vlgmr.msra.gmra.mrb[30].mxu0 %v12649_v17  ;;  %8180 = vmatmul.mubr.f32.vlgmr.msra.gmra.mrb[34].mxu1 %v12649_v17  ;;  %v3141_v36 = vrot.slane %v12649_v17, 6 }
 0xe57   :  { %9776 = vmatpush1.bf16.msra.mxu0 %v12271_v41  ;;  %9807 = vmatpush3.bf16.msra.mxu1 %v12330_v39 }
 0xe58   :  { %9778 = vmatprep.subr.bf16.mxu0 %v12275_v51  ;;  %9808 = vmatprep.subr.bf16.mxu1 %v11550_v43 }
 0xe59   :  { %3212 = vmatprep.mubr.f32.mxu0 %v11549_v0  ;;  %8214 = vmatprep.mubr.msk.f32.mxu1 %vm11551_vm1, %v11549_v0 }
 0xe5b   :  { %9780 = vmatpush1.bf16.msra.mxu0 %v12277_v59  ;;  %9810 = vmatpush3.bf16.msra.mxu1 %v12336_v50 }
 0xe5c   :  { %9782 = vmatprep.subr.bf16.mxu0 %v12281_v14  ;;  %9811 = vmatprep.subr.bf16.mxu1 %v11550_v43 }
 0xe5f   :  { %9784 = vmatpush1.bf16.msra.mxu0 %v12283_v29  ;;  %9813 = vmatpush3.bf16.msra.mxu1 %v12343_v49 }
 0xe60   :  { %9786 = vmatprep.subr.bf16.mxu0 %v12287_v55  ;;  %9814 = vmatprep.subr.bf16.mxu1 %v11550_v43 }
 0xe63   :  { %9788 = vmatpush1.bf16.msra.mxu0 %v12289_v1  ;;  %9816 = vmatpush3.bf16.msra.mxu1 %v12350_v13 }
 0xe64   :  { %9790 = vmatprep.subr.bf16.mxu0 %v12293_v27  ;;  %9817 = vmatprep.subr.bf16.mxu1 %v11550_v43 }
 0xe67   :  { %9792 = vmatpush1.bf16.msra.mxu0 %v12295_v58  ;;  %9819 = vmatpush3.bf16.msra.mxu1 %v12356_v25 }
 0xe68   :  { %9794 = vmatprep.subr.bf16.mxu0 %v12298_v26  ;;  %9820 = vmatprep.subr.bf16.mxu1 %v11550_v43 }
 0xe6b   :  { %9796 = vmatpush1.bf16.msra.mxu0 %v12301_v40  ;;  %9822 = vmatpush3.bf16.msra.mxu1 %v12362_v46 }
 0xe6c   :  { %9798 = vmatprep.subr.bf16.mxu0 %v12304_v44  ;;  %9823 = vmatprep.subr.bf16.mxu1 %v11550_v43 }
 0xe6f   :  { %9800 = vmatpush1.bf16.msra.mxu0 %v12307_v62  ;;  %9825 = vmatpush3.bf16.msra.mxu1 %v12368_v56 }
 0xe70   :  { %9802 = vmatprep.subr.bf16.mxu0 %v12312_v7  ;;  %9826 = vmatprep.subr.bf16.mxu1 %v11550_v43 }
 0xe73   :  { %9804 = vmatpush1.bf16.msra.mxu0 %v12314_v8  ;;  %9828 = vmatpush3.bf16.msra.mxu1 %v12374_v6 }
 0xe74   :  { %9830 = vmatprep.subr.bf16.mxu0 %v12269_v35  ;;  %9861 = vmatprep.subr.bf16.mxu1 %v11550_v43 }
 0xf29   :  { %v3037_v32 = vpop.f32.mrb[30].mxu0  ;;  %v3108_v52 = vpop.f32.mrb[34].mxu1 }
 0xf2a   :  { %v3038_v61 = vadd.f32 %v3037_v32, %v12421_v48  ;;  %v3039_v2 = vpop.f32.mrb[31].mxu0  ;;  %v8181_v47 = vpop.f32.mrb[35].mxu1  ;;  %v3109_v20 = vadd.f32 %v3108_v52, %v12442_v5 }
 0xf2b   :  { %v3040_v16 = vadd.f32 %v3039_v2, %v12424_v10 }
 0xf2c   :  { %v3113_v45 = vrot.slane %v3038_v61, 6  ;;  %v3133_v19 = vrot.slane %v3109_v20, 6 }
 0xf2d   :  { %v3123_v54 = vrot.slane %v3040_v16, 6 }
 0xf2e   :  { %v3115_v21 = vadd.f32 %v3113_v45, %v12636_v37 }
 0xf2f   :  { %v3125_v12 = vadd.f32 %v3123_v54, %v12643_v30 }
 0xf30   :  { %v6991_v28 = vmul.f32 -1.442695, %v3115_v21  ;;  %v3503_v21 = vld [vmem:[#allocation11] sm:$0xff] }
 0xf31   :  { %v6992_v33 = vmul.f32 -1.442695, %v3125_v12  ;;  %v3510_v12 = vld [vmem:[#allocation11 + $0x38] sm:$0xff] }
 0xf32   :  { %11089 = vpow2.f32 %v6991_v28  ;;  %v3506_v28 = vld [vmem:[#allocation11 + $0x18] sm:$0xff] }
 0xf33   :  { %11091 = vpow2.f32 %v6992_v33  ;;  %v3513_v33 = vld [vmem:[#allocation11 + $0x50] sm:$0xff] }
 0xf3c   :  { %v11090_v35 = vpop.eup %11089 }
 0xf3d   :  { %v3119_v22 = vadd.f32 1.0, %v11090_v35  ;;  %v11092_v4 = vpop.eup %11091 }
 0xf3e   :  { %v3129_v23 = vadd.f32 1.0, %v11092_v4 }
 0xf3f   :  { %11093 = vrcp.f32 %v3119_v22  ;;  %v9887_v22 = vpack.c.bf16 %v3506_v28, %v3503_v21  ;;  %v3511_v21 = vld [vmem:[#allocation11 + $0x40] sm:$0xff]  ;;  %v3514_v28 = vld [vmem:[#allocation11 + $0x58] sm:$0xff] }
 0xf40   :  { %11095 = vrcp.f32 %v3129_v23  ;;  %v9889_v23 = vpack.c.bf16 %v3513_v33, %v3510_v12  ;;  %v9921_v12 = vpack.c.bf16 %v3514_v28, %v3511_v21  ;;  %v3552_v33 = vld [vmem:[#allocation13 + $0x8] sm:$0xff] }
 0xf41   :  { %v3584_v21 = vld [vmem:[#allocation13 + $0x108] sm:$0xff] }
 0xf49   :  { %v11094_v63 = vpop.eup %11093 }
 0xf4a   :  { %v3135_v18 = vmul.f32 %v11094_v63, %v3133_v19  ;;  %v11096_v9 = vpop.eup %11095  ;;  %v3509_v19 = vld [vmem:[#allocation11 + $0x30] sm:$0xff]  ;;  %v3512_v63 = vld [vmem:[#allocation11 + $0x48] sm:$0xff] }
 0xf4b   :  { %v3138_v42 = vsub.f32 1.0, %v11096_v9  ;;  %v3143_v53 = vmul.f32 %v11096_v9, %v3141_v36  ;;  %v3519_v9 = vld [vmem:[#allocation11 + $0x80] sm:$0xff]  ;;  %v9891_v36 = vpack.c.bf16 %v3512_v63, %v3509_v19  ;;  %v3520_v63 = vld [vmem:[#allocation11 + $0x88] sm:$0xff] }
 0xf4c   :  { %v3136_v3 = vadd.f32 %v3135_v18, %v12416_v57 }
 0xf4e   :  { %11097 = vtanh.f32 %v3136_v3  ;;  %v3516_v3 = vld [vmem:[#allocation11 + $0x68] sm:$0xff] }
 0xf58   :  { %v11098_v15 = vpop.eup %11097 }
 0xf59   :  { %v3139_v24 = vmul.f32 %v11098_v15, %v3138_v42  ;;  %v9893_v42 = vpack.c.bf16 %v3519_v9, %v3516_v3  ;;  %v3518_v15 = vld [vmem:[#allocation11 + $0x78] sm:$0xff] }
 0xf5a   :  { %v3558_v9 = vld [vmem:[#allocation13 + $0x38] sm:$0xff] }
 0xf5b   :  { %v12695_v60 = vadd.f32 %v3143_v53, %v3139_v24  ;;  %v3522_v24 = vld [vmem:[#allocation11 + $0x98] sm:$0xff]  ;;  %v3525_v53 = vld [vmem:[#allocation11 + $0xb0] sm:$0xff] }
 0xf5d   :  { %v3146_v32 = vrot.slane %v12695_v60, 2  ;;  %v3500_v4 = vsel %vm1827_vm2, %v12649_v17, %v12695_v60  ;;  %v3515_v17 = vld [vmem:[#allocation11 + $0x60] sm:$0xff] }
 0xf5f   :  { %3213 = vmatmul.mubr.f32.vlgmr.msra.gmra.mrb[32].mxu0 %v3146_v32  ;;  %8215 = vmatmul.mubr.f32.vlgmr.msra.gmra.mrb[36].mxu1 %v3146_v32  ;;  %v9897_v32 = vpack.c.bf16 %v3525_v53, %v3522_v24  ;;  %v3523_v53 = vld [vmem:[#allocation11 + $0xa0] sm:$0xff] }
 0xf60   :  { %9832 = vmatpush1.bf16.msra.mxu0 %v12271_v41  ;;  %9863 = vmatpush3.bf16.msra.mxu1 %v12330_v39  ;;  %v3504_v41 = vld [vmem:[#allocation11 + $0x8] sm:$0xff] }
 0xf61   :  { %9834 = vmatprep.subr.bf16.mxu0 %v12275_v51  ;;  %9864 = vmatprep.subr.bf16.mxu1 %v11550_v43  ;;  %v3507_v51 = vld [vmem:[#allocation11 + $0x20] sm:$0xff] }
 0xf62   :  { %3388 = vmatprep.mubr.f32.mxu0 %v11549_v0  ;;  %8249 = vmatprep.mubr.msk.f32.mxu1 %vm11551_vm1, %v11549_v0 }
 0xf64   :  { %9836 = vmatpush1.bf16.msra.mxu0 %v12277_v59  ;;  %9866 = vmatpush3.bf16.msra.mxu1 %v12336_v50  ;;  %v9885_v59 = vpack.c.bf16 %v3507_v51, %v3504_v41  ;;  %v3521_v41 = vld [vmem:[#allocation11 + $0x90] sm:$0xff]  ;;  %v3524_v51 = vld [vmem:[#allocation11 + $0xa8] sm:$0xff] }
 0xf65   :  { %9838 = vmatprep.subr.bf16.mxu0 %v12281_v14  ;;  %9867 = vmatprep.subr.bf16.mxu1 %v11550_v43 }
 0xf68   :  { %9840 = vmatpush1.bf16.msra.mxu0 %v12283_v29  ;;  %9869 = vmatpush3.bf16.msra.mxu1 %v12343_v49 }
 0xf69   :  { %9842 = vmatprep.subr.bf16.mxu0 %v12287_v55  ;;  %9870 = vmatprep.subr.bf16.mxu1 %v11550_v43 }
 0xf6c   :  { %9844 = vmatpush1.bf16.msra.mxu0 %v12289_v1  ;;  %9872 = vmatpush3.bf16.msra.mxu1 %v12350_v13 }
 0xf6d   :  { %9846 = vmatprep.subr.bf16.mxu0 %v12293_v27  ;;  %9873 = vmatprep.subr.bf16.mxu1 %v11550_v43 }
 0xf70   :  { %9848 = vmatpush1.bf16.msra.mxu0 %v12295_v58  ;;  %9875 = vmatpush3.bf16.msra.mxu1 %v12356_v25 }
 0xf71   :  { %9850 = vmatprep.subr.bf16.mxu0 %v12298_v26  ;;  %9876 = vmatprep.subr.bf16.mxu1 %v11550_v43 }
 0xf74   :  { %9852 = vmatpush1.bf16.msra.mxu0 %v12301_v40  ;;  %9878 = vmatpush3.bf16.msra.mxu1 %v12362_v46 }
 0xf75   :  { %9854 = vmatprep.subr.bf16.mxu0 %v12304_v44  ;;  %9879 = vmatprep.subr.bf16.mxu1 %v11550_v43 }
 0xf78   :  { %9856 = vmatpush1.bf16.msra.mxu0 %v12307_v62  ;;  %9881 = vmatpush3.bf16.msra.mxu1 %v12368_v56 }
 0xf79   :  { %9858 = vmatprep.subr.bf16.mxu0 %v12312_v7  ;;  %9882 = vmatprep.subr.bf16.mxu1 %v11550_v43 }
 0xf7c   :  { %9860 = vmatpush1.bf16.msra.mxu0 %v12314_v8  ;;  %9884 = vmatpush3.bf16.msra.mxu1 %v12374_v6  ;;  %v3317_v6 = vrot.slane %v12695_v60, 6  ;;  %v9895_v60 = vpack.c.bf16 %v3518_v15, %v3515_v17  ;;  %v3557_v17 = vld [vmem:[#allocation13 + $0x30] sm:$0xff]  ;;  %v3560_v15 = vld [vmem:[#allocation13 + $0x48] sm:$0xff] }
 0xf7d   :  { %9886 = vmatprep.subr.bf16.mxu0 %v9885_v59  ;;  %v3528_v59 = vld [vmem:[#allocation11 + $0xc8] sm:$0xff]  ;;  %v12760_v24 = vpack.c.bf16 %v3560_v15, %v3557_v17  ;;  %v3594_v17 = vld [vmem:[#allocation13 + $0x158] sm:$0xff]  ;;  %v3597_v15 = vld [vmem:[#allocation13 + $0x170] sm:$0xff] }
0x1032   :  { %v3214_v14 = vpop.f32.mrb[32].mxu0  ;;  %v3285_v29 = vpop.f32.mrb[36].mxu1 }
0x1033   :  { %v3215_v55 = vadd.f32 %v3214_v14, %v12421_v48  ;;  %v3216_v1 = vpop.f32.mrb[33].mxu0  ;;  %v8216_v27 = vpop.f32.mrb[37].mxu1  ;;  %v3286_v25 = vadd.f32 %v3285_v29, %v12442_v5  ;;  %v3531_v14 = vld [vmem:[#allocation11 + $0xe0] sm:$0xff]  ;;  %v9899_v29 = vpack.c.bf16 %v3524_v51, %v3521_v41  ;;  %v3564_v41 = vld [vmem:[#allocation13 + $0x68] sm:$0xff] }
0x1034   :  { %v3217_v58 = vadd.f32 %v3216_v1, %v12424_v10  ;;  %v3527_v1 = vld [vmem:[#allocation11 + $0xc0] sm:$0xff]  ;;  %v3530_v27 = vld [vmem:[#allocation11 + $0xd8] sm:$0xff] }
0x1035   :  { %v3290_v26 = vrot.slane %v3215_v55, 4  ;;  %v3310_v46 = vrot.slane %v3286_v25, 4  ;;  %v9901_v55 = vpack.c.bf16 %v3531_v14, %v3528_v59  ;;  %v3542_v25 = vld [vmem:[#allocation11 + $0x138] sm:$0xff]  ;;  %v3567_v51 = vld [vmem:[#allocation13 + $0x80] sm:$0xff] }
0x1036   :  { %v3300_v40 = vrot.slane %v3217_v58, 4  ;;  %v3534_v58 = vld [vmem:[#allocation11 + $0xf8] sm:$0xff]  ;;  %v12764_v59 = vpack.c.bf16 %v3567_v51, %v3564_v41  ;;  %v3563_v14 = vld [vmem:[#allocation13 + $0x60] sm:$0xff] }
0x1037   :  { %v3292_v44 = vadd.f32 %v3290_v26, %v12636_v37  ;;  %v3537_v26 = vld [vmem:[#allocation11 + $0x110] sm:$0xff] }
0x1038   :  { %v3302_v62 = vadd.f32 %v3300_v40, %v12643_v30  ;;  %v9903_v40 = vpack.c.bf16 %v3530_v27, %v3527_v1  ;;  %v3529_v1 = vld [vmem:[#allocation11 + $0xd0] sm:$0xff]  ;;  %v3532_v27 = vld [vmem:[#allocation11 + $0xe8] sm:$0xff] }
0x1039   :  { %v6993_v7 = vmul.f32 -1.442695, %v3292_v44  ;;  %v9905_v44 = vpack.c.bf16 %v3537_v26, %v3534_v58  ;;  %v9933_v58 = vpack.c.bf16 %v3532_v27, %v3529_v1  ;;  %v3570_v26 = vld [vmem:[#allocation13 + $0x98] sm:$0xff] }
0x103a   :  { %v6994_v8 = vmul.f32 -1.442695, %v3302_v62  ;;  %v3533_v62 = vld [vmem:[#allocation11 + $0xf0] sm:$0xff] }
0x103b   :  { %11099 = vpow2.f32 %v6993_v7  ;;  %v3536_v7 = vld [vmem:[#allocation11 + $0x108] sm:$0xff] }
0x103c   :  { %11101 = vpow2.f32 %v6994_v8  ;;  %v3540_v8 = vld [vmem:[#allocation11 + $0x128] sm:$0xff] }
0x1045   :  { %v11100_v39 = vpop.eup %11099 }
0x1046   :  { %v11102_v50 = vpop.eup %11101  ;;  %v3296_v49 = vadd.f32 1.0, %v11100_v39  ;;  %v3543_v39 = vld [vmem:[#allocation11 + $0x140] sm:$0xff] }
0x1047   :  { %v3306_v13 = vadd.f32 1.0, %v11102_v50  ;;  %v9907_v50 = vpack.c.bf16 %v3536_v7, %v3533_v62  ;;  %v3569_v62 = vld [vmem:[#allocation13 + $0x90] sm:$0xff]  ;;  %v3572_v7 = vld [vmem:[#allocation13 + $0xa8] sm:$0xff] }
0x1048   :  { %11103 = vrcp.f32 %v3296_v49  ;;  %v9909_v49 = vpack.c.bf16 %v3543_v39, %v3540_v8  ;;  %v12772_v8 = vpack.c.bf16 %v3572_v7, %v3569_v62  ;;  %v3535_v39 = vld [vmem:[#allocation11 + $0x100] sm:$0xff] }
0x1049   :  { %11105 = vrcp.f32 %v3306_v13  ;;  %v3539_v13 = vld [vmem:[#allocation11 + $0x120] sm:$0xff] }
0x1052   :  { %v11104_v56 = vpop.eup %11103 }
0x1053   :  { %v11106_v52 = vpop.eup %11105  ;;  %v3312_v61 = vmul.f32 %v11104_v56, %v3310_v46  ;;  %v3546_v46 = vld [vmem:[#allocation11 + $0x158] sm:$0xff]  ;;  %v3549_v56 = vld [vmem:[#allocation11 + $0x170] sm:$0xff] }
0x1054   :  { %v3319_v2 = vmul.f32 %v11106_v52, %v3317_v6  ;;  %v3315_v16 = vsub.f32 1.0, %v11106_v52  ;;  %v9911_v6 = vpack.c.bf16 %v3542_v25, %v3539_v13  ;;  %v9913_v52 = vpack.c.bf16 %v3549_v56, %v3546_v46  ;;  %v3579_v25 = vld [vmem:[#allocation13 + $0xe0] sm:$0xff]  ;;  %v3578_v56 = vld [vmem:[#allocation13 + $0xd8] sm:$0xff] }
0x1055   :  { %v3313_v47 = vadd.f32 %v3312_v61, %v12416_v57  ;;  %v3545_v61 = vld [vmem:[#allocation11 + $0x150] sm:$0xff]  ;;  %v3575_v46 = vld [vmem:[#allocation13 + $0xc0] sm:$0xff] }
0x1057   :  { %11107 = vtanh.f32 %v3313_v47 }
0x1061   :  { %v11108_v45 = vpop.eup %11107 }
0x1062   :  { %v3316_v54 = vmul.f32 %v11108_v45, %v3315_v16  ;;  %v3505_v16 = vld [vmem:[#allocation11 + $0x10] sm:$0xff]  ;;  %v3508_v45 = vld [vmem:[#allocation11 + $0x28] sm:$0xff] }
0x1064   :  { %v12738_v35 = vadd.f32 %v3319_v2, %v3316_v54  ;;  %v3548_v2 = vld [vmem:[#allocation11 + $0x168] sm:$0xff]  ;;  %v9917_v54 = vpack.c.bf16 %v3508_v45, %v3505_v16  ;;  %v3585_v45 = vld [vmem:[#allocation13 + $0x110] sm:$0xff] }
0x1065   :  { %v9915_v47 = vpack.c.bf16 %v3548_v2, %v3545_v61  ;;  %v3541_v61 = vld [vmem:[#allocation11 + $0x130] sm:$0xff]  ;;  %v3544_v2 = vld [vmem:[#allocation11 + $0x148] sm:$0xff] }
0x1066   :  { %v3322_v20 = vrot.slane %v12738_v35, 4  ;;  %v12746_v18 = vsel %vm1829_vm3, %v3500_v4, %v12738_v35  ;;  %9918 = vmatprep.subr.bf16.mxu1 %v9917_v54  ;;  %v9941_v16 = vpack.c.bf16 %v3544_v2, %v3541_v61 }
0x1068   :  { %3389 = vmatmul.mubr.f32.vlgmr.msra.gmra.mrb[34].mxu0 %v3322_v20  ;;  %8250 = vmatmul.mubr.f32.vlgmr.msra.gmra.mrb[38].mxu1 %v3322_v20  ;;  %v3551_v20 = vld [vmem:[#allocation13] sm:$0xff] }
0x1069   :  { %9888 = vmatpush1.bf16.msra.mxu0 %v9887_v22  ;;  %8284 = vmatprep.mubr.f32.mxu1 %v12595_v11  ;;  %v3555_v22 = vld [vmem:[#allocation13 + $0x20] sm:$0xff] }
0x106a   :  { %9890 = vmatprep.subr.bf16.mxu0 %v9889_v23  ;;  %3680 = vmatprep.mubr.f32.mxu0 %v11549_v0  ;;  %v12752_v4 = vpack.c.bf16 %v3555_v22, %v3552_v33  ;;  %v3554_v23 = vld [vmem:[#allocation13 + $0x18] sm:$0xff]  ;;  %v3588_v22 = vld [vmem:[#allocation13 + $0x128] sm:$0xff] }
0x106b   :  { %9920 = vmatpush3.bf16.msra.mxu1 %v9917_v54  ;;  %v12754_v19 = vpack.c.bf16 %v3554_v23, %v3551_v20  ;;  %v3581_v54 = vld [vmem:[#allocation13 + $0xf0] sm:$0xff]  ;;  %v3550_v33 = vld [vmem:[#allocation11 + $0x178] sm:$0xff]  ;;  %v3591_v20 = vld [vmem:[#allocation13 + $0x140] sm:$0xff] }
0x106c   :  { %9922 = vmatprep.subr.bf16.mxu1 %v9921_v12  ;;  %v12784_v23 = vpack.c.bf16 %v3584_v21, %v3581_v54 }
0x106d   :  { %9892 = vmatpush1.bf16.msra.mxu0 %v9891_v36  ;;  %v3561_v36 = vld [vmem:[#allocation13 + $0x50] sm:$0xff] }
0x106e   :  { %9894 = vmatprep.subr.bf16.mxu0 %v9893_v42  ;;  %v12758_v42 = vpack.c.bf16 %v3561_v36, %v3558_v9  ;;  %v3590_v9 = vld [vmem:[#allocation13 + $0x138] sm:$0xff] }
0x106f   :  { %9924 = vmatpush3.bf16.msra.mxu1 %v9921_v12  ;;  %v3547_v12 = vld [vmem:[#allocation11 + $0x160] sm:$0xff] }
0x1071   :  { %9896 = vmatpush1.bf16.msra.mxu0 %v9895_v60  ;;  %v3526_v60 = vld [vmem:[#allocation11 + $0xb8] sm:$0xff] }
0x1072   :  { %9898 = vmatprep.subr.bf16.mxu0 %v9897_v32  ;;  %v9929_v32 = vpack.c.bf16 %v3526_v60, %v3523_v53  ;;  %v12795_v53 = vpack.c.bf16 %v3597_v15, %v3594_v17  ;;  %v3593_v60 = vld [vmem:[#allocation13 + $0x150] sm:$0xff]  ;;  %v3568_v17 = vld [vmem:[#allocation13 + $0x88] sm:$0xff]  ;;  %v3571_v15 = vld [vmem:[#allocation13 + $0xa0] sm:$0xff] }
0x1075   :  { %9900 = vmatpush1.bf16.msra.mxu0 %v9899_v29  ;;  %v3566_v29 = vld [vmem:[#allocation13 + $0x78] sm:$0xff] }
0x1076   :  { %9902 = vmatprep.subr.bf16.mxu0 %v9901_v55  ;;  %v12766_v55 = vpack.c.bf16 %v3566_v29, %v3563_v14 }
0x1079   :  { %9904 = vmatpush1.bf16.msra.mxu0 %v9903_v40  ;;  %v3573_v40 = vld [vmem:[#allocation13 + $0xb0] sm:$0xff] }
0x107a   :  { %9906 = vmatprep.subr.bf16.mxu0 %v9905_v44  ;;  %v12770_v44 = vpack.c.bf16 %v3573_v40, %v3570_v26 }
0x107d   :  { %9908 = vmatpush1.bf16.msra.mxu0 %v9907_v50  ;;  %v3538_v50 = vld [vmem:[#allocation11 + $0x118] sm:$0xff] }
0x107e   :  { %9910 = vmatprep.subr.bf16.mxu0 %v9909_v49  ;;  %v3576_v49 = vld [vmem:[#allocation13 + $0xc8] sm:$0xff]  ;;  %v9937_v13 = vpack.c.bf16 %v3538_v50, %v3535_v39 }
0x1081   :  { %9912 = vmatpush1.bf16.msra.mxu0 %v9911_v6  ;;  %v12776_v6 = vpack.c.bf16 %v3579_v25, %v3576_v49 }
0x1082   :  { %9914 = vmatprep.subr.bf16.mxu0 %v9913_v52  ;;  %v12778_v52 = vpack.c.bf16 %v3578_v56, %v3575_v46 }
0x1085   :  { %9916 = vmatpush1.bf16.msra.mxu0 %v9915_v47  ;;  %v3582_v47 = vld [vmem:[#allocation13 + $0xf8] sm:$0xff] }
0x1086   :  { %9950 = vmatprep.subr.bf16.mxu0 %v12752_v4  ;;  %v12781_v28 = vpack.c.bf16 %v3585_v45, %v3582_v47 }
0x1088   :  { %3681 = vmatmul.mubr.f32.vlgmr.msra.gmra.mrb[36].mxu0 %v12595_v11  ;;  %v3517_v11 = vld [vmem:[#allocation11 + $0x70] sm:$0xff] }
0x1089   :  { %3686 = vmatprep.mubr.f32.mxu0 %v11549_v0  ;;  %9952 = vmatpush1.bf16.msra.mxu0 %v12754_v19  ;;  %v9925_v3 = vpack.c.bf16 %v3520_v63, %v3517_v11  ;;  %v9945_v11 = vpack.c.bf16 %v3550_v33, %v3547_v12  ;;  %v12787_v63 = vpack.c.bf16 %v3591_v20, %v3588_v22  ;;  %v3553_v12 = vld [vmem:[#allocation13 + $0x10] sm:$0xff]  ;;  %v3556_v33 = vld [vmem:[#allocation13 + $0x28] sm:$0xff] }
0x108a   :  { %9954 = vmatprep.subr.bf16.mxu0 %v12758_v42  ;;  %v12813_v20 = vpack.c.bf16 %v3556_v33, %v3553_v12 }
0x108b   :  { %9926 = vmatprep.subr.bf16.mxu1 %v9925_v3 }
0x108c   :  { %9928 = vmatpush3.bf16.msra.mxu1 %v9925_v3  ;;  %v3587_v3 = vld [vmem:[#allocation13 + $0x120] sm:$0xff] }
0x108d   :  { %9956 = vmatpush1.bf16.msra.mxu0 %v12760_v24  ;;  %9930 = vmatprep.subr.bf16.mxu1 %v9929_v32  ;;  %v12790_v36 = vpack.c.bf16 %v3590_v9, %v3587_v3  ;;  %v3562_v3 = vld [vmem:[#allocation13 + $0x58] sm:$0xff]  ;;  %v3565_v9 = vld [vmem:[#allocation13 + $0x70] sm:$0xff] }
0x108e   :  { %9958 = vmatprep.subr.bf16.mxu0 %v12764_v59 }
0x1090   :  { %9932 = vmatpush3.bf16.msra.mxu1 %v9929_v32  ;;  %v3596_v32 = vld [vmem:[#allocation13 + $0x168] sm:$0xff] }
0x1091   :  { %9960 = vmatpush1.bf16.msra.mxu0 %v12766_v55  ;;  %9934 = vmatprep.subr.bf16.mxu1 %v9933_v58  ;;  %v12797_v41 = vpack.c.bf16 %v3596_v32, %v3593_v60  ;;  %v3574_v60 = vld [vmem:[#allocation13 + $0xb8] sm:$0xff] }
0x1092   :  { %9962 = vmatprep.subr.bf16.mxu0 %v12770_v44  ;;  %v12833_v32 = vpack.c.bf16 %v3574_v60, %v3571_v15 }
0x1094   :  { %9936 = vmatpush3.bf16.msra.mxu1 %v9933_v58 }
0x1095   :  { %9964 = vmatpush1.bf16.msra.mxu0 %v12772_v8  ;;  %9938 = vmatprep.subr.bf16.mxu1 %v9937_v13 }
0x1096   :  { %9966 = vmatprep.subr.bf16.mxu0 %v12776_v6 }
0x1098   :  { %9940 = vmatpush3.bf16.msra.mxu1 %v9937_v13 }
0x1099   :  { %9968 = vmatpush1.bf16.msra.mxu0 %v12778_v52  ;;  %9942 = vmatprep.subr.bf16.mxu1 %v9941_v16 }
0x109a   :  { %9970 = vmatprep.subr.bf16.mxu0 %v12781_v28 }
0x109c   :  { %9944 = vmatpush3.bf16.msra.mxu1 %v9941_v16 }
0x109d   :  { %9972 = vmatpush1.bf16.msra.mxu0 %v12784_v23  ;;  %9946 = vmatprep.subr.bf16.mxu1 %v9945_v11 }
0x109e   :  { %9974 = vmatprep.subr.bf16.mxu0 %v12787_v63 }
0x10a0   :  { %9948 = vmatpush3.bf16.msra.mxu1 %v9945_v11  ;;  %v3559_v11 = vld [vmem:[#allocation13 + $0x40] sm:$0xff] }
0x10a1   :  { %9976 = vmatpush1.bf16.msra.mxu0 %v12790_v36  ;;  %9981 = vmatprep.subr.bf16.mxu1 %v11550_v43 }
0x10a2   :  { %9978 = vmatprep.subr.bf16.mxu0 %v12795_v53 }
0x10a5   :  { %9980 = vmatpush1.bf16.msra.mxu0 %v12797_v41 }
0x10a6   :  { %10006 = vmatprep.subr.bf16.mxu0 %v12752_v4 }
0x113b   :  { %v3390_v51 = vpop.f32.mrb[34].mxu0  ;;  %v3461_v14 = vpop.f32.mrb[38].mxu1 }
0x113c   :  { %v3391_v29 = vadd.f32 %v3390_v51, %v12421_v48  ;;  %v3392_v1 = vpop.f32.mrb[35].mxu0  ;;  %v8251_v27 = vpop.f32.mrb[39].mxu1  ;;  %v3462_v48 = vadd.f32 %v3461_v14, %v12442_v5  ;;  %v3577_v51 = vld [vmem:[#allocation13 + $0xd0] sm:$0xff]  ;;  %v3580_v14 = vld [vmem:[#allocation13 + $0xe8] sm:$0xff] }
0x113d   :  { %v3393_v58 = vadd.f32 %v3392_v1, %v12424_v10  ;;  %v3583_v1 = vld [vmem:[#allocation13 + $0x100] sm:$0xff]  ;;  %v3586_v27 = vld [vmem:[#allocation13 + $0x118] sm:$0xff] }
0x113e   :  { %v3466_v26 = vrot.slane %v3391_v29, 2  ;;  %v3486_v56 = vrot.slane %v3462_v48, 2  ;;  %v12839_v29 = vpack.c.bf16 %v3580_v14, %v3577_v51 }
0x113f   :  { %v3476_v40 = vrot.slane %v3393_v58, 2  ;;  %v12845_v58 = vpack.c.bf16 %v3586_v27, %v3583_v1 }
0x1140   :  { %v3468_v62 = vadd.f32 %v3466_v26, %v12636_v37  ;;  %v3493_v37 = vrot.slane %v12738_v35, 6  ;;  %v3589_v26 = vld [vmem:[#allocation13 + $0x130] sm:$0xff] }
0x1141   :  { %v3478_v7 = vadd.f32 %v3476_v40, %v12643_v30  ;;  %v3592_v40 = vld [vmem:[#allocation13 + $0x148] sm:$0xff] }
0x1142   :  { %v6995_v39 = vmul.f32 -1.442695, %v3468_v62  ;;  %v12851_v62 = vpack.c.bf16 %v3592_v40, %v3589_v26 }
0x1143   :  { %v6996_v50 = vmul.f32 -1.442695, %v3478_v7  ;;  %v3595_v7 = vld [vmem:[#allocation13 + $0x160] sm:$0xff] }
0x1144   :  { %11109 = vpow2.f32 %v6995_v39  ;;  %v3598_v39 = vld [vmem:[#allocation13 + $0x178] sm:$0xff] }
0x1145   :  { %11111 = vpow2.f32 %v6996_v50  ;;  %v12857_v50 = vpack.c.bf16 %v3598_v39, %v3595_v7 }
0x114e   :  { %v11110_v49 = vpop.eup %11109 }
0x114f   :  { %v11112_v13 = vpop.eup %11111  ;;  %v3472_v25 = vadd.f32 1.0, %v11110_v49  ;;  %v3599_v49 = vld [vmem:[%s13753_s11] sm:$0x7] }
0x1150   :  { %v3482_v46 = vadd.f32 1.0, %v11112_v13  ;;  %v3612_v13 = vrot.slane %v3599_v49, %v11938_v38 }
0x1151   :  { %11113 = vrcp.f32 %v3472_v25  ;;  %v3768_v25 = vld [vmem:[%s13754_s12] sm:$0x7] }
0x1152   :  { %11115 = vrcp.f32 %v3482_v46  ;;  %v12925_v60 = vrot.slane %v3768_v25, %v11938_v38 }
0x115b   :  { %v11114_v10 = vpop.eup %11113  ;;  %v12807_v61 = vpop.f32.mrb[36].mxu0 }
0x115c   :  { %v11116_v2 = vpop.eup %11115  ;;  %v3488_v30 = vmul.f32 %v11114_v10, %v3486_v56  ;;  %v12810_v47 = vpop.f32.mrb[37].mxu0  ;;  %v12897_v56 = vrot.slane %v3599_v49, %v11931_v31 }
0x115d   :  { %v3495_v16 = vmul.f32 %v11116_v2, %v3493_v37  ;;  %v3491_v54 = vsub.f32 1.0, %v11116_v2 }
0x115e   :  { %v3489_v45 = vadd.f32 %v3488_v30, %v12416_v57  ;;  %v12819_v57 = vpack.c.bf16 %v3562_v3, %v3559_v11  ;;  %v12904_v30 = vrot.slane %v3768_v25, %v11931_v31 }
0x1160   :  { %11117 = vtanh.f32 %v3489_v45  ;;  %v12910_v45 = vrot.slane %v3599_v49, %v11936_v34 }
0x1162   :  { %v12921_v11 = vadd.f32 %v12810_v47, %v12910_v45 }
0x116a   :  { %v11118_v21 = vpop.eup %11117 }
0x116b   :  { %v3492_v22 = vmul.f32 %v11118_v21, %v3491_v54  ;;  %v12914_v21 = vadd.f32 %v12807_v61, %v12897_v56 }
0x116d   :  { %v3496_v5 = vadd.f32 %v3495_v16, %v3492_v22  ;;  %v12907_v16 = vrot.slane %v3768_v25, %v11936_v34 }
0x116f   :  { %v3502_v35 = vsel %vm1831_vm4, %v12746_v18, %v3496_v5  ;;  %v12826_v18 = vpack.c.bf16 %v3568_v17, %v3565_v9 }
0x1170   :  { %3687 = vmatmul.mubr.f32.gmra.mrb[38].mxu0 %v3502_v35  ;;  %8285 = vmatmul.mubr.f32.vlgmr.msra.gmra.mrb[40].mxu1 %v3502_v35 }
0x1171   :  { %9983 = vmatpush3.bf16.msra.mxu1 %v12813_v20  ;;  %3849 = vmatprep.mubr.f32.mxu0 %v11549_v0 }
0x1172   :  { %9984 = vmatprep.subr.bf16.mxu1 %v11550_v43  ;;  %8319 = vmatprep.mubr.msk.f32.mxu1 %vm11551_vm1, %v11549_v0 }
0x1174   :  { %3850 = vmatmul.mubr.f32.vlgmr.msra.gmra.mrb[40].mxu0 %v11549_v0 }
0x1175   :  { %9986 = vmatpush3.bf16.msra.mxu1 %v12819_v57  ;;  %10008 = vmatpush1.bf16.msra.mxu0 %v12754_v19 }
0x1176   :  { %9987 = vmatprep.subr.bf16.mxu1 %v11550_v43  ;;  %10010 = vmatprep.subr.bf16.mxu0 %v12758_v42 }
0x1177   :  { %4011 = vmatprep.mubr.f32.mxu0 %v11549_v0 }
0x1179   :  { %9989 = vmatpush3.bf16.msra.mxu1 %v12826_v18  ;;  %10012 = vmatpush1.bf16.msra.mxu0 %v12760_v24 }
0x117a   :  { %9990 = vmatprep.subr.bf16.mxu1 %v11550_v43  ;;  %10014 = vmatprep.subr.bf16.mxu0 %v12764_v59 }
0x117d   :  { %9992 = vmatpush3.bf16.msra.mxu1 %v12833_v32  ;;  %10016 = vmatpush1.bf16.msra.mxu0 %v12766_v55 }
0x117e   :  { %9993 = vmatprep.subr.bf16.mxu1 %v11550_v43  ;;  %10018 = vmatprep.subr.bf16.mxu0 %v12770_v44 }
0x1181   :  { %9995 = vmatpush3.bf16.msra.mxu1 %v12839_v29  ;;  %10020 = vmatpush1.bf16.msra.mxu0 %v12772_v8 }
0x1182   :  { %9996 = vmatprep.subr.bf16.mxu1 %v11550_v43  ;;  %10022 = vmatprep.subr.bf16.mxu0 %v12776_v6 }
0x1185   :  { %9998 = vmatpush3.bf16.msra.mxu1 %v12845_v58  ;;  %10024 = vmatpush1.bf16.msra.mxu0 %v12778_v52 }
0x1186   :  { %9999 = vmatprep.subr.bf16.mxu1 %v11550_v43  ;;  %10026 = vmatprep.subr.bf16.mxu0 %v12781_v28 }
0x1189   :  { %10001 = vmatpush3.bf16.msra.mxu1 %v12851_v62  ;;  %10028 = vmatpush1.bf16.msra.mxu0 %v12784_v23 }
0x118a   :  { %10002 = vmatprep.subr.bf16.mxu1 %v11550_v43  ;;  %10030 = vmatprep.subr.bf16.mxu0 %v12787_v63 }
0x118d   :  { %10004 = vmatpush3.bf16.msra.mxu1 %v12857_v50  ;;  %10032 = vmatpush1.bf16.msra.mxu0 %v12790_v36 }
0x118e   :  { %10037 = vmatprep.subr.bf16.mxu1 %v11550_v43  ;;  %10034 = vmatprep.subr.bf16.mxu0 %v12795_v53 }
0x1190   :  { %8320 = vmatmul.mubr.f32.vlgmr.msra.gmra.mrb[42].mxu1 %v11549_v0 }
0x1191   :  { %10039 = vmatpush3.bf16.msra.mxu1 %v12813_v20  ;;  %10036 = vmatpush1.bf16.msra.mxu0 %v12797_v41 }
0x1192   :  { %10040 = vmatprep.subr.bf16.mxu1 %v11550_v43  ;;  %8354 = vmatprep.mubr.msk.f32.mxu1 %vm11551_vm1, %v11549_v0 }
0x1193   :  { %10062 = vmatprep.subr.bf16.mxu0 %v12752_v4 }
0x1195   :  { %10042 = vmatpush3.bf16.msra.mxu1 %v12819_v57 }
0x1196   :  { %10043 = vmatprep.subr.bf16.mxu1 %v11550_v43 }
0x1199   :  { %10045 = vmatpush3.bf16.msra.mxu1 %v12826_v18 }
0x119a   :  { %10046 = vmatprep.subr.bf16.mxu1 %v11550_v43 }
0x119d   :  { %10048 = vmatpush3.bf16.msra.mxu1 %v12833_v32 }
0x119e   :  { %10049 = vmatprep.subr.bf16.mxu1 %v11550_v43 }
0x11a1   :  { %10051 = vmatpush3.bf16.msra.mxu1 %v12839_v29 }
0x11a2   :  { %10052 = vmatprep.subr.bf16.mxu1 %v11550_v43 }
0x11a5   :  { %10054 = vmatpush3.bf16.msra.mxu1 %v12845_v58 }
0x11a6   :  { %10055 = vmatprep.subr.bf16.mxu1 %v11550_v43 }
0x11a9   :  { %10057 = vmatpush3.bf16.msra.mxu1 %v12851_v62 }
0x11aa   :  { %10058 = vmatprep.subr.bf16.mxu1 %v11550_v43 }
0x11ad   :  { %10060 = vmatpush3.bf16.msra.mxu1 %v12857_v50 }
0x11ae   :  { %10093 = vmatprep.subr.bf16.mxu1 %v11550_v43 }
0x1243   :  { %v12894_v46 = vpop.f32.mrb[38].mxu0  ;;  %v8286_v48 = vpop.f32.mrb[40].mxu1 }
0x1244   :  { %v12899_v10 = vadd.f32 %v8286_v48, %v3612_v13  ;;  %v12901_v37 = vpop.f32.mrb[39].mxu0  ;;  %v3759_v2 = vpop.f32.mrb[41].mxu1 }
0x1245   :  { %v12928_v26 = vadd.f32 %v3759_v2, %v3612_v13 }
0x1247   :  { %v3851_v54 = vpop.f32.mrb[40].mxu0 }
0x1248   :  { %v3852_v12 = vadd.f32 %v3851_v54, %v12904_v30  ;;  %v3853_v33 = vpop.f32.mrb[41].mxu0 }
0x1249   :  { %v3854_v22 = vadd.f32 %v3853_v33, %v12907_v16 }
0x124a   :  { %v3926_v5 = vadd.f32 %v3852_v12, %v12914_v21 }
0x124b   :  { %v3933_v35 = vadd.f32 %v3854_v22, %v12921_v11 }
0x124c   :  { %v6997_v3 = vmul.f32 -1.442695, %v3926_v5 }
0x124d   :  { %v6998_v9 = vmul.f32 -1.442695, %v3933_v35 }
0x124e   :  { %11119 = vpow2.f32 %v6997_v3 }
0x124f   :  { %11121 = vpow2.f32 %v6998_v9 }
0x1258   :  { %v11120_v17 = vpop.eup %11119 }
0x1259   :  { %v3930_v61 = vadd.f32 1.0, %v11120_v17  ;;  %v11122_v15 = vpop.eup %11121 }
0x125a   :  { %v3937_v51 = vadd.f32 1.0, %v11122_v15 }
0x125b   :  { %11123 = vrcp.f32 %v3930_v61 }
0x125c   :  { %11125 = vrcp.f32 %v3937_v51 }
0x1263   :  { %v3922_v14 = vpop.f32.mrb[42].mxu1 }
0x1264   :  { %v3923_v1 = vadd.f32 %v3922_v14, %v12925_v60  ;;  %v8321_v27 = vpop.f32.mrb[43].mxu1 }
0x1265   :  { %v11124_v47 = vpop.eup %11123 }
0x1266   :  { %v3940_v40 = vmul.f32 %v11124_v47, %v3923_v1  ;;  %v11126_v39 = vpop.eup %11125 }
0x1267   :  { %v3943_v49 = vsub.f32 1.0, %v11126_v39  ;;  %v3945_v12 = vmul.f32 0.0, %v11126_v39 }
0x1268   :  { %v3941_v7 = vadd.f32 %v3940_v40, %v12928_v26 }
0x126a   :  { %11127 = vtanh.f32 %v3941_v7 }
0x1274   :  { %v11128_v48 = vpop.eup %11127 }
0x1275   :  { %v3944_v54 = vmul.f32 %v11128_v48, %v3943_v49 }
0x1277   :  { %v12931_v25 = vadd.f32 %v3945_v12, %v3944_v54 }
0x1279   :  { %4012 = vmatmul.mubr.f32.vlgmr.msra.gmra.mrb[42].mxu0 %v12931_v25  ;;  %8355 = vmatmul.mubr.f32.vlgmr.msra.gmra.mrb[44].mxu1 %v12931_v25  ;;  %v4117_v12 = vrot.slane %v12931_v25, 6 }
0x127a   :  { %10064 = vmatpush1.bf16.msra.mxu0 %v12754_v19  ;;  %10095 = vmatpush3.bf16.msra.mxu1 %v12813_v20 }
0x127b   :  { %10066 = vmatprep.subr.bf16.mxu0 %v12758_v42  ;;  %10096 = vmatprep.subr.bf16.mxu1 %v11550_v43 }
0x127c   :  { %4188 = vmatprep.mubr.f32.mxu0 %v11549_v0  ;;  %8389 = vmatprep.mubr.msk.f32.mxu1 %vm11551_vm1, %v11549_v0 }
0x127e   :  { %10068 = vmatpush1.bf16.msra.mxu0 %v12760_v24  ;;  %10098 = vmatpush3.bf16.msra.mxu1 %v12819_v57 }
0x127f   :  { %10070 = vmatprep.subr.bf16.mxu0 %v12764_v59  ;;  %10099 = vmatprep.subr.bf16.mxu1 %v11550_v43 }
0x1282   :  { %10072 = vmatpush1.bf16.msra.mxu0 %v12766_v55  ;;  %10101 = vmatpush3.bf16.msra.mxu1 %v12826_v18 }
0x1283   :  { %10074 = vmatprep.subr.bf16.mxu0 %v12770_v44  ;;  %10102 = vmatprep.subr.bf16.mxu1 %v11550_v43 }
0x1286   :  { %10076 = vmatpush1.bf16.msra.mxu0 %v12772_v8  ;;  %10104 = vmatpush3.bf16.msra.mxu1 %v12833_v32 }
0x1287   :  { %10078 = vmatprep.subr.bf16.mxu0 %v12776_v6  ;;  %10105 = vmatprep.subr.bf16.mxu1 %v11550_v43 }
0x128a   :  { %10080 = vmatpush1.bf16.msra.mxu0 %v12778_v52  ;;  %10107 = vmatpush3.bf16.msra.mxu1 %v12839_v29 }
0x128b   :  { %10082 = vmatprep.subr.bf16.mxu0 %v12781_v28  ;;  %10108 = vmatprep.subr.bf16.mxu1 %v11550_v43 }
0x128e   :  { %10084 = vmatpush1.bf16.msra.mxu0 %v12784_v23  ;;  %10110 = vmatpush3.bf16.msra.mxu1 %v12845_v58 }
0x128f   :  { %10086 = vmatprep.subr.bf16.mxu0 %v12787_v63  ;;  %10111 = vmatprep.subr.bf16.mxu1 %v11550_v43 }
0x1292   :  { %10088 = vmatpush1.bf16.msra.mxu0 %v12790_v36  ;;  %10113 = vmatpush3.bf16.msra.mxu1 %v12851_v62 }
0x1293   :  { %10090 = vmatprep.subr.bf16.mxu0 %v12795_v53  ;;  %10114 = vmatprep.subr.bf16.mxu1 %v11550_v43 }
0x1296   :  { %10092 = vmatpush1.bf16.msra.mxu0 %v12797_v41  ;;  %10116 = vmatpush3.bf16.msra.mxu1 %v12857_v50 }
0x1297   :  { %10118 = vmatprep.subr.bf16.mxu0 %v12752_v4  ;;  %10149 = vmatprep.subr.bf16.mxu1 %v11550_v43 }
0x134c   :  { %v4013_v13 = vpop.f32.mrb[42].mxu0  ;;  %v4084_v2 = vpop.f32.mrb[44].mxu1 }
0x134d   :  { %v4014_v33 = vadd.f32 %v4013_v13, %v12904_v30  ;;  %v4015_v22 = vpop.f32.mrb[43].mxu0  ;;  %v8356_v5 = vpop.f32.mrb[45].mxu1  ;;  %v4085_v47 = vadd.f32 %v4084_v2, %v12925_v60 }
0x134e   :  { %v4016_v3 = vadd.f32 %v4015_v22, %v12907_v16 }
0x134f   :  { %v4089_v35 = vrot.slane %v4014_v33, 6  ;;  %v4109_v7 = vrot.slane %v4085_v47, 6 }
0x1350   :  { %v4099_v9 = vrot.slane %v4016_v3, 6 }
0x1351   :  { %v4091_v17 = vadd.f32 %v4089_v35, %v12914_v21 }
0x1352   :  { %v4101_v15 = vadd.f32 %v4099_v9, %v12921_v11 }
0x1353   :  { %v6999_v61 = vmul.f32 -1.442695, %v4091_v17 }
0x1354   :  { %v7000_v51 = vmul.f32 -1.442695, %v4101_v15 }
0x1355   :  { %11129 = vpow2.f32 %v6999_v61 }
0x1356   :  { %11131 = vpow2.f32 %v7000_v51 }
0x135f   :  { %v11130_v14 = vpop.eup %11129 }
0x1360   :  { %v4095_v1 = vadd.f32 1.0, %v11130_v14  ;;  %v11132_v27 = vpop.eup %11131 }
0x1361   :  { %v4105_v40 = vadd.f32 1.0, %v11132_v27 }
0x1362   :  { %11133 = vrcp.f32 %v4095_v1 }
0x1363   :  { %11135 = vrcp.f32 %v4105_v40 }
0x136c   :  { %v11134_v39 = vpop.eup %11133 }
0x136d   :  { %v4111_v49 = vmul.f32 %v11134_v39, %v4109_v7  ;;  %v11136_v54 = vpop.eup %11135 }
0x136e   :  { %v4114_v13 = vsub.f32 1.0, %v11136_v54  ;;  %v4119_v5 = vmul.f32 %v11136_v54, %v4117_v12 }
0x136f   :  { %v4112_v48 = vadd.f32 %v4111_v49, %v12928_v26 }
0x1371   :  { %11137 = vtanh.f32 %v4112_v48 }
0x137b   :  { %v11138_v33 = vpop.eup %11137 }
0x137c   :  { %v4115_v22 = vmul.f32 %v11138_v33, %v4114_v13 }
0x137e   :  { %v12977_v3 = vadd.f32 %v4119_v5, %v4115_v22 }
0x1380   :  { %v4122_v35 = vrot.slane %v12977_v3, 2  ;;  %v4293_v22 = vrot.slane %v12977_v3, 6 }
0x1382   :  { %4189 = vmatmul.mubr.f32.vlgmr.msra.gmra.mrb[44].mxu0 %v4122_v35  ;;  %8390 = vmatmul.mubr.f32.vlgmr.msra.gmra.mrb[46].mxu1 %v4122_v35 }
0x1383   :  { %10120 = vmatpush1.bf16.msra.mxu0 %v12754_v19  ;;  %10151 = vmatpush3.bf16.msra.mxu1 %v12813_v20 }
0x1384   :  { %10122 = vmatprep.subr.bf16.mxu0 %v12758_v42  ;;  %10152 = vmatprep.subr.bf16.mxu1 %v11550_v43 }
0x1385   :  { %4364 = vmatprep.mubr.f32.mxu0 %v11549_v0  ;;  %8424 = vmatprep.mubr.msk.f32.mxu1 %vm11551_vm1, %v11549_v0 }
0x1387   :  { %10124 = vmatpush1.bf16.msra.mxu0 %v12760_v24  ;;  %10154 = vmatpush3.bf16.msra.mxu1 %v12819_v57 }
0x1388   :  { %10126 = vmatprep.subr.bf16.mxu0 %v12764_v59  ;;  %10155 = vmatprep.subr.bf16.mxu1 %v11550_v43 }
0x138b   :  { %10128 = vmatpush1.bf16.msra.mxu0 %v12766_v55  ;;  %10157 = vmatpush3.bf16.msra.mxu1 %v12826_v18 }
0x138c   :  { %10130 = vmatprep.subr.bf16.mxu0 %v12770_v44  ;;  %10158 = vmatprep.subr.bf16.mxu1 %v11550_v43 }
0x138f   :  { %10132 = vmatpush1.bf16.msra.mxu0 %v12772_v8  ;;  %10160 = vmatpush3.bf16.msra.mxu1 %v12833_v32 }
0x1390   :  { %10134 = vmatprep.subr.bf16.mxu0 %v12776_v6  ;;  %10161 = vmatprep.subr.bf16.mxu1 %v11550_v43 }
0x1393   :  { %10136 = vmatpush1.bf16.msra.mxu0 %v12778_v52  ;;  %10163 = vmatpush3.bf16.msra.mxu1 %v12839_v29 }
0x1394   :  { %10138 = vmatprep.subr.bf16.mxu0 %v12781_v28  ;;  %10164 = vmatprep.subr.bf16.mxu1 %v11550_v43 }
0x1397   :  { %10140 = vmatpush1.bf16.msra.mxu0 %v12784_v23  ;;  %10166 = vmatpush3.bf16.msra.mxu1 %v12845_v58 }
0x1398   :  { %10142 = vmatprep.subr.bf16.mxu0 %v12787_v63  ;;  %10167 = vmatprep.subr.bf16.mxu1 %v11550_v43 }
0x139b   :  { %10144 = vmatpush1.bf16.msra.mxu0 %v12790_v36  ;;  %10169 = vmatpush3.bf16.msra.mxu1 %v12851_v62 }
0x139c   :  { %10146 = vmatprep.subr.bf16.mxu0 %v12795_v53  ;;  %10170 = vmatprep.subr.bf16.mxu1 %v11550_v43 }
0x139f   :  { %10148 = vmatpush1.bf16.msra.mxu0 %v12797_v41  ;;  %10172 = vmatpush3.bf16.msra.mxu1 %v12857_v50 }
0x13a0   :  { %10174 = vmatprep.subr.bf16.mxu0 %v12752_v4  ;;  %10205 = vmatprep.subr.bf16.mxu1 %v11550_v43 }
0x1455   :  { %v4190_v2 = vpop.f32.mrb[44].mxu0  ;;  %v4261_v9 = vpop.f32.mrb[46].mxu1 }
0x1456   :  { %v4191_v17 = vadd.f32 %v4190_v2, %v12904_v30  ;;  %v4192_v61 = vpop.f32.mrb[45].mxu0  ;;  %v8391_v15 = vpop.f32.mrb[47].mxu1  ;;  %v4262_v12 = vadd.f32 %v4261_v9, %v12925_v60 }
0x1457   :  { %v4193_v51 = vadd.f32 %v4192_v61, %v12907_v16 }
0x1458   :  { %v4266_v14 = vrot.slane %v4191_v17, 4  ;;  %v4286_v13 = vrot.slane %v4262_v12, 4 }
0x1459   :  { %v4276_v1 = vrot.slane %v4193_v51, 4 }
0x145a   :  { %v4268_v27 = vadd.f32 %v4266_v14, %v12914_v21 }
0x145b   :  { %v4278_v47 = vadd.f32 %v4276_v1, %v12921_v11  ;;  %v5164_v1 = vsel %vm1827_vm2, %v12931_v25, %v12977_v3 }
0x145c   :  { %v7001_v40 = vmul.f32 -1.442695, %v4268_v27 }
0x145d   :  { %v7002_v7 = vmul.f32 -1.442695, %v4278_v47 }
0x145e   :  { %11139 = vpow2.f32 %v7001_v40 }
0x145f   :  { %11141 = vpow2.f32 %v7002_v7 }
0x1468   :  { %v11140_v39 = vpop.eup %11139 }
0x1469   :  { %v11142_v49 = vpop.eup %11141  ;;  %v4272_v48 = vadd.f32 1.0, %v11140_v39 }
0x146a   :  { %v4282_v54 = vadd.f32 1.0, %v11142_v49 }
0x146b   :  { %11143 = vrcp.f32 %v4272_v48 }
0x146c   :  { %11145 = vrcp.f32 %v4282_v54 }
0x1475   :  { %v11144_v33 = vpop.eup %11143 }
0x1476   :  { %v11146_v5 = vpop.eup %11145  ;;  %v4288_v35 = vmul.f32 %v11144_v33, %v4286_v13 }
0x1477   :  { %v4295_v2 = vmul.f32 %v11146_v5, %v4293_v22  ;;  %v4291_v61 = vsub.f32 1.0, %v11146_v5 }
0x1478   :  { %v4289_v17 = vadd.f32 %v4288_v35, %v12928_v26 }
0x147a   :  { %11147 = vtanh.f32 %v4289_v17 }
0x1484   :  { %v11148_v15 = vpop.eup %11147 }
0x1485   :  { %v4292_v51 = vmul.f32 %v11148_v15, %v4291_v61 }
0x1487   :  { %v13022_v14 = vadd.f32 %v4295_v2, %v4292_v51 }
0x1489   :  { %v4298_v9 = vrot.slane %v13022_v14, 4  ;;  %v13030_v27 = vsel %vm1829_vm3, %v5164_v1, %v13022_v14  ;;  %v4469_v51 = vrot.slane %v13022_v14, 6 }
0x148b   :  { %4365 = vmatmul.mubr.f32.vlgmr.msra.gmra.mrb[46].mxu0 %v4298_v9  ;;  %8425 = vmatmul.mubr.f32.vlgmr.msra.gmra.mrb[48].mxu1 %v4298_v9 }
0x148c   :  { %10176 = vmatpush1.bf16.msra.mxu0 %v12754_v19  ;;  %10207 = vmatpush3.bf16.msra.mxu1 %v12813_v20 }
0x148d   :  { %10178 = vmatprep.subr.bf16.mxu0 %v12758_v42  ;;  %10208 = vmatprep.subr.bf16.mxu1 %v11550_v43 }
0x148e   :  { %4540 = vmatprep.mubr.f32.mxu0 %v11549_v0  ;;  %8459 = vmatprep.mubr.msk.f32.mxu1 %vm11551_vm1, %v11549_v0 }
0x1490   :  { %10180 = vmatpush1.bf16.msra.mxu0 %v12760_v24  ;;  %10210 = vmatpush3.bf16.msra.mxu1 %v12819_v57 }
0x1491   :  { %10182 = vmatprep.subr.bf16.mxu0 %v12764_v59  ;;  %10211 = vmatprep.subr.bf16.mxu1 %v11550_v43 }
0x1494   :  { %10184 = vmatpush1.bf16.msra.mxu0 %v12766_v55  ;;  %10213 = vmatpush3.bf16.msra.mxu1 %v12826_v18 }
0x1495   :  { %10186 = vmatprep.subr.bf16.mxu0 %v12770_v44  ;;  %10214 = vmatprep.subr.bf16.mxu1 %v11550_v43 }
0x1498   :  { %10188 = vmatpush1.bf16.msra.mxu0 %v12772_v8  ;;  %10216 = vmatpush3.bf16.msra.mxu1 %v12833_v32 }
0x1499   :  { %10190 = vmatprep.subr.bf16.mxu0 %v12776_v6  ;;  %10217 = vmatprep.subr.bf16.mxu1 %v11550_v43 }
0x149c   :  { %10192 = vmatpush1.bf16.msra.mxu0 %v12778_v52  ;;  %10219 = vmatpush3.bf16.msra.mxu1 %v12839_v29 }
0x149d   :  { %10194 = vmatprep.subr.bf16.mxu0 %v12781_v28  ;;  %10220 = vmatprep.subr.bf16.mxu1 %v11550_v43 }
0x14a0   :  { %10196 = vmatpush1.bf16.msra.mxu0 %v12784_v23  ;;  %10222 = vmatpush3.bf16.msra.mxu1 %v12845_v58 }
0x14a1   :  { %10198 = vmatprep.subr.bf16.mxu0 %v12787_v63  ;;  %10223 = vmatprep.subr.bf16.mxu1 %v11550_v43 }
0x14a4   :  { %10200 = vmatpush1.bf16.msra.mxu0 %v12790_v36  ;;  %10225 = vmatpush3.bf16.msra.mxu1 %v12851_v62 }
0x14a5   :  { %10202 = vmatprep.subr.bf16.mxu0 %v12795_v53  ;;  %10226 = vmatprep.subr.bf16.mxu1 %v11550_v43 }
0x14a8   :  { %10204 = vmatpush1.bf16.msra.mxu0 %v12797_v41  ;;  %10228 = vmatpush3.bf16.msra.mxu1 %v12857_v50 }
0x14a9   :  { %10230 = vmatprep.subr.bf16.mxu0 %v12752_v4  ;;  %10261 = vmatprep.subr.bf16.mxu1 %v11550_v43 }
0x155e   :  { %v4366_v25 = vpop.f32.mrb[46].mxu0  ;;  %v4437_v3 = vpop.f32.mrb[48].mxu1 }
0x155f   :  { %v4367_v47 = vadd.f32 %v4366_v25, %v12904_v30  ;;  %v4368_v40 = vpop.f32.mrb[47].mxu0  ;;  %v8426_v7 = vpop.f32.mrb[49].mxu1  ;;  %v4438_v17 = vadd.f32 %v4437_v3, %v12925_v60 }
0x1560   :  { %v4369_v39 = vadd.f32 %v4368_v40, %v12907_v16 }
0x1561   :  { %v4442_v49 = vrot.slane %v4367_v47, 2  ;;  %v4462_v61 = vrot.slane %v4438_v17, 2 }
0x1562   :  { %v4452_v48 = vrot.slane %v4369_v39, 2 }
0x1563   :  { %v4444_v54 = vadd.f32 %v4442_v49, %v12914_v21 }
0x1564   :  { %v4454_v12 = vadd.f32 %v4452_v48, %v12921_v11 }
0x1565   :  { %v7003_v13 = vmul.f32 -1.442695, %v4444_v54 }
0x1566   :  { %v7004_v33 = vmul.f32 -1.442695, %v4454_v12 }
0x1567   :  { %11149 = vpow2.f32 %v7003_v13 }
0x1568   :  { %11151 = vpow2.f32 %v7004_v33  ;;  %v13126_v33 = vadd.f32 %v12901_v37, %v12910_v45 }
0x1571   :  { %v11150_v22 = vpop.eup %11149 }
0x1572   :  { %v11152_v5 = vpop.eup %11151  ;;  %v4448_v35 = vadd.f32 1.0, %v11150_v22 }
0x1573   :  { %v4458_v2 = vadd.f32 1.0, %v11152_v5 }
0x1574   :  { %11153 = vrcp.f32 %v4448_v35 }
0x1575   :  { %11155 = vrcp.f32 %v4458_v2 }
0x157e   :  { %v11154_v15 = vpop.eup %11153 }
0x157f   :  { %v11156_v1 = vpop.eup %11155  ;;  %v4464_v21 = vmul.f32 %v11154_v15, %v4462_v61 }
0x1580   :  { %v4471_v9 = vmul.f32 %v11156_v1, %v4469_v51  ;;  %v4467_v25 = vsub.f32 1.0, %v11156_v1 }
0x1581   :  { %v4465_v11 = vadd.f32 %v4464_v21, %v12928_v26 }
0x1583   :  { %11157 = vtanh.f32 %v4465_v11 }
0x158d   :  { %v11158_v47 = vpop.eup %11157 }
0x158e   :  { %v4468_v40 = vmul.f32 %v11158_v47, %v4467_v25 }
0x1590   :  { %v4472_v7 = vadd.f32 %v4471_v9, %v4468_v40 }
0x1592   :  { %v13074_v39 = vrot.slane %v4472_v7, 6  ;;  %v13078_v49 = vsel %vm1831_vm4, %v13030_v27, %v4472_v7  ;;  %v13119_v27 = vadd.f32 %v12894_v46, %v12897_v56 }
0x1594   :  { %4541 = vmatmul.mubr.f32.vlgmr.msra.gmra.mrb[48].mxu0 %v13074_v39  ;;  %8460 = vmatmul.mubr.f32.vlgmr.msra.gmra.mrb[50].mxu1 %v13074_v39 }
0x1595   :  { %10232 = vmatpush1.bf16.msra.mxu0 %v12754_v19  ;;  %10263 = vmatpush3.bf16.msra.mxu1 %v12813_v20 }
0x1596   :  { %10234 = vmatprep.subr.bf16.mxu0 %v12758_v42  ;;  %10264 = vmatprep.subr.bf16.mxu1 %v11550_v43 }
0x1597   :  { %4702 = vmatprep.mubr.f32.mxu0 %v11549_v0  ;;  %8494 = vmatprep.mubr.msk.f32.mxu1 %vm11551_vm1, %v11549_v0 }
0x1599   :  { %10236 = vmatpush1.bf16.msra.mxu0 %v12760_v24  ;;  %10266 = vmatpush3.bf16.msra.mxu1 %v12819_v57 }
0x159a   :  { %10238 = vmatprep.subr.bf16.mxu0 %v12764_v59  ;;  %10267 = vmatprep.subr.bf16.mxu1 %v11550_v43 }
0x159d   :  { %10240 = vmatpush1.bf16.msra.mxu0 %v12766_v55  ;;  %10269 = vmatpush3.bf16.msra.mxu1 %v12826_v18 }
0x159e   :  { %10242 = vmatprep.subr.bf16.mxu0 %v12770_v44  ;;  %10270 = vmatprep.subr.bf16.mxu1 %v11550_v43 }
0x15a1   :  { %10244 = vmatpush1.bf16.msra.mxu0 %v12772_v8  ;;  %10272 = vmatpush3.bf16.msra.mxu1 %v12833_v32 }
0x15a2   :  { %10246 = vmatprep.subr.bf16.mxu0 %v12776_v6  ;;  %10273 = vmatprep.subr.bf16.mxu1 %v11550_v43 }
0x15a5   :  { %10248 = vmatpush1.bf16.msra.mxu0 %v12778_v52  ;;  %10275 = vmatpush3.bf16.msra.mxu1 %v12839_v29 }
0x15a6   :  { %10250 = vmatprep.subr.bf16.mxu0 %v12781_v28  ;;  %10276 = vmatprep.subr.bf16.mxu1 %v11550_v43 }
0x15a9   :  { %10252 = vmatpush1.bf16.msra.mxu0 %v12784_v23  ;;  %10278 = vmatpush3.bf16.msra.mxu1 %v12845_v58 }
0x15aa   :  { %10254 = vmatprep.subr.bf16.mxu0 %v12787_v63  ;;  %10279 = vmatprep.subr.bf16.mxu1 %v11550_v43 }
0x15ad   :  { %10256 = vmatpush1.bf16.msra.mxu0 %v12790_v36  ;;  %10281 = vmatpush3.bf16.msra.mxu1 %v12851_v62 }
0x15ae   :  { %10258 = vmatprep.subr.bf16.mxu0 %v12795_v53  ;;  %10282 = vmatprep.subr.bf16.mxu1 %v11550_v43 }
0x15b1   :  { %10260 = vmatpush1.bf16.msra.mxu0 %v12797_v41  ;;  %10284 = vmatpush3.bf16.msra.mxu1 %v12857_v50 }
0x15b2   :  { %10286 = vmatprep.subr.bf16.mxu0 %v12752_v4  ;;  %10317 = vmatprep.subr.bf16.mxu1 %v11550_v43 }
0x1667   :  { %v4542_v26 = vpop.f32.mrb[48].mxu0  ;;  %v4613_v14 = vpop.f32.mrb[50].mxu1 }
0x1668   :  { %v4543_v3 = vadd.f32 %v4542_v26, %v12904_v30  ;;  %v4544_v48 = vpop.f32.mrb[49].mxu0  ;;  %v8461_v54 = vpop.f32.mrb[51].mxu1  ;;  %v4614_v61 = vadd.f32 %v4613_v14, %v12925_v60 }
0x1669   :  { %v4545_v12 = vadd.f32 %v4544_v48, %v12907_v16 }
0x166a   :  { %v4617_v13 = vadd.f32 %v4543_v3, %v13119_v27 }
0x166b   :  { %v4624_v5 = vadd.f32 %v4545_v12, %v13126_v33 }
0x166c   :  { %v7005_v22 = vmul.f32 -1.442695, %v4617_v13 }
0x166d   :  { %v7006_v35 = vmul.f32 -1.442695, %v4624_v5 }
0x166e   :  { %11159 = vpow2.f32 %v7005_v22 }
0x166f   :  { %11161 = vpow2.f32 %v7006_v35 }
0x1678   :  { %v11160_v46 = vpop.eup %11159 }
0x1679   :  { %v4621_v56 = vadd.f32 1.0, %v11160_v46  ;;  %v11162_v2 = vpop.eup %11161 }
0x167a   :  { %v4628_v17 = vadd.f32 1.0, %v11162_v2 }
0x167b   :  { %11163 = vrcp.f32 %v4621_v56 }
0x167c   :  { %11165 = vrcp.f32 %v4628_v17 }
0x1685   :  { %v11164_v15 = vpop.eup %11163 }
0x1686   :  { %v4631_v51 = vmul.f32 %v11164_v15, %v4614_v61  ;;  %v11166_v37 = vpop.eup %11165 }
0x1687   :  { %v4634_v45 = vsub.f32 1.0, %v11166_v37  ;;  %v4636_v11 = vmul.f32 %v11166_v37, %v13074_v39 }
0x1688   :  { %v4632_v1 = vadd.f32 %v4631_v51, %v12899_v10 }
0x168a   :  { %11167 = vtanh.f32 %v4632_v1 }
0x1694   :  { %v11168_v21 = vpop.eup %11167 }
0x1695   :  { %v4635_v9 = vmul.f32 %v11168_v21, %v4634_v45 }
0x1697   :  { %v13132_v25 = vadd.f32 %v4636_v11, %v4635_v9 }
0x1699   :  { %4703 = vmatmul.mubr.f32.vlgmr.msra.gmra.mrb[50].mxu0 %v13132_v25  ;;  %8495 = vmatmul.mubr.f32.vlgmr.msra.gmra.mrb[52].mxu1 %v13132_v25  ;;  %v4808_v1 = vrot.slane %v13132_v25, 6 }
0x169a   :  { %10288 = vmatpush1.bf16.msra.mxu0 %v12754_v19  ;;  %10319 = vmatpush3.bf16.msra.mxu1 %v12813_v20 }
0x169b   :  { %10290 = vmatprep.subr.bf16.mxu0 %v12758_v42  ;;  %10320 = vmatprep.subr.bf16.mxu1 %v11550_v43 }
0x169c   :  { %4879 = vmatprep.mubr.f32.mxu0 %v11549_v0  ;;  %8529 = vmatprep.mubr.msk.f32.mxu1 %vm11551_vm1, %v11549_v0 }
0x169e   :  { %10292 = vmatpush1.bf16.msra.mxu0 %v12760_v24  ;;  %10322 = vmatpush3.bf16.msra.mxu1 %v12819_v57 }
0x169f   :  { %10294 = vmatprep.subr.bf16.mxu0 %v12764_v59  ;;  %10323 = vmatprep.subr.bf16.mxu1 %v11550_v43 }
0x16a2   :  { %10296 = vmatpush1.bf16.msra.mxu0 %v12766_v55  ;;  %10325 = vmatpush3.bf16.msra.mxu1 %v12826_v18 }
0x16a3   :  { %10298 = vmatprep.subr.bf16.mxu0 %v12770_v44  ;;  %10326 = vmatprep.subr.bf16.mxu1 %v11550_v43 }
0x16a6   :  { %10300 = vmatpush1.bf16.msra.mxu0 %v12772_v8  ;;  %10328 = vmatpush3.bf16.msra.mxu1 %v12833_v32 }
0x16a7   :  { %10302 = vmatprep.subr.bf16.mxu0 %v12776_v6  ;;  %10329 = vmatprep.subr.bf16.mxu1 %v11550_v43 }
0x16aa   :  { %10304 = vmatpush1.bf16.msra.mxu0 %v12778_v52  ;;  %10331 = vmatpush3.bf16.msra.mxu1 %v12839_v29 }
0x16ab   :  { %10306 = vmatprep.subr.bf16.mxu0 %v12781_v28  ;;  %10332 = vmatprep.subr.bf16.mxu1 %v11550_v43 }
0x16ae   :  { %10308 = vmatpush1.bf16.msra.mxu0 %v12784_v23  ;;  %10334 = vmatpush3.bf16.msra.mxu1 %v12845_v58 }
0x16af   :  { %10310 = vmatprep.subr.bf16.mxu0 %v12787_v63  ;;  %10335 = vmatprep.subr.bf16.mxu1 %v11550_v43 }
0x16b2   :  { %10312 = vmatpush1.bf16.msra.mxu0 %v12790_v36  ;;  %10337 = vmatpush3.bf16.msra.mxu1 %v12851_v62 }
0x16b3   :  { %10314 = vmatprep.subr.bf16.mxu0 %v12795_v53  ;;  %10338 = vmatprep.subr.bf16.mxu1 %v11550_v43 }
0x16b6   :  { %10316 = vmatpush1.bf16.msra.mxu0 %v12797_v41  ;;  %10340 = vmatpush3.bf16.msra.mxu1 %v12857_v50 }
0x16b7   :  { %10342 = vmatprep.subr.bf16.mxu0 %v12752_v4  ;;  %10373 = vmatprep.subr.bf16.mxu1 %v11550_v43 }
0x176c   :  { %v4704_v47 = vpop.f32.mrb[50].mxu0  ;;  %v4775_v40 = vpop.f32.mrb[52].mxu1 }
0x176d   :  { %v4705_v7 = vadd.f32 %v4704_v47, %v12904_v30  ;;  %v4706_v39 = vpop.f32.mrb[51].mxu0  ;;  %v8496_v26 = vpop.f32.mrb[53].mxu1  ;;  %v4776_v46 = vadd.f32 %v4775_v40, %v12925_v60 }
0x176e   :  { %v4707_v14 = vadd.f32 %v4706_v39, %v12907_v16 }
0x176f   :  { %v4780_v3 = vrot.slane %v4705_v7, 6  ;;  %v4800_v2 = vrot.slane %v4776_v46, 6 }
0x1770   :  { %v4790_v48 = vrot.slane %v4707_v14, 6 }
0x1771   :  { %v4782_v54 = vadd.f32 %v4780_v3, %v13119_v27 }
0x1772   :  { %v4792_v13 = vadd.f32 %v4790_v48, %v13126_v33 }
0x1773   :  { %v7007_v12 = vmul.f32 -1.442695, %v4782_v54  ;;  %v5170_v54 = vld [vmem:[#allocation14] sm:$0xff] }
0x1774   :  { %v7008_v22 = vmul.f32 -1.442695, %v4792_v13  ;;  %v5177_v13 = vld [vmem:[#allocation14 + $0x38] sm:$0xff] }
0x1775   :  { %11169 = vpow2.f32 %v7007_v12  ;;  %v5173_v12 = vld [vmem:[#allocation14 + $0x18] sm:$0xff] }
0x1776   :  { %11171 = vpow2.f32 %v7008_v22  ;;  %v5180_v22 = vld [vmem:[#allocation14 + $0x50] sm:$0xff] }
0x177f   :  { %v11170_v4 = vpop.eup %11169 }
0x1780   :  { %v4786_v5 = vadd.f32 1.0, %v11170_v4  ;;  %v11172_v35 = vpop.eup %11171 }
0x1781   :  { %v4796_v56 = vadd.f32 1.0, %v11172_v35 }
0x1782   :  { %11173 = vrcp.f32 %v4786_v5  ;;  %v10399_v5 = vpack.c.bf16 %v5173_v12, %v5170_v54  ;;  %v5178_v54 = vld [vmem:[#allocation14 + $0x40] sm:$0xff]  ;;  %v5181_v12 = vld [vmem:[#allocation14 + $0x58] sm:$0xff] }
0x1783   :  { %11175 = vrcp.f32 %v4796_v56  ;;  %v10401_v56 = vpack.c.bf16 %v5180_v22, %v5177_v13  ;;  %v10433_v13 = vpack.c.bf16 %v5181_v12, %v5178_v54  ;;  %v5219_v22 = vld [vmem:[#allocation16 + $0x8] sm:$0xff] }
0x1784   :  { %v5251_v54 = vld [vmem:[#allocation16 + $0x108] sm:$0xff] }
0x178c   :  { %v11174_v17 = vpop.eup %11173 }
0x178d   :  { %v4802_v61 = vmul.f32 %v11174_v17, %v4800_v2  ;;  %v11176_v51 = vpop.eup %11175  ;;  %v5176_v2 = vld [vmem:[#allocation14 + $0x30] sm:$0xff]  ;;  %v5179_v17 = vld [vmem:[#allocation14 + $0x48] sm:$0xff] }
0x178e   :  { %v4805_v37 = vsub.f32 1.0, %v11176_v51  ;;  %v4810_v9 = vmul.f32 %v11176_v51, %v4808_v1  ;;  %v5186_v51 = vld [vmem:[#allocation14 + $0x80] sm:$0xff]  ;;  %v10403_v1 = vpack.c.bf16 %v5179_v17, %v5176_v2  ;;  %v5187_v17 = vld [vmem:[#allocation14 + $0x88] sm:$0xff] }
0x178f   :  { %v4803_v15 = vadd.f32 %v4802_v61, %v12899_v10 }
0x1791   :  { %11177 = vtanh.f32 %v4803_v15  ;;  %v5183_v15 = vld [vmem:[#allocation14 + $0x68] sm:$0xff] }
0x179b   :  { %v11178_v45 = vpop.eup %11177 }
0x179c   :  { %v4806_v21 = vmul.f32 %v11178_v45, %v4805_v37  ;;  %v10405_v37 = vpack.c.bf16 %v5186_v51, %v5183_v15  ;;  %v5185_v45 = vld [vmem:[#allocation14 + $0x78] sm:$0xff] }
0x179d   :  { %v5225_v51 = vld [vmem:[#allocation16 + $0x38] sm:$0xff] }
0x179e   :  { %v13178_v11 = vadd.f32 %v4810_v9, %v4806_v21  ;;  %v5189_v21 = vld [vmem:[#allocation14 + $0x98] sm:$0xff]  ;;  %v5192_v9 = vld [vmem:[#allocation14 + $0xb0] sm:$0xff] }
0x17a0   :  { %v4813_v47 = vrot.slane %v13178_v11, 2  ;;  %v5167_v35 = vsel %vm1827_vm2, %v13132_v25, %v13178_v11  ;;  %v5182_v25 = vld [vmem:[#allocation14 + $0x60] sm:$0xff] }
0x17a2   :  { %4880 = vmatmul.mubr.f32.vlgmr.msra.gmra.mrb[52].mxu0 %v4813_v47  ;;  %8530 = vmatmul.mubr.f32.vlgmr.msra.gmra.mrb[54].mxu1 %v4813_v47  ;;  %v10409_v47 = vpack.c.bf16 %v5192_v9, %v5189_v21  ;;  %v5190_v9 = vld [vmem:[#allocation14 + $0xa0] sm:$0xff] }
0x17a3   :  { %10344 = vmatpush1.bf16.msra.mxu0 %v12754_v19  ;;  %10375 = vmatpush3.bf16.msra.mxu1 %v12813_v20  ;;  %v5171_v19 = vld [vmem:[#allocation14 + $0x8] sm:$0xff] }
0x17a4   :  { %10346 = vmatprep.subr.bf16.mxu0 %v12758_v42  ;;  %10376 = vmatprep.subr.bf16.mxu1 %v11550_v43  ;;  %v5174_v42 = vld [vmem:[#allocation14 + $0x20] sm:$0xff] }
0x17a5   :  { %5055 = vmatprep.mubr.f32.mxu0 %v11549_v0  ;;  %8564 = vmatprep.mubr.msk.f32.mxu1 %vm11551_vm1, %v11549_v0 }
0x17a7   :  { %10348 = vmatpush1.bf16.msra.mxu0 %v12760_v24  ;;  %10378 = vmatpush3.bf16.msra.mxu1 %v12819_v57  ;;  %v10397_v24 = vpack.c.bf16 %v5174_v42, %v5171_v19  ;;  %v5188_v19 = vld [vmem:[#allocation14 + $0x90] sm:$0xff]  ;;  %v5191_v42 = vld [vmem:[#allocation14 + $0xa8] sm:$0xff] }
0x17a8   :  { %10350 = vmatprep.subr.bf16.mxu0 %v12764_v59  ;;  %10379 = vmatprep.subr.bf16.mxu1 %v11550_v43 }
0x17ab   :  { %10352 = vmatpush1.bf16.msra.mxu0 %v12766_v55  ;;  %10381 = vmatpush3.bf16.msra.mxu1 %v12826_v18 }
0x17ac   :  { %10354 = vmatprep.subr.bf16.mxu0 %v12770_v44  ;;  %10382 = vmatprep.subr.bf16.mxu1 %v11550_v43 }
0x17af   :  { %10356 = vmatpush1.bf16.msra.mxu0 %v12772_v8  ;;  %10384 = vmatpush3.bf16.msra.mxu1 %v12833_v32 }
0x17b0   :  { %10358 = vmatprep.subr.bf16.mxu0 %v12776_v6  ;;  %10385 = vmatprep.subr.bf16.mxu1 %v11550_v43 }
0x17b3   :  { %10360 = vmatpush1.bf16.msra.mxu0 %v12778_v52  ;;  %10387 = vmatpush3.bf16.msra.mxu1 %v12839_v29 }
0x17b4   :  { %10362 = vmatprep.subr.bf16.mxu0 %v12781_v28  ;;  %10388 = vmatprep.subr.bf16.mxu1 %v11550_v43 }
0x17b7   :  { %10364 = vmatpush1.bf16.msra.mxu0 %v12784_v23  ;;  %10390 = vmatpush3.bf16.msra.mxu1 %v12845_v58 }
0x17b8   :  { %10366 = vmatprep.subr.bf16.mxu0 %v12787_v63  ;;  %10391 = vmatprep.subr.bf16.mxu1 %v11550_v43 }
0x17bb   :  { %10368 = vmatpush1.bf16.msra.mxu0 %v12790_v36  ;;  %10393 = vmatpush3.bf16.msra.mxu1 %v12851_v62 }
0x17bc   :  { %10370 = vmatprep.subr.bf16.mxu0 %v12795_v53  ;;  %10394 = vmatprep.subr.bf16.mxu1 %v11550_v43 }
0x17bf   :  { %10372 = vmatpush1.bf16.msra.mxu0 %v12797_v41  ;;  %10396 = vmatpush3.bf16.msra.mxu1 %v12857_v50  ;;  %v4984_v50 = vrot.slane %v13178_v11, 6  ;;  %v10407_v11 = vpack.c.bf16 %v5185_v45, %v5182_v25  ;;  %v5224_v25 = vld [vmem:[#allocation16 + $0x30] sm:$0xff]  ;;  %v5227_v45 = vld [vmem:[#allocation16 + $0x48] sm:$0xff] }
0x17c0   :  { %10398 = vmatprep.subr.bf16.mxu0 %v10397_v24  ;;  %v5195_v24 = vld [vmem:[#allocation14 + $0xc8] sm:$0xff]  ;;  %v13243_v21 = vpack.c.bf16 %v5227_v45, %v5224_v25  ;;  %v5261_v25 = vld [vmem:[#allocation16 + $0x158] sm:$0xff]  ;;  %v5264_v45 = vld [vmem:[#allocation16 + $0x170] sm:$0xff] }
0x1875   :  { %v4881_v59 = vpop.f32.mrb[52].mxu0  ;;  %v4952_v55 = vpop.f32.mrb[54].mxu1 }
0x1876   :  { %v4882_v44 = vadd.f32 %v4881_v59, %v12904_v30  ;;  %v4883_v8 = vpop.f32.mrb[53].mxu0  ;;  %v8531_v6 = vpop.f32.mrb[55].mxu1  ;;  %v4953_v29 = vadd.f32 %v4952_v55, %v12925_v60  ;;  %v5198_v59 = vld [vmem:[#allocation14 + $0xe0] sm:$0xff]  ;;  %v10411_v55 = vpack.c.bf16 %v5191_v42, %v5188_v19  ;;  %v5231_v19 = vld [vmem:[#allocation16 + $0x68] sm:$0xff] }
0x1877   :  { %v4884_v52 = vadd.f32 %v4883_v8, %v12907_v16  ;;  %v5194_v8 = vld [vmem:[#allocation14 + $0xc0] sm:$0xff]  ;;  %v5197_v6 = vld [vmem:[#allocation14 + $0xd8] sm:$0xff] }
0x1878   :  { %v4957_v28 = vrot.slane %v4882_v44, 4  ;;  %v4977_v58 = vrot.slane %v4953_v29, 4  ;;  %v10413_v44 = vpack.c.bf16 %v5198_v59, %v5195_v24  ;;  %v5209_v29 = vld [vmem:[#allocation14 + $0x138] sm:$0xff]  ;;  %v5234_v42 = vld [vmem:[#allocation16 + $0x80] sm:$0xff] }
0x1879   :  { %v4967_v23 = vrot.slane %v4884_v52, 4  ;;  %v5201_v52 = vld [vmem:[#allocation14 + $0xf8] sm:$0xff]  ;;  %v13247_v24 = vpack.c.bf16 %v5234_v42, %v5231_v19  ;;  %v5230_v59 = vld [vmem:[#allocation16 + $0x60] sm:$0xff] }
0x187a   :  { %v4959_v63 = vadd.f32 %v4957_v28, %v13119_v27  ;;  %v5204_v28 = vld [vmem:[#allocation14 + $0x110] sm:$0xff] }
0x187b   :  { %v4969_v36 = vadd.f32 %v4967_v23, %v13126_v33  ;;  %v10415_v23 = vpack.c.bf16 %v5197_v6, %v5194_v8  ;;  %v5196_v8 = vld [vmem:[#allocation14 + $0xd0] sm:$0xff]  ;;  %v5199_v6 = vld [vmem:[#allocation14 + $0xe8] sm:$0xff] }
0x187c   :  { %v7009_v53 = vmul.f32 -1.442695, %v4959_v63  ;;  %v10417_v63 = vpack.c.bf16 %v5204_v28, %v5201_v52  ;;  %v10445_v52 = vpack.c.bf16 %v5199_v6, %v5196_v8  ;;  %v5237_v28 = vld [vmem:[#allocation16 + $0x98] sm:$0xff] }
0x187d   :  { %v7010_v41 = vmul.f32 -1.442695, %v4969_v36  ;;  %v5200_v36 = vld [vmem:[#allocation14 + $0xf0] sm:$0xff] }
0x187e   :  { %11179 = vpow2.f32 %v7009_v53  ;;  %v5203_v53 = vld [vmem:[#allocation14 + $0x108] sm:$0xff] }
0x187f   :  { %11181 = vpow2.f32 %v7010_v41  ;;  %v5207_v41 = vld [vmem:[#allocation14 + $0x128] sm:$0xff] }
0x1888   :  { %v11180_v20 = vpop.eup %11179 }
0x1889   :  { %v11182_v57 = vpop.eup %11181  ;;  %v4963_v18 = vadd.f32 1.0, %v11180_v20  ;;  %v5210_v20 = vld [vmem:[#allocation14 + $0x140] sm:$0xff] }
0x188a   :  { %v4973_v32 = vadd.f32 1.0, %v11182_v57  ;;  %v10419_v57 = vpack.c.bf16 %v5203_v53, %v5200_v36  ;;  %v5236_v36 = vld [vmem:[#allocation16 + $0x90] sm:$0xff]  ;;  %v5239_v53 = vld [vmem:[#allocation16 + $0xa8] sm:$0xff] }
0x188b   :  { %11183 = vrcp.f32 %v4963_v18  ;;  %v10421_v18 = vpack.c.bf16 %v5210_v20, %v5207_v41  ;;  %v13255_v41 = vpack.c.bf16 %v5239_v53, %v5236_v36  ;;  %v5202_v20 = vld [vmem:[#allocation14 + $0x100] sm:$0xff] }
0x188c   :  { %11185 = vrcp.f32 %v4973_v32  ;;  %v5206_v32 = vld [vmem:[#allocation14 + $0x120] sm:$0xff] }
0x1895   :  { %v11184_v62 = vpop.eup %11183 }
0x1896   :  { %v11186_v40 = vpop.eup %11185  ;;  %v4979_v7 = vmul.f32 %v11184_v62, %v4977_v58  ;;  %v5213_v58 = vld [vmem:[#allocation14 + $0x158] sm:$0xff]  ;;  %v5216_v62 = vld [vmem:[#allocation14 + $0x170] sm:$0xff] }
0x1897   :  { %v4986_v39 = vmul.f32 %v11186_v40, %v4984_v50  ;;  %v4982_v14 = vsub.f32 1.0, %v11186_v40  ;;  %v10423_v50 = vpack.c.bf16 %v5209_v29, %v5206_v32  ;;  %v10425_v40 = vpack.c.bf16 %v5216_v62, %v5213_v58  ;;  %v5246_v29 = vld [vmem:[#allocation16 + $0xe0] sm:$0xff]  ;;  %v5245_v62 = vld [vmem:[#allocation16 + $0xd8] sm:$0xff] }
0x1898   :  { %v4980_v26 = vadd.f32 %v4979_v7, %v12899_v10  ;;  %v5212_v7 = vld [vmem:[#allocation14 + $0x150] sm:$0xff]  ;;  %v5242_v58 = vld [vmem:[#allocation16 + $0xc0] sm:$0xff] }
0x189a   :  { %11187 = vtanh.f32 %v4980_v26 }
0x18a4   :  { %v11188_v3 = vpop.eup %11187 }
0x18a5   :  { %v4983_v48 = vmul.f32 %v11188_v3, %v4982_v14  ;;  %v5172_v14 = vld [vmem:[#allocation14 + $0x10] sm:$0xff]  ;;  %v5175_v3 = vld [vmem:[#allocation14 + $0x28] sm:$0xff] }
0x18a7   :  { %v13221_v4 = vadd.f32 %v4986_v39, %v4983_v48  ;;  %v5215_v39 = vld [vmem:[#allocation14 + $0x168] sm:$0xff]  ;;  %v10429_v48 = vpack.c.bf16 %v5175_v3, %v5172_v14  ;;  %v5252_v3 = vld [vmem:[#allocation16 + $0x110] sm:$0xff] }
0x18a8   :  { %v10427_v26 = vpack.c.bf16 %v5215_v39, %v5212_v7  ;;  %v5208_v7 = vld [vmem:[#allocation14 + $0x130] sm:$0xff]  ;;  %v5211_v39 = vld [vmem:[#allocation14 + $0x148] sm:$0xff] }
0x18a9   :  { %v4989_v46 = vrot.slane %v13221_v4, 4  ;;  %v13229_v61 = vsel %vm1829_vm3, %v5167_v35, %v13221_v4  ;;  %10430 = vmatprep.subr.bf16.mxu1 %v10429_v48  ;;  %v10453_v14 = vpack.c.bf16 %v5211_v39, %v5208_v7 }
0x18ab   :  { %5056 = vmatmul.mubr.f32.vlgmr.msra.gmra.mrb[54].mxu0 %v4989_v46  ;;  %8565 = vmatmul.mubr.f32.vlgmr.msra.gmra.mrb[56].mxu1 %v4989_v46  ;;  %v5218_v46 = vld [vmem:[#allocation16] sm:$0xff] }
0x18ac   :  { %10400 = vmatpush1.bf16.msra.mxu0 %v10399_v5  ;;  %8599 = vmatprep.mubr.f32.mxu1 %v13078_v49  ;;  %v5222_v5 = vld [vmem:[#allocation16 + $0x20] sm:$0xff] }
0x18ad   :  { %10402 = vmatprep.subr.bf16.mxu0 %v10401_v56  ;;  %5347 = vmatprep.mubr.f32.mxu0 %v11549_v0  ;;  %v13235_v35 = vpack.c.bf16 %v5222_v5, %v5219_v22  ;;  %v5221_v56 = vld [vmem:[#allocation16 + $0x18] sm:$0xff]  ;;  %v5255_v5 = vld [vmem:[#allocation16 + $0x128] sm:$0xff] }
0x18ae   :  { %10432 = vmatpush3.bf16.msra.mxu1 %v10429_v48  ;;  %v13237_v2 = vpack.c.bf16 %v5221_v56, %v5218_v46  ;;  %v5248_v48 = vld [vmem:[#allocation16 + $0xf0] sm:$0xff]  ;;  %v5217_v22 = vld [vmem:[#allocation14 + $0x178] sm:$0xff]  ;;  %v5258_v46 = vld [vmem:[#allocation16 + $0x140] sm:$0xff] }
0x18af   :  { %10434 = vmatprep.subr.bf16.mxu1 %v10433_v13  ;;  %v13267_v56 = vpack.c.bf16 %v5251_v54, %v5248_v48 }
0x18b0   :  { %10404 = vmatpush1.bf16.msra.mxu0 %v10403_v1  ;;  %v5228_v1 = vld [vmem:[#allocation16 + $0x50] sm:$0xff] }
0x18b1   :  { %10406 = vmatprep.subr.bf16.mxu0 %v10405_v37  ;;  %v13241_v37 = vpack.c.bf16 %v5228_v1, %v5225_v51  ;;  %v5257_v51 = vld [vmem:[#allocation16 + $0x138] sm:$0xff] }
0x18b2   :  { %10436 = vmatpush3.bf16.msra.mxu1 %v10433_v13  ;;  %v5214_v13 = vld [vmem:[#allocation14 + $0x160] sm:$0xff] }
0x18b4   :  { %10408 = vmatpush1.bf16.msra.mxu0 %v10407_v11  ;;  %v5193_v11 = vld [vmem:[#allocation14 + $0xb8] sm:$0xff] }
0x18b5   :  { %10410 = vmatprep.subr.bf16.mxu0 %v10409_v47  ;;  %v10441_v47 = vpack.c.bf16 %v5193_v11, %v5190_v9  ;;  %v13278_v9 = vpack.c.bf16 %v5264_v45, %v5261_v25  ;;  %v5260_v11 = vld [vmem:[#allocation16 + $0x150] sm:$0xff]  ;;  %v5235_v25 = vld [vmem:[#allocation16 + $0x88] sm:$0xff]  ;;  %v5238_v45 = vld [vmem:[#allocation16 + $0xa0] sm:$0xff] }
0x18b8   :  { %10412 = vmatpush1.bf16.msra.mxu0 %v10411_v55  ;;  %v5233_v55 = vld [vmem:[#allocation16 + $0x78] sm:$0xff] }
0x18b9   :  { %10414 = vmatprep.subr.bf16.mxu0 %v10413_v44  ;;  %v13249_v44 = vpack.c.bf16 %v5233_v55, %v5230_v59 }
0x18bc   :  { %10416 = vmatpush1.bf16.msra.mxu0 %v10415_v23  ;;  %v5240_v23 = vld [vmem:[#allocation16 + $0xb0] sm:$0xff] }
0x18bd   :  { %10418 = vmatprep.subr.bf16.mxu0 %v10417_v63  ;;  %v13253_v63 = vpack.c.bf16 %v5240_v23, %v5237_v28 }
0x18c0   :  { %10420 = vmatpush1.bf16.msra.mxu0 %v10419_v57  ;;  %v5205_v57 = vld [vmem:[#allocation14 + $0x118] sm:$0xff] }
0x18c1   :  { %10422 = vmatprep.subr.bf16.mxu0 %v10421_v18  ;;  %v5243_v18 = vld [vmem:[#allocation16 + $0xc8] sm:$0xff]  ;;  %v10449_v32 = vpack.c.bf16 %v5205_v57, %v5202_v20 }
0x18c4   :  { %10424 = vmatpush1.bf16.msra.mxu0 %v10423_v50  ;;  %v13259_v50 = vpack.c.bf16 %v5246_v29, %v5243_v18 }
0x18c5   :  { %10426 = vmatprep.subr.bf16.mxu0 %v10425_v40  ;;  %v13261_v40 = vpack.c.bf16 %v5245_v62, %v5242_v58 }
0x18c8   :  { %10428 = vmatpush1.bf16.msra.mxu0 %v10427_v26  ;;  %v5249_v26 = vld [vmem:[#allocation16 + $0xf8] sm:$0xff] }
0x18c9   :  { %10462 = vmatprep.subr.bf16.mxu0 %v13235_v35  ;;  %v13264_v12 = vpack.c.bf16 %v5252_v3, %v5249_v26 }
0x18cb   :  { %5348 = vmatmul.mubr.f32.vlgmr.msra.gmra.mrb[56].mxu0 %v13078_v49  ;;  %v5184_v49 = vld [vmem:[#allocation14 + $0x70] sm:$0xff] }
0x18cc   :  { %5353 = vmatprep.mubr.f32.mxu0 %v11549_v0  ;;  %10464 = vmatpush1.bf16.msra.mxu0 %v13237_v2  ;;  %v10437_v15 = vpack.c.bf16 %v5187_v17, %v5184_v49  ;;  %v10457_v49 = vpack.c.bf16 %v5217_v22, %v5214_v13  ;;  %v13270_v17 = vpack.c.bf16 %v5258_v46, %v5255_v5  ;;  %v5220_v13 = vld [vmem:[#allocation16 + $0x10] sm:$0xff]  ;;  %v5223_v22 = vld [vmem:[#allocation16 + $0x28] sm:$0xff] }
0x18cd   :  { %10466 = vmatprep.subr.bf16.mxu0 %v13241_v37  ;;  %v13296_v46 = vpack.c.bf16 %v5223_v22, %v5220_v13 }
0x18ce   :  { %10438 = vmatprep.subr.bf16.mxu1 %v10437_v15 }
0x18cf   :  { %10440 = vmatpush3.bf16.msra.mxu1 %v10437_v15  ;;  %v5254_v15 = vld [vmem:[#allocation16 + $0x120] sm:$0xff] }
0x18d0   :  { %10468 = vmatpush1.bf16.msra.mxu0 %v13243_v21  ;;  %10442 = vmatprep.subr.bf16.mxu1 %v10441_v47  ;;  %v13273_v1 = vpack.c.bf16 %v5257_v51, %v5254_v15  ;;  %v5229_v15 = vld [vmem:[#allocation16 + $0x58] sm:$0xff]  ;;  %v5232_v51 = vld [vmem:[#allocation16 + $0x70] sm:$0xff] }
0x18d1   :  { %10470 = vmatprep.subr.bf16.mxu0 %v13247_v24 }
0x18d3   :  { %10444 = vmatpush3.bf16.msra.mxu1 %v10441_v47  ;;  %v5263_v47 = vld [vmem:[#allocation16 + $0x168] sm:$0xff] }
0x18d4   :  { %10472 = vmatpush1.bf16.msra.mxu0 %v13249_v44  ;;  %10446 = vmatprep.subr.bf16.mxu1 %v10445_v52  ;;  %v13280_v19 = vpack.c.bf16 %v5263_v47, %v5260_v11  ;;  %v5241_v11 = vld [vmem:[#allocation16 + $0xb8] sm:$0xff] }
0x18d5   :  { %10474 = vmatprep.subr.bf16.mxu0 %v13253_v63  ;;  %v13316_v47 = vpack.c.bf16 %v5241_v11, %v5238_v45 }
0x18d7   :  { %10448 = vmatpush3.bf16.msra.mxu1 %v10445_v52 }
0x18d8   :  { %10476 = vmatpush1.bf16.msra.mxu0 %v13255_v41  ;;  %10450 = vmatprep.subr.bf16.mxu1 %v10449_v32 }
0x18d9   :  { %10478 = vmatprep.subr.bf16.mxu0 %v13259_v50 }
0x18db   :  { %10452 = vmatpush3.bf16.msra.mxu1 %v10449_v32 }
0x18dc   :  { %10480 = vmatpush1.bf16.msra.mxu0 %v13261_v40  ;;  %10454 = vmatprep.subr.bf16.mxu1 %v10453_v14 }
0x18dd   :  { %10482 = vmatprep.subr.bf16.mxu0 %v13264_v12 }
0x18df   :  { %10456 = vmatpush3.bf16.msra.mxu1 %v10453_v14 }
0x18e0   :  { %10484 = vmatpush1.bf16.msra.mxu0 %v13267_v56  ;;  %10458 = vmatprep.subr.bf16.mxu1 %v10457_v49 }
0x18e1   :  { %10486 = vmatprep.subr.bf16.mxu0 %v13270_v17 }
0x18e3   :  { %10460 = vmatpush3.bf16.msra.mxu1 %v10457_v49  ;;  %v5226_v49 = vld [vmem:[#allocation16 + $0x40] sm:$0xff] }
0x18e4   :  { %10488 = vmatpush1.bf16.msra.mxu0 %v13273_v1  ;;  %10493 = vmatprep.subr.bf16.mxu1 %v11550_v43 }
0x18e5   :  { %10490 = vmatprep.subr.bf16.mxu0 %v13278_v9 }
0x18e8   :  { %10492 = vmatpush1.bf16.msra.mxu0 %v13280_v19 }
0x18e9   :  { %10518 = vmatprep.subr.bf16.mxu0 %v13235_v35 }
0x197e   :  { %v5057_v42 = vpop.f32.mrb[54].mxu0  ;;  %v5128_v59 = vpop.f32.mrb[56].mxu1 }
0x197f   :  { %v5058_v55 = vadd.f32 %v5057_v42, %v12904_v30  ;;  %v5059_v8 = vpop.f32.mrb[55].mxu0  ;;  %v8566_v6 = vpop.f32.mrb[57].mxu1  ;;  %v5129_v30 = vadd.f32 %v5128_v59, %v12925_v60  ;;  %v5244_v42 = vld [vmem:[#allocation16 + $0xd0] sm:$0xff]  ;;  %v5247_v59 = vld [vmem:[#allocation16 + $0xe8] sm:$0xff] }
0x1980   :  { %v5060_v52 = vadd.f32 %v5059_v8, %v12907_v16  ;;  %v5250_v8 = vld [vmem:[#allocation16 + $0x100] sm:$0xff]  ;;  %v5253_v6 = vld [vmem:[#allocation16 + $0x118] sm:$0xff] }
0x1981   :  { %v5133_v28 = vrot.slane %v5058_v55, 2  ;;  %v5153_v62 = vrot.slane %v5129_v30, 2  ;;  %v13322_v55 = vpack.c.bf16 %v5247_v59, %v5244_v42 }
0x1982   :  { %v5143_v23 = vrot.slane %v5060_v52, 2  ;;  %v13328_v52 = vpack.c.bf16 %v5253_v6, %v5250_v8 }
0x1983   :  { %v5135_v36 = vadd.f32 %v5133_v28, %v13119_v27  ;;  %v5160_v27 = vrot.slane %v13221_v4, 6  ;;  %v5256_v28 = vld [vmem:[#allocation16 + $0x130] sm:$0xff] }
0x1984   :  { %v5145_v53 = vadd.f32 %v5143_v23, %v13126_v33  ;;  %v5259_v23 = vld [vmem:[#allocation16 + $0x148] sm:$0xff] }
0x1985   :  { %v7011_v20 = vmul.f32 -1.442695, %v5135_v36  ;;  %v13334_v36 = vpack.c.bf16 %v5259_v23, %v5256_v28 }
0x1986   :  { %v7012_v57 = vmul.f32 -1.442695, %v5145_v53  ;;  %v5262_v53 = vld [vmem:[#allocation16 + $0x160] sm:$0xff] }
0x1987   :  { %11189 = vpow2.f32 %v7011_v20  ;;  %v5265_v20 = vld [vmem:[#allocation16 + $0x178] sm:$0xff] }
0x1988   :  { %11191 = vpow2.f32 %v7012_v57  ;;  %v13340_v57 = vpack.c.bf16 %v5265_v20, %v5262_v53 }
0x1991   :  { %v11190_v18 = vpop.eup %11189 }
0x1992   :  { %v11192_v32 = vpop.eup %11191  ;;  %v5139_v29 = vadd.f32 1.0, %v11190_v18  ;;  %v5266_v18 = vld [vmem:[%s13757_s15] sm:$0x7] }
0x1993   :  { %v5149_v58 = vadd.f32 1.0, %v11192_v32  ;;  %v5279_v32 = vrot.slane %v5266_v18, %v11938_v38 }
0x1994   :  { %11193 = vrcp.f32 %v5139_v29  ;;  %v5435_v29 = vld [vmem:[%s13758_s16] sm:$0x7] }
0x1995   :  { %11195 = vrcp.f32 %v5149_v58 }
0x199e   :  { %v11194_v16 = vpop.eup %11193  ;;  %v13290_v7 = vpop.f32.mrb[56].mxu0 }
0x199f   :  { %v11196_v39 = vpop.eup %11195  ;;  %v5155_v33 = vmul.f32 %v11194_v16, %v5153_v62  ;;  %v13293_v26 = vpop.f32.mrb[57].mxu0  ;;  %v13380_v62 = vrot.slane %v5266_v18, %v11931_v31 }
0x19a0   :  { %v5162_v14 = vmul.f32 %v11196_v39, %v5160_v27  ;;  %v5158_v48 = vsub.f32 1.0, %v11196_v39 }
0x19a1   :  { %v5156_v3 = vadd.f32 %v5155_v33, %v12899_v10  ;;  %v13302_v10 = vpack.c.bf16 %v5229_v15, %v5226_v49  ;;  %v13387_v33 = vrot.slane %v5435_v29, %v11931_v31 }
0x19a3   :  { %11197 = vtanh.f32 %v5156_v3  ;;  %v13393_v3 = vrot.slane %v5266_v18, %v11936_v34 }
0x19a5   :  { %v13404_v31 = vadd.f32 %v13293_v26, %v13393_v3 }
0x19ad   :  { %v11198_v54 = vpop.eup %11197 }
0x19ae   :  { %v5159_v5 = vmul.f32 %v11198_v54, %v5158_v48  ;;  %v13397_v54 = vadd.f32 %v13290_v7, %v13380_v62 }
0x19b0   :  { %v5163_v60 = vadd.f32 %v5162_v14, %v5159_v5  ;;  %v13390_v14 = vrot.slane %v5435_v29, %v11936_v34 }
0x19b2   :  { %v5169_v4 = vsel %vm1831_vm4, %v13229_v61, %v5163_v60  ;;  %v13309_v61 = vpack.c.bf16 %v5235_v25, %v5232_v51  ;;  %v13408_v25 = vrot.slane %v5435_v29, %v11938_v38 }
0x19b3   :  { %5354 = vmatmul.mubr.f32.gmra.mrb[58].mxu0 %v5169_v4  ;;  %8600 = vmatmul.mubr.f32.vlgmr.msra.gmra.mrb[58].mxu1 %v5169_v4 }
0x19b4   :  { %10495 = vmatpush3.bf16.msra.mxu1 %v13296_v46  ;;  %5516 = vmatprep.mubr.f32.mxu0 %v11549_v0 }
0x19b5   :  { %10496 = vmatprep.subr.bf16.mxu1 %v11550_v43  ;;  %8634 = vmatprep.mubr.msk.f32.mxu1 %vm11551_vm1, %v11549_v0 }
0x19b7   :  { %5517 = vmatmul.mubr.f32.vlgmr.msra.gmra.mrb[60].mxu0 %v11549_v0 }
0x19b8   :  { %10498 = vmatpush3.bf16.msra.mxu1 %v13302_v10  ;;  %10520 = vmatpush1.bf16.msra.mxu0 %v13237_v2 }
0x19b9   :  { %10499 = vmatprep.subr.bf16.mxu1 %v11550_v43  ;;  %10522 = vmatprep.subr.bf16.mxu0 %v13241_v37 }
0x19ba   :  { %5678 = vmatprep.mubr.f32.mxu0 %v11549_v0 }
0x19bc   :  { %10501 = vmatpush3.bf16.msra.mxu1 %v13309_v61  ;;  %10524 = vmatpush1.bf16.msra.mxu0 %v13243_v21 }
0x19bd   :  { %10502 = vmatprep.subr.bf16.mxu1 %v11550_v43  ;;  %10526 = vmatprep.subr.bf16.mxu0 %v13247_v24 }
0x19c0   :  { %10504 = vmatpush3.bf16.msra.mxu1 %v13316_v47  ;;  %10528 = vmatpush1.bf16.msra.mxu0 %v13249_v44 }
0x19c1   :  { %10505 = vmatprep.subr.bf16.mxu1 %v11550_v43  ;;  %10530 = vmatprep.subr.bf16.mxu0 %v13253_v63 }
0x19c4   :  { %10507 = vmatpush3.bf16.msra.mxu1 %v13322_v55  ;;  %10532 = vmatpush1.bf16.msra.mxu0 %v13255_v41 }
0x19c5   :  { %10508 = vmatprep.subr.bf16.mxu1 %v11550_v43  ;;  %10534 = vmatprep.subr.bf16.mxu0 %v13259_v50 }
0x19c8   :  { %10510 = vmatpush3.bf16.msra.mxu1 %v13328_v52  ;;  %10536 = vmatpush1.bf16.msra.mxu0 %v13261_v40 }
0x19c9   :  { %10511 = vmatprep.subr.bf16.mxu1 %v11550_v43  ;;  %10538 = vmatprep.subr.bf16.mxu0 %v13264_v12 }
0x19cc   :  { %10513 = vmatpush3.bf16.msra.mxu1 %v13334_v36  ;;  %10540 = vmatpush1.bf16.msra.mxu0 %v13267_v56 }
0x19cd   :  { %10514 = vmatprep.subr.bf16.mxu1 %v11550_v43  ;;  %10542 = vmatprep.subr.bf16.mxu0 %v13270_v17 }
0x19d0   :  { %10516 = vmatpush3.bf16.msra.mxu1 %v13340_v57  ;;  %10544 = vmatpush1.bf16.msra.mxu0 %v13273_v1 }
0x19d1   :  { %10549 = vmatprep.subr.bf16.mxu1 %v11550_v43  ;;  %10546 = vmatprep.subr.bf16.mxu0 %v13278_v9 }
0x19d3   :  { %8635 = vmatmul.mubr.f32.vlgmr.msra.gmra.mrb[60].mxu1 %v11549_v0 }
0x19d4   :  { %10551 = vmatpush3.bf16.msra.mxu1 %v13296_v46  ;;  %10548 = vmatpush1.bf16.msra.mxu0 %v13280_v19 }
0x19d5   :  { %10552 = vmatprep.subr.bf16.mxu1 %v11550_v43  ;;  %8669 = vmatprep.mubr.msk.f32.mxu1 %vm11551_vm1, %v11549_v0 }
0x19d6   :  { %10574 = vmatprep.subr.bf16.mxu0 %v13235_v35 }
0x19d8   :  { %10554 = vmatpush3.bf16.msra.mxu1 %v13302_v10 }
0x19d9   :  { %10555 = vmatprep.subr.bf16.mxu1 %v11550_v43 }
0x19dc   :  { %10557 = vmatpush3.bf16.msra.mxu1 %v13309_v61 }
0x19dd   :  { %10558 = vmatprep.subr.bf16.mxu1 %v11550_v43 }
0x19e0   :  { %10560 = vmatpush3.bf16.msra.mxu1 %v13316_v47 }
0x19e1   :  { %10561 = vmatprep.subr.bf16.mxu1 %v11550_v43 }
0x19e4   :  { %10563 = vmatpush3.bf16.msra.mxu1 %v13322_v55 }
0x19e5   :  { %10564 = vmatprep.subr.bf16.mxu1 %v11550_v43 }
0x19e8   :  { %10566 = vmatpush3.bf16.msra.mxu1 %v13328_v52 }
0x19e9   :  { %10567 = vmatprep.subr.bf16.mxu1 %v11550_v43 }
0x19ec   :  { %10569 = vmatpush3.bf16.msra.mxu1 %v13334_v36 }
0x19ed   :  { %10570 = vmatprep.subr.bf16.mxu1 %v11550_v43 }
0x19f0   :  { %10572 = vmatpush3.bf16.msra.mxu1 %v13340_v57 }
0x19f1   :  { %10605 = vmatprep.subr.bf16.mxu1 %v11550_v43 }
0x1a86   :  { %v13377_v58 = vpop.f32.mrb[58].mxu0  ;;  %v8601_v30 = vpop.f32.mrb[58].mxu1 }
0x1a87   :  { %v13382_v16 = vadd.f32 %v8601_v30, %v5279_v32  ;;  %v13384_v27 = vpop.f32.mrb[59].mxu0  ;;  %v5426_v39 = vpop.f32.mrb[59].mxu1 }
0x1a88   :  { %v13411_v8 = vadd.f32 %v5426_v39, %v5279_v32 }
0x1a8a   :  { %v5518_v48 = vpop.f32.mrb[60].mxu0 }
0x1a8b   :  { %v5519_v13 = vadd.f32 %v5518_v48, %v13387_v33  ;;  %v5520_v22 = vpop.f32.mrb[61].mxu0 }
0x1a8c   :  { %v5521_v5 = vadd.f32 %v5520_v22, %v13390_v14 }
0x1a8d   :  { %v5593_v60 = vadd.f32 %v5519_v13, %v13397_v54 }
0x1a8e   :  { %v5600_v34 = vadd.f32 %v5521_v5, %v13404_v31 }
0x1a8f   :  { %v7013_v49 = vmul.f32 -1.442695, %v5593_v60 }
0x1a90   :  { %v7014_v15 = vmul.f32 -1.442695, %v5600_v34 }
0x1a91   :  { %11199 = vpow2.f32 %v7013_v49 }
0x1a92   :  { %11201 = vpow2.f32 %v7014_v15 }
0x1a9b   :  { %v11200_v4 = vpop.eup %11199 }
0x1a9c   :  { %v5597_v7 = vadd.f32 1.0, %v11200_v4  ;;  %v11202_v51 = vpop.eup %11201 }
0x1a9d   :  { %v5604_v45 = vadd.f32 1.0, %v11202_v51 }
0x1a9e   :  { %11203 = vrcp.f32 %v5597_v7 }
0x1a9f   :  { %11205 = vrcp.f32 %v5604_v45 }
0x1aa6   :  { %v5589_v11 = vpop.f32.mrb[60].mxu1 }
0x1aa7   :  { %v5590_v42 = vadd.f32 %v5589_v11, %v13408_v25  ;;  %v8636_v59 = vpop.f32.mrb[61].mxu1 }
0x1aa8   :  { %v11204_v26 = vpop.eup %11203 }
0x1aa9   :  { %v5607_v6 = vmul.f32 %v11204_v26, %v5590_v42  ;;  %v11206_v23 = vpop.eup %11205 }
0x1aaa   :  { %v5610_v53 = vsub.f32 1.0, %v11206_v23  ;;  %v5612_v30 = vmul.f32 0.0, %v11206_v23 }
0x1aab   :  { %v5608_v28 = vadd.f32 %v5607_v6, %v13411_v8 }
0x1aad   :  { %11207 = vtanh.f32 %v5608_v28 }
0x1ab7   :  { %v11208_v20 = vpop.eup %11207 }
0x1ab8   :  { %v5611_v18 = vmul.f32 %v11208_v20, %v5610_v53 }
0x1aba   :  { %v13414_v38 = vadd.f32 %v5612_v30, %v5611_v18 }
0x1abc   :  { %5679 = vmatmul.mubr.f32.vlgmr.msra.gmra.mrb[62].mxu0 %v13414_v38  ;;  %8670 = vmatmul.mubr.f32.vlgmr.msra.gmra.mrb[62].mxu1 %v13414_v38  ;;  %v5784_v53 = vrot.slane %v13414_v38, 6 }
0x1abd   :  { %10576 = vmatpush1.bf16.msra.mxu0 %v13237_v2  ;;  %10607 = vmatpush3.bf16.msra.mxu1 %v13296_v46 }
0x1abe   :  { %10578 = vmatprep.subr.bf16.mxu0 %v13241_v37  ;;  %10608 = vmatprep.subr.bf16.mxu1 %v11550_v43 }
0x1abf   :  { %5855 = vmatprep.mubr.f32.mxu0 %v11549_v0  ;;  %8704 = vmatprep.mubr.msk.f32.mxu1 %vm11551_vm1, %v11549_v0 }
0x1ac1   :  { %10580 = vmatpush1.bf16.msra.mxu0 %v13243_v21  ;;  %10610 = vmatpush3.bf16.msra.mxu1 %v13302_v10 }
0x1ac2   :  { %10582 = vmatprep.subr.bf16.mxu0 %v13247_v24  ;;  %10611 = vmatprep.subr.bf16.mxu1 %v11550_v43 }
0x1ac5   :  { %10584 = vmatpush1.bf16.msra.mxu0 %v13249_v44  ;;  %10613 = vmatpush3.bf16.msra.mxu1 %v13309_v61 }
0x1ac6   :  { %10586 = vmatprep.subr.bf16.mxu0 %v13253_v63  ;;  %10614 = vmatprep.subr.bf16.mxu1 %v11550_v43 }
0x1ac9   :  { %10588 = vmatpush1.bf16.msra.mxu0 %v13255_v41  ;;  %10616 = vmatpush3.bf16.msra.mxu1 %v13316_v47 }
0x1aca   :  { %10590 = vmatprep.subr.bf16.mxu0 %v13259_v50  ;;  %10617 = vmatprep.subr.bf16.mxu1 %v11550_v43 }
0x1acd   :  { %10592 = vmatpush1.bf16.msra.mxu0 %v13261_v40  ;;  %10619 = vmatpush3.bf16.msra.mxu1 %v13322_v55 }
0x1ace   :  { %10594 = vmatprep.subr.bf16.mxu0 %v13264_v12  ;;  %10620 = vmatprep.subr.bf16.mxu1 %v11550_v43 }
0x1ad1   :  { %10596 = vmatpush1.bf16.msra.mxu0 %v13267_v56  ;;  %10622 = vmatpush3.bf16.msra.mxu1 %v13328_v52 }
0x1ad2   :  { %10598 = vmatprep.subr.bf16.mxu0 %v13270_v17  ;;  %10623 = vmatprep.subr.bf16.mxu1 %v11550_v43 }
0x1ad5   :  { %10600 = vmatpush1.bf16.msra.mxu0 %v13273_v1  ;;  %10625 = vmatpush3.bf16.msra.mxu1 %v13334_v36 }
0x1ad6   :  { %10602 = vmatprep.subr.bf16.mxu0 %v13278_v9  ;;  %10626 = vmatprep.subr.bf16.mxu1 %v11550_v43 }
0x1ad9   :  { %10604 = vmatpush1.bf16.msra.mxu0 %v13280_v19  ;;  %10628 = vmatpush3.bf16.msra.mxu1 %v13340_v57 }
0x1ada   :  { %10630 = vmatprep.subr.bf16.mxu0 %v13235_v35  ;;  %10661 = vmatprep.subr.bf16.mxu1 %v11550_v43 }
0x1b8f   :  { %v5680_v32 = vpop.f32.mrb[62].mxu0  ;;  %v5751_v29 = vpop.f32.mrb[62].mxu1 }
0x1b90   :  { %v5681_v39 = vadd.f32 %v5680_v32, %v13387_v33  ;;  %v5682_v48 = vpop.f32.mrb[63].mxu0  ;;  %v8671_v13 = vpop.f32.mrb[63].mxu1  ;;  %v5752_v11 = vadd.f32 %v5751_v29, %v13408_v25 }
0x1b91   :  { %v5683_v22 = vadd.f32 %v5682_v48, %v13390_v14 }
0x1b92   :  { %v5756_v5 = vrot.slane %v5681_v39, 6  ;;  %v5776_v59 = vrot.slane %v5752_v11, 6 }
0x1b93   :  { %v5766_v60 = vrot.slane %v5683_v22, 6 }
0x1b94   :  { %v5758_v49 = vadd.f32 %v5756_v5, %v13397_v54 }
0x1b95   :  { %v5768_v15 = vadd.f32 %v5766_v60, %v13404_v31 }
0x1b96   :  { %v7015_v34 = vmul.f32 -1.442695, %v5758_v49 }
0x1b97   :  { %v7016_v4 = vmul.f32 -1.442695, %v5768_v15 }
0x1b98   :  { %11209 = vpow2.f32 %v7015_v34 }
0x1b99   :  { %11211 = vpow2.f32 %v7016_v4 }
0x1ba2   :  { %v11210_v7 = vpop.eup %11209 }
0x1ba3   :  { %v5762_v51 = vadd.f32 1.0, %v11210_v7  ;;  %v11212_v45 = vpop.eup %11211 }
0x1ba4   :  { %v5772_v42 = vadd.f32 1.0, %v11212_v45 }
0x1ba5   :  { %11213 = vrcp.f32 %v5762_v51 }
0x1ba6   :  { %11215 = vrcp.f32 %v5772_v42 }
0x1baf   :  { %v11214_v26 = vpop.eup %11213 }
0x1bb0   :  { %v5778_v6 = vmul.f32 %v11214_v26, %v5776_v59  ;;  %v11216_v23 = vpop.eup %11215 }
0x1bb1   :  { %v5781_v20 = vsub.f32 1.0, %v11216_v23  ;;  %v5786_v32 = vmul.f32 %v11216_v23, %v5784_v53 }
0x1bb2   :  { %v5779_v28 = vadd.f32 %v5778_v6, %v13411_v8 }
0x1bb4   :  { %11217 = vtanh.f32 %v5779_v28 }
0x1bbe   :  { %v11218_v18 = vpop.eup %11217 }
0x1bbf   :  { %v5782_v30 = vmul.f32 %v11218_v18, %v5781_v20 }
0x1bc1   :  { %v13460_v39 = vadd.f32 %v5786_v32, %v5782_v30 }
0x1bc3   :  { %v5789_v48 = vrot.slane %v13460_v39, 2  ;;  %v5960_v53 = vrot.slane %v13460_v39, 6 }
0x1bc5   :  { %5856 = vmatmul.mubr.f32.vlgmr.msra.gmra.mrb[64].mxu0 %v5789_v48  ;;  %8705 = vmatmul.mubr.f32.vlgmr.msra.gmra.mrb[64].mxu1 %v5789_v48 }
0x1bc6   :  { %10632 = vmatpush1.bf16.msra.mxu0 %v13237_v2  ;;  %10663 = vmatpush3.bf16.msra.mxu1 %v13296_v46 }
0x1bc7   :  { %10634 = vmatprep.subr.bf16.mxu0 %v13241_v37  ;;  %10664 = vmatprep.subr.bf16.mxu1 %v11550_v43 }
0x1bc8   :  { %6031 = vmatprep.mubr.f32.mxu0 %v11549_v0  ;;  %8739 = vmatprep.mubr.msk.f32.mxu1 %vm11551_vm1, %v11549_v0 }
0x1bca   :  { %10636 = vmatpush1.bf16.msra.mxu0 %v13243_v21  ;;  %10666 = vmatpush3.bf16.msra.mxu1 %v13302_v10 }
0x1bcb   :  { %10638 = vmatprep.subr.bf16.mxu0 %v13247_v24  ;;  %10667 = vmatprep.subr.bf16.mxu1 %v11550_v43 }
0x1bce   :  { %10640 = vmatpush1.bf16.msra.mxu0 %v13249_v44  ;;  %10669 = vmatpush3.bf16.msra.mxu1 %v13309_v61 }
0x1bcf   :  { %10642 = vmatprep.subr.bf16.mxu0 %v13253_v63  ;;  %10670 = vmatprep.subr.bf16.mxu1 %v11550_v43 }
0x1bd2   :  { %10644 = vmatpush1.bf16.msra.mxu0 %v13255_v41  ;;  %10672 = vmatpush3.bf16.msra.mxu1 %v13316_v47 }
0x1bd3   :  { %10646 = vmatprep.subr.bf16.mxu0 %v13259_v50  ;;  %10673 = vmatprep.subr.bf16.mxu1 %v11550_v43 }
0x1bd6   :  { %10648 = vmatpush1.bf16.msra.mxu0 %v13261_v40  ;;  %10675 = vmatpush3.bf16.msra.mxu1 %v13322_v55 }
0x1bd7   :  { %10650 = vmatprep.subr.bf16.mxu0 %v13264_v12  ;;  %10676 = vmatprep.subr.bf16.mxu1 %v11550_v43 }
0x1bda   :  { %10652 = vmatpush1.bf16.msra.mxu0 %v13267_v56  ;;  %10678 = vmatpush3.bf16.msra.mxu1 %v13328_v52 }
0x1bdb   :  { %10654 = vmatprep.subr.bf16.mxu0 %v13270_v17  ;;  %10679 = vmatprep.subr.bf16.mxu1 %v11550_v43 }
0x1bde   :  { %10656 = vmatpush1.bf16.msra.mxu0 %v13273_v1  ;;  %10681 = vmatpush3.bf16.msra.mxu1 %v13334_v36 }
0x1bdf   :  { %10658 = vmatprep.subr.bf16.mxu0 %v13278_v9  ;;  %10682 = vmatprep.subr.bf16.mxu1 %v11550_v43 }
0x1be2   :  { %10660 = vmatpush1.bf16.msra.mxu0 %v13280_v19  ;;  %10684 = vmatpush3.bf16.msra.mxu1 %v13340_v57 }
0x1be3   :  { %10686 = vmatprep.subr.bf16.mxu0 %v13235_v35  ;;  %10717 = vmatprep.subr.bf16.mxu1 %v11550_v43 }
0x1c98   :  { %v5857_v29 = vpop.f32.mrb[64].mxu0  ;;  %v5928_v13 = vpop.f32.mrb[64].mxu1 }
0x1c99   :  { %v5858_v22 = vadd.f32 %v5857_v29, %v13387_v33  ;;  %v5859_v5 = vpop.f32.mrb[65].mxu0  ;;  %v8706_v60 = vpop.f32.mrb[65].mxu1  ;;  %v5929_v6 = vadd.f32 %v5928_v13, %v13408_v25 }
0x1c9a   :  { %v5860_v49 = vadd.f32 %v5859_v5, %v13390_v14  ;;  %v6831_v60 = vsel %vm1827_vm2, %v13414_v38, %v13460_v39 }
0x1c9b   :  { %v5933_v34 = vrot.slane %v5858_v22, 4  ;;  %v5953_v28 = vrot.slane %v5929_v6, 4 }
0x1c9c   :  { %v5943_v15 = vrot.slane %v5860_v49, 4 }
0x1c9d   :  { %v5935_v4 = vadd.f32 %v5933_v34, %v13397_v54 }
0x1c9e   :  { %v5945_v7 = vadd.f32 %v5943_v15, %v13404_v31 }
0x1c9f   :  { %v7017_v51 = vmul.f32 -1.442695, %v5935_v4 }
0x1ca0   :  { %v7018_v45 = vmul.f32 -1.442695, %v5945_v7 }
0x1ca1   :  { %11219 = vpow2.f32 %v7017_v51 }
0x1ca2   :  { %11221 = vpow2.f32 %v7018_v45 }
0x1cab   :  { %v11220_v11 = vpop.eup %11219 }
0x1cac   :  { %v11222_v42 = vpop.eup %11221  ;;  %v5939_v59 = vadd.f32 1.0, %v11220_v11 }
0x1cad   :  { %v5949_v26 = vadd.f32 1.0, %v11222_v42 }
0x1cae   :  { %11223 = vrcp.f32 %v5939_v59 }
0x1caf   :  { %11225 = vrcp.f32 %v5949_v26 }
0x1cb8   :  { %v11224_v23 = vpop.eup %11223 }
0x1cb9   :  { %v11226_v20 = vpop.eup %11225  ;;  %v5955_v18 = vmul.f32 %v11224_v23, %v5953_v28 }
0x1cba   :  { %v5962_v30 = vmul.f32 %v11226_v20, %v5960_v53  ;;  %v5958_v48 = vsub.f32 1.0, %v11226_v20 }
0x1cbb   :  { %v5956_v32 = vadd.f32 %v5955_v18, %v13411_v8 }
0x1cbd   :  { %11227 = vtanh.f32 %v5956_v32 }
0x1cc7   :  { %v11228_v29 = vpop.eup %11227 }
0x1cc8   :  { %v5959_v22 = vmul.f32 %v11228_v29, %v5958_v48 }
0x1cca   :  { %v13505_v5 = vadd.f32 %v5962_v30, %v5959_v22 }
0x1ccc   :  { %v5965_v13 = vrot.slane %v13505_v5, 4  ;;  %v13513_v49 = vsel %vm1829_vm3, %v6831_v60, %v13505_v5  ;;  %v6136_v32 = vrot.slane %v13505_v5, 6 }
0x1cce   :  { %6032 = vmatmul.mubr.f32.vlgmr.msra.gmra.mrb[66].mxu0 %v5965_v13  ;;  %8740 = vmatmul.mubr.f32.vlgmr.msra.gmra.mrb[66].mxu1 %v5965_v13 }
0x1ccf   :  { %10688 = vmatpush1.bf16.msra.mxu0 %v13237_v2  ;;  %10719 = vmatpush3.bf16.msra.mxu1 %v13296_v46 }
0x1cd0   :  { %10690 = vmatprep.subr.bf16.mxu0 %v13241_v37  ;;  %10720 = vmatprep.subr.bf16.mxu1 %v11550_v43 }
0x1cd1   :  { %6207 = vmatprep.mubr.f32.mxu0 %v11549_v0  ;;  %8774 = vmatprep.mubr.msk.f32.mxu1 %vm11551_vm1, %v11549_v0 }
0x1cd3   :  { %10692 = vmatpush1.bf16.msra.mxu0 %v13243_v21  ;;  %10722 = vmatpush3.bf16.msra.mxu1 %v13302_v10 }
0x1cd4   :  { %10694 = vmatprep.subr.bf16.mxu0 %v13247_v24  ;;  %10723 = vmatprep.subr.bf16.mxu1 %v11550_v43 }
0x1cd7   :  { %10696 = vmatpush1.bf16.msra.mxu0 %v13249_v44  ;;  %10725 = vmatpush3.bf16.msra.mxu1 %v13309_v61 }
0x1cd8   :  { %10698 = vmatprep.subr.bf16.mxu0 %v13253_v63  ;;  %10726 = vmatprep.subr.bf16.mxu1 %v11550_v43 }
0x1cdb   :  { %10700 = vmatpush1.bf16.msra.mxu0 %v13255_v41  ;;  %10728 = vmatpush3.bf16.msra.mxu1 %v13316_v47 }
0x1cdc   :  { %10702 = vmatprep.subr.bf16.mxu0 %v13259_v50  ;;  %10729 = vmatprep.subr.bf16.mxu1 %v11550_v43 }
0x1cdf   :  { %10704 = vmatpush1.bf16.msra.mxu0 %v13261_v40  ;;  %10731 = vmatpush3.bf16.msra.mxu1 %v13322_v55 }
0x1ce0   :  { %10706 = vmatprep.subr.bf16.mxu0 %v13264_v12  ;;  %10732 = vmatprep.subr.bf16.mxu1 %v11550_v43 }
0x1ce3   :  { %10708 = vmatpush1.bf16.msra.mxu0 %v13267_v56  ;;  %10734 = vmatpush3.bf16.msra.mxu1 %v13328_v52 }
0x1ce4   :  { %10710 = vmatprep.subr.bf16.mxu0 %v13270_v17  ;;  %10735 = vmatprep.subr.bf16.mxu1 %v11550_v43 }
0x1ce7   :  { %10712 = vmatpush1.bf16.msra.mxu0 %v13273_v1  ;;  %10737 = vmatpush3.bf16.msra.mxu1 %v13334_v36 }
0x1ce8   :  { %10714 = vmatprep.subr.bf16.mxu0 %v13278_v9  ;;  %10738 = vmatprep.subr.bf16.mxu1 %v11550_v43 }
0x1ceb   :  { %10716 = vmatpush1.bf16.msra.mxu0 %v13280_v19  ;;  %10740 = vmatpush3.bf16.msra.mxu1 %v13340_v57 }
0x1cec   :  { %10742 = vmatprep.subr.bf16.mxu0 %v13235_v35  ;;  %10773 = vmatprep.subr.bf16.mxu1 %v11550_v43 }
0x1da1   :  { %v6033_v38 = vpop.f32.mrb[66].mxu0  ;;  %v6104_v39 = vpop.f32.mrb[66].mxu1 }
0x1da2   :  { %v6034_v34 = vadd.f32 %v6033_v38, %v13387_v33  ;;  %v6035_v15 = vpop.f32.mrb[67].mxu0  ;;  %v8741_v4 = vpop.f32.mrb[67].mxu1  ;;  %v6105_v20 = vadd.f32 %v6104_v39, %v13408_v25 }
0x1da3   :  { %v6036_v7 = vadd.f32 %v6035_v15, %v13390_v14 }
0x1da4   :  { %v6109_v51 = vrot.slane %v6034_v34, 2  ;;  %v6129_v18 = vrot.slane %v6105_v20, 2 }
0x1da5   :  { %v6119_v45 = vrot.slane %v6036_v7, 2 }
0x1da6   :  { %v6111_v11 = vadd.f32 %v6109_v51, %v13397_v54 }
0x1da7   :  { %v6121_v42 = vadd.f32 %v6119_v45, %v13404_v31 }
0x1da8   :  { %v7019_v59 = vmul.f32 -1.442695, %v6111_v11  ;;  %v13609_v11 = vadd.f32 %v13384_v27, %v13393_v3 }
0x1da9   :  { %v7020_v26 = vmul.f32 -1.442695, %v6121_v42 }
0x1daa   :  { %11229 = vpow2.f32 %v7019_v59 }
0x1dab   :  { %11231 = vpow2.f32 %v7020_v26 }
0x1db4   :  { %v11230_v6 = vpop.eup %11229 }
0x1db5   :  { %v11232_v28 = vpop.eup %11231  ;;  %v6115_v23 = vadd.f32 1.0, %v11230_v6 }
0x1db6   :  { %v6125_v53 = vadd.f32 1.0, %v11232_v28 }
0x1db7   :  { %11233 = vrcp.f32 %v6115_v23 }
0x1db8   :  { %11235 = vrcp.f32 %v6125_v53 }
0x1dc1   :  { %v11234_v30 = vpop.eup %11233 }
0x1dc2   :  { %v11236_v48 = vpop.eup %11235  ;;  %v6131_v54 = vmul.f32 %v11234_v30, %v6129_v18 }
0x1dc3   :  { %v6138_v29 = vmul.f32 %v11236_v48, %v6136_v32  ;;  %v6134_v22 = vsub.f32 1.0, %v11236_v48 }
0x1dc4   :  { %v6132_v31 = vadd.f32 %v6131_v54, %v13411_v8 }
0x1dc6   :  { %11237 = vtanh.f32 %v6132_v31 }
0x1dd0   :  { %v11238_v60 = vpop.eup %11237 }
0x1dd1   :  { %v6135_v13 = vmul.f32 %v11238_v60, %v6134_v22 }
0x1dd3   :  { %v6139_v38 = vadd.f32 %v6138_v29, %v6135_v13 }
0x1dd5   :  { %v13557_v34 = vrot.slane %v6139_v38, 6  ;;  %v13561_v15 = vsel %vm1831_vm4, %v13513_v49, %v6139_v38  ;;  %v13602_v49 = vadd.f32 %v13377_v58, %v13380_v62 }
0x1dd7   :  { %6208 = vmatmul.mubr.f32.vlgmr.msra.gmra.mrb[68].mxu0 %v13557_v34  ;;  %8775 = vmatmul.mubr.f32.vlgmr.msra.gmra.mrb[68].mxu1 %v13557_v34 }
0x1dd8   :  { %10744 = vmatpush1.bf16.msra.mxu0 %v13237_v2  ;;  %10775 = vmatpush3.bf16.msra.mxu1 %v13296_v46 }
0x1dd9   :  { %10746 = vmatprep.subr.bf16.mxu0 %v13241_v37  ;;  %10776 = vmatprep.subr.bf16.mxu1 %v11550_v43 }
0x1dda   :  { %6369 = vmatprep.mubr.f32.mxu0 %v11549_v0  ;;  %8809 = vmatprep.mubr.msk.f32.mxu1 %vm11551_vm1, %v11549_v0 }
0x1ddc   :  { %10748 = vmatpush1.bf16.msra.mxu0 %v13243_v21  ;;  %10778 = vmatpush3.bf16.msra.mxu1 %v13302_v10 }
0x1ddd   :  { %10750 = vmatprep.subr.bf16.mxu0 %v13247_v24  ;;  %10779 = vmatprep.subr.bf16.mxu1 %v11550_v43 }
0x1de0   :  { %10752 = vmatpush1.bf16.msra.mxu0 %v13249_v44  ;;  %10781 = vmatpush3.bf16.msra.mxu1 %v13309_v61 }
0x1de1   :  { %10754 = vmatprep.subr.bf16.mxu0 %v13253_v63  ;;  %10782 = vmatprep.subr.bf16.mxu1 %v11550_v43 }
0x1de4   :  { %10756 = vmatpush1.bf16.msra.mxu0 %v13255_v41  ;;  %10784 = vmatpush3.bf16.msra.mxu1 %v13316_v47 }
0x1de5   :  { %10758 = vmatprep.subr.bf16.mxu0 %v13259_v50  ;;  %10785 = vmatprep.subr.bf16.mxu1 %v11550_v43 }
0x1de8   :  { %10760 = vmatpush1.bf16.msra.mxu0 %v13261_v40  ;;  %10787 = vmatpush3.bf16.msra.mxu1 %v13322_v55 }
0x1de9   :  { %10762 = vmatprep.subr.bf16.mxu0 %v13264_v12  ;;  %10788 = vmatprep.subr.bf16.mxu1 %v11550_v43 }
0x1dec   :  { %10764 = vmatpush1.bf16.msra.mxu0 %v13267_v56  ;;  %10790 = vmatpush3.bf16.msra.mxu1 %v13328_v52 }
0x1ded   :  { %10766 = vmatprep.subr.bf16.mxu0 %v13270_v17  ;;  %10791 = vmatprep.subr.bf16.mxu1 %v11550_v43 }
0x1df0   :  { %10768 = vmatpush1.bf16.msra.mxu0 %v13273_v1  ;;  %10793 = vmatpush3.bf16.msra.mxu1 %v13334_v36 }
0x1df1   :  { %10770 = vmatprep.subr.bf16.mxu0 %v13278_v9  ;;  %10794 = vmatprep.subr.bf16.mxu1 %v11550_v43 }
0x1df4   :  { %10772 = vmatpush1.bf16.msra.mxu0 %v13280_v19  ;;  %10796 = vmatpush3.bf16.msra.mxu1 %v13340_v57 }
0x1df5   :  { %10798 = vmatprep.subr.bf16.mxu0 %v13235_v35  ;;  %10829 = vmatprep.subr.bf16.mxu1 %v11550_v43 }
0x1eaa   :  { %v6209_v8 = vpop.f32.mrb[68].mxu0  ;;  %v6280_v5 = vpop.f32.mrb[68].mxu1 }
0x1eab   :  { %v6210_v39 = vadd.f32 %v6209_v8, %v13387_v33  ;;  %v6211_v4 = vpop.f32.mrb[69].mxu0  ;;  %v8776_v7 = vpop.f32.mrb[69].mxu1  ;;  %v6281_v23 = vadd.f32 %v6280_v5, %v13408_v25 }
0x1eac   :  { %v6212_v51 = vadd.f32 %v6211_v4, %v13390_v14 }
0x1ead   :  { %v6284_v45 = vadd.f32 %v6210_v39, %v13602_v49 }
0x1eae   :  { %v6291_v59 = vadd.f32 %v6212_v51, %v13609_v11 }
0x1eaf   :  { %v7021_v42 = vmul.f32 -1.442695, %v6284_v45 }
0x1eb0   :  { %v7022_v26 = vmul.f32 -1.442695, %v6291_v59 }
0x1eb1   :  { %11239 = vpow2.f32 %v7021_v42 }
0x1eb2   :  { %11241 = vpow2.f32 %v7022_v26 }
0x1ebb   :  { %v11240_v58 = vpop.eup %11239 }
0x1ebc   :  { %v6288_v62 = vadd.f32 1.0, %v11240_v58  ;;  %v11242_v6 = vpop.eup %11241 }
0x1ebd   :  { %v6295_v28 = vadd.f32 1.0, %v11242_v6 }
0x1ebe   :  { %11243 = vrcp.f32 %v6288_v62 }
0x1ebf   :  { %11245 = vrcp.f32 %v6295_v28 }
0x1ec8   :  { %v11244_v53 = vpop.eup %11243 }
0x1ec9   :  { %v6298_v20 = vmul.f32 %v11244_v53, %v6281_v23  ;;  %v11246_v27 = vpop.eup %11245 }
0x1eca   :  { %v6301_v3 = vsub.f32 1.0, %v11246_v27  ;;  %v6303_v48 = vmul.f32 %v11246_v27, %v13557_v34 }
0x1ecb   :  { %v6299_v18 = vadd.f32 %v6298_v20, %v13382_v16 }
0x1ecd   :  { %11247 = vtanh.f32 %v6299_v18 }
0x1ed7   :  { %v11248_v30 = vpop.eup %11247 }
0x1ed8   :  { %v6302_v32 = vmul.f32 %v11248_v30, %v6301_v3 }
0x1eda   :  { %v13615_v54 = vadd.f32 %v6303_v48, %v6302_v32 }
0x1edc   :  { %6370 = vmatmul.mubr.f32.vlgmr.msra.gmra.mrb[70].mxu0 %v13615_v54  ;;  %8810 = vmatmul.mubr.f32.vlgmr.msra.gmra.mrb[70].mxu1 %v13615_v54  ;;  %v6475_v23 = vrot.slane %v13615_v54, 6 }
0x1edd   :  { %10800 = vmatpush1.bf16.msra.mxu0 %v13237_v2  ;;  %10831 = vmatpush3.bf16.msra.mxu1 %v13296_v46 }
0x1ede   :  { %10802 = vmatprep.subr.bf16.mxu0 %v13241_v37  ;;  %10832 = vmatprep.subr.bf16.mxu1 %v11550_v43 }
0x1edf   :  { %6546 = vmatprep.mubr.f32.mxu0 %v11549_v0  ;;  %8844 = vmatprep.mubr.msk.f32.mxu1 %vm11551_vm1, %v11549_v0 }
0x1ee1   :  { %10804 = vmatpush1.bf16.msra.mxu0 %v13243_v21  ;;  %10834 = vmatpush3.bf16.msra.mxu1 %v13302_v10 }
0x1ee2   :  { %10806 = vmatprep.subr.bf16.mxu0 %v13247_v24  ;;  %10835 = vmatprep.subr.bf16.mxu1 %v11550_v43 }
0x1ee5   :  { %10808 = vmatpush1.bf16.msra.mxu0 %v13249_v44  ;;  %10837 = vmatpush3.bf16.msra.mxu1 %v13309_v61 }
0x1ee6   :  { %10810 = vmatprep.subr.bf16.mxu0 %v13253_v63  ;;  %10838 = vmatprep.subr.bf16.mxu1 %v11550_v43 }
0x1ee9   :  { %10812 = vmatpush1.bf16.msra.mxu0 %v13255_v41  ;;  %10840 = vmatpush3.bf16.msra.mxu1 %v13316_v47 }
0x1eea   :  { %10814 = vmatprep.subr.bf16.mxu0 %v13259_v50  ;;  %10841 = vmatprep.subr.bf16.mxu1 %v11550_v43 }
0x1eed   :  { %10816 = vmatpush1.bf16.msra.mxu0 %v13261_v40  ;;  %10843 = vmatpush3.bf16.msra.mxu1 %v13322_v55 }
0x1eee   :  { %10818 = vmatprep.subr.bf16.mxu0 %v13264_v12  ;;  %10844 = vmatprep.subr.bf16.mxu1 %v11550_v43 }
0x1ef1   :  { %10820 = vmatpush1.bf16.msra.mxu0 %v13267_v56  ;;  %10846 = vmatpush3.bf16.msra.mxu1 %v13328_v52 }
0x1ef2   :  { %10822 = vmatprep.subr.bf16.mxu0 %v13270_v17  ;;  %10847 = vmatprep.subr.bf16.mxu1 %v11550_v43 }
0x1ef5   :  { %10824 = vmatpush1.bf16.msra.mxu0 %v13273_v1  ;;  %10849 = vmatpush3.bf16.msra.mxu1 %v13334_v36 }
0x1ef6   :  { %10826 = vmatprep.subr.bf16.mxu0 %v13278_v9  ;;  %10850 = vmatprep.subr.bf16.mxu1 %v11550_v43 }
0x1ef9   :  { %10828 = vmatpush1.bf16.msra.mxu0 %v13280_v19  ;;  %10852 = vmatpush3.bf16.msra.mxu1 %v13340_v57 }
0x1efa   :  { %10854 = vmatprep.subr.bf16.mxu0 %v13235_v35  ;;  %10885 = vmatprep.subr.bf16.mxu1 %v11550_v43 }
0x1faf   :  { %v6371_v29 = vpop.f32.mrb[70].mxu0  ;;  %v6442_v31 = vpop.f32.mrb[70].mxu1 }
0x1fb0   :  { %v6372_v22 = vadd.f32 %v6371_v29, %v13387_v33  ;;  %v6373_v60 = vpop.f32.mrb[71].mxu0  ;;  %v8811_v13 = vpop.f32.mrb[71].mxu1  ;;  %v6443_v42 = vadd.f32 %v6442_v31, %v13408_v25 }
0x1fb1   :  { %v6374_v38 = vadd.f32 %v6373_v60, %v13390_v14  ;;  %v6837_v13 = vmax.f32 %v13561_v15, 0.0  ;;  %v6846_v15 = vld [vmem:[#allocation17 + $0x38] sm:$0xff] }
0x1fb2   :  { %v6447_v34 = vrot.slane %v6372_v22, 6  ;;  %v6467_v26 = vrot.slane %v6443_v42, 6  ;;  %v6847_v42 = vld [vmem:[#allocation17 + $0x40] sm:$0xff] }
0x1fb3   :  { %v6457_v8 = vrot.slane %v6374_v38, 6  ;;  %v6839_v38 = vld [vmem:[#allocation17] sm:$0xff] }
0x1fb4   :  { %v6449_v5 = vadd.f32 %v6447_v34, %v13602_v49  ;;  %v6840_v34 = vld [vmem:[#allocation17 + $0x8] sm:$0xff] }
0x1fb5   :  { %v6459_v4 = vadd.f32 %v6457_v8, %v13609_v11  ;;  %v10909_v8 = vpack.c.bf16 %v6840_v34, %v6839_v38 }
0x1fb6   :  { %v7023_v39 = vmul.f32 -1.442695, %v6449_v5  ;;  %v6841_v5 = vld [vmem:[#allocation17 + $0x10] sm:$0xff] }
0x1fb7   :  { %v7024_v7 = vmul.f32 -1.442695, %v6459_v4 }
0x1fb8   :  { %11249 = vpow2.f32 %v7023_v39  ;;  %v6842_v39 = vld [vmem:[#allocation17 + $0x18] sm:$0xff] }
0x1fb9   :  { %11251 = vpow2.f32 %v7024_v7  ;;  %v10913_v4 = vpack.c.bf16 %v6842_v39, %v6841_v5  ;;  %v6844_v7 = vld [vmem:[#allocation17 + $0x28] sm:$0xff] }
0x1fc2   :  { %v11250_v35 = vpop.eup %11249 }
0x1fc3   :  { %v6453_v51 = vadd.f32 1.0, %v11250_v35  ;;  %v11252_v45 = vpop.eup %11251 }
0x1fc4   :  { %v6463_v59 = vadd.f32 1.0, %v11252_v45 }
0x1fc5   :  { %11253 = vrcp.f32 %v6453_v51  ;;  %v6845_v51 = vld [vmem:[#allocation17 + $0x30] sm:$0xff] }
0x1fc6   :  { %11255 = vrcp.f32 %v6463_v59  ;;  %v10921_v45 = vpack.c.bf16 %v6846_v15, %v6845_v51  ;;  %v6848_v59 = vld [vmem:[#allocation17 + $0x48] sm:$0xff] }
0x1fcf   :  { %v11254_v58 = vpop.eup %11253 }
0x1fd0   :  { %v6469_v62 = vmul.f32 %v11254_v58, %v6467_v26  ;;  %v11256_v28 = vpop.eup %11255  ;;  %v6849_v26 = vld [vmem:[#allocation17 + $0x50] sm:$0xff]  ;;  %v10925_v58 = vpack.c.bf16 %v6848_v59, %v6847_v42 }
0x1fd1   :  { %v6472_v53 = vsub.f32 1.0, %v11256_v28  ;;  %v6477_v27 = vmul.f32 %v11256_v28, %v6475_v23  ;;  %v6851_v28 = vld [vmem:[#allocation17 + $0x60] sm:$0xff]  ;;  %v6852_v23 = vld [vmem:[#allocation17 + $0x68] sm:$0xff] }
0x1fd2   :  { %v6470_v6 = vadd.f32 %v6469_v62, %v13382_v16  ;;  %v6850_v62 = vld [vmem:[#allocation17 + $0x58] sm:$0xff] }
0x1fd4   :  { %11257 = vtanh.f32 %v6470_v6  ;;  %v10929_v6 = vpack.c.bf16 %v6850_v62, %v6849_v26 }
0x1fde   :  { %v11258_v20 = vpop.eup %11257 }
0x1fdf   :  { %v6473_v18 = vmul.f32 %v11258_v20, %v6472_v53  ;;  %v10933_v53 = vpack.c.bf16 %v6852_v23, %v6851_v28  ;;  %v6853_v20 = vld [vmem:[#allocation17 + $0x70] sm:$0xff] }
0x1fe1   :  { %v13661_v3 = vadd.f32 %v6477_v27, %v6473_v18  ;;  %v6854_v18 = vld [vmem:[#allocation17 + $0x78] sm:$0xff] }
0x1fe2   :  { %v10937_v27 = vpack.c.bf16 %v6854_v18, %v6853_v20 }
0x1fe3   :  { %v6480_v30 = vrot.slane %v13661_v3, 2  ;;  %v6834_v31 = vsel %vm1827_vm2, %v13615_v54, %v13661_v3  ;;  %v6843_v54 = vld [vmem:[#allocation17 + $0x20] sm:$0xff] }
0x1fe4   :  { %v10917_v35 = vpack.c.bf16 %v6844_v7, %v6843_v54 }
0x1fe5   :  { %6547 = vmatmul.mubr.f32.vlgmr.msra.gmra.mrb[72].mxu0 %v6480_v30  ;;  %8845 = vmatmul.mubr.f32.vlgmr.msra.gmra.mrb[72].mxu1 %v6480_v30 }
0x1fe6   :  { %10856 = vmatpush1.bf16.msra.mxu0 %v13237_v2  ;;  %10887 = vmatpush3.bf16.msra.mxu1 %v13296_v46 }
0x1fe7   :  { %10858 = vmatprep.subr.bf16.mxu0 %v13241_v37  ;;  %10888 = vmatprep.subr.bf16.mxu1 %v11550_v43 }
0x1fe8   :  { %6722 = vmatprep.mubr.f32.mxu0 %v11549_v0  ;;  %8879 = vmatprep.mubr.msk.f32.mxu1 %vm11551_vm1, %v11549_v0 }
0x1fea   :  { %10860 = vmatpush1.bf16.msra.mxu0 %v13243_v21  ;;  %10890 = vmatpush3.bf16.msra.mxu1 %v13302_v10 }
0x1feb   :  { %10862 = vmatprep.subr.bf16.mxu0 %v13247_v24  ;;  %10891 = vmatprep.subr.bf16.mxu1 %v11550_v43 }
0x1fee   :  { %10864 = vmatpush1.bf16.msra.mxu0 %v13249_v44  ;;  %10893 = vmatpush3.bf16.msra.mxu1 %v13309_v61  ;;  %v6651_v61 = vrot.slane %v13661_v3, 6 }
0x1fef   :  { %10866 = vmatprep.subr.bf16.mxu0 %v13253_v63  ;;  %10894 = vmatprep.subr.bf16.mxu1 %v11550_v43 }
0x1ff2   :  { %10868 = vmatpush1.bf16.msra.mxu0 %v13255_v41  ;;  %10896 = vmatpush3.bf16.msra.mxu1 %v13316_v47 }
0x1ff3   :  { %10870 = vmatprep.subr.bf16.mxu0 %v13259_v50  ;;  %10897 = vmatprep.subr.bf16.mxu1 %v11550_v43 }
0x1ff6   :  { %10872 = vmatpush1.bf16.msra.mxu0 %v13261_v40  ;;  %10899 = vmatpush3.bf16.msra.mxu1 %v13322_v55 }
0x1ff7   :  { %10874 = vmatprep.subr.bf16.mxu0 %v13264_v12  ;;  %10900 = vmatprep.subr.bf16.mxu1 %v11550_v43 }
0x1ffa   :  { %10876 = vmatpush1.bf16.msra.mxu0 %v13267_v56  ;;  %10902 = vmatpush3.bf16.msra.mxu1 %v13328_v52 }
0x1ffb   :  { %10878 = vmatprep.subr.bf16.mxu0 %v13270_v17  ;;  %10903 = vmatprep.subr.bf16.mxu1 %v11550_v43 }
0x1ffe   :  { %10880 = vmatpush1.bf16.msra.mxu0 %v13273_v1  ;;  %10905 = vmatpush3.bf16.msra.mxu1 %v13334_v36 }
0x1fff   :  { %10882 = vmatprep.subr.bf16.mxu0 %v13278_v9  ;;  %10906 = vmatprep.subr.bf16.mxu1 %v11550_v43 }
0x2002   :  { %10884 = vmatpush1.bf16.msra.mxu0 %v13280_v19  ;;  %10908 = vmatpush3.bf16.msra.mxu1 %v13340_v57 }
0x2003   :  { %10910 = vmatprep.subr.bf16.mxu0 %v10909_v8 }
0x20b8   :  { %v6548_v0 = vpop.f32.mrb[72].mxu0  ;;  %v6619_v2 = vpop.f32.mrb[72].mxu1 }
0x20b9   :  { %v6549_v37 = vadd.f32 %v6548_v0, %v13387_v33  ;;  %v6550_v21 = vpop.f32.mrb[73].mxu0  ;;  %v8846_v24 = vpop.f32.mrb[73].mxu1  ;;  %v6620_v19 = vadd.f32 %v6619_v2, %v13408_v25 }
0x20ba   :  { %v6551_v44 = vadd.f32 %v6550_v21, %v13390_v14 }
0x20bb   :  { %v6624_v63 = vrot.slane %v6549_v37, 4  ;;  %v6644_v46 = vrot.slane %v6620_v19, 4 }
0x20bc   :  { %v6634_v41 = vrot.slane %v6551_v44, 4 }
0x20bd   :  { %v6626_v50 = vadd.f32 %v6624_v63, %v13602_v49 }
0x20be   :  { %v6636_v40 = vadd.f32 %v6634_v41, %v13609_v11 }
0x20bf   :  { %v7025_v12 = vmul.f32 -1.442695, %v6626_v50 }
0x20c0   :  { %v7026_v43 = vmul.f32 -1.442695, %v6636_v40 }
0x20c1   :  { %11259 = vpow2.f32 %v7025_v12 }
0x20c2   :  { %11261 = vpow2.f32 %v7026_v43 }
0x20cb   :  { %v11260_v56 = vpop.eup %11259 }
0x20cc   :  { %v11262_v17 = vpop.eup %11261  ;;  %v6630_v1 = vadd.f32 1.0, %v11260_v56 }
0x20cd   :  { %v6640_v9 = vadd.f32 1.0, %v11262_v17 }
0x20ce   :  { %11263 = vrcp.f32 %v6630_v1 }
0x20cf   :  { %11265 = vrcp.f32 %v6640_v9 }
0x20d8   :  { %v11264_v10 = vpop.eup %11263 }
0x20d9   :  { %v11266_v47 = vpop.eup %11265  ;;  %v6646_v55 = vmul.f32 %v11264_v10, %v6644_v46 }
0x20da   :  { %v6653_v52 = vmul.f32 %v11266_v47, %v6651_v61  ;;  %v6649_v57 = vsub.f32 1.0, %v11266_v47 }
0x20db   :  { %v6647_v36 = vadd.f32 %v6646_v55, %v13382_v16 }
0x20dd   :  { %11267 = vtanh.f32 %v6647_v36 }
0x20e7   :  { %v11268_v32 = vpop.eup %11267 }
0x20e8   :  { %v6650_v48 = vmul.f32 %v11268_v32, %v6649_v57 }
0x20ea   :  { %v13704_v29 = vadd.f32 %v6653_v52, %v6650_v48 }
0x20ec   :  { %v6656_v22 = vrot.slane %v13704_v29, 4  ;;  %v13712_v60 = vsel %vm1829_vm3, %v6834_v31, %v13704_v29  ;;  %v6827_v9 = vrot.slane %v13704_v29, 6 }
0x20ee   :  { %6723 = vmatmul.mubr.f32.vlgmr.msra.gmra.mrb[74].mxu0 %v6656_v22  ;;  %8880 = vmatmul.mubr.f32.vlgmr.msra.gmra.mrb[74].mxu1 %v6656_v22 }
0x20ef   :  { %8914 = vmatprep.mubr.f32.mxu0 %v6837_v13  ;;  %10912 = vmatpush3.bf16.msra.mxu0 %v10909_v8 }
0x20f0   :  { %10914 = vmatprep.subr.bf16.mxu0 %v10913_v4 }
0x20f3   :  { %10916 = vmatpush3.bf16.msra.mxu0 %v10913_v4 }
0x20f4   :  { %10918 = vmatprep.subr.bf16.mxu0 %v10917_v35 }
0x20f7   :  { %10920 = vmatpush3.bf16.msra.mxu0 %v10917_v35 }
0x20f8   :  { %10922 = vmatprep.subr.bf16.mxu0 %v10921_v45 }
0x20fb   :  { %10924 = vmatpush3.bf16.msra.mxu0 %v10921_v45 }
0x20fc   :  { %10926 = vmatprep.subr.bf16.mxu0 %v10925_v58 }
0x20ff   :  { %10928 = vmatpush3.bf16.msra.mxu0 %v10925_v58 }
0x2100   :  { %10930 = vmatprep.subr.bf16.mxu0 %v10929_v6 }
0x2103   :  { %10932 = vmatpush3.bf16.msra.mxu0 %v10929_v6 }
0x2104   :  { %10934 = vmatprep.subr.bf16.mxu0 %v10933_v53 }
0x2107   :  { %10936 = vmatpush3.bf16.msra.mxu0 %v10933_v53 }
0x2108   :  { %10938 = vmatprep.subr.bf16.mxu0 %v10937_v27 }
0x210b   :  { %10940 = vmatpush3.bf16.msra.mxu0 %v10937_v27 }
0x21c1   :  { %v6724_v3 = vpop.f32.mrb[74].mxu0  ;;  %v6795_v30 = vpop.f32.mrb[74].mxu1 }
0x21c2   :  { %v6725_v0 = vadd.f32 %v6724_v3, %v13387_v33  ;;  %v6726_v2 = vpop.f32.mrb[75].mxu0  ;;  %v8881_v37 = vpop.f32.mrb[75].mxu1  ;;  %v6796_v33 = vadd.f32 %v6795_v30, %v13408_v25  ;;  %v7029_v25 = vld [vmem:[%s13776_s5] ss:$0 sm:$0xff] }
0x21c3   :  { %v6727_v21 = vadd.f32 %v6726_v2, %v13390_v14 }
0x21c4   :  { %v6800_v24 = vrot.slane %v6725_v0, 2  ;;  %v6820_v1 = vrot.slane %v6796_v33, 2 }
0x21c5   :  { %v6810_v44 = vrot.slane %v6727_v21, 2 }
0x21c6   :  { %v6802_v63 = vadd.f32 %v6800_v24, %v13602_v49 }
0x21c7   :  { %v6812_v41 = vadd.f32 %v6810_v44, %v13609_v11 }
0x21c8   :  { %v7027_v50 = vmul.f32 -1.442695, %v6802_v63 }
0x21c9   :  { %v7028_v40 = vmul.f32 -1.442695, %v6812_v41 }
0x21ca   :  { %11269 = vpow2.f32 %v7027_v50 }
0x21cb   :  { %11271 = vpow2.f32 %v7028_v40 }
0x21d4   :  { %v11270_v12 = vpop.eup %11269 }
0x21d5   :  { %v11272_v43 = vpop.eup %11271  ;;  %v6806_v56 = vadd.f32 1.0, %v11270_v12 }
0x21d6   :  { %v6816_v17 = vadd.f32 1.0, %v11272_v43 }
0x21d7   :  { %11273 = vrcp.f32 %v6806_v56 }
0x21d8   :  { %11275 = vrcp.f32 %v6816_v17 }
0x21e1   :  { %v11274_v14 = vpop.eup %11273 }
0x21e2   :  { %v11276_v19 = vpop.eup %11275  ;;  %v6822_v49 = vmul.f32 %v11274_v14, %v6820_v1 }
0x21e3   :  { %v6829_v46 = vmul.f32 %v11276_v19, %v6827_v9  ;;  %v6825_v10 = vsub.f32 1.0, %v11276_v19 }
0x21e4   :  { %v6823_v11 = vadd.f32 %v6822_v49, %v13382_v16 }
0x21e6   :  { %11277 = vtanh.f32 %v6823_v11 }
0x21f0   :  { %v11278_v61 = vpop.eup %11277 }
0x21f1   :  { %v6826_v47 = vmul.f32 %v11278_v61, %v6825_v10 }
0x21f3   :  { %v6830_v55 = vadd.f32 %v6829_v46, %v6826_v47 }
0x21f5   :  { %v6836_v52 = vsel %vm1831_vm4, %v13712_v60, %v6830_v55 }
0x21f6   :  { %v6838_v36 = vmax.f32 %v6836_v52, 0.0 }
0x21f8   :  { %8915 = vmatmul.mubr.f32.vlgmr.msra.gmra.mrb[76].mxu0 %v6838_v36 }
0x22cb   :  { %v8916_v57 = vpop.f32.mrb[76].mxu0 }
0x22cc   :  { %v6934_v32 = vadd.f32 %v8916_v57, %v7029_v25  ;;  %v6928_v48 = vpop.f32.mrb[77].mxu0 }
0x22cd   :  { %v6929_v16 = vadd.f32 %v7029_v25, %v6928_v48 }
0x22ce   :  { %6938 = vst [vmem:[#allocation19 + $0x8] sm:$0xff] %v6934_v32 }
0x22cf   :  { %6937 = vst [vmem:[#allocation19] sm:$0xff] %v6929_v16 }
0x22d0   :  { %11510 = shalt.err (!%p11507_p0)
}
0x22d1   :  { %s13777_s9 = sld [smem:[#allocation32_spill]] }
0x22d7   :  { %s11511_s25 = scalar_lea.hbm %s13777_s9, 256 }
0x22d8   :  { %p11512_p1 = scmp.ne.s32.totalorder %s13777_s9, %s11511_s25  ;;  %p11515_p2 = scmp.lt.u32.totalorder %s11511_s25, %s13777_s9 }
0x22da   :  { %p11517_p3 = pnand %p11515_p2, %p11512_p1 }
0x22dc   :  { %11520 = shalt.err (!%p11517_p3)
}
0x22dd   :  { %6950 = dma.vmem_to_hbm [thread:$0]  %s6945_s6, 256, %s13777_s9, [#allocation4], %s11542_s13, %s11542_s13, %s11543_s3  }
0x22de   :  { %11533 = dma.done.wait [#allocation4], 256  }
0x22df   :  { %11534 = vsyncadd [#allocation4], 4294967040 }
0x22e0   :  { %6954 = vsyncpa [#allocation3], 1 }
0x22e1   :  { %6955 = vsyncpa [#allocation6], 1 }
0x22e2   :  { %6956 = vsyncpa [#allocation9], 1 }
0x22e3   :  { %6957 = vsyncpa [#allocation12], 1 }
0x22e4   :  { %6958 = vsyncpa [#allocation15], 1 }
0x22e5   :  { %6959 = vsyncpa [#allocation18], 1 }
0x22e6   :  { %6960 = vsyncpa [#allocation4], 1 }

</bundles_post_ra>
